<compile_context>
chip_gen: v7x
topology: tpu7x:2x2x1
jax: 0.10.0
libtpu: 0.0.40
codegen_flags: <defaults>
</compile_context>

<pallas_src>
import math
import jax
import jax.numpy as jnp
from jax.experimental import pallas as pl
from jax.experimental.pallas import tpu as pltpu

INPUT_DIM = 1
HIDDEN = 32          # d_model (C)
OUTPUT_DIM = 1
STEP_EMB = 32
NUM_BLOCKS = 2
LN_EPS = 1e-5


# ---------------------------- fused Pallas kernel ----------------------------

def backbone_kernel(x_ref, tl_ref,
                    selw_ref, binp_ref,
                    mgrp_ref, gamma_ref, beta_ref,
                    coef_ref, d_ref,
                    wso_ref, bso_ref,
                    w12_ref, b12_ref,
                    wh1_ref, bh1_ref, wh2_ref, bh2_ref,
                    out_ref):
    """Whole BackboneModel forward for G packed (batch, series) slices.

    Activations are (L, G*C) f32, lane g*C+c = channel c of slice g.
    """
    _, L, G = x_ref.shape
    GC = selw_ref.shape[1]

    x_lg = x_ref[0]                                     # (L, G) raw input series
    tl = tl_ref[0]                                      # (NB, GC) hoisted time_linear(t)

    # input_init: Linear(1, C) + ReLU.  Broadcast each series into its 32-lane
    # group via a tiny (L,G)x(G,GC) selection/scale matmul, then bias + ReLU.
    x_b = jnp.dot(x_lg, selw_ref[...], preferred_element_type=jnp.float32)    # (L, GC)
    x_cur = jnp.maximum(x_b + binp_ref[...], 0.0)
    skip_sum = jnp.zeros((L, GC), jnp.float32)

    mgrp = mgrp_ref[...]                                # (GC, GC) block-diag 1/C averaging

    for n in range(NUM_BLOCKS):                         # statically unrolled (NB = 2)
        # ---- S4Block ----
        s4_in = x_cur + tl[n:n + 1, :]                  # x + time_linear(t), broadcast over L

        # S4Layer LayerNorm over the channel dim (per 32-lane group)
        mu = jnp.dot(s4_in, mgrp, preferred_element_type=jnp.float32)
        ex2 = jnp.dot(s4_in * s4_in, mgrp, preferred_element_type=jnp.float32)
        var = ex2 - mu * mu
        z = (s4_in - mu) * jax.lax.rsqrt(var + LN_EPS)
        z = z * gamma_ref[n:n + 1, :] + beta_ref[n:n + 1, :]

        # Bidirectional depthwise long conv (stand-in for the S4 SSM), using
        # precomputed per-shift coefficients and 4 independent accumulators.
        part = [coef_ref[n, 0] * z,
                jnp.zeros((L, GC), jnp.float32),
                jnp.zeros((L, GC), jnp.float32),
                jnp.zeros((L, GC), jnp.float32)]
        for s in range(1, L):                           # L is small here; fori_loop for big L
            part[s % 4] = part[s % 4] + coef_ref[n, s] * pltpu.roll(z, shift=s, axis=0)
        y = (part[0] + part[1]) + (part[2] + part[3]) + d_ref[n:n + 1, :] * z
        y = jax.nn.gelu(y)
        y = jnp.dot(y.astype(jnp.bfloat16), wso_ref[n],
                    preferred_element_type=jnp.float32) + bso_ref[n:n + 1, :]

        out = y + s4_in                                 # S4Layer residual (z + x)
        g = jnp.tanh(out) * jax.nn.sigmoid(out)         # gated activation

        # out_linear1 / out_linear2 fused into a single (GC, 2*GC) block-diag matmul
        o12 = jnp.dot(g.astype(jnp.bfloat16), w12_ref[n],
                      preferred_element_type=jnp.float32) + b12_ref[n:n + 1, :]
        x_cur = o12[:, :GC] + x_cur                     # residual to block input
        skip_sum = skip_sum + o12[:, GC:]               # torch.stack(skips).sum(0)

    # output head: Linear(C,C)+ReLU then C->1 per group, init_skip: out - x_in
    h = jnp.maximum(
        jnp.dot(skip_sum.astype(jnp.bfloat16), wh1_ref[...],
                preferred_element_type=jnp.float32) + bh1_ref[...], 0.0)
    res = jnp.dot(h, wh2_ref[...], preferred_element_type=jnp.float32) + bh2_ref[0]  # (L, G)
    out_ref[0] = res - x_lg


# ---------------------------- plain-JAX glue ----------------------------

def _rep(shape):
    """Full-extent, grid-replicated BlockSpec for a weight array."""
    nd = len(shape)
    return pl.BlockSpec(shape, lambda s, _nd=nd: (0,) * _nd)


def _blockdiag(w, G):
    """(..., C, D) -> (..., G*C, G*D) block-diagonal with G copies of w."""
    eye = jnp.eye(G, dtype=w.dtype)
    out = jnp.einsum('gh,...ij->...gihj', eye, w)
    return out.reshape(w.shape[:-2] + (G * w.shape[-2], G * w.shape[-1]))


def sinusoidal_embedding(t_b1, dim):
    half = dim // 2
    scale = math.log(10000.0) / (half - 1)
    freqs = jnp.exp(jnp.arange(half, dtype=jnp.float32) * (-scale))
    emb = t_b1[:, None] * freqs[None, :]                              # (B, 1, half)
    return jnp.concatenate([jnp.sin(emb), jnp.cos(emb)], axis=-1)     # (B, 1, dim)


def backbone_forward(params, t, x_in):
    """t: scalar, x_in: (B, L, K) float32 -> (B, L, K) float32.  Requires K == 1."""
    B, L, K = x_in.shape
    assert K == 1, "univariate config (target_dim=1): transformer path not implemented"
    C, NB = HIDDEN, NUM_BLOCKS
    G = max(g for g in (4, 2, 1) if B % g == 0)     # slices packed per grid step
    GC = G * C
    steps = B // G

    # step embedding + time_init MLP + hoisted per-block time_linear
    # (reference applies the *10000 scale outside SinusoidalPositionEmbeddings)
    t_b1 = jnp.broadcast_to(jnp.asarray(t, jnp.float32), (B, 1))
    emb = sinusoidal_embedding(t_b1 * 10000.0, STEP_EMB)              # (B, 1, E)
    hh = jax.nn.silu(jnp.dot(emb, params["ti_w1"]) + params["ti_b1"])
    t_vec = jax.nn.silu(jnp.dot(hh, params["ti_w2"]) + params["ti_b2"])[:, 0, :]   # (B, C)
    tl_all = jnp.einsum("bc,ncd->bnd", t_vec, params["wt"]) + params["bt"][None]   # (B, NB, C)
    tl_packed = tl_all.reshape(steps, G, NB, C).transpose(0, 2, 1, 3).reshape(steps, NB, GC)

    # lane-packed input / output layout: (steps, L, G)
    x_packed = x_in[:, :, 0].reshape(steps, G, L).transpose(0, 2, 1)

    # ---- weight-only packing (lane tiling + block-diagonalisation) ----
    selw = jnp.kron(jnp.eye(G, dtype=jnp.float32), params["in_w"])        # (G, GC)
    binp = jnp.tile(params["in_b"], (1, G))                               # (1, GC)
    mgrp = jnp.kron(jnp.eye(G, dtype=jnp.float32),
                    jnp.full((C, C), 1.0 / C, jnp.float32))               # (GC, GC)
    gamma = jnp.tile(params["gamma"], (1, G))
    beta = jnp.tile(params["beta"], (1, G))
    d_t = jnp.tile(params["D"], (1, G))
    wso_bd = _blockdiag(params["wso"], G).astype(jnp.bfloat16)            # (NB, GC, GC)
    bso_t = jnp.tile(params["bso"], (1, G))
    w12_bd = jnp.concatenate([_blockdiag(params["w12"][:, :, :C], G),
                              _blockdiag(params["w12"][:, :, C:], G)],
                             axis=-1).astype(jnp.bfloat16)                # (NB, GC, 2GC)
    b12_t = jnp.concatenate([jnp.tile(params["b12"][:, :C], (1, G)),
                             jnp.tile(params["b12"][:, C:], (1, G))], axis=-1)
    wh1_bd = _blockdiag(params["out_w1"], G).astype(jnp.bfloat16)         # (GC, GC)
    bh1_t = jnp.tile(params["out_b1"], (1, G))
    wh2_col = jnp.kron(jnp.eye(G, dtype=jnp.float32), params["out_w2t"].T)  # (GC, G)
    bh2 = params["out_b2"].reshape((1,))                                  # SMEM scalar

    # precomputed per-shift conv coefficients (weight-only): (NB, L, L, GC)
    kf, kb = params["kf"], params["kb"]
    kb_rev = kb[:, (L - jnp.arange(L)) % L, :]                            # kb[L-s] (s=0 -> kb[0])
    mask = jnp.arange(L)[None, :] >= jnp.arange(L)[:, None]               # mask[s, l] = l >= s
    coef = jnp.where(mask[None, :, :, None], kf[:, :, None, :], kb_rev[:, :, None, :])
    coef = coef.at[:, 0].add(kb[:, 0][:, None, :])                        # center tap kf[0]+kb[0]
    coef_packed = jnp.tile(coef, (1, 1, 1, G))                            # (NB, L, L, GC)

    out_packed = pl.pallas_call(
        backbone_kernel,
        grid=(steps,),
        in_specs=[
            pl.BlockSpec((1, L, G), lambda s: (s, 0, 0)),     # x slab
            pl.BlockSpec((1, NB, GC), lambda s: (s, 0, 0)),   # hoisted time_linear outputs
            _rep((G, GC)), _rep((1, GC)),                     # input_init broadcast w / b
            _rep((GC, GC)),                                   # LayerNorm group-average matrix
            _rep((NB, GC)), _rep((NB, GC)),                   # LayerNorm gamma / beta
            _rep((NB, L, L, GC)),                             # precomputed conv coefficients
            _rep((NB, GC)),                                   # D skip
            _rep((NB, GC, GC)), _rep((NB, GC)),               # S4 output linear (bf16) + bias
            _rep((NB, GC, 2 * GC)), _rep((NB, 2 * GC)),       # fused out_linear1|out_linear2
            _rep((GC, GC)), _rep((1, GC)),                    # head linear 1 (bf16) + bias
            _rep((GC, G)),                                    # head C->1 projection (per group)
            pl.BlockSpec(memory_space=pltpu.MemorySpace.SMEM),  # head bias scalar
        ],
        out_specs=pl.BlockSpec((1, L, G), lambda s: (s, 0, 0)),
        out_shape=jax.ShapeDtypeStruct((steps, L, G), jnp.float32),
        compiler_params=pltpu.CompilerParams(
            dimension_semantics=("parallel",)),               # 2 fat steps -> both TCs on v7x
    )(x_packed, tl_packed,
      selw, binp, mgrp, gamma, beta,
      coef_packed, d_t,
      wso_bd, bso_t, w12_bd, b12_t,
      wh1_bd, bh1_t, wh2_col, bh2)

    out2d = out_packed.transpose(0, 2, 1).reshape(B, L)       # unpack slices
    return out2d[:, :, None]                                  # (B, L, K=1)


def init_params(seq_len, seed=0):
    C, E, NB = HIDDEN, STEP_EMB, NUM_BLOCKS
    keys = iter(jax.random.split(jax.random.PRNGKey(seed), 24))

    def nrm(shape, scale=0.1):
        return (scale * jax.random.normal(next(keys), shape)).astype(jnp.float32)

    return {
        # input_init / time_init / output head
        "in_w": nrm((INPUT_DIM, C)), "in_b": nrm((1, C)),
        "ti_w1": nrm((E, C)), "ti_b1": nrm((1, C)),
        "ti_w2": nrm((C, C)), "ti_b2": nrm((1, C)),
        "out_w1": nrm((C, C)), "out_b1": nrm((1, C)),
        "out_w2t": nrm((1, C)), "out_b2": nrm((1, 1)),        # final C->1 projection (row form)
        # per-block parameters stacked on a leading NUM_BLOCKS axis
        "wt": nrm((NB, C, C)), "bt": nrm((NB, C)),
        "gamma": jnp.ones((NB, C), jnp.float32), "beta": jnp.zeros((NB, C), jnp.float32),
        "kf": nrm((NB, seq_len, C), scale=1.0 / seq_len),
        "kb": nrm((NB, seq_len, C), scale=1.0 / seq_len),
        "D": nrm((NB, C)),
        "wso": nrm((NB, C, C)), "bso": nrm((NB, C)),
        "w12": nrm((NB, C, 2 * C)), "b12": nrm((NB, 2 * C)),
    }


if __name__ == "__main__":
    B, L, K = 8, 16, 1          # batch, length, num_series (target_dim=1 -> univariate)
    params = init_params(seq_len=L, seed=0)
    x_in = jax.random.normal(jax.random.PRNGKey(0), (B, L, K), dtype=jnp.float32)
    t = jnp.float32(0.37)

    fwd = jax.jit(backbone_forward)
    out = fwd(params, t, x_in)
    jax.block_until_ready(out)
    assert out.shape == (B, L, K) and out.dtype == jnp.float32
    print("KERNEL_OK")
</pallas_src>

<mosaic_0001>
module attributes {stable_mosaic.version = 11 : i64} {
  func.func @backbone_kernel(%arg0: i32, %arg1: memref<1x16x4xf32, #tpu.memory_space<vmem>>, %arg2: memref<1x2x128xf32, #tpu.memory_space<vmem>>, %arg3: memref<4x128xf32, #tpu.memory_space<vmem>>, %arg4: memref<1x128xf32, #tpu.memory_space<vmem>>, %arg5: memref<128x128xf32, #tpu.memory_space<vmem>>, %arg6: memref<2x128xf32, #tpu.memory_space<vmem>>, %arg7: memref<2x128xf32, #tpu.memory_space<vmem>>, %arg8: memref<2x16x16x128xf32, #tpu.memory_space<vmem>>, %arg9: memref<2x128xf32, #tpu.memory_space<vmem>>, %arg10: memref<2x128x128xbf16, #tpu.memory_space<vmem>>, %arg11: memref<2x128xf32, #tpu.memory_space<vmem>>, %arg12: memref<2x128x256xbf16, #tpu.memory_space<vmem>>, %arg13: memref<2x256xf32, #tpu.memory_space<vmem>>, %arg14: memref<128x128xbf16, #tpu.memory_space<vmem>>, %arg15: memref<1x128xf32, #tpu.memory_space<vmem>>, %arg16: memref<128x4xf32, #tpu.memory_space<vmem>>, %arg17: memref<1xf32, #tpu.memory_space<smem>>, %arg18: memref<1x16x4xf32, #tpu.memory_space<vmem>>) attributes {dimension_semantics = [#tpu.dimension_semantics<parallel>], iteration_bounds = array<i64: 2>, scalar_prefetch = 0 : i64, scratch_operands = 0 : i64, tpu.core_type = #tpu.core_type<tc>, window_params = [{transform_indices = @transform_0, window_bounds = array<i64: 1, 16, 4>}, {transform_indices = @transform_1, window_bounds = array<i64: 1, 2, 128>}, {pipeline_mode = #tpu.pipeline_mode<synchronous>, transform_indices = @transform_2, window_bounds = array<i64: 4, 128>}, {pipeline_mode = #tpu.pipeline_mode<synchronous>, transform_indices = @transform_3, window_bounds = array<i64: 1, 128>}, {pipeline_mode = #tpu.pipeline_mode<synchronous>, transform_indices = @transform_4, window_bounds = array<i64: 128, 128>}, {pipeline_mode = #tpu.pipeline_mode<synchronous>, transform_indices = @transform_5, window_bounds = array<i64: 2, 128>}, {pipeline_mode = #tpu.pipeline_mode<synchronous>, transform_indices = @transform_6, window_bounds = array<i64: 2, 128>}, {pipeline_mode = #tpu.pipeline_mode<synchronous>, transform_indices = @transform_7, window_bounds = array<i64: 2, 16, 16, 128>}, {pipeline_mode = #tpu.pipeline_mode<synchronous>, transform_indices = @transform_8, window_bounds = array<i64: 2, 128>}, {pipeline_mode = #tpu.pipeline_mode<synchronous>, transform_indices = @transform_9, window_bounds = array<i64: 2, 128, 128>}, {pipeline_mode = #tpu.pipeline_mode<synchronous>, transform_indices = @transform_10, window_bounds = array<i64: 2, 128>}, {pipeline_mode = #tpu.pipeline_mode<synchronous>, transform_indices = @transform_11, window_bounds = array<i64: 2, 128, 256>}, {pipeline_mode = #tpu.pipeline_mode<synchronous>, transform_indices = @transform_12, window_bounds = array<i64: 2, 256>}, {pipeline_mode = #tpu.pipeline_mode<synchronous>, transform_indices = @transform_13, window_bounds = array<i64: 128, 128>}, {pipeline_mode = #tpu.pipeline_mode<synchronous>, transform_indices = @transform_14, window_bounds = array<i64: 1, 128>}, {pipeline_mode = #tpu.pipeline_mode<synchronous>, transform_indices = @transform_15, window_bounds = array<i64: 128, 4>}, {transform_indices = @transform_16, window_bounds = array<i64: 1>}, {transform_indices = @transform_17, window_bounds = array<i64: 1, 16, 4>}]} {
    %c0 = arith.constant 0 : index
    %c0_0 = arith.constant 0 : index
    %c0_1 = arith.constant 0 : index
    %0 = vector.load %arg1[%c0, %c0_0, %c0_1] : memref<1x16x4xf32, #tpu.memory_space<vmem>>, vector<1x16x4xf32>
    %1 = vector.shape_cast %0 : vector<1x16x4xf32> to vector<16x4xf32>
    %c0_2 = arith.constant 0 : index
    %c0_3 = arith.constant 0 : index
    %c0_4 = arith.constant 0 : index
    %2 = vector.load %arg2[%c0_2, %c0_3, %c0_4] : memref<1x2x128xf32, #tpu.memory_space<vmem>>, vector<1x2x128xf32>
    %3 = vector.shape_cast %2 : vector<1x2x128xf32> to vector<2x128xf32>
    %c0_5 = arith.constant 0 : index
    %c0_6 = arith.constant 0 : index
    %4 = vector.load %arg3[%c0_5, %c0_6] : memref<4x128xf32, #tpu.memory_space<vmem>>, vector<4x128xf32>
    %cst = arith.constant dense<0.000000e+00> : vector<16x128xf32>
    %5 = tpu.matmul %1, %4, %cst {dimension_numbers = #tpu.dot_dimension_numbers<[1], [0], [0], [1], [0, 0, 1, 1], [], []>} : vector<16x4xf32>, vector<4x128xf32>, vector<16x128xf32> -> vector<16x128xf32>
    %c0_7 = arith.constant 0 : index
    %c0_8 = arith.constant 0 : index
    %6 = vector.load %arg4[%c0_7, %c0_8] : memref<1x128xf32, #tpu.memory_space<vmem>>, vector<1x128xf32>
    %7 = vector.broadcast %6 : vector<1x128xf32> to vector<16x128xf32>
    %8 = arith.addf %5, %7 : vector<16x128xf32>
    %cst_9 = arith.constant 0.000000e+00 : f32
    %9 = vector.broadcast %cst_9 : f32 to vector<16x128xf32>
    %10 = arith.maximumf %8, %9 : vector<16x128xf32>
    %cst_10 = arith.constant 0.000000e+00 : f32
    %11 = vector.broadcast %cst_10 : f32 to vector<16x128xf32>
    %c0_11 = arith.constant 0 : index
    %c0_12 = arith.constant 0 : index
    %12 = vector.load %arg5[%c0_11, %c0_12] : memref<128x128xf32, #tpu.memory_space<vmem>>, vector<128x128xf32>
    %13 = vector.extract_strided_slice %3 {offsets = [0, 0], sizes = [1, 128], strides = [1, 1]} : vector<2x128xf32> to vector<1x128xf32>
    %14 = vector.broadcast %13 : vector<1x128xf32> to vector<16x128xf32>
    %15 = arith.addf %10, %14 : vector<16x128xf32>
    %cst_13 = arith.constant dense<0.000000e+00> : vector<16x128xf32>
    %16 = tpu.matmul %15, %12, %cst_13 {dimension_numbers = #tpu.dot_dimension_numbers<[1], [0], [0], [1], [0, 0, 1, 1], [], []>} : vector<16x128xf32>, vector<128x128xf32>, vector<16x128xf32> -> vector<16x128xf32>
    %17 = arith.mulf %15, %15 : vector<16x128xf32>
    %cst_14 = arith.constant dense<0.000000e+00> : vector<16x128xf32>
    %18 = tpu.matmul %17, %12, %cst_14 {dimension_numbers = #tpu.dot_dimension_numbers<[1], [0], [0], [1], [0, 0, 1, 1], [], []>} : vector<16x128xf32>, vector<128x128xf32>, vector<16x128xf32> -> vector<16x128xf32>
    %19 = arith.mulf %16, %16 : vector<16x128xf32>
    %20 = arith.subf %18, %19 : vector<16x128xf32>
    %21 = arith.subf %15, %16 : vector<16x128xf32>
    %cst_15 = arith.constant 9.99999974E-6 : f32
    %22 = vector.broadcast %cst_15 : f32 to vector<16x128xf32>
    %23 = arith.addf %20, %22 : vector<16x128xf32>
    %24 = math.rsqrt %23 : vector<16x128xf32>
    %25 = arith.mulf %21, %24 : vector<16x128xf32>
    %c0_16 = arith.constant 0 : index
    %c0_17 = arith.constant 0 : index
    %26 = vector.load %arg6[%c0_16, %c0_17] : memref<2x128xf32, #tpu.memory_space<vmem>>, vector<1x128xf32>
    %27 = vector.broadcast %26 : vector<1x128xf32> to vector<16x128xf32>
    %28 = arith.mulf %25, %27 : vector<16x128xf32>
    %c0_18 = arith.constant 0 : index
    %c0_19 = arith.constant 0 : index
    %29 = vector.load %arg7[%c0_18, %c0_19] : memref<2x128xf32, #tpu.memory_space<vmem>>, vector<1x128xf32>
    %30 = vector.broadcast %29 : vector<1x128xf32> to vector<16x128xf32>
    %31 = arith.addf %28, %30 : vector<16x128xf32>
    %c0_20 = arith.constant 0 : index
    %c0_21 = arith.constant 0 : index
    %c0_22 = arith.constant 0 : index
    %c0_23 = arith.constant 0 : index
    %32 = vector.load %arg8[%c0_20, %c0_21, %c0_22, %c0_23] : memref<2x16x16x128xf32, #tpu.memory_space<vmem>>, vector<1x1x16x128xf32>
    %33 = vector.shape_cast %32 : vector<1x1x16x128xf32> to vector<16x128xf32>
    %34 = arith.mulf %33, %31 : vector<16x128xf32>
    %cst_24 = arith.constant 0.000000e+00 : f32
    %35 = vector.broadcast %cst_24 : f32 to vector<16x128xf32>
    %cst_25 = arith.constant 0.000000e+00 : f32
    %36 = vector.broadcast %cst_25 : f32 to vector<16x128xf32>
    %cst_26 = arith.constant 0.000000e+00 : f32
    %37 = vector.broadcast %cst_26 : f32 to vector<16x128xf32>
    %c0_27 = arith.constant 0 : index
    %c1 = arith.constant 1 : index
    %c0_28 = arith.constant 0 : index
    %c0_29 = arith.constant 0 : index
    %38 = vector.load %arg8[%c0_27, %c1, %c0_28, %c0_29] : memref<2x16x16x128xf32, #tpu.memory_space<vmem>>, vector<1x1x16x128xf32>
    %39 = vector.shape_cast %38 : vector<1x1x16x128xf32> to vector<16x128xf32>
    %c1_i32 = arith.constant 1 : i32
    %40 = tpu.dynamic_rotate %31 by %c1_i32 dim 0 : vector<16x128xf32>, i32 -> vector<16x128xf32>
    %41 = arith.mulf %39, %40 : vector<16x128xf32>
    %42 = arith.addf %35, %41 : vector<16x128xf32>
    %c0_30 = arith.constant 0 : index
    %c2 = arith.constant 2 : index
    %c0_31 = arith.constant 0 : index
    %c0_32 = arith.constant 0 : index
    %43 = vector.load %arg8[%c0_30, %c2, %c0_31, %c0_32] : memref<2x16x16x128xf32, #tpu.memory_space<vmem>>, vector<1x1x16x128xf32>
    %44 = vector.shape_cast %43 : vector<1x1x16x128xf32> to vector<16x128xf32>
    %c2_i32 = arith.constant 2 : i32
    %45 = tpu.dynamic_rotate %31 by %c2_i32 dim 0 : vector<16x128xf32>, i32 -> vector<16x128xf32>
    %46 = arith.mulf %44, %45 : vector<16x128xf32>
    %47 = arith.addf %36, %46 : vector<16x128xf32>
    %c0_33 = arith.constant 0 : index
    %c3 = arith.constant 3 : index
    %c0_34 = arith.constant 0 : index
    %c0_35 = arith.constant 0 : index
    %48 = vector.load %arg8[%c0_33, %c3, %c0_34, %c0_35] : memref<2x16x16x128xf32, #tpu.memory_space<vmem>>, vector<1x1x16x128xf32>
    %49 = vector.shape_cast %48 : vector<1x1x16x128xf32> to vector<16x128xf32>
    %c3_i32 = arith.constant 3 : i32
    %50 = tpu.dynamic_rotate %31 by %c3_i32 dim 0 : vector<16x128xf32>, i32 -> vector<16x128xf32>
    %51 = arith.mulf %49, %50 : vector<16x128xf32>
    %52 = arith.addf %37, %51 : vector<16x128xf32>
    %c0_36 = arith.constant 0 : index
    %c4 = arith.constant 4 : index
    %c0_37 = arith.constant 0 : index
    %c0_38 = arith.constant 0 : index
    %53 = vector.load %arg8[%c0_36, %c4, %c0_37, %c0_38] : memref<2x16x16x128xf32, #tpu.memory_space<vmem>>, vector<1x1x16x128xf32>
    %54 = vector.shape_cast %53 : vector<1x1x16x128xf32> to vector<16x128xf32>
    %c4_i32 = arith.constant 4 : i32
    %55 = tpu.dynamic_rotate %31 by %c4_i32 dim 0 : vector<16x128xf32>, i32 -> vector<16x128xf32>
    %56 = arith.mulf %54, %55 : vector<16x128xf32>
    %57 = arith.addf %34, %56 : vector<16x128xf32>
    %c0_39 = arith.constant 0 : index
    %c5 = arith.constant 5 : index
    %c0_40 = arith.constant 0 : index
    %c0_41 = arith.constant 0 : index
    %58 = vector.load %arg8[%c0_39, %c5, %c0_40, %c0_41] : memref<2x16x16x128xf32, #tpu.memory_space<vmem>>, vector<1x1x16x128xf32>
    %59 = vector.shape_cast %58 : vector<1x1x16x128xf32> to vector<16x128xf32>
    %c5_i32 = arith.constant 5 : i32
    %60 = tpu.dynamic_rotate %31 by %c5_i32 dim 0 : vector<16x128xf32>, i32 -> vector<16x128xf32>
    %61 = arith.mulf %59, %60 : vector<16x128xf32>
    %62 = arith.addf %42, %61 : vector<16x128xf32>
    %c0_42 = arith.constant 0 : index
    %c6 = arith.constant 6 : index
    %c0_43 = arith.constant 0 : index
    %c0_44 = arith.constant 0 : index
    %63 = vector.load %arg8[%c0_42, %c6, %c0_43, %c0_44] : memref<2x16x16x128xf32, #tpu.memory_space<vmem>>, vector<1x1x16x128xf32>
    %64 = vector.shape_cast %63 : vector<1x1x16x128xf32> to vector<16x128xf32>
    %c6_i32 = arith.constant 6 : i32
    %65 = tpu.dynamic_rotate %31 by %c6_i32 dim 0 : vector<16x128xf32>, i32 -> vector<16x128xf32>
    %66 = arith.mulf %64, %65 : vector<16x128xf32>
    %67 = arith.addf %47, %66 : vector<16x128xf32>
    %c0_45 = arith.constant 0 : index
    %c7 = arith.constant 7 : index
    %c0_46 = arith.constant 0 : index
    %c0_47 = arith.constant 0 : index
    %68 = vector.load %arg8[%c0_45, %c7, %c0_46, %c0_47] : memref<2x16x16x128xf32, #tpu.memory_space<vmem>>, vector<1x1x16x128xf32>
    %69 = vector.shape_cast %68 : vector<1x1x16x128xf32> to vector<16x128xf32>
    %c7_i32 = arith.constant 7 : i32
    %70 = tpu.dynamic_rotate %31 by %c7_i32 dim 0 : vector<16x128xf32>, i32 -> vector<16x128xf32>
    %71 = arith.mulf %69, %70 : vector<16x128xf32>
    %72 = arith.addf %52, %71 : vector<16x128xf32>
    %c0_48 = arith.constant 0 : index
    %c8 = arith.constant 8 : index
    %c0_49 = arith.constant 0 : index
    %c0_50 = arith.constant 0 : index
    %73 = vector.load %arg8[%c0_48, %c8, %c0_49, %c0_50] : memref<2x16x16x128xf32, #tpu.memory_space<vmem>>, vector<1x1x16x128xf32>
    %74 = vector.shape_cast %73 : vector<1x1x16x128xf32> to vector<16x128xf32>
    %c8_i32 = arith.constant 8 : i32
    %75 = tpu.dynamic_rotate %31 by %c8_i32 dim 0 : vector<16x128xf32>, i32 -> vector<16x128xf32>
    %76 = arith.mulf %74, %75 : vector<16x128xf32>
    %77 = arith.addf %57, %76 : vector<16x128xf32>
    %c0_51 = arith.constant 0 : index
    %c9 = arith.constant 9 : index
    %c0_52 = arith.constant 0 : index
    %c0_53 = arith.constant 0 : index
    %78 = vector.load %arg8[%c0_51, %c9, %c0_52, %c0_53] : memref<2x16x16x128xf32, #tpu.memory_space<vmem>>, vector<1x1x16x128xf32>
    %79 = vector.shape_cast %78 : vector<1x1x16x128xf32> to vector<16x128xf32>
    %c9_i32 = arith.constant 9 : i32
    %80 = tpu.dynamic_rotate %31 by %c9_i32 dim 0 : vector<16x128xf32>, i32 -> vector<16x128xf32>
    %81 = arith.mulf %79, %80 : vector<16x128xf32>
    %82 = arith.addf %62, %81 : vector<16x128xf32>
    %c0_54 = arith.constant 0 : index
    %c10 = arith.constant 10 : index
    %c0_55 = arith.constant 0 : index
    %c0_56 = arith.constant 0 : index
    %83 = vector.load %arg8[%c0_54, %c10, %c0_55, %c0_56] : memref<2x16x16x128xf32, #tpu.memory_space<vmem>>, vector<1x1x16x128xf32>
    %84 = vector.shape_cast %83 : vector<1x1x16x128xf32> to vector<16x128xf32>
    %c10_i32 = arith.constant 10 : i32
    %85 = tpu.dynamic_rotate %31 by %c10_i32 dim 0 : vector<16x128xf32>, i32 -> vector<16x128xf32>
    %86 = arith.mulf %84, %85 : vector<16x128xf32>
    %87 = arith.addf %67, %86 : vector<16x128xf32>
    %c0_57 = arith.constant 0 : index
    %c11 = arith.constant 11 : index
    %c0_58 = arith.constant 0 : index
    %c0_59 = arith.constant 0 : index
    %88 = vector.load %arg8[%c0_57, %c11, %c0_58, %c0_59] : memref<2x16x16x128xf32, #tpu.memory_space<vmem>>, vector<1x1x16x128xf32>
    %89 = vector.shape_cast %88 : vector<1x1x16x128xf32> to vector<16x128xf32>
    %c11_i32 = arith.constant 11 : i32
    %90 = tpu.dynamic_rotate %31 by %c11_i32 dim 0 : vector<16x128xf32>, i32 -> vector<16x128xf32>
    %91 = arith.mulf %89, %90 : vector<16x128xf32>
    %92 = arith.addf %72, %91 : vector<16x128xf32>
    %c0_60 = arith.constant 0 : index
    %c12 = arith.constant 12 : index
    %c0_61 = arith.constant 0 : index
    %c0_62 = arith.constant 0 : index
    %93 = vector.load %arg8[%c0_60, %c12, %c0_61, %c0_62] : memref<2x16x16x128xf32, #tpu.memory_space<vmem>>, vector<1x1x16x128xf32>
    %94 = vector.shape_cast %93 : vector<1x1x16x128xf32> to vector<16x128xf32>
    %c12_i32 = arith.constant 12 : i32
    %95 = tpu.dynamic_rotate %31 by %c12_i32 dim 0 : vector<16x128xf32>, i32 -> vector<16x128xf32>
    %96 = arith.mulf %94, %95 : vector<16x128xf32>
    %97 = arith.addf %77, %96 : vector<16x128xf32>
    %c0_63 = arith.constant 0 : index
    %c13 = arith.constant 13 : index
    %c0_64 = arith.constant 0 : index
    %c0_65 = arith.constant 0 : index
    %98 = vector.load %arg8[%c0_63, %c13, %c0_64, %c0_65] : memref<2x16x16x128xf32, #tpu.memory_space<vmem>>, vector<1x1x16x128xf32>
    %99 = vector.shape_cast %98 : vector<1x1x16x128xf32> to vector<16x128xf32>
    %c13_i32 = arith.constant 13 : i32
    %100 = tpu.dynamic_rotate %31 by %c13_i32 dim 0 : vector<16x128xf32>, i32 -> vector<16x128xf32>
    %101 = arith.mulf %99, %100 : vector<16x128xf32>
    %102 = arith.addf %82, %101 : vector<16x128xf32>
    %c0_66 = arith.constant 0 : index
    %c14 = arith.constant 14 : index
    %c0_67 = arith.constant 0 : index
    %c0_68 = arith.constant 0 : index
    %103 = vector.load %arg8[%c0_66, %c14, %c0_67, %c0_68] : memref<2x16x16x128xf32, #tpu.memory_space<vmem>>, vector<1x1x16x128xf32>
    %104 = vector.shape_cast %103 : vector<1x1x16x128xf32> to vector<16x128xf32>
    %c14_i32 = arith.constant 14 : i32
    %105 = tpu.dynamic_rotate %31 by %c14_i32 dim 0 : vector<16x128xf32>, i32 -> vector<16x128xf32>
    %106 = arith.mulf %104, %105 : vector<16x128xf32>
    %107 = arith.addf %87, %106 : vector<16x128xf32>
    %c0_69 = arith.constant 0 : index
    %c15 = arith.constant 15 : index
    %c0_70 = arith.constant 0 : index
    %c0_71 = arith.constant 0 : index
    %108 = vector.load %arg8[%c0_69, %c15, %c0_70, %c0_71] : memref<2x16x16x128xf32, #tpu.memory_space<vmem>>, vector<1x1x16x128xf32>
    %109 = vector.shape_cast %108 : vector<1x1x16x128xf32> to vector<16x128xf32>
    %c15_i32 = arith.constant 15 : i32
    %110 = tpu.dynamic_rotate %31 by %c15_i32 dim 0 : vector<16x128xf32>, i32 -> vector<16x128xf32>
    %111 = arith.mulf %109, %110 : vector<16x128xf32>
    %112 = arith.addf %92, %111 : vector<16x128xf32>
    %113 = arith.addf %97, %102 : vector<16x128xf32>
    %114 = arith.addf %107, %112 : vector<16x128xf32>
    %115 = arith.addf %113, %114 : vector<16x128xf32>
    %c0_72 = arith.constant 0 : index
    %c0_73 = arith.constant 0 : index
    %116 = vector.load %arg9[%c0_72, %c0_73] : memref<2x128xf32, #tpu.memory_space<vmem>>, vector<1x128xf32>
    %117 = vector.broadcast %116 : vector<1x128xf32> to vector<16x128xf32>
    %118 = arith.mulf %117, %31 : vector<16x128xf32>
    %119 = arith.addf %115, %118 : vector<16x128xf32>
    %120 = arith.mulf %119, %119 : vector<16x128xf32>
    %121 = arith.mulf %119, %120 : vector<16x128xf32>
    %cst_74 = arith.constant 4.471500e-02 : f32
    %122 = vector.broadcast %cst_74 : f32 to vector<16x128xf32>
    %123 = arith.mulf %122, %121 : vector<16x128xf32>
    %124 = arith.addf %119, %123 : vector<16x128xf32>
    %cst_75 = arith.constant 0.797884583 : f32
    %125 = vector.broadcast %cst_75 : f32 to vector<16x128xf32>
    %126 = arith.mulf %125, %124 : vector<16x128xf32>
    %127 = math.tanh %126 : vector<16x128xf32>
    %cst_76 = arith.constant 1.000000e+00 : f32
    %128 = vector.broadcast %cst_76 : f32 to vector<16x128xf32>
    %129 = arith.addf %128, %127 : vector<16x128xf32>
    %cst_77 = arith.constant 5.000000e-01 : f32
    %130 = vector.broadcast %cst_77 : f32 to vector<16x128xf32>
    %131 = arith.mulf %130, %129 : vector<16x128xf32>
    %132 = arith.mulf %119, %131 : vector<16x128xf32>
    %133 = arith.truncf %132 : vector<16x128xf32> to vector<16x128xbf16>
    %c0_78 = arith.constant 0 : index
    %c0_79 = arith.constant 0 : index
    %c0_80 = arith.constant 0 : index
    %134 = vector.load %arg10[%c0_78, %c0_79, %c0_80] : memref<2x128x128xbf16, #tpu.memory_space<vmem>>, vector<1x128x128xbf16>
    %135 = vector.shape_cast %134 : vector<1x128x128xbf16> to vector<128x128xbf16>
    %cst_81 = arith.constant dense<0.000000e+00> : vector<16x128xf32>
    %136 = tpu.matmul %133, %135, %cst_81 {dimension_numbers = #tpu.dot_dimension_numbers<[1], [0], [0], [1], [0, 0, 1, 1], [], []>} : vector<16x128xbf16>, vector<128x128xbf16>, vector<16x128xf32> -> vector<16x128xf32>
    %c0_82 = arith.constant 0 : index
    %c0_83 = arith.constant 0 : index
    %137 = vector.load %arg11[%c0_82, %c0_83] : memref<2x128xf32, #tpu.memory_space<vmem>>, vector<1x128xf32>
    %138 = vector.broadcast %137 : vector<1x128xf32> to vector<16x128xf32>
    %139 = arith.addf %136, %138 : vector<16x128xf32>
    %140 = arith.addf %139, %15 : vector<16x128xf32>
    %141 = math.tanh %140 : vector<16x128xf32>
    %142 = arith.negf %140 : vector<16x128xf32>
    %143 = math.exp %142 : vector<16x128xf32>
    %cst_84 = arith.constant 1.000000e+00 : f32
    %144 = vector.broadcast %cst_84 : f32 to vector<16x128xf32>
    %145 = arith.addf %144, %143 : vector<16x128xf32>
    %146 = arith.divf %144, %145 : vector<16x128xf32>
    %147 = arith.mulf %141, %146 : vector<16x128xf32>
    %148 = arith.truncf %147 : vector<16x128xf32> to vector<16x128xbf16>
    %c0_85 = arith.constant 0 : index
    %c0_86 = arith.constant 0 : index
    %c0_87 = arith.constant 0 : index
    %149 = vector.load %arg12[%c0_85, %c0_86, %c0_87] : memref<2x128x256xbf16, #tpu.memory_space<vmem>>, vector<1x128x256xbf16>
    %150 = vector.shape_cast %149 : vector<1x128x256xbf16> to vector<128x256xbf16>
    %cst_88 = arith.constant dense<0.000000e+00> : vector<16x256xf32>
    %151 = tpu.matmul %148, %150, %cst_88 {dimension_numbers = #tpu.dot_dimension_numbers<[1], [0], [0], [1], [0, 0, 1, 1], [], []>} : vector<16x128xbf16>, vector<128x256xbf16>, vector<16x256xf32> -> vector<16x256xf32>
    %c0_89 = arith.constant 0 : index
    %c0_90 = arith.constant 0 : index
    %152 = vector.load %arg13[%c0_89, %c0_90] : memref<2x256xf32, #tpu.memory_space<vmem>>, vector<1x256xf32>
    %153 = vector.broadcast %152 : vector<1x256xf32> to vector<16x256xf32>
    %154 = arith.addf %151, %153 : vector<16x256xf32>
    %155 = vector.extract_strided_slice %154 {offsets = [0, 0], sizes = [16, 128], strides = [1, 1]} : vector<16x256xf32> to vector<16x128xf32>
    %156 = arith.addf %155, %10 : vector<16x128xf32>
    %157 = vector.extract_strided_slice %154 {offsets = [0, 128], sizes = [16, 128], strides = [1, 1]} : vector<16x256xf32> to vector<16x128xf32>
    %158 = arith.addf %11, %157 : vector<16x128xf32>
    %159 = vector.extract_strided_slice %3 {offsets = [1, 0], sizes = [1, 128], strides = [1, 1]} : vector<2x128xf32> to vector<1x128xf32>
    %160 = vector.broadcast %159 : vector<1x128xf32> to vector<16x128xf32>
    %161 = arith.addf %156, %160 : vector<16x128xf32>
    %cst_91 = arith.constant dense<0.000000e+00> : vector<16x128xf32>
    %162 = tpu.matmul %161, %12, %cst_91 {dimension_numbers = #tpu.dot_dimension_numbers<[1], [0], [0], [1], [0, 0, 1, 1], [], []>} : vector<16x128xf32>, vector<128x128xf32>, vector<16x128xf32> -> vector<16x128xf32>
    %163 = arith.mulf %161, %161 : vector<16x128xf32>
    %cst_92 = arith.constant dense<0.000000e+00> : vector<16x128xf32>
    %164 = tpu.matmul %163, %12, %cst_92 {dimension_numbers = #tpu.dot_dimension_numbers<[1], [0], [0], [1], [0, 0, 1, 1], [], []>} : vector<16x128xf32>, vector<128x128xf32>, vector<16x128xf32> -> vector<16x128xf32>
    %165 = arith.mulf %162, %162 : vector<16x128xf32>
    %166 = arith.subf %164, %165 : vector<16x128xf32>
    %167 = arith.subf %161, %162 : vector<16x128xf32>
    %cst_93 = arith.constant 9.99999974E-6 : f32
    %168 = vector.broadcast %cst_93 : f32 to vector<16x128xf32>
    %169 = arith.addf %166, %168 : vector<16x128xf32>
    %170 = math.rsqrt %169 : vector<16x128xf32>
    %171 = arith.mulf %167, %170 : vector<16x128xf32>
    %c1_94 = arith.constant 1 : index
    %c0_95 = arith.constant 0 : index
    %172 = vector.load %arg6[%c1_94, %c0_95] : memref<2x128xf32, #tpu.memory_space<vmem>>, vector<1x128xf32>
    %173 = vector.broadcast %172 : vector<1x128xf32> to vector<16x128xf32>
    %174 = arith.mulf %171, %173 : vector<16x128xf32>
    %c1_96 = arith.constant 1 : index
    %c0_97 = arith.constant 0 : index
    %175 = vector.load %arg7[%c1_96, %c0_97] : memref<2x128xf32, #tpu.memory_space<vmem>>, vector<1x128xf32>
    %176 = vector.broadcast %175 : vector<1x128xf32> to vector<16x128xf32>
    %177 = arith.addf %174, %176 : vector<16x128xf32>
    %c1_98 = arith.constant 1 : index
    %c0_99 = arith.constant 0 : index
    %c0_100 = arith.constant 0 : index
    %c0_101 = arith.constant 0 : index
    %178 = vector.load %arg8[%c1_98, %c0_99, %c0_100, %c0_101] : memref<2x16x16x128xf32, #tpu.memory_space<vmem>>, vector<1x1x16x128xf32>
    %179 = vector.shape_cast %178 : vector<1x1x16x128xf32> to vector<16x128xf32>
    %180 = arith.mulf %179, %177 : vector<16x128xf32>
    %cst_102 = arith.constant 0.000000e+00 : f32
    %181 = vector.broadcast %cst_102 : f32 to vector<16x128xf32>
    %cst_103 = arith.constant 0.000000e+00 : f32
    %182 = vector.broadcast %cst_103 : f32 to vector<16x128xf32>
    %cst_104 = arith.constant 0.000000e+00 : f32
    %183 = vector.broadcast %cst_104 : f32 to vector<16x128xf32>
    %c1_105 = arith.constant 1 : index
    %c1_106 = arith.constant 1 : index
    %c0_107 = arith.constant 0 : index
    %c0_108 = arith.constant 0 : index
    %184 = vector.load %arg8[%c1_105, %c1_106, %c0_107, %c0_108] : memref<2x16x16x128xf32, #tpu.memory_space<vmem>>, vector<1x1x16x128xf32>
    %185 = vector.shape_cast %184 : vector<1x1x16x128xf32> to vector<16x128xf32>
    %c1_i32_109 = arith.constant 1 : i32
    %186 = tpu.dynamic_rotate %177 by %c1_i32_109 dim 0 : vector<16x128xf32>, i32 -> vector<16x128xf32>
    %187 = arith.mulf %185, %186 : vector<16x128xf32>
    %188 = arith.addf %181, %187 : vector<16x128xf32>
    %c1_110 = arith.constant 1 : index
    %c2_111 = arith.constant 2 : index
    %c0_112 = arith.constant 0 : index
    %c0_113 = arith.constant 0 : index
    %189 = vector.load %arg8[%c1_110, %c2_111, %c0_112, %c0_113] : memref<2x16x16x128xf32, #tpu.memory_space<vmem>>, vector<1x1x16x128xf32>
    %190 = vector.shape_cast %189 : vector<1x1x16x128xf32> to vector<16x128xf32>
    %c2_i32_114 = arith.constant 2 : i32
    %191 = tpu.dynamic_rotate %177 by %c2_i32_114 dim 0 : vector<16x128xf32>, i32 -> vector<16x128xf32>
    %192 = arith.mulf %190, %191 : vector<16x128xf32>
    %193 = arith.addf %182, %192 : vector<16x128xf32>
    %c1_115 = arith.constant 1 : index
    %c3_116 = arith.constant 3 : index
    %c0_117 = arith.constant 0 : index
    %c0_118 = arith.constant 0 : index
    %194 = vector.load %arg8[%c1_115, %c3_116, %c0_117, %c0_118] : memref<2x16x16x128xf32, #tpu.memory_space<vmem>>, vector<1x1x16x128xf32>
    %195 = vector.shape_cast %194 : vector<1x1x16x128xf32> to vector<16x128xf32>
    %c3_i32_119 = arith.constant 3 : i32
    %196 = tpu.dynamic_rotate %177 by %c3_i32_119 dim 0 : vector<16x128xf32>, i32 -> vector<16x128xf32>
    %197 = arith.mulf %195, %196 : vector<16x128xf32>
    %198 = arith.addf %183, %197 : vector<16x128xf32>
    %c1_120 = arith.constant 1 : index
    %c4_121 = arith.constant 4 : index
    %c0_122 = arith.constant 0 : index
    %c0_123 = arith.constant 0 : index
    %199 = vector.load %arg8[%c1_120, %c4_121, %c0_122, %c0_123] : memref<2x16x16x128xf32, #tpu.memory_space<vmem>>, vector<1x1x16x128xf32>
    %200 = vector.shape_cast %199 : vector<1x1x16x128xf32> to vector<16x128xf32>
    %c4_i32_124 = arith.constant 4 : i32
    %201 = tpu.dynamic_rotate %177 by %c4_i32_124 dim 0 : vector<16x128xf32>, i32 -> vector<16x128xf32>
    %202 = arith.mulf %200, %201 : vector<16x128xf32>
    %203 = arith.addf %180, %202 : vector<16x128xf32>
    %c1_125 = arith.constant 1 : index
    %c5_126 = arith.constant 5 : index
    %c0_127 = arith.constant 0 : index
    %c0_128 = arith.constant 0 : index
    %204 = vector.load %arg8[%c1_125, %c5_126, %c0_127, %c0_128] : memref<2x16x16x128xf32, #tpu.memory_space<vmem>>, vector<1x1x16x128xf32>
    %205 = vector.shape_cast %204 : vector<1x1x16x128xf32> to vector<16x128xf32>
    %c5_i32_129 = arith.constant 5 : i32
    %206 = tpu.dynamic_rotate %177 by %c5_i32_129 dim 0 : vector<16x128xf32>, i32 -> vector<16x128xf32>
    %207 = arith.mulf %205, %206 : vector<16x128xf32>
    %208 = arith.addf %188, %207 : vector<16x128xf32>
    %c1_130 = arith.constant 1 : index
    %c6_131 = arith.constant 6 : index
    %c0_132 = arith.constant 0 : index
    %c0_133 = arith.constant 0 : index
    %209 = vector.load %arg8[%c1_130, %c6_131, %c0_132, %c0_133] : memref<2x16x16x128xf32, #tpu.memory_space<vmem>>, vector<1x1x16x128xf32>
    %210 = vector.shape_cast %209 : vector<1x1x16x128xf32> to vector<16x128xf32>
    %c6_i32_134 = arith.constant 6 : i32
    %211 = tpu.dynamic_rotate %177 by %c6_i32_134 dim 0 : vector<16x128xf32>, i32 -> vector<16x128xf32>
    %212 = arith.mulf %210, %211 : vector<16x128xf32>
    %213 = arith.addf %193, %212 : vector<16x128xf32>
    %c1_135 = arith.constant 1 : index
    %c7_136 = arith.constant 7 : index
    %c0_137 = arith.constant 0 : index
    %c0_138 = arith.constant 0 : index
    %214 = vector.load %arg8[%c1_135, %c7_136, %c0_137, %c0_138] : memref<2x16x16x128xf32, #tpu.memory_space<vmem>>, vector<1x1x16x128xf32>
    %215 = vector.shape_cast %214 : vector<1x1x16x128xf32> to vector<16x128xf32>
    %c7_i32_139 = arith.constant 7 : i32
    %216 = tpu.dynamic_rotate %177 by %c7_i32_139 dim 0 : vector<16x128xf32>, i32 -> vector<16x128xf32>
    %217 = arith.mulf %215, %216 : vector<16x128xf32>
    %218 = arith.addf %198, %217 : vector<16x128xf32>
    %c1_140 = arith.constant 1 : index
    %c8_141 = arith.constant 8 : index
    %c0_142 = arith.constant 0 : index
    %c0_143 = arith.constant 0 : index
    %219 = vector.load %arg8[%c1_140, %c8_141, %c0_142, %c0_143] : memref<2x16x16x128xf32, #tpu.memory_space<vmem>>, vector<1x1x16x128xf32>
    %220 = vector.shape_cast %219 : vector<1x1x16x128xf32> to vector<16x128xf32>
    %c8_i32_144 = arith.constant 8 : i32
    %221 = tpu.dynamic_rotate %177 by %c8_i32_144 dim 0 : vector<16x128xf32>, i32 -> vector<16x128xf32>
    %222 = arith.mulf %220, %221 : vector<16x128xf32>
    %223 = arith.addf %203, %222 : vector<16x128xf32>
    %c1_145 = arith.constant 1 : index
    %c9_146 = arith.constant 9 : index
    %c0_147 = arith.constant 0 : index
    %c0_148 = arith.constant 0 : index
    %224 = vector.load %arg8[%c1_145, %c9_146, %c0_147, %c0_148] : memref<2x16x16x128xf32, #tpu.memory_space<vmem>>, vector<1x1x16x128xf32>
    %225 = vector.shape_cast %224 : vector<1x1x16x128xf32> to vector<16x128xf32>
    %c9_i32_149 = arith.constant 9 : i32
    %226 = tpu.dynamic_rotate %177 by %c9_i32_149 dim 0 : vector<16x128xf32>, i32 -> vector<16x128xf32>
    %227 = arith.mulf %225, %226 : vector<16x128xf32>
    %228 = arith.addf %208, %227 : vector<16x128xf32>
    %c1_150 = arith.constant 1 : index
    %c10_151 = arith.constant 10 : index
    %c0_152 = arith.constant 0 : index
    %c0_153 = arith.constant 0 : index
    %229 = vector.load %arg8[%c1_150, %c10_151, %c0_152, %c0_153] : memref<2x16x16x128xf32, #tpu.memory_space<vmem>>, vector<1x1x16x128xf32>
    %230 = vector.shape_cast %229 : vector<1x1x16x128xf32> to vector<16x128xf32>
    %c10_i32_154 = arith.constant 10 : i32
    %231 = tpu.dynamic_rotate %177 by %c10_i32_154 dim 0 : vector<16x128xf32>, i32 -> vector<16x128xf32>
    %232 = arith.mulf %230, %231 : vector<16x128xf32>
    %233 = arith.addf %213, %232 : vector<16x128xf32>
    %c1_155 = arith.constant 1 : index
    %c11_156 = arith.constant 11 : index
    %c0_157 = arith.constant 0 : index
    %c0_158 = arith.constant 0 : index
    %234 = vector.load %arg8[%c1_155, %c11_156, %c0_157, %c0_158] : memref<2x16x16x128xf32, #tpu.memory_space<vmem>>, vector<1x1x16x128xf32>
    %235 = vector.shape_cast %234 : vector<1x1x16x128xf32> to vector<16x128xf32>
    %c11_i32_159 = arith.constant 11 : i32
    %236 = tpu.dynamic_rotate %177 by %c11_i32_159 dim 0 : vector<16x128xf32>, i32 -> vector<16x128xf32>
    %237 = arith.mulf %235, %236 : vector<16x128xf32>
    %238 = arith.addf %218, %237 : vector<16x128xf32>
    %c1_160 = arith.constant 1 : index
    %c12_161 = arith.constant 12 : index
    %c0_162 = arith.constant 0 : index
    %c0_163 = arith.constant 0 : index
    %239 = vector.load %arg8[%c1_160, %c12_161, %c0_162, %c0_163] : memref<2x16x16x128xf32, #tpu.memory_space<vmem>>, vector<1x1x16x128xf32>
    %240 = vector.shape_cast %239 : vector<1x1x16x128xf32> to vector<16x128xf32>
    %c12_i32_164 = arith.constant 12 : i32
    %241 = tpu.dynamic_rotate %177 by %c12_i32_164 dim 0 : vector<16x128xf32>, i32 -> vector<16x128xf32>
    %242 = arith.mulf %240, %241 : vector<16x128xf32>
    %243 = arith.addf %223, %242 : vector<16x128xf32>
    %c1_165 = arith.constant 1 : index
    %c13_166 = arith.constant 13 : index
    %c0_167 = arith.constant 0 : index
    %c0_168 = arith.constant 0 : index
    %244 = vector.load %arg8[%c1_165, %c13_166, %c0_167, %c0_168] : memref<2x16x16x128xf32, #tpu.memory_space<vmem>>, vector<1x1x16x128xf32>
    %245 = vector.shape_cast %244 : vector<1x1x16x128xf32> to vector<16x128xf32>
    %c13_i32_169 = arith.constant 13 : i32
    %246 = tpu.dynamic_rotate %177 by %c13_i32_169 dim 0 : vector<16x128xf32>, i32 -> vector<16x128xf32>
    %247 = arith.mulf %245, %246 : vector<16x128xf32>
    %248 = arith.addf %228, %247 : vector<16x128xf32>
    %c1_170 = arith.constant 1 : index
    %c14_171 = arith.constant 14 : index
    %c0_172 = arith.constant 0 : index
    %c0_173 = arith.constant 0 : index
    %249 = vector.load %arg8[%c1_170, %c14_171, %c0_172, %c0_173] : memref<2x16x16x128xf32, #tpu.memory_space<vmem>>, vector<1x1x16x128xf32>
    %250 = vector.shape_cast %249 : vector<1x1x16x128xf32> to vector<16x128xf32>
    %c14_i32_174 = arith.constant 14 : i32
    %251 = tpu.dynamic_rotate %177 by %c14_i32_174 dim 0 : vector<16x128xf32>, i32 -> vector<16x128xf32>
    %252 = arith.mulf %250, %251 : vector<16x128xf32>
    %253 = arith.addf %233, %252 : vector<16x128xf32>
    %c1_175 = arith.constant 1 : index
    %c15_176 = arith.constant 15 : index
    %c0_177 = arith.constant 0 : index
    %c0_178 = arith.constant 0 : index
    %254 = vector.load %arg8[%c1_175, %c15_176, %c0_177, %c0_178] : memref<2x16x16x128xf32, #tpu.memory_space<vmem>>, vector<1x1x16x128xf32>
    %255 = vector.shape_cast %254 : vector<1x1x16x128xf32> to vector<16x128xf32>
    %c15_i32_179 = arith.constant 15 : i32
    %256 = tpu.dynamic_rotate %177 by %c15_i32_179 dim 0 : vector<16x128xf32>, i32 -> vector<16x128xf32>
    %257 = arith.mulf %255, %256 : vector<16x128xf32>
    %258 = arith.addf %238, %257 : vector<16x128xf32>
    %259 = arith.addf %243, %248 : vector<16x128xf32>
    %260 = arith.addf %253, %258 : vector<16x128xf32>
    %261 = arith.addf %259, %260 : vector<16x128xf32>
    %c1_180 = arith.constant 1 : index
    %c0_181 = arith.constant 0 : index
    %262 = vector.load %arg9[%c1_180, %c0_181] : memref<2x128xf32, #tpu.memory_space<vmem>>, vector<1x128xf32>
    %263 = vector.broadcast %262 : vector<1x128xf32> to vector<16x128xf32>
    %264 = arith.mulf %263, %177 : vector<16x128xf32>
    %265 = arith.addf %261, %264 : vector<16x128xf32>
    %266 = arith.mulf %265, %265 : vector<16x128xf32>
    %267 = arith.mulf %265, %266 : vector<16x128xf32>
    %cst_182 = arith.constant 4.471500e-02 : f32
    %268 = vector.broadcast %cst_182 : f32 to vector<16x128xf32>
    %269 = arith.mulf %268, %267 : vector<16x128xf32>
    %270 = arith.addf %265, %269 : vector<16x128xf32>
    %cst_183 = arith.constant 0.797884583 : f32
    %271 = vector.broadcast %cst_183 : f32 to vector<16x128xf32>
    %272 = arith.mulf %271, %270 : vector<16x128xf32>
    %273 = math.tanh %272 : vector<16x128xf32>
    %cst_184 = arith.constant 1.000000e+00 : f32
    %274 = vector.broadcast %cst_184 : f32 to vector<16x128xf32>
    %275 = arith.addf %274, %273 : vector<16x128xf32>
    %cst_185 = arith.constant 5.000000e-01 : f32
    %276 = vector.broadcast %cst_185 : f32 to vector<16x128xf32>
    %277 = arith.mulf %276, %275 : vector<16x128xf32>
    %278 = arith.mulf %265, %277 : vector<16x128xf32>
    %279 = arith.truncf %278 : vector<16x128xf32> to vector<16x128xbf16>
    %c1_186 = arith.constant 1 : index
    %c0_187 = arith.constant 0 : index
    %c0_188 = arith.constant 0 : index
    %280 = vector.load %arg10[%c1_186, %c0_187, %c0_188] : memref<2x128x128xbf16, #tpu.memory_space<vmem>>, vector<1x128x128xbf16>
    %281 = vector.shape_cast %280 : vector<1x128x128xbf16> to vector<128x128xbf16>
    %cst_189 = arith.constant dense<0.000000e+00> : vector<16x128xf32>
    %282 = tpu.matmul %279, %281, %cst_189 {dimension_numbers = #tpu.dot_dimension_numbers<[1], [0], [0], [1], [0, 0, 1, 1], [], []>} : vector<16x128xbf16>, vector<128x128xbf16>, vector<16x128xf32> -> vector<16x128xf32>
    %c1_190 = arith.constant 1 : index
    %c0_191 = arith.constant 0 : index
    %283 = vector.load %arg11[%c1_190, %c0_191] : memref<2x128xf32, #tpu.memory_space<vmem>>, vector<1x128xf32>
    %284 = vector.broadcast %283 : vector<1x128xf32> to vector<16x128xf32>
    %285 = arith.addf %282, %284 : vector<16x128xf32>
    %286 = arith.addf %285, %161 : vector<16x128xf32>
    %287 = math.tanh %286 : vector<16x128xf32>
    %288 = arith.negf %286 : vector<16x128xf32>
    %289 = math.exp %288 : vector<16x128xf32>
    %cst_192 = arith.constant 1.000000e+00 : f32
    %290 = vector.broadcast %cst_192 : f32 to vector<16x128xf32>
    %291 = arith.addf %290, %289 : vector<16x128xf32>
    %292 = arith.divf %290, %291 : vector<16x128xf32>
    %293 = arith.mulf %287, %292 : vector<16x128xf32>
    %294 = arith.truncf %293 : vector<16x128xf32> to vector<16x128xbf16>
    %c1_193 = arith.constant 1 : index
    %c0_194 = arith.constant 0 : index
    %c0_195 = arith.constant 0 : index
    %295 = vector.load %arg12[%c1_193, %c0_194, %c0_195] : memref<2x128x256xbf16, #tpu.memory_space<vmem>>, vector<1x128x256xbf16>
    %296 = vector.shape_cast %295 : vector<1x128x256xbf16> to vector<128x256xbf16>
    %cst_196 = arith.constant dense<0.000000e+00> : vector<16x256xf32>
    %297 = tpu.matmul %294, %296, %cst_196 {dimension_numbers = #tpu.dot_dimension_numbers<[1], [0], [0], [1], [0, 0, 1, 1], [], []>} : vector<16x128xbf16>, vector<128x256xbf16>, vector<16x256xf32> -> vector<16x256xf32>
    %c1_197 = arith.constant 1 : index
    %c0_198 = arith.constant 0 : index
    %298 = vector.load %arg13[%c1_197, %c0_198] : memref<2x256xf32, #tpu.memory_space<vmem>>, vector<1x256xf32>
    %299 = vector.broadcast %298 : vector<1x256xf32> to vector<16x256xf32>
    %300 = arith.addf %297, %299 : vector<16x256xf32>
    %301 = vector.extract_strided_slice %300 {offsets = [0, 128], sizes = [16, 128], strides = [1, 1]} : vector<16x256xf32> to vector<16x128xf32>
    %302 = arith.addf %158, %301 : vector<16x128xf32>
    %303 = arith.truncf %302 : vector<16x128xf32> to vector<16x128xbf16>
    %c0_199 = arith.constant 0 : index
    %c0_200 = arith.constant 0 : index
    %304 = vector.load %arg14[%c0_199, %c0_200] : memref<128x128xbf16, #tpu.memory_space<vmem>>, vector<128x128xbf16>
    %cst_201 = arith.constant dense<0.000000e+00> : vector<16x128xf32>
    %305 = tpu.matmul %303, %304, %cst_201 {dimension_numbers = #tpu.dot_dimension_numbers<[1], [0], [0], [1], [0, 0, 1, 1], [], []>} : vector<16x128xbf16>, vector<128x128xbf16>, vector<16x128xf32> -> vector<16x128xf32>
    %c0_202 = arith.constant 0 : index
    %c0_203 = arith.constant 0 : index
    %306 = vector.load %arg15[%c0_202, %c0_203] : memref<1x128xf32, #tpu.memory_space<vmem>>, vector<1x128xf32>
    %307 = vector.broadcast %306 : vector<1x128xf32> to vector<16x128xf32>
    %308 = arith.addf %305, %307 : vector<16x128xf32>
    %cst_204 = arith.constant 0.000000e+00 : f32
    %309 = vector.broadcast %cst_204 : f32 to vector<16x128xf32>
    %310 = arith.maximumf %308, %309 : vector<16x128xf32>
    %c0_205 = arith.constant 0 : index
    %c0_206 = arith.constant 0 : index
    %311 = vector.load %arg16[%c0_205, %c0_206] : memref<128x4xf32, #tpu.memory_space<vmem>>, vector<128x4xf32>
    %cst_207 = arith.constant dense<0.000000e+00> : vector<16x4xf32>
    %312 = tpu.matmul %310, %311, %cst_207 {dimension_numbers = #tpu.dot_dimension_numbers<[1], [0], [0], [1], [0, 0, 1, 1], [], []>} : vector<16x128xf32>, vector<128x4xf32>, vector<16x4xf32> -> vector<16x4xf32>
    %c0_208 = arith.constant 0 : index
    %313 = memref.load %arg17[%c0_208] : memref<1xf32, #tpu.memory_space<smem>>
    %314 = vector.broadcast %313 : f32 to vector<16x4xf32>
    %315 = arith.addf %312, %314 : vector<16x4xf32>
    %316 = arith.subf %315, %1 : vector<16x4xf32>
    %c0_209 = arith.constant 0 : index
    %c0_210 = arith.constant 0 : index
    %c0_211 = arith.constant 0 : index
    %317 = vector.load %arg18[%c0_209, %c0_210, %c0_211] : memref<1x16x4xf32, #tpu.memory_space<vmem>>, vector<1x16x4xf32>
    %318 = vector.shape_cast %317 : vector<1x16x4xf32> to vector<16x4xf32>
    %319 = vector.shape_cast %316 : vector<16x4xf32> to vector<1x16x4xf32>
    tpu.vector_store %arg18[%c0_209, %c0_210, %c0_211], %319 {strides = array<i32>} : memref<1x16x4xf32, #tpu.memory_space<vmem>>, vector<1x16x4xf32>,
    return
  }
  func.func @transform_0(%arg0: i32) -> (i32, i32, i32) {
    %c0_i32 = arith.constant 0 : i32
    %c0_i32_0 = arith.constant 0 : i32
    %c0_i32_1 = arith.constant 0 : i32
    return %arg0, %c0_i32, %c0_i32_0 : i32, i32, i32
  }
  func.func @transform_1(%arg0: i32) -> (i32, i32, i32) {
    %c0_i32 = arith.constant 0 : i32
    %c0_i32_0 = arith.constant 0 : i32
    %c0_i32_1 = arith.constant 0 : i32
    return %arg0, %c0_i32, %c0_i32_0 : i32, i32, i32
  }
  func.func @transform_2(%arg0: i32) -> (i32, i32) {
    %c0_i32 = arith.constant 0 : i32
    %c0_i32_0 = arith.constant 0 : i32
    %c0_i32_1 = arith.constant 0 : i32
    return %c0_i32, %c0_i32_0 : i32, i32
  }
  func.func @transform_3(%arg0: i32) -> (i32, i32) {
    %c0_i32 = arith.constant 0 : i32
    %c0_i32_0 = arith.constant 0 : i32
    %c0_i32_1 = arith.constant 0 : i32
    return %c0_i32, %c0_i32_0 : i32, i32
  }
  func.func @transform_4(%arg0: i32) -> (i32, i32) {
    %c0_i32 = arith.constant 0 : i32
    %c0_i32_0 = arith.constant 0 : i32
    %c0_i32_1 = arith.constant 0 : i32
    return %c0_i32, %c0_i32_0 : i32, i32
  }
  func.func @transform_5(%arg0: i32) -> (i32, i32) {
    %c0_i32 = arith.constant 0 : i32
    %c0_i32_0 = arith.constant 0 : i32
    %c0_i32_1 = arith.constant 0 : i32
    return %c0_i32, %c0_i32_0 : i32, i32
  }
  func.func @transform_6(%arg0: i32) -> (i32, i32) {
    %c0_i32 = arith.constant 0 : i32
    %c0_i32_0 = arith.constant 0 : i32
    %c0_i32_1 = arith.constant 0 : i32
    return %c0_i32, %c0_i32_0 : i32, i32
  }
  func.func @transform_7(%arg0: i32) -> (i32, i32, i32, i32) {
    %c0_i32 = arith.constant 0 : i32
    %c0_i32_0 = arith.constant 0 : i32
    %c0_i32_1 = arith.constant 0 : i32
    %c0_i32_2 = arith.constant 0 : i32
    %c0_i32_3 = arith.constant 0 : i32
    return %c0_i32, %c0_i32_0, %c0_i32_1, %c0_i32_2 : i32, i32, i32, i32
  }
  func.func @transform_8(%arg0: i32) -> (i32, i32) {
    %c0_i32 = arith.constant 0 : i32
    %c0_i32_0 = arith.constant 0 : i32
    %c0_i32_1 = arith.constant 0 : i32
    return %c0_i32, %c0_i32_0 : i32, i32
  }
  func.func @transform_9(%arg0: i32) -> (i32, i32, i32) {
    %c0_i32 = arith.constant 0 : i32
    %c0_i32_0 = arith.constant 0 : i32
    %c0_i32_1 = arith.constant 0 : i32
    %c0_i32_2 = arith.constant 0 : i32
    return %c0_i32, %c0_i32_0, %c0_i32_1 : i32, i32, i32
  }
  func.func @transform_10(%arg0: i32) -> (i32, i32) {
    %c0_i32 = arith.constant 0 : i32
    %c0_i32_0 = arith.constant 0 : i32
    %c0_i32_1 = arith.constant 0 : i32
    return %c0_i32, %c0_i32_0 : i32, i32
  }
  func.func @transform_11(%arg0: i32) -> (i32, i32, i32) {
    %c0_i32 = arith.constant 0 : i32
    %c0_i32_0 = arith.constant 0 : i32
    %c0_i32_1 = arith.constant 0 : i32
    %c0_i32_2 = arith.constant 0 : i32
    return %c0_i32, %c0_i32_0, %c0_i32_1 : i32, i32, i32
  }
  func.func @transform_12(%arg0: i32) -> (i32, i32) {
    %c0_i32 = arith.constant 0 : i32
    %c0_i32_0 = arith.constant 0 : i32
    %c0_i32_1 = arith.constant 0 : i32
    return %c0_i32, %c0_i32_0 : i32, i32
  }
  func.func @transform_13(%arg0: i32) -> (i32, i32) {
    %c0_i32 = arith.constant 0 : i32
    %c0_i32_0 = arith.constant 0 : i32
    %c0_i32_1 = arith.constant 0 : i32
    return %c0_i32, %c0_i32_0 : i32, i32
  }
  func.func @transform_14(%arg0: i32) -> (i32, i32) {
    %c0_i32 = arith.constant 0 : i32
    %c0_i32_0 = arith.constant 0 : i32
    %c0_i32_1 = arith.constant 0 : i32
    return %c0_i32, %c0_i32_0 : i32, i32
  }
  func.func @transform_15(%arg0: i32) -> (i32, i32) {
    %c0_i32 = arith.constant 0 : i32
    %c0_i32_0 = arith.constant 0 : i32
    %c0_i32_1 = arith.constant 0 : i32
    return %c0_i32, %c0_i32_0 : i32, i32
  }
  func.func @transform_16(%arg0: i32) -> i32 {
    %c0_i32 = arith.constant 0 : i32
    %c0_i32_0 = arith.constant 0 : i32
    return %c0_i32 : i32
  }
  func.func @transform_17(%arg0: i32) -> (i32, i32, i32) {
    %c0_i32 = arith.constant 0 : i32
    %c0_i32_0 = arith.constant 0 : i32
    %c0_i32_1 = arith.constant 0 : i32
    return %arg0, %c0_i32, %c0_i32_0 : i32, i32, i32
  }
}

</mosaic_0001>

<bundles_post_ra>
// kernel: tile.54
= control target key start
LH: loop header
LB: loop body
LE: loop exit
PB: predicated region body
PF: predicated region fallthrough
CT: control target
= control target key end

     0   :  { %s29_s10 = smov 3  ;;  %s10_s11 = smov 3  ;;  %vm12_vm0 = vcmask 261120   ;;  %vm19_vm1 = vcmask 1048320   ;;  %vm26_vm2 = vcmask 785920   ;;  %vm33_vm3 = vcmask 523520   ;;  %s67_s0 = inlined_call_operand.vmem [shape: f32[2,4,32], index: 0, kind: input, shape index: {}]   ;;  %s68_s1 = inlined_call_operand.vmem [shape: f32[2,128], index: 1, kind: output, shape index: {}]  }
   0x1   :  { %v41_v0 = vld [vmem:[%s67_s0 + $0x4] sm:$0xf]  ;;  %v8_v1 = vld [vmem:[%s67_s0] sm:$0xf]  ;;  %s15_s0 = smov 3  ;;  %s22_s12 = smov 3 }
   0x2   :  { %7 = vst [vmem:[#allocation1 + $0x8] sm:$0xf] %v41_v0  ;;  %9 = vst [vmem:[#allocation1] sm:$0xf] %v8_v1  ;;  %s45_s13 = smov 96   ;;  %s46_s14 = smov 32  }
   0x3   :  { %s47_s15 = smov 64  }
   0x9   :  { %v16_v2 = vld [vmem:[#allocation1 + $0x3] ss:$8 sm:%s15_s0]   ;;  %v30_v3 = vld [vmem:[#allocation1 + $0x1] ss:$8 sm:%s29_s10]   ;;  %v11_v4 = vld [vmem:[#allocation1] ss:$8 sm:%s10_s11]  }
   0xa   :  { %17 = vrot.lane.b32.xlu0 %v16_v2, %s45_s13  ;;  %31 = vrot.lane.b32.xlu1 %v30_v3, %s46_s14  ;;  %v23_v5 = vld [vmem:[#allocation1 + $0x2] ss:$8 sm:%s22_s12]   ;;  %13 = vst.msk [vmem:[#allocation0] sm:$0x3] %vm12_vm0, %v11_v4  }
   0xe   :  { %24 = vrot.lane.b32.xlu0 %v23_v5, %s47_s15 }
  0x7c   :  { %v18_v6 = vpop.permute.xlu0 %17   ;;  %v32_v7 = vpop.permute.xlu1 %31  }
  0x7d   :  { %20 = vst.msk [vmem:[#allocation0] sm:$0x3] %vm19_vm1, %v18_v6  }
  0x80   :  { %v25_v8 = vpop.permute.xlu0 %24  }
  0x81   :  { %27 = vst.msk [vmem:[#allocation0] sm:$0x3] %vm26_vm2, %v25_v8  }
  0x82   :  { %34 = vst.msk [vmem:[#allocation0] sm:$0x3] %vm33_vm3, %v32_v7  }
  0x89   :  { %v38_v9 = vld [vmem:[#allocation0] sm:$0x3] }
  0x8a   :  { %40 = vst [vmem:[%s68_s1] sm:$0x3] %v38_v9 }

// kernel: tile.89
= control target key start
LH: loop header
LB: loop body
LE: loop exit
PB: predicated region body
PF: predicated region fallthrough
CT: control target
= control target key end

     0   :  { %vm2562_vm0 = vcmask 1047556   ;;  %s6518_s10 = smov 96   ;;  %vm2564_vm1 = vcmask 261120   ;;  %vm3141_vm2 = vcmask 1048320   ;;  %vm3844_vm3 = vcmask 785920   ;;  %s9710_s0 = inlined_call_operand.vmem [shape: f32[2,16,16,4,32], index: 0, kind: input, shape index: {}]   ;;  %s9711_s1 = inlined_call_operand.vmem [shape: f32[2,16,16,128], index: 1, kind: output, shape index: {}]  }
   0x1   :  { %v6256_v0 = vld [vmem:[%s9710_s0 + $0x1c] sm:$0xf]  ;;  %v6257_v1 = vld [vmem:[%s9710_s0 + $0x18] sm:$0xf]  ;;  %v6258_v2 = vld [vmem:[%s9710_s0 + $0x14] sm:$0xf] }
   0x2   :  { %2528 = vst [vmem:[#allocation0 + $0x38] sm:$0xf] %v6256_v0  ;;  %2533 = vst [vmem:[#allocation0 + $0x30] sm:$0xf] %v6257_v1  ;;  %v6259_v3 = vld [vmem:[%s9710_s0 + $0x10] sm:$0xf] }
   0x3   :  { %2538 = vst [vmem:[#allocation0 + $0x28] sm:$0xf] %v6258_v2  ;;  %v6260_v4 = vld [vmem:[%s9710_s0 + $0xc] sm:$0xf]  ;;  %v6261_v5 = vld [vmem:[%s9710_s0 + $0x8] sm:$0xf] }
   0x4   :  { %2543 = vst [vmem:[#allocation0 + $0x20] sm:$0xf] %v6259_v3  ;;  %2548 = vst [vmem:[#allocation0 + $0x18] sm:$0xf] %v6260_v4  ;;  %v6262_v6 = vld [vmem:[%s9710_s0 + $0x4] sm:$0xf] }
   0x5   :  { %2553 = vst [vmem:[#allocation0 + $0x10] sm:$0xf] %v6261_v5  ;;  %v2558_v7 = vld [vmem:[%s9710_s0] sm:$0xf]  ;;  %2557 = vst [vmem:[#allocation0 + $0x8] sm:$0xf] %v6262_v6 }
   0x6   :  { %2559 = vst [vmem:[#allocation0] sm:$0xf] %v2558_v7  ;;  %v6192_v8 = vld [vmem:[%s9710_s0 + $0x11c] sm:$0xf]  ;;  %v6193_v9 = vld [vmem:[%s9710_s0 + $0x118] sm:$0xf] }
   0x7   :  { %v6194_v10 = vld [vmem:[%s9710_s0 + $0x114] sm:$0xf]  ;;  %2208 = vst [vmem:[#allocation0 + $0x238] sm:$0xf] %v6192_v8  ;;  %2213 = vst [vmem:[#allocation0 + $0x230] sm:$0xf] %v6193_v9 }
   0x8   :  { %2218 = vst [vmem:[#allocation0 + $0x228] sm:$0xf] %v6194_v10  ;;  %v6195_v11 = vld [vmem:[%s9710_s0 + $0x110] sm:$0xf]  ;;  %v6196_v12 = vld [vmem:[%s9710_s0 + $0x10c] sm:$0xf] }
   0x9   :  { %v6197_v13 = vld [vmem:[%s9710_s0 + $0x108] sm:$0xf]  ;;  %2223 = vst [vmem:[#allocation0 + $0x220] sm:$0xf] %v6195_v11  ;;  %2228 = vst [vmem:[#allocation0 + $0x218] sm:$0xf] %v6196_v12 }
   0xa   :  { %2233 = vst [vmem:[#allocation0 + $0x210] sm:$0xf] %v6197_v13  ;;  %v6198_v14 = vld [vmem:[%s9710_s0 + $0x104] sm:$0xf]  ;;  %v6199_v15 = vld [vmem:[%s9710_s0 + $0x100] sm:$0xf] }
   0xb   :  { %v6224_v16 = vld [vmem:[%s9710_s0 + $0x9c] sm:$0xf]  ;;  %2238 = vst [vmem:[#allocation0 + $0x208] sm:$0xf] %v6198_v14  ;;  %2243 = vst [vmem:[#allocation0 + $0x200] sm:$0xf] %v6199_v15 }
   0xc   :  { %2368 = vst [vmem:[#allocation0 + $0x138] sm:$0xf] %v6224_v16  ;;  %v6225_v17 = vld [vmem:[%s9710_s0 + $0x98] sm:$0xf]  ;;  %v6226_v18 = vld [vmem:[%s9710_s0 + $0x94] sm:$0xf] }
   0xd   :  { %v6227_v19 = vld [vmem:[%s9710_s0 + $0x90] sm:$0xf]  ;;  %2373 = vst [vmem:[#allocation0 + $0x130] sm:$0xf] %v6225_v17  ;;  %2378 = vst [vmem:[#allocation0 + $0x128] sm:$0xf] %v6226_v18 }
   0xe   :  { %2383 = vst [vmem:[#allocation0 + $0x120] sm:$0xf] %v6227_v19  ;;  %v6228_v20 = vld [vmem:[%s9710_s0 + $0x8c] sm:$0xf]  ;;  %v6229_v21 = vld [vmem:[%s9710_s0 + $0x88] sm:$0xf] }
   0xf   :  { %v6230_v22 = vld [vmem:[%s9710_s0 + $0x84] sm:$0xf]  ;;  %2388 = vst [vmem:[#allocation0 + $0x118] sm:$0xf] %v6228_v20  ;;  %2393 = vst [vmem:[#allocation0 + $0x110] sm:$0xf] %v6229_v21 }
  0x10   :  { %2398 = vst [vmem:[#allocation0 + $0x108] sm:$0xf] %v6230_v22  ;;  %v6231_v23 = vld [vmem:[%s9710_s0 + $0x80] sm:$0xf]  ;;  %v6160_v24 = vld [vmem:[%s9710_s0 + $0x19c] sm:$0xf] }
  0x11   :  { %v6161_v25 = vld [vmem:[%s9710_s0 + $0x198] sm:$0xf]  ;;  %2403 = vst [vmem:[#allocation0 + $0x100] sm:$0xf] %v6231_v23  ;;  %2048 = vst [vmem:[#allocation0 + $0x338] sm:$0xf] %v6160_v24 }
  0x12   :  { %v3136_v26 = vld [vmem:[#allocation0 + $0x3] ss:$8 sm:$0xf0]   ;;  %2053 = vst [vmem:[#allocation0 + $0x330] sm:$0xf] %v6161_v25  ;;  %vm4547_vm4 = vcmask 523520  }
  0x13   :  { %v6162_v27 = vld [vmem:[%s9710_s0 + $0x194] sm:$0xf]  ;;  %v3134_v28 = vld [vmem:[#allocation0 + $0x3] ss:$8 sm:$0xf]  }
  0x14   :  { %2058 = vst [vmem:[#allocation0 + $0x328] sm:$0xf] %v6162_v27  ;;  %v6163_v29 = vld [vmem:[%s9710_s0 + $0x190] sm:$0xf]  ;;  %v3138_v30 = vsel %vm2562_vm0, %v3136_v26, %v3134_v28  ;;  %v6164_v31 = vld [vmem:[%s9710_s0 + $0x18c] sm:$0xf] }
  0x15   :  { %2063 = vst [vmem:[#allocation0 + $0x320] sm:$0xf] %v6163_v29  ;;  %v6165_v32 = vld [vmem:[%s9710_s0 + $0x188] sm:$0xf]  ;;  %v6166_v33 = vld [vmem:[%s9710_s0 + $0x184] sm:$0xf]  ;;  %3139 = vrot.lane.b32.xlu0 %v3138_v30, %s6518_s10 }
  0x16   :  { %v3157_v34 = vld [vmem:[#allocation0 + $0x203] ss:$8 sm:$0xf0]   ;;  %2068 = vst [vmem:[#allocation0 + $0x318] sm:$0xf] %v6164_v31 }
  0x17   :  { %2073 = vst [vmem:[#allocation0 + $0x310] sm:$0xf] %v6165_v32  ;;  %2078 = vst [vmem:[#allocation0 + $0x308] sm:$0xf] %v6166_v33  ;;  %v6167_v35 = vld [vmem:[%s9710_s0 + $0x180] sm:$0xf] }
  0x18   :  { %v3155_v36 = vld [vmem:[#allocation0 + $0x203] ss:$8 sm:$0xf]   ;;  %2083 = vst [vmem:[#allocation0 + $0x300] sm:$0xf] %v6167_v35 }
  0x19   :  { %v6128_v37 = vld [vmem:[%s9710_s0 + $0x21c] sm:$0xf]  ;;  %v3159_v38 = vsel %vm2562_vm0, %v3157_v34, %v3155_v36  ;;  %v3146_v39 = vld [vmem:[#allocation0 + $0x103] ss:$8 sm:$0xf0]  }
  0x1a   :  { %1888 = vst [vmem:[#allocation0 + $0x438] sm:$0xf] %v6128_v37  ;;  %v6129_v40 = vld [vmem:[%s9710_s0 + $0x218] sm:$0xf]  ;;  %3160 = vrot.lane.b32.xlu1 %v3159_v38, %s6518_s10  ;;  %v6130_v41 = vld [vmem:[%s9710_s0 + $0x214] sm:$0xf] }
  0x1b   :  { %1893 = vst [vmem:[#allocation0 + $0x430] sm:$0xf] %v6129_v40  ;;  %v6131_v42 = vld [vmem:[%s9710_s0 + $0x210] sm:$0xf]  ;;  %v6132_v43 = vld [vmem:[%s9710_s0 + $0x20c] sm:$0xf] }
  0x1c   :  { %v3144_v44 = vld [vmem:[#allocation0 + $0x103] ss:$8 sm:$0xf]   ;;  %1898 = vst [vmem:[#allocation0 + $0x428] sm:$0xf] %v6130_v41 }
  0x1d   :  { %1903 = vst [vmem:[#allocation0 + $0x420] sm:$0xf] %v6131_v42  ;;  %1908 = vst [vmem:[#allocation0 + $0x418] sm:$0xf] %v6132_v43  ;;  %v6133_v45 = vld [vmem:[%s9710_s0 + $0x208] sm:$0xf]  ;;  %v3148_v46 = vsel %vm2562_vm0, %v3146_v39, %v3144_v44 }
  0x1e   :  { %1913 = vst [vmem:[#allocation0 + $0x410] sm:$0xf] %v6133_v45  ;;  %v6134_v47 = vld [vmem:[%s9710_s0 + $0x204] sm:$0xf]  ;;  %v6135_v48 = vld [vmem:[%s9710_s0 + $0x200] sm:$0xf]  ;;  %3149 = vrot.lane.b32.xlu0 %v3148_v46, %s6518_s10 }
  0x1f   :  { %v6096_v49 = vld [vmem:[%s9710_s0 + $0x29c] sm:$0xf]  ;;  %v3168_v50 = vld [vmem:[#allocation0 + $0x303] ss:$8 sm:$0xf0]  }
  0x20   :  { %1918 = vst [vmem:[#allocation0 + $0x408] sm:$0xf] %v6134_v47  ;;  %1923 = vst [vmem:[#allocation0 + $0x400] sm:$0xf] %v6135_v48  ;;  %v6097_v51 = vld [vmem:[%s9710_s0 + $0x298] sm:$0xf] }
  0x21   :  { %1728 = vst [vmem:[#allocation0 + $0x538] sm:$0xf] %v6096_v49  ;;  %1733 = vst [vmem:[#allocation0 + $0x530] sm:$0xf] %v6097_v51  ;;  %v6098_v52 = vld [vmem:[%s9710_s0 + $0x294] sm:$0xf] }
  0x22   :  { %v6099_v53 = vld [vmem:[%s9710_s0 + $0x290] sm:$0xf]  ;;  %v6100_v54 = vld [vmem:[%s9710_s0 + $0x28c] sm:$0xf]  ;;  %1738 = vst [vmem:[#allocation0 + $0x528] sm:$0xf] %v6098_v52 }
  0x23   :  { %v3166_v55 = vld [vmem:[#allocation0 + $0x303] ss:$8 sm:$0xf]   ;;  %1743 = vst [vmem:[#allocation0 + $0x520] sm:$0xf] %v6099_v53 }
  0x24   :  { %1748 = vst [vmem:[#allocation0 + $0x518] sm:$0xf] %v6100_v54  ;;  %v6101_v56 = vld [vmem:[%s9710_s0 + $0x288] sm:$0xf]  ;;  %v3170_v57 = vsel %vm2562_vm0, %v3168_v50, %v3166_v55  ;;  %v6102_v58 = vld [vmem:[%s9710_s0 + $0x284] sm:$0xf] }
  0x25   :  { %1753 = vst [vmem:[#allocation0 + $0x510] sm:$0xf] %v6101_v56  ;;  %v6103_v59 = vld [vmem:[%s9710_s0 + $0x280] sm:$0xf]  ;;  %v6064_v60 = vld [vmem:[%s9710_s0 + $0x31c] sm:$0xf]  ;;  %3171 = vrot.lane.b32.xlu1 %v3170_v57, %s6518_s10 }
  0x26   :  { %1758 = vst [vmem:[#allocation0 + $0x508] sm:$0xf] %v6102_v58  ;;  %1763 = vst [vmem:[#allocation0 + $0x500] sm:$0xf] %v6103_v59  ;;  %v6065_v61 = vld [vmem:[%s9710_s0 + $0x318] sm:$0xf] }
  0x27   :  { %1568 = vst [vmem:[#allocation0 + $0x638] sm:$0xf] %v6064_v60  ;;  %v6066_v62 = vld [vmem:[%s9710_s0 + $0x314] sm:$0xf]  ;;  %v6067_v63 = vld [vmem:[%s9710_s0 + $0x310] sm:$0xf] }
  0x28   :  { %v3179_v0 = vld [vmem:[#allocation0 + $0x403] ss:$8 sm:$0xf0]   ;;  %1573 = vst [vmem:[#allocation0 + $0x630] sm:$0xf] %v6065_v61 }
  0x29   :  { %1578 = vst [vmem:[#allocation0 + $0x628] sm:$0xf] %v6066_v62  ;;  %1583 = vst [vmem:[#allocation0 + $0x620] sm:$0xf] %v6067_v63  ;;  %v6068_v1 = vld [vmem:[%s9710_s0 + $0x30c] sm:$0xf] }
  0x2a   :  { %1588 = vst [vmem:[#allocation0 + $0x618] sm:$0xf] %v6068_v1  ;;  %v6069_v2 = vld [vmem:[%s9710_s0 + $0x308] sm:$0xf]  ;;  %v6070_v3 = vld [vmem:[%s9710_s0 + $0x304] sm:$0xf] }
  0x2b   :  { %v6071_v4 = vld [vmem:[%s9710_s0 + $0x300] sm:$0xf]  ;;  %1593 = vst [vmem:[#allocation0 + $0x610] sm:$0xf] %v6069_v2  ;;  %1598 = vst [vmem:[#allocation0 + $0x608] sm:$0xf] %v6070_v3 }
  0x2c   :  { %v3177_v5 = vld [vmem:[#allocation0 + $0x403] ss:$8 sm:$0xf]   ;;  %1603 = vst [vmem:[#allocation0 + $0x600] sm:$0xf] %v6071_v4 }
  0x2d   :  { %v6032_v6 = vld [vmem:[%s9710_s0 + $0x39c] sm:$0xf]  ;;  %v3181_v7 = vsel %vm2562_vm0, %v3179_v0, %v3177_v5  ;;  %v6033_v8 = vld [vmem:[%s9710_s0 + $0x398] sm:$0xf]  ;;  %v6034_v9 = vld [vmem:[%s9710_s0 + $0x394] sm:$0xf] }
  0x2e   :  { %1408 = vst [vmem:[#allocation0 + $0x738] sm:$0xf] %v6032_v6  ;;  %v6035_v10 = vld [vmem:[%s9710_s0 + $0x390] sm:$0xf]  ;;  %3182 = vrot.lane.b32.xlu0 %v3181_v7, %s6518_s10  ;;  %1413 = vst [vmem:[#allocation0 + $0x730] sm:$0xf] %v6033_v8 }
  0x2f   :  { %v3190_v11 = vld [vmem:[#allocation0 + $0x503] ss:$8 sm:$0xf0]   ;;  %1418 = vst [vmem:[#allocation0 + $0x728] sm:$0xf] %v6034_v9 }
  0x30   :  { %1423 = vst [vmem:[#allocation0 + $0x720] sm:$0xf] %v6035_v10  ;;  %v6036_v12 = vld [vmem:[%s9710_s0 + $0x38c] sm:$0xf]  ;;  %v6037_v13 = vld [vmem:[%s9710_s0 + $0x388] sm:$0xf] }
  0x31   :  { %1428 = vst [vmem:[#allocation0 + $0x718] sm:$0xf] %v6036_v12  ;;  %v6038_v14 = vld [vmem:[%s9710_s0 + $0x384] sm:$0xf]  ;;  %v6039_v15 = vld [vmem:[%s9710_s0 + $0x380] sm:$0xf] }
  0x32   :  { %v3188_v16 = vld [vmem:[#allocation0 + $0x503] ss:$8 sm:$0xf]   ;;  %1433 = vst [vmem:[#allocation0 + $0x710] sm:$0xf] %v6037_v13 }
  0x33   :  { %1438 = vst [vmem:[#allocation0 + $0x708] sm:$0xf] %v6038_v14  ;;  %1443 = vst [vmem:[#allocation0 + $0x700] sm:$0xf] %v6039_v15  ;;  %v6000_v17 = vld [vmem:[%s9710_s0 + $0x41c] sm:$0xf]  ;;  %v3192_v18 = vsel %vm2562_vm0, %v3190_v11, %v3188_v16 }
  0x34   :  { %v3201_v19 = vld [vmem:[#allocation0 + $0x603] ss:$8 sm:$0xf0]   ;;  %1248 = vst [vmem:[#allocation0 + $0x838] sm:$0xf] %v6000_v17  ;;  %3193 = vrot.lane.b32.xlu1 %v3192_v18, %s6518_s10 }
  0x35   :  { %v6001_v20 = vld [vmem:[%s9710_s0 + $0x418] sm:$0xf]  ;;  %v6002_v21 = vld [vmem:[%s9710_s0 + $0x414] sm:$0xf]  ;;  %v6003_v22 = vld [vmem:[%s9710_s0 + $0x410] sm:$0xf] }
  0x36   :  { %1253 = vst [vmem:[#allocation0 + $0x830] sm:$0xf] %v6001_v20  ;;  %v6004_v23 = vld [vmem:[%s9710_s0 + $0x40c] sm:$0xf]  ;;  %1258 = vst [vmem:[#allocation0 + $0x828] sm:$0xf] %v6002_v21 }
  0x37   :  { %v3199_v24 = vld [vmem:[#allocation0 + $0x603] ss:$8 sm:$0xf]   ;;  %1263 = vst [vmem:[#allocation0 + $0x820] sm:$0xf] %v6003_v22 }
  0x38   :  { %1268 = vst [vmem:[#allocation0 + $0x818] sm:$0xf] %v6004_v23  ;;  %v6005_v25 = vld [vmem:[%s9710_s0 + $0x408] sm:$0xf]  ;;  %v3203_v26 = vsel %vm2562_vm0, %v3201_v19, %v3199_v24  ;;  %v6006_v27 = vld [vmem:[%s9710_s0 + $0x404] sm:$0xf] }
  0x39   :  { %1273 = vst [vmem:[#allocation0 + $0x810] sm:$0xf] %v6005_v25  ;;  %v6007_v28 = vld [vmem:[%s9710_s0 + $0x400] sm:$0xf]  ;;  %v5968_v29 = vld [vmem:[%s9710_s0 + $0x49c] sm:$0xf]  ;;  %3204 = vrot.lane.b32.xlu0 %v3203_v26, %s6518_s10 }
  0x3a   :  { %v3212_v30 = vld [vmem:[#allocation0 + $0x703] ss:$8 sm:$0xf0]   ;;  %1278 = vst [vmem:[#allocation0 + $0x808] sm:$0xf] %v6006_v27 }
  0x3b   :  { %1283 = vst [vmem:[#allocation0 + $0x800] sm:$0xf] %v6007_v28  ;;  %1088 = vst [vmem:[#allocation0 + $0x938] sm:$0xf] %v5968_v29  ;;  %v5969_v31 = vld [vmem:[%s9710_s0 + $0x498] sm:$0xf] }
  0x3c   :  { %1093 = vst [vmem:[#allocation0 + $0x930] sm:$0xf] %v5969_v31  ;;  %v5970_v32 = vld [vmem:[%s9710_s0 + $0x494] sm:$0xf]  ;;  %v5971_v33 = vld [vmem:[%s9710_s0 + $0x490] sm:$0xf] }
  0x3d   :  { %v5972_v34 = vld [vmem:[%s9710_s0 + $0x48c] sm:$0xf]  ;;  %v3210_v35 = vld [vmem:[#allocation0 + $0x703] ss:$8 sm:$0xf]  }
  0x3e   :  { %1098 = vst [vmem:[#allocation0 + $0x928] sm:$0xf] %v5970_v32  ;;  %1103 = vst [vmem:[#allocation0 + $0x920] sm:$0xf] %v5971_v33  ;;  %v5973_v36 = vld [vmem:[%s9710_s0 + $0x488] sm:$0xf]  ;;  %v3214_v37 = vsel %vm2562_vm0, %v3212_v30, %v3210_v35 }
  0x3f   :  { %1108 = vst [vmem:[#allocation0 + $0x918] sm:$0xf] %v5972_v34  ;;  %1113 = vst [vmem:[#allocation0 + $0x910] sm:$0xf] %v5973_v36  ;;  %v5974_v38 = vld [vmem:[%s9710_s0 + $0x484] sm:$0xf]  ;;  %3215 = vrot.lane.b32.xlu1 %v3214_v37, %s6518_s10 }
  0x40   :  { %v5975_v39 = vld [vmem:[%s9710_s0 + $0x480] sm:$0xf]  ;;  %v5936_v40 = vld [vmem:[%s9710_s0 + $0x51c] sm:$0xf]  ;;  %1118 = vst [vmem:[#allocation0 + $0x908] sm:$0xf] %v5974_v38 }
  0x41   :  { %1123 = vst [vmem:[#allocation0 + $0x900] sm:$0xf] %v5975_v39  ;;  %928 = vst [vmem:[#allocation0 + $0xa38] sm:$0xf] %v5936_v40  ;;  %v5937_v41 = vld [vmem:[%s9710_s0 + $0x518] sm:$0xf] }
  0x42   :  { %v5938_v42 = vld [vmem:[%s9710_s0 + $0x514] sm:$0xf]  ;;  %v5939_v43 = vld [vmem:[%s9710_s0 + $0x510] sm:$0xf]  ;;  %933 = vst [vmem:[#allocation0 + $0xa30] sm:$0xf] %v5937_v41 }
  0x43   :  { %v3223_v44 = vld [vmem:[#allocation0 + $0x803] ss:$8 sm:$0xf0]   ;;  %938 = vst [vmem:[#allocation0 + $0xa28] sm:$0xf] %v5938_v42 }
  0x44   :  { %943 = vst [vmem:[#allocation0 + $0xa20] sm:$0xf] %v5939_v43  ;;  %v5940_v45 = vld [vmem:[%s9710_s0 + $0x50c] sm:$0xf]  ;;  %v5941_v46 = vld [vmem:[%s9710_s0 + $0x508] sm:$0xf] }
  0x45   :  { %948 = vst [vmem:[#allocation0 + $0xa18] sm:$0xf] %v5940_v45  ;;  %v5942_v47 = vld [vmem:[%s9710_s0 + $0x504] sm:$0xf]  ;;  %v5943_v48 = vld [vmem:[%s9710_s0 + $0x500] sm:$0xf] }
  0x46   :  { %v3221_v49 = vld [vmem:[#allocation0 + $0x803] ss:$8 sm:$0xf]   ;;  %953 = vst [vmem:[#allocation0 + $0xa10] sm:$0xf] %v5941_v46 }
  0x47   :  { %958 = vst [vmem:[#allocation0 + $0xa08] sm:$0xf] %v5942_v47  ;;  %963 = vst [vmem:[#allocation0 + $0xa00] sm:$0xf] %v5943_v48  ;;  %v5904_v50 = vld [vmem:[%s9710_s0 + $0x59c] sm:$0xf]  ;;  %v3225_v51 = vsel %vm2562_vm0, %v3223_v44, %v3221_v49 }
  0x48   :  { %768 = vst [vmem:[#allocation0 + $0xb38] sm:$0xf] %v5904_v50  ;;  %v5905_v52 = vld [vmem:[%s9710_s0 + $0x598] sm:$0xf]  ;;  %v5906_v53 = vld [vmem:[%s9710_s0 + $0x594] sm:$0xf]  ;;  %3226 = vrot.lane.b32.xlu0 %v3225_v51, %s6518_s10 }
  0x49   :  { %v5907_v54 = vld [vmem:[%s9710_s0 + $0x590] sm:$0xf]  ;;  %773 = vst [vmem:[#allocation0 + $0xb30] sm:$0xf] %v5905_v52  ;;  %778 = vst [vmem:[#allocation0 + $0xb28] sm:$0xf] %v5906_v53 }
  0x4a   :  { %v3234_v55 = vld [vmem:[#allocation0 + $0x903] ss:$8 sm:$0xf0]   ;;  %783 = vst [vmem:[#allocation0 + $0xb20] sm:$0xf] %v5907_v54 }
  0x4b   :  { %v5908_v56 = vld [vmem:[%s9710_s0 + $0x58c] sm:$0xf]  ;;  %v5909_v57 = vld [vmem:[%s9710_s0 + $0x588] sm:$0xf]  ;;  %v5910_v58 = vld [vmem:[%s9710_s0 + $0x584] sm:$0xf] }
  0x4c   :  { %788 = vst [vmem:[#allocation0 + $0xb18] sm:$0xf] %v5908_v56  ;;  %v5911_v59 = vld [vmem:[%s9710_s0 + $0x580] sm:$0xf]  ;;  %793 = vst [vmem:[#allocation0 + $0xb10] sm:$0xf] %v5909_v57 }
  0x4d   :  { %v3232_v60 = vld [vmem:[#allocation0 + $0x903] ss:$8 sm:$0xf]   ;;  %798 = vst [vmem:[#allocation0 + $0xb08] sm:$0xf] %v5910_v58 }
  0x4e   :  { %803 = vst [vmem:[#allocation0 + $0xb00] sm:$0xf] %v5911_v59  ;;  %v5872_v61 = vld [vmem:[%s9710_s0 + $0x61c] sm:$0xf]  ;;  %v3236_v62 = vsel %vm2562_vm0, %v3234_v55, %v3232_v60  ;;  %v5873_v0 = vld [vmem:[%s9710_s0 + $0x618] sm:$0xf] }
  0x4f   :  { %v3245_v63 = vld [vmem:[#allocation0 + $0xa03] ss:$8 sm:$0xf0]   ;;  %608 = vst [vmem:[#allocation0 + $0xc38] sm:$0xf] %v5872_v61  ;;  %3237 = vrot.lane.b32.xlu1 %v3236_v62, %s6518_s10 }
  0x50   :  { %613 = vst [vmem:[#allocation0 + $0xc30] sm:$0xf] %v5873_v0  ;;  %v5874_v1 = vld [vmem:[%s9710_s0 + $0x614] sm:$0xf]  ;;  %v5875_v2 = vld [vmem:[%s9710_s0 + $0x610] sm:$0xf] }
  0x51   :  { %v5876_v3 = vld [vmem:[%s9710_s0 + $0x60c] sm:$0xf]  ;;  %v3243_v4 = vld [vmem:[#allocation0 + $0xa03] ss:$8 sm:$0xf]  }
  0x52   :  { %618 = vst [vmem:[#allocation0 + $0xc28] sm:$0xf] %v5874_v1  ;;  %623 = vst [vmem:[#allocation0 + $0xc20] sm:$0xf] %v5875_v2  ;;  %v5877_v5 = vld [vmem:[%s9710_s0 + $0x608] sm:$0xf]  ;;  %v3247_v6 = vsel %vm2562_vm0, %v3245_v63, %v3243_v4 }
  0x53   :  { %628 = vst [vmem:[#allocation0 + $0xc18] sm:$0xf] %v5876_v3  ;;  %633 = vst [vmem:[#allocation0 + $0xc10] sm:$0xf] %v5877_v5  ;;  %v5878_v7 = vld [vmem:[%s9710_s0 + $0x604] sm:$0xf]  ;;  %3248 = vrot.lane.b32.xlu0 %v3247_v6, %s6518_s10 }
  0x54   :  { %v5879_v8 = vld [vmem:[%s9710_s0 + $0x600] sm:$0xf]  ;;  %v5840_v9 = vld [vmem:[%s9710_s0 + $0x69c] sm:$0xf]  ;;  %638 = vst [vmem:[#allocation0 + $0xc08] sm:$0xf] %v5878_v7 }
  0x55   :  { %v3256_v10 = vld [vmem:[#allocation0 + $0xb03] ss:$8 sm:$0xf0]   ;;  %643 = vst [vmem:[#allocation0 + $0xc00] sm:$0xf] %v5879_v8 }
  0x56   :  { %448 = vst [vmem:[#allocation0 + $0xd38] sm:$0xf] %v5840_v9  ;;  %v5841_v11 = vld [vmem:[%s9710_s0 + $0x698] sm:$0xf]  ;;  %v5842_v12 = vld [vmem:[%s9710_s0 + $0x694] sm:$0xf] }
  0x57   :  { %453 = vst [vmem:[#allocation0 + $0xd30] sm:$0xf] %v5841_v11  ;;  %v5843_v13 = vld [vmem:[%s9710_s0 + $0x690] sm:$0xf]  ;;  %v5844_v14 = vld [vmem:[%s9710_s0 + $0x68c] sm:$0xf] }
  0x58   :  { %v3254_v15 = vld [vmem:[#allocation0 + $0xb03] ss:$8 sm:$0xf]   ;;  %458 = vst [vmem:[#allocation0 + $0xd28] sm:$0xf] %v5842_v12 }
  0x59   :  { %463 = vst [vmem:[#allocation0 + $0xd20] sm:$0xf] %v5843_v13  ;;  %468 = vst [vmem:[#allocation0 + $0xd18] sm:$0xf] %v5844_v14  ;;  %v5845_v16 = vld [vmem:[%s9710_s0 + $0x688] sm:$0xf]  ;;  %v3258_v17 = vsel %vm2562_vm0, %v3256_v10, %v3254_v15 }
  0x5a   :  { %473 = vst [vmem:[#allocation0 + $0xd10] sm:$0xf] %v5845_v16  ;;  %v5846_v18 = vld [vmem:[%s9710_s0 + $0x684] sm:$0xf]  ;;  %v5847_v19 = vld [vmem:[%s9710_s0 + $0x680] sm:$0xf]  ;;  %3259 = vrot.lane.b32.xlu1 %v3258_v17, %s6518_s10 }
  0x5b   :  { %v5808_v20 = vld [vmem:[%s9710_s0 + $0x71c] sm:$0xf]  ;;  %478 = vst [vmem:[#allocation0 + $0xd08] sm:$0xf] %v5846_v18  ;;  %483 = vst [vmem:[#allocation0 + $0xd00] sm:$0xf] %v5847_v19 }
  0x5c   :  { %288 = vst [vmem:[#allocation0 + $0xe38] sm:$0xf] %v5808_v20  ;;  %v5809_v21 = vld [vmem:[%s9710_s0 + $0x718] sm:$0xf]  ;;  %v5810_v22 = vld [vmem:[%s9710_s0 + $0x714] sm:$0xf] }
  0x5d   :  { %v5811_v23 = vld [vmem:[%s9710_s0 + $0x710] sm:$0xf]  ;;  %293 = vst [vmem:[#allocation0 + $0xe30] sm:$0xf] %v5809_v21  ;;  %298 = vst [vmem:[#allocation0 + $0xe28] sm:$0xf] %v5810_v22 }
  0x5e   :  { %v3267_v24 = vld [vmem:[#allocation0 + $0xc03] ss:$8 sm:$0xf0]   ;;  %303 = vst [vmem:[#allocation0 + $0xe20] sm:$0xf] %v5811_v23 }
  0x5f   :  { %v5812_v25 = vld [vmem:[%s9710_s0 + $0x70c] sm:$0xf]  ;;  %v5813_v26 = vld [vmem:[%s9710_s0 + $0x708] sm:$0xf]  ;;  %v5814_v27 = vld [vmem:[%s9710_s0 + $0x704] sm:$0xf] }
  0x60   :  { %308 = vst [vmem:[#allocation0 + $0xe18] sm:$0xf] %v5812_v25  ;;  %v5815_v28 = vld [vmem:[%s9710_s0 + $0x700] sm:$0xf]  ;;  %313 = vst [vmem:[#allocation0 + $0xe10] sm:$0xf] %v5813_v26 }
  0x61   :  { %v3265_v29 = vld [vmem:[#allocation0 + $0xc03] ss:$8 sm:$0xf]   ;;  %318 = vst [vmem:[#allocation0 + $0xe08] sm:$0xf] %v5814_v27 }
  0x62   :  { %323 = vst [vmem:[#allocation0 + $0xe00] sm:$0xf] %v5815_v28  ;;  %v5776_v30 = vld [vmem:[%s9710_s0 + $0x79c] sm:$0xf]  ;;  %v3269_v31 = vsel %vm2562_vm0, %v3267_v24, %v3265_v29  ;;  %v5777_v32 = vld [vmem:[%s9710_s0 + $0x798] sm:$0xf] }
  0x63   :  { %128 = vst [vmem:[#allocation0 + $0xf38] sm:$0xf] %v5776_v30  ;;  %v5778_v33 = vld [vmem:[%s9710_s0 + $0x794] sm:$0xf]  ;;  %v5779_v34 = vld [vmem:[%s9710_s0 + $0x790] sm:$0xf]  ;;  %3270 = vrot.lane.b32.xlu0 %v3269_v31, %s6518_s10 }
  0x64   :  { %v3278_v35 = vld [vmem:[#allocation0 + $0xd03] ss:$8 sm:$0xf0]   ;;  %133 = vst [vmem:[#allocation0 + $0xf30] sm:$0xf] %v5777_v32 }
  0x65   :  { %138 = vst [vmem:[#allocation0 + $0xf28] sm:$0xf] %v5778_v33  ;;  %143 = vst [vmem:[#allocation0 + $0xf20] sm:$0xf] %v5779_v34  ;;  %v5780_v36 = vld [vmem:[%s9710_s0 + $0x78c] sm:$0xf] }
  0x66   :  { %148 = vst [vmem:[#allocation0 + $0xf18] sm:$0xf] %v5780_v36  ;;  %v5781_v37 = vld [vmem:[%s9710_s0 + $0x788] sm:$0xf]  ;;  %v5782_v38 = vld [vmem:[%s9710_s0 + $0x784] sm:$0xf] }
  0x67   :  { %v5783_v39 = vld [vmem:[%s9710_s0 + $0x780] sm:$0xf]  ;;  %153 = vst [vmem:[#allocation0 + $0xf10] sm:$0xf] %v5781_v37  ;;  %158 = vst [vmem:[#allocation0 + $0xf08] sm:$0xf] %v5782_v38 }
  0x68   :  { %v3276_v40 = vld [vmem:[#allocation0 + $0xd03] ss:$8 sm:$0xf]   ;;  %163 = vst [vmem:[#allocation0 + $0xf00] sm:$0xf] %v5783_v39 }
  0x69   :  { %v6248_v41 = vld [vmem:[%s9710_s0 + $0x3c] sm:$0xf]  ;;  %v3280_v42 = vsel %vm2562_vm0, %v3278_v35, %v3276_v40  ;;  %v3289_v43 = vld [vmem:[#allocation0 + $0xe03] ss:$8 sm:$0xf0]  }
  0x6a   :  { %2488 = vst [vmem:[#allocation0 + $0x78] sm:$0xf] %v6248_v41  ;;  %v6249_v44 = vld [vmem:[%s9710_s0 + $0x38] sm:$0xf]  ;;  %3281 = vrot.lane.b32.xlu1 %v3280_v42, %s6518_s10  ;;  %v6250_v45 = vld [vmem:[%s9710_s0 + $0x34] sm:$0xf] }
  0x6b   :  { %2493 = vst [vmem:[#allocation0 + $0x70] sm:$0xf] %v6249_v44  ;;  %v6251_v46 = vld [vmem:[%s9710_s0 + $0x30] sm:$0xf]  ;;  %v6252_v47 = vld [vmem:[%s9710_s0 + $0x2c] sm:$0xf] }
  0x6c   :  { %v3287_v48 = vld [vmem:[#allocation0 + $0xe03] ss:$8 sm:$0xf]   ;;  %2498 = vst [vmem:[#allocation0 + $0x68] sm:$0xf] %v6250_v45 }
  0x6d   :  { %2503 = vst [vmem:[#allocation0 + $0x60] sm:$0xf] %v6251_v46  ;;  %2508 = vst [vmem:[#allocation0 + $0x58] sm:$0xf] %v6252_v47  ;;  %v6253_v49 = vld [vmem:[%s9710_s0 + $0x28] sm:$0xf]  ;;  %v3291_v50 = vsel %vm2562_vm0, %v3289_v43, %v3287_v48 }
  0x6e   :  { %2513 = vst [vmem:[#allocation0 + $0x50] sm:$0xf] %v6253_v49  ;;  %v6254_v51 = vld [vmem:[%s9710_s0 + $0x24] sm:$0xf]  ;;  %v6255_v52 = vld [vmem:[%s9710_s0 + $0x20] sm:$0xf]  ;;  %3292 = vrot.lane.b32.xlu0 %v3291_v50, %s6518_s10 }
  0x6f   :  { %v6216_v53 = vld [vmem:[%s9710_s0 + $0xbc] sm:$0xf]  ;;  %v3300_v54 = vld [vmem:[#allocation0 + $0xf03] ss:$8 sm:$0xf0]  }
  0x70   :  { %2518 = vst [vmem:[#allocation0 + $0x48] sm:$0xf] %v6254_v51  ;;  %2523 = vst [vmem:[#allocation0 + $0x40] sm:$0xf] %v6255_v52  ;;  %v6217_v55 = vld [vmem:[%s9710_s0 + $0xb8] sm:$0xf] }
  0x71   :  { %2328 = vst [vmem:[#allocation0 + $0x178] sm:$0xf] %v6216_v53  ;;  %2333 = vst [vmem:[#allocation0 + $0x170] sm:$0xf] %v6217_v55  ;;  %v6218_v56 = vld [vmem:[%s9710_s0 + $0xb4] sm:$0xf] }
  0x72   :  { %v6219_v57 = vld [vmem:[%s9710_s0 + $0xb0] sm:$0xf]  ;;  %v6220_v58 = vld [vmem:[%s9710_s0 + $0xac] sm:$0xf]  ;;  %2338 = vst [vmem:[#allocation0 + $0x168] sm:$0xf] %v6218_v56 }
  0x73   :  { %v3298_v59 = vld [vmem:[#allocation0 + $0xf03] ss:$8 sm:$0xf]   ;;  %2343 = vst [vmem:[#allocation0 + $0x160] sm:$0xf] %v6219_v57 }
  0x74   :  { %2348 = vst [vmem:[#allocation0 + $0x158] sm:$0xf] %v6220_v58  ;;  %v6221_v60 = vld [vmem:[%s9710_s0 + $0xa8] sm:$0xf]  ;;  %v3302_v61 = vsel %vm2562_vm0, %v3300_v54, %v3298_v59  ;;  %v6222_v62 = vld [vmem:[%s9710_s0 + $0xa4] sm:$0xf] }
  0x75   :  { %2353 = vst [vmem:[#allocation0 + $0x150] sm:$0xf] %v6221_v60  ;;  %v6223_v63 = vld [vmem:[%s9710_s0 + $0xa0] sm:$0xf]  ;;  %v6184_v0 = vld [vmem:[%s9710_s0 + $0x13c] sm:$0xf]  ;;  %3303 = vrot.lane.b32.xlu1 %v3302_v61, %s6518_s10 }
  0x76   :  { %2358 = vst [vmem:[#allocation0 + $0x148] sm:$0xf] %v6222_v62  ;;  %2363 = vst [vmem:[#allocation0 + $0x140] sm:$0xf] %v6223_v63  ;;  %v6185_v1 = vld [vmem:[%s9710_s0 + $0x138] sm:$0xf] }
  0x77   :  { %2168 = vst [vmem:[#allocation0 + $0x278] sm:$0xf] %v6184_v0  ;;  %v6186_v2 = vld [vmem:[%s9710_s0 + $0x134] sm:$0xf]  ;;  %v6187_v3 = vld [vmem:[%s9710_s0 + $0x130] sm:$0xf] }
  0x78   :  { %v3311_v4 = vld [vmem:[#allocation0 + $0x43] ss:$8 sm:$0xf0]   ;;  %2173 = vst [vmem:[#allocation0 + $0x270] sm:$0xf] %v6185_v1 }
  0x79   :  { %2178 = vst [vmem:[#allocation0 + $0x268] sm:$0xf] %v6186_v2  ;;  %2183 = vst [vmem:[#allocation0 + $0x260] sm:$0xf] %v6187_v3  ;;  %v6188_v5 = vld [vmem:[%s9710_s0 + $0x12c] sm:$0xf] }
  0x7a   :  { %2188 = vst [vmem:[#allocation0 + $0x258] sm:$0xf] %v6188_v5  ;;  %v6189_v6 = vld [vmem:[%s9710_s0 + $0x128] sm:$0xf]  ;;  %v6190_v7 = vld [vmem:[%s9710_s0 + $0x124] sm:$0xf] }
  0x7b   :  { %v6191_v8 = vld [vmem:[%s9710_s0 + $0x120] sm:$0xf]  ;;  %2193 = vst [vmem:[#allocation0 + $0x250] sm:$0xf] %v6189_v6  ;;  %2198 = vst [vmem:[#allocation0 + $0x248] sm:$0xf] %v6190_v7 }
  0x7c   :  { %v3309_v9 = vld [vmem:[#allocation0 + $0x43] ss:$8 sm:$0xf]   ;;  %2203 = vst [vmem:[#allocation0 + $0x240] sm:$0xf] %v6191_v8 }
  0x7d   :  { %v6152_v10 = vld [vmem:[%s9710_s0 + $0x1bc] sm:$0xf]  ;;  %v3313_v11 = vsel %vm2562_vm0, %v3311_v4, %v3309_v9  ;;  %v6153_v12 = vld [vmem:[%s9710_s0 + $0x1b8] sm:$0xf]  ;;  %v6154_v13 = vld [vmem:[%s9710_s0 + $0x1b4] sm:$0xf] }
  0x7e   :  { %2008 = vst [vmem:[#allocation0 + $0x378] sm:$0xf] %v6152_v10  ;;  %v6155_v14 = vld [vmem:[%s9710_s0 + $0x1b0] sm:$0xf]  ;;  %3314 = vrot.lane.b32.xlu0 %v3313_v11, %s6518_s10  ;;  %2013 = vst [vmem:[#allocation0 + $0x370] sm:$0xf] %v6153_v12 }
  0x7f   :  { %v3322_v15 = vld [vmem:[#allocation0 + $0x143] ss:$8 sm:$0xf0]   ;;  %2018 = vst [vmem:[#allocation0 + $0x368] sm:$0xf] %v6154_v13 }
  0x80   :  { %2023 = vst [vmem:[#allocation0 + $0x360] sm:$0xf] %v6155_v14  ;;  %v6156_v16 = vld [vmem:[%s9710_s0 + $0x1ac] sm:$0xf]  ;;  %v6157_v17 = vld [vmem:[%s9710_s0 + $0x1a8] sm:$0xf] }
  0x81   :  { %2028 = vst [vmem:[#allocation0 + $0x358] sm:$0xf] %v6156_v16  ;;  %v6158_v18 = vld [vmem:[%s9710_s0 + $0x1a4] sm:$0xf]  ;;  %v6159_v19 = vld [vmem:[%s9710_s0 + $0x1a0] sm:$0xf] }
  0x82   :  { %v3320_v20 = vld [vmem:[#allocation0 + $0x143] ss:$8 sm:$0xf]   ;;  %2033 = vst [vmem:[#allocation0 + $0x350] sm:$0xf] %v6157_v17 }
  0x83   :  { %2038 = vst [vmem:[#allocation0 + $0x348] sm:$0xf] %v6158_v18  ;;  %2043 = vst [vmem:[#allocation0 + $0x340] sm:$0xf] %v6159_v19  ;;  %v6120_v21 = vld [vmem:[%s9710_s0 + $0x23c] sm:$0xf]  ;;  %v3324_v22 = vsel %vm2562_vm0, %v3322_v15, %v3320_v20 }
  0x84   :  { %v3333_v23 = vld [vmem:[#allocation0 + $0x243] ss:$8 sm:$0xf0]   ;;  %1848 = vst [vmem:[#allocation0 + $0x478] sm:$0xf] %v6120_v21  ;;  %3325 = vrot.lane.b32.xlu1 %v3324_v22, %s6518_s10 }
  0x85   :  { %v6121_v24 = vld [vmem:[%s9710_s0 + $0x238] sm:$0xf]  ;;  %v6122_v25 = vld [vmem:[%s9710_s0 + $0x234] sm:$0xf]  ;;  %v6123_v26 = vld [vmem:[%s9710_s0 + $0x230] sm:$0xf] }
  0x86   :  { %1853 = vst [vmem:[#allocation0 + $0x470] sm:$0xf] %v6121_v24  ;;  %v6124_v27 = vld [vmem:[%s9710_s0 + $0x22c] sm:$0xf]  ;;  %1858 = vst [vmem:[#allocation0 + $0x468] sm:$0xf] %v6122_v25 }
  0x87   :  { %v3331_v28 = vld [vmem:[#allocation0 + $0x243] ss:$8 sm:$0xf]   ;;  %1863 = vst [vmem:[#allocation0 + $0x460] sm:$0xf] %v6123_v26 }
  0x88   :  { %1868 = vst [vmem:[#allocation0 + $0x458] sm:$0xf] %v6124_v27  ;;  %v6125_v29 = vld [vmem:[%s9710_s0 + $0x228] sm:$0xf]  ;;  %v3335_v30 = vsel %vm2562_vm0, %v3333_v23, %v3331_v28  ;;  %v6126_v31 = vld [vmem:[%s9710_s0 + $0x224] sm:$0xf] }
  0x89   :  { %1873 = vst [vmem:[#allocation0 + $0x450] sm:$0xf] %v6125_v29  ;;  %v6127_v32 = vld [vmem:[%s9710_s0 + $0x220] sm:$0xf]  ;;  %v6088_v33 = vld [vmem:[%s9710_s0 + $0x2bc] sm:$0xf]  ;;  %3336 = vrot.lane.b32.xlu0 %v3335_v30, %s6518_s10 }
  0x8a   :  { %v3344_v34 = vld [vmem:[#allocation0 + $0x343] ss:$8 sm:$0xf0]   ;;  %1878 = vst [vmem:[#allocation0 + $0x448] sm:$0xf] %v6126_v31 }
  0x8b   :  { %1883 = vst [vmem:[#allocation0 + $0x440] sm:$0xf] %v6127_v32  ;;  %1688 = vst [vmem:[#allocation0 + $0x578] sm:$0xf] %v6088_v33  ;;  %v6089_v35 = vld [vmem:[%s9710_s0 + $0x2b8] sm:$0xf] }
  0x8c   :  { %1693 = vst [vmem:[#allocation0 + $0x570] sm:$0xf] %v6089_v35  ;;  %v6090_v36 = vld [vmem:[%s9710_s0 + $0x2b4] sm:$0xf]  ;;  %v6091_v37 = vld [vmem:[%s9710_s0 + $0x2b0] sm:$0xf] }
  0x8d   :  { %v6092_v38 = vld [vmem:[%s9710_s0 + $0x2ac] sm:$0xf]  ;;  %v3342_v39 = vld [vmem:[#allocation0 + $0x343] ss:$8 sm:$0xf]  }
  0x8e   :  { %1698 = vst [vmem:[#allocation0 + $0x568] sm:$0xf] %v6090_v36  ;;  %1703 = vst [vmem:[#allocation0 + $0x560] sm:$0xf] %v6091_v37  ;;  %v6093_v40 = vld [vmem:[%s9710_s0 + $0x2a8] sm:$0xf]  ;;  %v3346_v41 = vsel %vm2562_vm0, %v3344_v34, %v3342_v39 }
  0x8f   :  { %1708 = vst [vmem:[#allocation0 + $0x558] sm:$0xf] %v6092_v38  ;;  %1713 = vst [vmem:[#allocation0 + $0x550] sm:$0xf] %v6093_v40  ;;  %v6094_v42 = vld [vmem:[%s9710_s0 + $0x2a4] sm:$0xf]  ;;  %3347 = vrot.lane.b32.xlu1 %v3346_v41, %s6518_s10 }
  0x90   :  { %v6095_v43 = vld [vmem:[%s9710_s0 + $0x2a0] sm:$0xf]  ;;  %v6056_v44 = vld [vmem:[%s9710_s0 + $0x33c] sm:$0xf]  ;;  %1718 = vst [vmem:[#allocation0 + $0x548] sm:$0xf] %v6094_v42 }
  0x91   :  { %1723 = vst [vmem:[#allocation0 + $0x540] sm:$0xf] %v6095_v43  ;;  %1528 = vst [vmem:[#allocation0 + $0x678] sm:$0xf] %v6056_v44  ;;  %v6057_v45 = vld [vmem:[%s9710_s0 + $0x338] sm:$0xf] }
  0x92   :  { %v6058_v46 = vld [vmem:[%s9710_s0 + $0x334] sm:$0xf]  ;;  %v6059_v47 = vld [vmem:[%s9710_s0 + $0x330] sm:$0xf]  ;;  %1533 = vst [vmem:[#allocation0 + $0x670] sm:$0xf] %v6057_v45 }
  0x93   :  { %v3355_v48 = vld [vmem:[#allocation0 + $0x443] ss:$8 sm:$0xf0]   ;;  %1538 = vst [vmem:[#allocation0 + $0x668] sm:$0xf] %v6058_v46 }
  0x94   :  { %1543 = vst [vmem:[#allocation0 + $0x660] sm:$0xf] %v6059_v47  ;;  %v6060_v49 = vld [vmem:[%s9710_s0 + $0x32c] sm:$0xf]  ;;  %v6061_v50 = vld [vmem:[%s9710_s0 + $0x328] sm:$0xf] }
  0x95   :  { %1548 = vst [vmem:[#allocation0 + $0x658] sm:$0xf] %v6060_v49  ;;  %v6062_v51 = vld [vmem:[%s9710_s0 + $0x324] sm:$0xf]  ;;  %v6063_v52 = vld [vmem:[%s9710_s0 + $0x320] sm:$0xf] }
  0x96   :  { %v3353_v53 = vld [vmem:[#allocation0 + $0x443] ss:$8 sm:$0xf]   ;;  %1553 = vst [vmem:[#allocation0 + $0x650] sm:$0xf] %v6061_v50 }
  0x97   :  { %1558 = vst [vmem:[#allocation0 + $0x648] sm:$0xf] %v6062_v51  ;;  %1563 = vst [vmem:[#allocation0 + $0x640] sm:$0xf] %v6063_v52  ;;  %v6024_v54 = vld [vmem:[%s9710_s0 + $0x3bc] sm:$0xf]  ;;  %v3357_v55 = vsel %vm2562_vm0, %v3355_v48, %v3353_v53 }
  0x98   :  { %1368 = vst [vmem:[#allocation0 + $0x778] sm:$0xf] %v6024_v54  ;;  %v6025_v56 = vld [vmem:[%s9710_s0 + $0x3b8] sm:$0xf]  ;;  %v6026_v57 = vld [vmem:[%s9710_s0 + $0x3b4] sm:$0xf]  ;;  %3358 = vrot.lane.b32.xlu0 %v3357_v55, %s6518_s10 }
  0x99   :  { %v6027_v58 = vld [vmem:[%s9710_s0 + $0x3b0] sm:$0xf]  ;;  %1373 = vst [vmem:[#allocation0 + $0x770] sm:$0xf] %v6025_v56  ;;  %1378 = vst [vmem:[#allocation0 + $0x768] sm:$0xf] %v6026_v57 }
  0x9a   :  { %v3366_v59 = vld [vmem:[#allocation0 + $0x543] ss:$8 sm:$0xf0]   ;;  %1383 = vst [vmem:[#allocation0 + $0x760] sm:$0xf] %v6027_v58 }
  0x9b   :  { %v6028_v60 = vld [vmem:[%s9710_s0 + $0x3ac] sm:$0xf]  ;;  %v6029_v61 = vld [vmem:[%s9710_s0 + $0x3a8] sm:$0xf]  ;;  %v6030_v62 = vld [vmem:[%s9710_s0 + $0x3a4] sm:$0xf] }
  0x9c   :  { %1388 = vst [vmem:[#allocation0 + $0x758] sm:$0xf] %v6028_v60  ;;  %v6031_v63 = vld [vmem:[%s9710_s0 + $0x3a0] sm:$0xf]  ;;  %1393 = vst [vmem:[#allocation0 + $0x750] sm:$0xf] %v6029_v61 }
  0x9d   :  { %v3364_v0 = vld [vmem:[#allocation0 + $0x543] ss:$8 sm:$0xf]   ;;  %1398 = vst [vmem:[#allocation0 + $0x748] sm:$0xf] %v6030_v62 }
  0x9e   :  { %1403 = vst [vmem:[#allocation0 + $0x740] sm:$0xf] %v6031_v63  ;;  %v5992_v1 = vld [vmem:[%s9710_s0 + $0x43c] sm:$0xf]  ;;  %v3368_v2 = vsel %vm2562_vm0, %v3366_v59, %v3364_v0  ;;  %v5993_v4 = vld [vmem:[%s9710_s0 + $0x438] sm:$0xf] }
  0x9f   :  { %v3377_v3 = vld [vmem:[#allocation0 + $0x643] ss:$8 sm:$0xf0]   ;;  %1208 = vst [vmem:[#allocation0 + $0x878] sm:$0xf] %v5992_v1  ;;  %3369 = vrot.lane.b32.xlu1 %v3368_v2, %s6518_s10 }
  0xa0   :  { %1213 = vst [vmem:[#allocation0 + $0x870] sm:$0xf] %v5993_v4  ;;  %v5994_v5 = vld [vmem:[%s9710_s0 + $0x434] sm:$0xf]  ;;  %v5995_v6 = vld [vmem:[%s9710_s0 + $0x430] sm:$0xf] }
  0xa1   :  { %v5996_v7 = vld [vmem:[%s9710_s0 + $0x42c] sm:$0xf]  ;;  %v3375_v8 = vld [vmem:[#allocation0 + $0x643] ss:$8 sm:$0xf]  }
  0xa2   :  { %1218 = vst [vmem:[#allocation0 + $0x868] sm:$0xf] %v5994_v5  ;;  %1223 = vst [vmem:[#allocation0 + $0x860] sm:$0xf] %v5995_v6  ;;  %v5997_v9 = vld [vmem:[%s9710_s0 + $0x428] sm:$0xf]  ;;  %v3379_v10 = vsel %vm2562_vm0, %v3377_v3, %v3375_v8 }
  0xa3   :  { %1228 = vst [vmem:[#allocation0 + $0x858] sm:$0xf] %v5996_v7  ;;  %1233 = vst [vmem:[#allocation0 + $0x850] sm:$0xf] %v5997_v9  ;;  %v5998_v11 = vld [vmem:[%s9710_s0 + $0x424] sm:$0xf]  ;;  %3380 = vrot.lane.b32.xlu0 %v3379_v10, %s6518_s10 }
  0xa4   :  { %v5999_v12 = vld [vmem:[%s9710_s0 + $0x420] sm:$0xf]  ;;  %v5960_v13 = vld [vmem:[%s9710_s0 + $0x4bc] sm:$0xf]  ;;  %1238 = vst [vmem:[#allocation0 + $0x848] sm:$0xf] %v5998_v11 }
  0xa5   :  { %v3388_v14 = vld [vmem:[#allocation0 + $0x743] ss:$8 sm:$0xf0]   ;;  %1243 = vst [vmem:[#allocation0 + $0x840] sm:$0xf] %v5999_v12 }
  0xa6   :  { %1048 = vst [vmem:[#allocation0 + $0x978] sm:$0xf] %v5960_v13  ;;  %v5961_v15 = vld [vmem:[%s9710_s0 + $0x4b8] sm:$0xf]  ;;  %v5962_v16 = vld [vmem:[%s9710_s0 + $0x4b4] sm:$0xf] }
  0xa7   :  { %1053 = vst [vmem:[#allocation0 + $0x970] sm:$0xf] %v5961_v15  ;;  %v5963_v17 = vld [vmem:[%s9710_s0 + $0x4b0] sm:$0xf]  ;;  %v5964_v18 = vld [vmem:[%s9710_s0 + $0x4ac] sm:$0xf] }
  0xa8   :  { %v3386_v19 = vld [vmem:[#allocation0 + $0x743] ss:$8 sm:$0xf]   ;;  %1058 = vst [vmem:[#allocation0 + $0x968] sm:$0xf] %v5962_v16 }
  0xa9   :  { %1063 = vst [vmem:[#allocation0 + $0x960] sm:$0xf] %v5963_v17  ;;  %1068 = vst [vmem:[#allocation0 + $0x958] sm:$0xf] %v5964_v18  ;;  %v5965_v20 = vld [vmem:[%s9710_s0 + $0x4a8] sm:$0xf]  ;;  %v3390_v21 = vsel %vm2562_vm0, %v3388_v14, %v3386_v19 }
  0xaa   :  { %1073 = vst [vmem:[#allocation0 + $0x950] sm:$0xf] %v5965_v20  ;;  %v5966_v22 = vld [vmem:[%s9710_s0 + $0x4a4] sm:$0xf]  ;;  %v5967_v23 = vld [vmem:[%s9710_s0 + $0x4a0] sm:$0xf]  ;;  %3391 = vrot.lane.b32.xlu1 %v3390_v21, %s6518_s10 }
  0xab   :  { %v5928_v24 = vld [vmem:[%s9710_s0 + $0x53c] sm:$0xf]  ;;  %1078 = vst [vmem:[#allocation0 + $0x948] sm:$0xf] %v5966_v22  ;;  %1083 = vst [vmem:[#allocation0 + $0x940] sm:$0xf] %v5967_v23 }
  0xac   :  { %888 = vst [vmem:[#allocation0 + $0xa78] sm:$0xf] %v5928_v24  ;;  %v5929_v25 = vld [vmem:[%s9710_s0 + $0x538] sm:$0xf]  ;;  %v5930_v26 = vld [vmem:[%s9710_s0 + $0x534] sm:$0xf] }
  0xad   :  { %v5931_v27 = vld [vmem:[%s9710_s0 + $0x530] sm:$0xf]  ;;  %893 = vst [vmem:[#allocation0 + $0xa70] sm:$0xf] %v5929_v25  ;;  %898 = vst [vmem:[#allocation0 + $0xa68] sm:$0xf] %v5930_v26 }
  0xae   :  { %v3399_v28 = vld [vmem:[#allocation0 + $0x843] ss:$8 sm:$0xf0]   ;;  %903 = vst [vmem:[#allocation0 + $0xa60] sm:$0xf] %v5931_v27 }
  0xaf   :  { %v5932_v29 = vld [vmem:[%s9710_s0 + $0x52c] sm:$0xf]  ;;  %v5933_v30 = vld [vmem:[%s9710_s0 + $0x528] sm:$0xf]  ;;  %v5934_v31 = vld [vmem:[%s9710_s0 + $0x524] sm:$0xf] }
  0xb0   :  { %908 = vst [vmem:[#allocation0 + $0xa58] sm:$0xf] %v5932_v29  ;;  %v5935_v32 = vld [vmem:[%s9710_s0 + $0x520] sm:$0xf]  ;;  %913 = vst [vmem:[#allocation0 + $0xa50] sm:$0xf] %v5933_v30  ;;  %v7364_v29 = vpop.permute.xlu0 %3139  }
  0xb1   :  { %v3397_v33 = vld [vmem:[#allocation0 + $0x843] ss:$8 sm:$0xf]   ;;  %918 = vst [vmem:[#allocation0 + $0xa48] sm:$0xf] %v5934_v31 }
  0xb2   :  { %923 = vst [vmem:[#allocation0 + $0xa40] sm:$0xf] %v5935_v32  ;;  %v5896_v34 = vld [vmem:[%s9710_s0 + $0x5bc] sm:$0xf]  ;;  %v3401_v35 = vsel %vm2562_vm0, %v3399_v28, %v3397_v33  ;;  %v5897_v36 = vld [vmem:[%s9710_s0 + $0x5b8] sm:$0xf] }
  0xb3   :  { %728 = vst [vmem:[#allocation0 + $0xb78] sm:$0xf] %v5896_v34  ;;  %v5898_v37 = vld [vmem:[%s9710_s0 + $0x5b4] sm:$0xf]  ;;  %v5899_v38 = vld [vmem:[%s9710_s0 + $0x5b0] sm:$0xf]  ;;  %3402 = vrot.lane.b32.xlu0 %v3401_v35, %s6518_s10 }
  0xb4   :  { %v3410_v39 = vld [vmem:[#allocation0 + $0x943] ss:$8 sm:$0xf0]   ;;  %733 = vst [vmem:[#allocation0 + $0xb70] sm:$0xf] %v5897_v36 }
  0xb5   :  { %738 = vst [vmem:[#allocation0 + $0xb68] sm:$0xf] %v5898_v37  ;;  %743 = vst [vmem:[#allocation0 + $0xb60] sm:$0xf] %v5899_v38  ;;  %v5900_v40 = vld [vmem:[%s9710_s0 + $0x5ac] sm:$0xf] }
  0xb6   :  { %748 = vst [vmem:[#allocation0 + $0xb58] sm:$0xf] %v5900_v40  ;;  %v5901_v41 = vld [vmem:[%s9710_s0 + $0x5a8] sm:$0xf]  ;;  %v5902_v42 = vld [vmem:[%s9710_s0 + $0x5a4] sm:$0xf] }
  0xb7   :  { %v5903_v43 = vld [vmem:[%s9710_s0 + $0x5a0] sm:$0xf]  ;;  %753 = vst [vmem:[#allocation0 + $0xb50] sm:$0xf] %v5901_v41  ;;  %758 = vst [vmem:[#allocation0 + $0xb48] sm:$0xf] %v5902_v42 }
  0xb8   :  { %v3408_v44 = vld [vmem:[#allocation0 + $0x943] ss:$8 sm:$0xf]   ;;  %763 = vst [vmem:[#allocation0 + $0xb40] sm:$0xf] %v5903_v43 }
  0xb9   :  { %v5864_v45 = vld [vmem:[%s9710_s0 + $0x63c] sm:$0xf]  ;;  %v3412_v46 = vsel %vm2562_vm0, %v3410_v39, %v3408_v44  ;;  %v3421_v47 = vld [vmem:[#allocation0 + $0xa43] ss:$8 sm:$0xf0]   ;;  %v7389_v39 = vpop.permute.xlu1 %3160  }
  0xba   :  { %568 = vst [vmem:[#allocation0 + $0xc78] sm:$0xf] %v5864_v45  ;;  %v5865_v48 = vld [vmem:[%s9710_s0 + $0x638] sm:$0xf]  ;;  %3413 = vrot.lane.b32.xlu1 %v3412_v46, %s6518_s10  ;;  %v5866_v49 = vld [vmem:[%s9710_s0 + $0x634] sm:$0xf] }
  0xbb   :  { %573 = vst [vmem:[#allocation0 + $0xc70] sm:$0xf] %v5865_v48  ;;  %v5867_v50 = vld [vmem:[%s9710_s0 + $0x630] sm:$0xf]  ;;  %v5868_v51 = vld [vmem:[%s9710_s0 + $0x62c] sm:$0xf] }
  0xbc   :  { %v3419_v52 = vld [vmem:[#allocation0 + $0xa43] ss:$8 sm:$0xf]   ;;  %578 = vst [vmem:[#allocation0 + $0xc68] sm:$0xf] %v5866_v49 }
  0xbd   :  { %583 = vst [vmem:[#allocation0 + $0xc60] sm:$0xf] %v5867_v50  ;;  %588 = vst [vmem:[#allocation0 + $0xc58] sm:$0xf] %v5868_v51  ;;  %v5869_v53 = vld [vmem:[%s9710_s0 + $0x628] sm:$0xf]  ;;  %v3423_v54 = vsel %vm2562_vm0, %v3421_v47, %v3419_v52  ;;  %v7407_v47 = vpop.permute.xlu0 %3149  }
  0xbe   :  { %593 = vst [vmem:[#allocation0 + $0xc50] sm:$0xf] %v5869_v53  ;;  %v5870_v55 = vld [vmem:[%s9710_s0 + $0x624] sm:$0xf]  ;;  %v5871_v56 = vld [vmem:[%s9710_s0 + $0x620] sm:$0xf]  ;;  %3424 = vrot.lane.b32.xlu0 %v3423_v54, %s6518_s10 }
  0xbf   :  { %v5832_v57 = vld [vmem:[%s9710_s0 + $0x6bc] sm:$0xf]  ;;  %v3432_v58 = vld [vmem:[#allocation0 + $0xb43] ss:$8 sm:$0xf0]  }
  0xc0   :  { %598 = vst [vmem:[#allocation0 + $0xc48] sm:$0xf] %v5870_v55  ;;  %603 = vst [vmem:[#allocation0 + $0xc40] sm:$0xf] %v5871_v56  ;;  %v5833_v59 = vld [vmem:[%s9710_s0 + $0x6b8] sm:$0xf] }
  0xc1   :  { %408 = vst [vmem:[#allocation0 + $0xd78] sm:$0xf] %v5832_v57  ;;  %413 = vst [vmem:[#allocation0 + $0xd70] sm:$0xf] %v5833_v59  ;;  %v5834_v60 = vld [vmem:[%s9710_s0 + $0x6b4] sm:$0xf] }
  0xc2   :  { %v5835_v61 = vld [vmem:[%s9710_s0 + $0x6b0] sm:$0xf]  ;;  %v5836_v62 = vld [vmem:[%s9710_s0 + $0x6ac] sm:$0xf]  ;;  %418 = vst [vmem:[#allocation0 + $0xd68] sm:$0xf] %v5834_v60  ;;  %v7441_v60 = vpop.permute.xlu1 %3171  }
  0xc3   :  { %v3430_v63 = vld [vmem:[#allocation0 + $0xb43] ss:$8 sm:$0xf]   ;;  %423 = vst [vmem:[#allocation0 + $0xd60] sm:$0xf] %v5835_v61 }
  0xc4   :  { %428 = vst [vmem:[#allocation0 + $0xd58] sm:$0xf] %v5836_v62  ;;  %v5837_v0 = vld [vmem:[%s9710_s0 + $0x6a8] sm:$0xf]  ;;  %v3434_v1 = vsel %vm2562_vm0, %v3432_v58, %v3430_v63  ;;  %v5838_v2 = vld [vmem:[%s9710_s0 + $0x6a4] sm:$0xf] }
  0xc5   :  { %433 = vst [vmem:[#allocation0 + $0xd50] sm:$0xf] %v5837_v0  ;;  %v5839_v3 = vld [vmem:[%s9710_s0 + $0x6a0] sm:$0xf]  ;;  %v5800_v4 = vld [vmem:[%s9710_s0 + $0x73c] sm:$0xf]  ;;  %3435 = vrot.lane.b32.xlu1 %v3434_v1, %s6518_s10 }
  0xc6   :  { %438 = vst [vmem:[#allocation0 + $0xd48] sm:$0xf] %v5838_v2  ;;  %443 = vst [vmem:[#allocation0 + $0xd40] sm:$0xf] %v5839_v3  ;;  %v5801_v5 = vld [vmem:[%s9710_s0 + $0x738] sm:$0xf] }
  0xc7   :  { %248 = vst [vmem:[#allocation0 + $0xe78] sm:$0xf] %v5800_v4  ;;  %v5802_v6 = vld [vmem:[%s9710_s0 + $0x734] sm:$0xf]  ;;  %v5803_v7 = vld [vmem:[%s9710_s0 + $0x730] sm:$0xf] }
  0xc8   :  { %v3443_v8 = vld [vmem:[#allocation0 + $0xc43] ss:$8 sm:$0xf0]   ;;  %253 = vst [vmem:[#allocation0 + $0xe70] sm:$0xf] %v5801_v5 }
  0xc9   :  { %258 = vst [vmem:[#allocation0 + $0xe68] sm:$0xf] %v5802_v6  ;;  %263 = vst [vmem:[#allocation0 + $0xe60] sm:$0xf] %v5803_v7  ;;  %v5804_v9 = vld [vmem:[%s9710_s0 + $0x72c] sm:$0xf] }
  0xca   :  { %268 = vst [vmem:[#allocation0 + $0xe58] sm:$0xf] %v5804_v9  ;;  %v5805_v10 = vld [vmem:[%s9710_s0 + $0x728] sm:$0xf]  ;;  %v5806_v11 = vld [vmem:[%s9710_s0 + $0x724] sm:$0xf] }
  0xcb   :  { %v5807_v12 = vld [vmem:[%s9710_s0 + $0x720] sm:$0xf]  ;;  %273 = vst [vmem:[#allocation0 + $0xe50] sm:$0xf] %v5805_v10  ;;  %278 = vst [vmem:[#allocation0 + $0xe48] sm:$0xf] %v5806_v11  ;;  %v7472_v10 = vpop.permute.xlu0 %3182  }
  0xcc   :  { %v3441_v13 = vld [vmem:[#allocation0 + $0xc43] ss:$8 sm:$0xf]   ;;  %283 = vst [vmem:[#allocation0 + $0xe40] sm:$0xf] %v5807_v12 }
  0xcd   :  { %v5768_v14 = vld [vmem:[%s9710_s0 + $0x7bc] sm:$0xf]  ;;  %v3445_v15 = vsel %vm2562_vm0, %v3443_v8, %v3441_v13  ;;  %v5769_v16 = vld [vmem:[%s9710_s0 + $0x7b8] sm:$0xf]  ;;  %v5770_v17 = vld [vmem:[%s9710_s0 + $0x7b4] sm:$0xf] }
  0xce   :  { %88 = vst [vmem:[#allocation0 + $0xf78] sm:$0xf] %v5768_v14  ;;  %v5771_v18 = vld [vmem:[%s9710_s0 + $0x7b0] sm:$0xf]  ;;  %3446 = vrot.lane.b32.xlu0 %v3445_v15, %s6518_s10  ;;  %93 = vst [vmem:[#allocation0 + $0xf70] sm:$0xf] %v5769_v16 }
  0xcf   :  { %v3454_v19 = vld [vmem:[#allocation0 + $0xd43] ss:$8 sm:$0xf0]   ;;  %98 = vst [vmem:[#allocation0 + $0xf68] sm:$0xf] %v5770_v17 }
  0xd0   :  { %103 = vst [vmem:[#allocation0 + $0xf60] sm:$0xf] %v5771_v18  ;;  %v5772_v20 = vld [vmem:[%s9710_s0 + $0x7ac] sm:$0xf]  ;;  %v5773_v21 = vld [vmem:[%s9710_s0 + $0x7a8] sm:$0xf] }
  0xd1   :  { %108 = vst [vmem:[#allocation0 + $0xf58] sm:$0xf] %v5772_v20  ;;  %v5774_v22 = vld [vmem:[%s9710_s0 + $0x7a4] sm:$0xf]  ;;  %v5775_v23 = vld [vmem:[%s9710_s0 + $0x7a0] sm:$0xf] }
  0xd2   :  { %v3452_v24 = vld [vmem:[#allocation0 + $0xd43] ss:$8 sm:$0xf]   ;;  %113 = vst [vmem:[#allocation0 + $0xf50] sm:$0xf] %v5773_v21 }
  0xd3   :  { %118 = vst [vmem:[#allocation0 + $0xf48] sm:$0xf] %v5774_v22  ;;  %123 = vst [vmem:[#allocation0 + $0xf40] sm:$0xf] %v5775_v23  ;;  %v6240_v25 = vld [vmem:[%s9710_s0 + $0x5c] sm:$0xf]  ;;  %v3456_v26 = vsel %vm2562_vm0, %v3454_v19, %v3452_v24  ;;  %v7501_v23 = vpop.permute.xlu1 %3193  }
  0xd4   :  { %v3465_v27 = vld [vmem:[#allocation0 + $0xe43] ss:$8 sm:$0xf0]   ;;  %2448 = vst [vmem:[#allocation0 + $0xb8] sm:$0xf] %v6240_v25  ;;  %3457 = vrot.lane.b32.xlu1 %v3456_v26, %s6518_s10 }
  0xd5   :  { %v6241_v28 = vld [vmem:[%s9710_s0 + $0x58] sm:$0xf]  ;;  %v6242_v30 = vld [vmem:[%s9710_s0 + $0x54] sm:$0xf]  ;;  %v6243_v31 = vld [vmem:[%s9710_s0 + $0x50] sm:$0xf] }
  0xd6   :  { %2453 = vst [vmem:[#allocation0 + $0xb0] sm:$0xf] %v6241_v28  ;;  %v6244_v32 = vld [vmem:[%s9710_s0 + $0x4c] sm:$0xf]  ;;  %2458 = vst [vmem:[#allocation0 + $0xa8] sm:$0xf] %v6242_v30 }
  0xd7   :  { %v3463_v33 = vld [vmem:[#allocation0 + $0xe43] ss:$8 sm:$0xf]   ;;  %2463 = vst [vmem:[#allocation0 + $0xa0] sm:$0xf] %v6243_v31 }
  0xd8   :  { %2468 = vst [vmem:[#allocation0 + $0x98] sm:$0xf] %v6244_v32  ;;  %v6245_v34 = vld [vmem:[%s9710_s0 + $0x48] sm:$0xf]  ;;  %v3467_v35 = vsel %vm2562_vm0, %v3465_v27, %v3463_v33  ;;  %v6246_v36 = vld [vmem:[%s9710_s0 + $0x44] sm:$0xf]  ;;  %v7519_v32 = vpop.permute.xlu0 %3204  }
  0xd9   :  { %2473 = vst [vmem:[#allocation0 + $0x90] sm:$0xf] %v6245_v34  ;;  %v6247_v37 = vld [vmem:[%s9710_s0 + $0x40] sm:$0xf]  ;;  %v6208_v38 = vld [vmem:[%s9710_s0 + $0xdc] sm:$0xf]  ;;  %3468 = vrot.lane.b32.xlu0 %v3467_v35, %s6518_s10 }
  0xda   :  { %v3476_v40 = vld [vmem:[#allocation0 + $0xf43] ss:$8 sm:$0xf0]   ;;  %2478 = vst [vmem:[#allocation0 + $0x88] sm:$0xf] %v6246_v36 }
  0xdb   :  { %2483 = vst [vmem:[#allocation0 + $0x80] sm:$0xf] %v6247_v37  ;;  %2288 = vst [vmem:[#allocation0 + $0x1b8] sm:$0xf] %v6208_v38  ;;  %v6209_v41 = vld [vmem:[%s9710_s0 + $0xd8] sm:$0xf] }
  0xdc   :  { %2293 = vst [vmem:[#allocation0 + $0x1b0] sm:$0xf] %v6209_v41  ;;  %v6210_v42 = vld [vmem:[%s9710_s0 + $0xd4] sm:$0xf]  ;;  %v6211_v43 = vld [vmem:[%s9710_s0 + $0xd0] sm:$0xf] }
  0xdd   :  { %v6212_v44 = vld [vmem:[%s9710_s0 + $0xcc] sm:$0xf]  ;;  %v3474_v45 = vld [vmem:[#allocation0 + $0xf43] ss:$8 sm:$0xf]  }
  0xde   :  { %2298 = vst [vmem:[#allocation0 + $0x1a8] sm:$0xf] %v6210_v42  ;;  %2303 = vst [vmem:[#allocation0 + $0x1a0] sm:$0xf] %v6211_v43  ;;  %v6213_v46 = vld [vmem:[%s9710_s0 + $0xc8] sm:$0xf]  ;;  %v3478_v48 = vsel %vm2562_vm0, %v3476_v40, %v3474_v45 }
  0xdf   :  { %2308 = vst [vmem:[#allocation0 + $0x198] sm:$0xf] %v6212_v44  ;;  %2313 = vst [vmem:[#allocation0 + $0x190] sm:$0xf] %v6213_v46  ;;  %v6214_v49 = vld [vmem:[%s9710_s0 + $0xc4] sm:$0xf]  ;;  %3479 = vrot.lane.b32.xlu1 %v3478_v48, %s6518_s10  ;;  %v7553_v46 = vpop.permute.xlu1 %3215  }
  0xe0   :  { %v6215_v50 = vld [vmem:[%s9710_s0 + $0xc0] sm:$0xf]  ;;  %v6176_v51 = vld [vmem:[%s9710_s0 + $0x15c] sm:$0xf]  ;;  %2318 = vst [vmem:[#allocation0 + $0x188] sm:$0xf] %v6214_v49 }
  0xe1   :  { %2323 = vst [vmem:[#allocation0 + $0x180] sm:$0xf] %v6215_v50  ;;  %2128 = vst [vmem:[#allocation0 + $0x2b8] sm:$0xf] %v6176_v51  ;;  %v6177_v52 = vld [vmem:[%s9710_s0 + $0x158] sm:$0xf] }
  0xe2   :  { %v6178_v53 = vld [vmem:[%s9710_s0 + $0x154] sm:$0xf]  ;;  %v6179_v54 = vld [vmem:[%s9710_s0 + $0x150] sm:$0xf]  ;;  %2133 = vst [vmem:[#allocation0 + $0x2b0] sm:$0xf] %v6177_v52 }
  0xe3   :  { %v3487_v55 = vld [vmem:[#allocation0 + $0x83] ss:$8 sm:$0xf0]   ;;  %2138 = vst [vmem:[#allocation0 + $0x2a8] sm:$0xf] %v6178_v53 }
  0xe4   :  { %2143 = vst [vmem:[#allocation0 + $0x2a0] sm:$0xf] %v6179_v54  ;;  %v6180_v56 = vld [vmem:[%s9710_s0 + $0x14c] sm:$0xf]  ;;  %v6181_v57 = vld [vmem:[%s9710_s0 + $0x148] sm:$0xf] }
  0xe5   :  { %2148 = vst [vmem:[#allocation0 + $0x298] sm:$0xf] %v6180_v56  ;;  %v6182_v58 = vld [vmem:[%s9710_s0 + $0x144] sm:$0xf]  ;;  %v6183_v59 = vld [vmem:[%s9710_s0 + $0x140] sm:$0xf] }
  0xe6   :  { %v3485_v61 = vld [vmem:[#allocation0 + $0x83] ss:$8 sm:$0xf]   ;;  %2153 = vst [vmem:[#allocation0 + $0x290] sm:$0xf] %v6181_v57 }
  0xe7   :  { %2158 = vst [vmem:[#allocation0 + $0x288] sm:$0xf] %v6182_v58  ;;  %2163 = vst [vmem:[#allocation0 + $0x280] sm:$0xf] %v6183_v59  ;;  %v6144_v62 = vld [vmem:[%s9710_s0 + $0x1dc] sm:$0xf]  ;;  %v3489_v63 = vsel %vm2562_vm0, %v3487_v55, %v3485_v61 }
  0xe8   :  { %1968 = vst [vmem:[#allocation0 + $0x3b8] sm:$0xf] %v6144_v62  ;;  %v6145_v0 = vld [vmem:[%s9710_s0 + $0x1d8] sm:$0xf]  ;;  %v6146_v1 = vld [vmem:[%s9710_s0 + $0x1d4] sm:$0xf]  ;;  %3490 = vrot.lane.b32.xlu0 %v3489_v63, %s6518_s10  ;;  %v7584_v62 = vpop.permute.xlu0 %3226  }
  0xe9   :  { %v6147_v2 = vld [vmem:[%s9710_s0 + $0x1d0] sm:$0xf]  ;;  %1973 = vst [vmem:[#allocation0 + $0x3b0] sm:$0xf] %v6145_v0  ;;  %1978 = vst [vmem:[#allocation0 + $0x3a8] sm:$0xf] %v6146_v1 }
  0xea   :  { %v3498_v3 = vld [vmem:[#allocation0 + $0x183] ss:$8 sm:$0xf0]   ;;  %1983 = vst [vmem:[#allocation0 + $0x3a0] sm:$0xf] %v6147_v2 }
  0xeb   :  { %v6148_v4 = vld [vmem:[%s9710_s0 + $0x1cc] sm:$0xf]  ;;  %v6149_v5 = vld [vmem:[%s9710_s0 + $0x1c8] sm:$0xf]  ;;  %v6150_v6 = vld [vmem:[%s9710_s0 + $0x1c4] sm:$0xf] }
  0xec   :  { %1988 = vst [vmem:[#allocation0 + $0x398] sm:$0xf] %v6148_v4  ;;  %v6151_v7 = vld [vmem:[%s9710_s0 + $0x1c0] sm:$0xf]  ;;  %1993 = vst [vmem:[#allocation0 + $0x390] sm:$0xf] %v6149_v5 }
  0xed   :  { %v3496_v8 = vld [vmem:[#allocation0 + $0x183] ss:$8 sm:$0xf]   ;;  %1998 = vst [vmem:[#allocation0 + $0x388] sm:$0xf] %v6150_v6 }
  0xee   :  { %2003 = vst [vmem:[#allocation0 + $0x380] sm:$0xf] %v6151_v7  ;;  %v6112_v9 = vld [vmem:[%s9710_s0 + $0x25c] sm:$0xf]  ;;  %v3500_v11 = vsel %vm2562_vm0, %v3498_v3, %v3496_v8  ;;  %v6113_v13 = vld [vmem:[%s9710_s0 + $0x258] sm:$0xf] }
  0xef   :  { %v3509_v12 = vld [vmem:[#allocation0 + $0x283] ss:$8 sm:$0xf0]   ;;  %1808 = vst [vmem:[#allocation0 + $0x4b8] sm:$0xf] %v6112_v9  ;;  %3501 = vrot.lane.b32.xlu1 %v3500_v11, %s6518_s10 }
  0xf0   :  { %1813 = vst [vmem:[#allocation0 + $0x4b0] sm:$0xf] %v6113_v13  ;;  %v6114_v14 = vld [vmem:[%s9710_s0 + $0x254] sm:$0xf]  ;;  %v6115_v15 = vld [vmem:[%s9710_s0 + $0x250] sm:$0xf] }
  0xf1   :  { %v6116_v16 = vld [vmem:[%s9710_s0 + $0x24c] sm:$0xf]  ;;  %v3507_v17 = vld [vmem:[#allocation0 + $0x283] ss:$8 sm:$0xf]  }
  0xf2   :  { %1818 = vst [vmem:[#allocation0 + $0x4a8] sm:$0xf] %v6114_v14  ;;  %1823 = vst [vmem:[#allocation0 + $0x4a0] sm:$0xf] %v6115_v15  ;;  %v6117_v18 = vld [vmem:[%s9710_s0 + $0x248] sm:$0xf]  ;;  %v3511_v19 = vsel %vm2562_vm0, %v3509_v12, %v3507_v17  ;;  %v7613_v12 = vpop.permute.xlu1 %3237  }
  0xf3   :  { %1828 = vst [vmem:[#allocation0 + $0x498] sm:$0xf] %v6116_v16  ;;  %1833 = vst [vmem:[#allocation0 + $0x490] sm:$0xf] %v6117_v18  ;;  %v6118_v20 = vld [vmem:[%s9710_s0 + $0x244] sm:$0xf]  ;;  %3512 = vrot.lane.b32.xlu0 %v3511_v19, %s6518_s10 }
  0xf4   :  { %v6119_v21 = vld [vmem:[%s9710_s0 + $0x240] sm:$0xf]  ;;  %v6080_v22 = vld [vmem:[%s9710_s0 + $0x2dc] sm:$0xf]  ;;  %1838 = vst [vmem:[#allocation0 + $0x488] sm:$0xf] %v6118_v20  ;;  %v7631_v20 = vpop.permute.xlu0 %3248  }
  0xf5   :  { %v3520_v24 = vld [vmem:[#allocation0 + $0x383] ss:$8 sm:$0xf0]   ;;  %1843 = vst [vmem:[#allocation0 + $0x480] sm:$0xf] %v6119_v21 }
  0xf6   :  { %1648 = vst [vmem:[#allocation0 + $0x5b8] sm:$0xf] %v6080_v22  ;;  %v6081_v25 = vld [vmem:[%s9710_s0 + $0x2d8] sm:$0xf]  ;;  %v6082_v26 = vld [vmem:[%s9710_s0 + $0x2d4] sm:$0xf] }
  0xf7   :  { %1653 = vst [vmem:[#allocation0 + $0x5b0] sm:$0xf] %v6081_v25  ;;  %v6083_v27 = vld [vmem:[%s9710_s0 + $0x2d0] sm:$0xf]  ;;  %v6084_v28 = vld [vmem:[%s9710_s0 + $0x2cc] sm:$0xf] }
  0xf8   :  { %v3518_v30 = vld [vmem:[#allocation0 + $0x383] ss:$8 sm:$0xf]   ;;  %1658 = vst [vmem:[#allocation0 + $0x5a8] sm:$0xf] %v6082_v26 }
  0xf9   :  { %1663 = vst [vmem:[#allocation0 + $0x5a0] sm:$0xf] %v6083_v27  ;;  %1668 = vst [vmem:[#allocation0 + $0x598] sm:$0xf] %v6084_v28  ;;  %v6085_v31 = vld [vmem:[%s9710_s0 + $0x2c8] sm:$0xf]  ;;  %v3522_v33 = vsel %vm2562_vm0, %v3520_v24, %v3518_v30 }
  0xfa   :  { %1673 = vst [vmem:[#allocation0 + $0x590] sm:$0xf] %v6085_v31  ;;  %v6086_v34 = vld [vmem:[%s9710_s0 + $0x2c4] sm:$0xf]  ;;  %v6087_v35 = vld [vmem:[%s9710_s0 + $0x2c0] sm:$0xf]  ;;  %3523 = vrot.lane.b32.xlu1 %v3522_v33, %s6518_s10 }
  0xfb   :  { %v6048_v36 = vld [vmem:[%s9710_s0 + $0x35c] sm:$0xf]  ;;  %1678 = vst [vmem:[#allocation0 + $0x588] sm:$0xf] %v6086_v34  ;;  %1683 = vst [vmem:[#allocation0 + $0x580] sm:$0xf] %v6087_v35 }
  0xfc   :  { %1488 = vst [vmem:[#allocation0 + $0x6b8] sm:$0xf] %v6048_v36  ;;  %v6049_v37 = vld [vmem:[%s9710_s0 + $0x358] sm:$0xf]  ;;  %v6050_v38 = vld [vmem:[%s9710_s0 + $0x354] sm:$0xf]  ;;  %v7665_v36 = vpop.permute.xlu1 %3259  }
  0xfd   :  { %v6051_v40 = vld [vmem:[%s9710_s0 + $0x350] sm:$0xf]  ;;  %1493 = vst [vmem:[#allocation0 + $0x6b0] sm:$0xf] %v6049_v37  ;;  %1498 = vst [vmem:[#allocation0 + $0x6a8] sm:$0xf] %v6050_v38 }
  0xfe   :  { %v3531_v41 = vld [vmem:[#allocation0 + $0x483] ss:$8 sm:$0xf0]   ;;  %1503 = vst [vmem:[#allocation0 + $0x6a0] sm:$0xf] %v6051_v40 }
  0xff   :  { %v6052_v42 = vld [vmem:[%s9710_s0 + $0x34c] sm:$0xf]  ;;  %v6053_v43 = vld [vmem:[%s9710_s0 + $0x348] sm:$0xf]  ;;  %v6054_v44 = vld [vmem:[%s9710_s0 + $0x344] sm:$0xf] }
 0x100   :  { %1508 = vst [vmem:[#allocation0 + $0x698] sm:$0xf] %v6052_v42  ;;  %v6055_v45 = vld [vmem:[%s9710_s0 + $0x340] sm:$0xf]  ;;  %1513 = vst [vmem:[#allocation0 + $0x690] sm:$0xf] %v6053_v43 }
 0x101   :  { %v3529_v48 = vld [vmem:[#allocation0 + $0x483] ss:$8 sm:$0xf]   ;;  %1518 = vst [vmem:[#allocation0 + $0x688] sm:$0xf] %v6054_v44 }
 0x102   :  { %1523 = vst [vmem:[#allocation0 + $0x680] sm:$0xf] %v6055_v45  ;;  %v6016_v49 = vld [vmem:[%s9710_s0 + $0x3dc] sm:$0xf]  ;;  %v3533_v50 = vsel %vm2562_vm0, %v3531_v41, %v3529_v48  ;;  %v6017_v51 = vld [vmem:[%s9710_s0 + $0x3d8] sm:$0xf] }
 0x103   :  { %1328 = vst [vmem:[#allocation0 + $0x7b8] sm:$0xf] %v6016_v49  ;;  %v6018_v52 = vld [vmem:[%s9710_s0 + $0x3d4] sm:$0xf]  ;;  %v6019_v53 = vld [vmem:[%s9710_s0 + $0x3d0] sm:$0xf]  ;;  %3534 = vrot.lane.b32.xlu0 %v3533_v50, %s6518_s10 }
 0x104   :  { %v3542_v54 = vld [vmem:[#allocation0 + $0x583] ss:$8 sm:$0xf0]   ;;  %1333 = vst [vmem:[#allocation0 + $0x7b0] sm:$0xf] %v6017_v51 }
 0x105   :  { %1338 = vst [vmem:[#allocation0 + $0x7a8] sm:$0xf] %v6018_v52  ;;  %1343 = vst [vmem:[#allocation0 + $0x7a0] sm:$0xf] %v6019_v53  ;;  %v6020_v55 = vld [vmem:[%s9710_s0 + $0x3cc] sm:$0xf]  ;;  %v7696_v53 = vpop.permute.xlu0 %3270  }
 0x106   :  { %1348 = vst [vmem:[#allocation0 + $0x798] sm:$0xf] %v6020_v55  ;;  %v6021_v56 = vld [vmem:[%s9710_s0 + $0x3c8] sm:$0xf]  ;;  %v6022_v57 = vld [vmem:[%s9710_s0 + $0x3c4] sm:$0xf] }
 0x107   :  { %v6023_v58 = vld [vmem:[%s9710_s0 + $0x3c0] sm:$0xf]  ;;  %1353 = vst [vmem:[#allocation0 + $0x790] sm:$0xf] %v6021_v56  ;;  %1358 = vst [vmem:[#allocation0 + $0x788] sm:$0xf] %v6022_v57 }
 0x108   :  { %v3540_v59 = vld [vmem:[#allocation0 + $0x583] ss:$8 sm:$0xf]   ;;  %1363 = vst [vmem:[#allocation0 + $0x780] sm:$0xf] %v6023_v58 }
 0x109   :  { %v5984_v61 = vld [vmem:[%s9710_s0 + $0x45c] sm:$0xf]  ;;  %v3544_v63 = vsel %vm2562_vm0, %v3542_v54, %v3540_v59  ;;  %v3553_v0 = vld [vmem:[#allocation0 + $0x683] ss:$8 sm:$0xf0]  }
 0x10a   :  { %1168 = vst [vmem:[#allocation0 + $0x8b8] sm:$0xf] %v5984_v61  ;;  %v5985_v1 = vld [vmem:[%s9710_s0 + $0x458] sm:$0xf]  ;;  %3545 = vrot.lane.b32.xlu1 %v3544_v63, %s6518_s10  ;;  %v5986_v2 = vld [vmem:[%s9710_s0 + $0x454] sm:$0xf] }
 0x10b   :  { %1173 = vst [vmem:[#allocation0 + $0x8b0] sm:$0xf] %v5985_v1  ;;  %v5987_v3 = vld [vmem:[%s9710_s0 + $0x450] sm:$0xf]  ;;  %v5988_v4 = vld [vmem:[%s9710_s0 + $0x44c] sm:$0xf] }
 0x10c   :  { %v3551_v5 = vld [vmem:[#allocation0 + $0x683] ss:$8 sm:$0xf]   ;;  %1178 = vst [vmem:[#allocation0 + $0x8a8] sm:$0xf] %v5986_v2 }
 0x10d   :  { %1183 = vst [vmem:[#allocation0 + $0x8a0] sm:$0xf] %v5987_v3  ;;  %1188 = vst [vmem:[#allocation0 + $0x898] sm:$0xf] %v5988_v4  ;;  %v5989_v6 = vld [vmem:[%s9710_s0 + $0x448] sm:$0xf]  ;;  %v3555_v7 = vsel %vm2562_vm0, %v3553_v0, %v3551_v5  ;;  %v7725_v4 = vpop.permute.xlu1 %3281  }
 0x10e   :  { %1193 = vst [vmem:[#allocation0 + $0x890] sm:$0xf] %v5989_v6  ;;  %v5990_v8 = vld [vmem:[%s9710_s0 + $0x444] sm:$0xf]  ;;  %v5991_v9 = vld [vmem:[%s9710_s0 + $0x440] sm:$0xf]  ;;  %3556 = vrot.lane.b32.xlu0 %v3555_v7, %s6518_s10 }
 0x10f   :  { %v5952_v11 = vld [vmem:[%s9710_s0 + $0x4dc] sm:$0xf]  ;;  %v3564_v13 = vld [vmem:[#allocation0 + $0x783] ss:$8 sm:$0xf0]  }
 0x110   :  { %1198 = vst [vmem:[#allocation0 + $0x888] sm:$0xf] %v5990_v8  ;;  %1203 = vst [vmem:[#allocation0 + $0x880] sm:$0xf] %v5991_v9  ;;  %v5953_v14 = vld [vmem:[%s9710_s0 + $0x4d8] sm:$0xf] }
 0x111   :  { %1008 = vst [vmem:[#allocation0 + $0x9b8] sm:$0xf] %v5952_v11  ;;  %1013 = vst [vmem:[#allocation0 + $0x9b0] sm:$0xf] %v5953_v14  ;;  %v5954_v15 = vld [vmem:[%s9710_s0 + $0x4d4] sm:$0xf]  ;;  %v7743_v14 = vpop.permute.xlu0 %3292  }
 0x112   :  { %v5955_v16 = vld [vmem:[%s9710_s0 + $0x4d0] sm:$0xf]  ;;  %v5956_v17 = vld [vmem:[%s9710_s0 + $0x4cc] sm:$0xf]  ;;  %1018 = vst [vmem:[#allocation0 + $0x9a8] sm:$0xf] %v5954_v15 }
 0x113   :  { %v3562_v18 = vld [vmem:[#allocation0 + $0x783] ss:$8 sm:$0xf]   ;;  %1023 = vst [vmem:[#allocation0 + $0x9a0] sm:$0xf] %v5955_v16 }
 0x114   :  { %1028 = vst [vmem:[#allocation0 + $0x998] sm:$0xf] %v5956_v17  ;;  %v5957_v19 = vld [vmem:[%s9710_s0 + $0x4c8] sm:$0xf]  ;;  %v3566_v21 = vsel %vm2562_vm0, %v3564_v13, %v3562_v18  ;;  %v5958_v22 = vld [vmem:[%s9710_s0 + $0x4c4] sm:$0xf] }
 0x115   :  { %1033 = vst [vmem:[#allocation0 + $0x990] sm:$0xf] %v5957_v19  ;;  %v5959_v24 = vld [vmem:[%s9710_s0 + $0x4c0] sm:$0xf]  ;;  %v5920_v25 = vld [vmem:[%s9710_s0 + $0x55c] sm:$0xf]  ;;  %3567 = vrot.lane.b32.xlu1 %v3566_v21, %s6518_s10 }
 0x116   :  { %1038 = vst [vmem:[#allocation0 + $0x988] sm:$0xf] %v5958_v22  ;;  %1043 = vst [vmem:[#allocation0 + $0x980] sm:$0xf] %v5959_v24  ;;  %v5921_v26 = vld [vmem:[%s9710_s0 + $0x558] sm:$0xf] }
 0x117   :  { %848 = vst [vmem:[#allocation0 + $0xab8] sm:$0xf] %v5920_v25  ;;  %v5922_v27 = vld [vmem:[%s9710_s0 + $0x554] sm:$0xf]  ;;  %v5923_v28 = vld [vmem:[%s9710_s0 + $0x550] sm:$0xf] }
 0x118   :  { %v3575_v30 = vld [vmem:[#allocation0 + $0x883] ss:$8 sm:$0xf0]   ;;  %853 = vst [vmem:[#allocation0 + $0xab0] sm:$0xf] %v5921_v26 }
 0x119   :  { %858 = vst [vmem:[#allocation0 + $0xaa8] sm:$0xf] %v5922_v27  ;;  %863 = vst [vmem:[#allocation0 + $0xaa0] sm:$0xf] %v5923_v28  ;;  %v5924_v31 = vld [vmem:[%s9710_s0 + $0x54c] sm:$0xf] }
 0x11a   :  { %868 = vst [vmem:[#allocation0 + $0xa98] sm:$0xf] %v5924_v31  ;;  %v5925_v33 = vld [vmem:[%s9710_s0 + $0x548] sm:$0xf]  ;;  %v5926_v34 = vld [vmem:[%s9710_s0 + $0x544] sm:$0xf] }
 0x11b   :  { %v5927_v35 = vld [vmem:[%s9710_s0 + $0x540] sm:$0xf]  ;;  %873 = vst [vmem:[#allocation0 + $0xa90] sm:$0xf] %v5925_v33  ;;  %878 = vst [vmem:[#allocation0 + $0xa88] sm:$0xf] %v5926_v34 }
 0x11c   :  { %v3573_v37 = vld [vmem:[#allocation0 + $0x883] ss:$8 sm:$0xf]   ;;  %883 = vst [vmem:[#allocation0 + $0xa80] sm:$0xf] %v5927_v35 }
 0x11d   :  { %v5888_v38 = vld [vmem:[%s9710_s0 + $0x5dc] sm:$0xf]  ;;  %v3577_v40 = vsel %vm2562_vm0, %v3575_v30, %v3573_v37  ;;  %v5889_v41 = vld [vmem:[%s9710_s0 + $0x5d8] sm:$0xf]  ;;  %v5890_v42 = vld [vmem:[%s9710_s0 + $0x5d4] sm:$0xf]  ;;  %v7777_v30 = vpop.permute.xlu1 %3303  }
 0x11e   :  { %688 = vst [vmem:[#allocation0 + $0xbb8] sm:$0xf] %v5888_v38  ;;  %v5891_v43 = vld [vmem:[%s9710_s0 + $0x5d0] sm:$0xf]  ;;  %3578 = vrot.lane.b32.xlu0 %v3577_v40, %s6518_s10  ;;  %693 = vst [vmem:[#allocation0 + $0xbb0] sm:$0xf] %v5889_v41 }
 0x11f   :  { %v3586_v44 = vld [vmem:[#allocation0 + $0x983] ss:$8 sm:$0xf0]   ;;  %698 = vst [vmem:[#allocation0 + $0xba8] sm:$0xf] %v5890_v42 }
 0x120   :  { %703 = vst [vmem:[#allocation0 + $0xba0] sm:$0xf] %v5891_v43  ;;  %v5892_v45 = vld [vmem:[%s9710_s0 + $0x5cc] sm:$0xf]  ;;  %v5893_v48 = vld [vmem:[%s9710_s0 + $0x5c8] sm:$0xf] }
 0x121   :  { %708 = vst [vmem:[#allocation0 + $0xb98] sm:$0xf] %v5892_v45  ;;  %v5894_v49 = vld [vmem:[%s9710_s0 + $0x5c4] sm:$0xf]  ;;  %v5895_v50 = vld [vmem:[%s9710_s0 + $0x5c0] sm:$0xf] }
 0x122   :  { %v3584_v51 = vld [vmem:[#allocation0 + $0x983] ss:$8 sm:$0xf]   ;;  %713 = vst [vmem:[#allocation0 + $0xb90] sm:$0xf] %v5893_v48 }
 0x123   :  { %718 = vst [vmem:[#allocation0 + $0xb88] sm:$0xf] %v5894_v49  ;;  %723 = vst [vmem:[#allocation0 + $0xb80] sm:$0xf] %v5895_v50  ;;  %v5856_v52 = vld [vmem:[%s9710_s0 + $0x65c] sm:$0xf]  ;;  %v3588_v54 = vsel %vm2562_vm0, %v3586_v44, %v3584_v51  ;;  %v7808_v49 = vpop.permute.xlu0 %3314  }
 0x124   :  { %v3597_v55 = vld [vmem:[#allocation0 + $0xa83] ss:$8 sm:$0xf0]   ;;  %528 = vst [vmem:[#allocation0 + $0xcb8] sm:$0xf] %v5856_v52  ;;  %3589 = vrot.lane.b32.xlu1 %v3588_v54, %s6518_s10 }
 0x125   :  { %v5857_v56 = vld [vmem:[%s9710_s0 + $0x658] sm:$0xf]  ;;  %v5858_v57 = vld [vmem:[%s9710_s0 + $0x654] sm:$0xf]  ;;  %v5859_v58 = vld [vmem:[%s9710_s0 + $0x650] sm:$0xf] }
 0x126   :  { %533 = vst [vmem:[#allocation0 + $0xcb0] sm:$0xf] %v5857_v56  ;;  %v5860_v59 = vld [vmem:[%s9710_s0 + $0x64c] sm:$0xf]  ;;  %538 = vst [vmem:[#allocation0 + $0xca8] sm:$0xf] %v5858_v57 }
 0x127   :  { %v3595_v61 = vld [vmem:[#allocation0 + $0xa83] ss:$8 sm:$0xf]   ;;  %543 = vst [vmem:[#allocation0 + $0xca0] sm:$0xf] %v5859_v58 }
 0x128   :  { %548 = vst [vmem:[#allocation0 + $0xc98] sm:$0xf] %v5860_v59  ;;  %v5861_v63 = vld [vmem:[%s9710_s0 + $0x648] sm:$0xf]  ;;  %v3599_v0 = vsel %vm2562_vm0, %v3597_v55, %v3595_v61  ;;  %v5862_v1 = vld [vmem:[%s9710_s0 + $0x644] sm:$0xf] }
 0x129   :  { %553 = vst [vmem:[#allocation0 + $0xc90] sm:$0xf] %v5861_v63  ;;  %v5863_v2 = vld [vmem:[%s9710_s0 + $0x640] sm:$0xf]  ;;  %v5824_v3 = vld [vmem:[%s9710_s0 + $0x6dc] sm:$0xf]  ;;  %3600 = vrot.lane.b32.xlu0 %v3599_v0, %s6518_s10 }
 0x12a   :  { %v3608_v5 = vld [vmem:[#allocation0 + $0xb83] ss:$8 sm:$0xf0]   ;;  %558 = vst [vmem:[#allocation0 + $0xc88] sm:$0xf] %v5862_v1  ;;  %v7837_v1 = vpop.permute.xlu1 %3325  }
 0x12b   :  { %563 = vst [vmem:[#allocation0 + $0xc80] sm:$0xf] %v5863_v2  ;;  %368 = vst [vmem:[#allocation0 + $0xdb8] sm:$0xf] %v5824_v3  ;;  %v5825_v6 = vld [vmem:[%s9710_s0 + $0x6d8] sm:$0xf] }
 0x12c   :  { %373 = vst [vmem:[#allocation0 + $0xdb0] sm:$0xf] %v5825_v6  ;;  %v5826_v7 = vld [vmem:[%s9710_s0 + $0x6d4] sm:$0xf]  ;;  %v5827_v8 = vld [vmem:[%s9710_s0 + $0x6d0] sm:$0xf] }
 0x12d   :  { %v5828_v9 = vld [vmem:[%s9710_s0 + $0x6cc] sm:$0xf]  ;;  %v3606_v11 = vld [vmem:[#allocation0 + $0xb83] ss:$8 sm:$0xf]  }
 0x12e   :  { %378 = vst [vmem:[#allocation0 + $0xda8] sm:$0xf] %v5826_v7  ;;  %383 = vst [vmem:[#allocation0 + $0xda0] sm:$0xf] %v5827_v8  ;;  %v5829_v13 = vld [vmem:[%s9710_s0 + $0x6c8] sm:$0xf]  ;;  %v3610_v15 = vsel %vm2562_vm0, %v3608_v5, %v3606_v11  ;;  %v7855_v11 = vpop.permute.xlu0 %3336  }
 0x12f   :  { %388 = vst [vmem:[#allocation0 + $0xd98] sm:$0xf] %v5828_v9  ;;  %393 = vst [vmem:[#allocation0 + $0xd90] sm:$0xf] %v5829_v13  ;;  %v5830_v16 = vld [vmem:[%s9710_s0 + $0x6c4] sm:$0xf]  ;;  %3611 = vrot.lane.b32.xlu1 %v3610_v15, %s6518_s10 }
 0x130   :  { %v5831_v17 = vld [vmem:[%s9710_s0 + $0x6c0] sm:$0xf]  ;;  %v5792_v18 = vld [vmem:[%s9710_s0 + $0x75c] sm:$0xf]  ;;  %398 = vst [vmem:[#allocation0 + $0xd88] sm:$0xf] %v5830_v16 }
 0x131   :  { %403 = vst [vmem:[#allocation0 + $0xd80] sm:$0xf] %v5831_v17  ;;  %208 = vst [vmem:[#allocation0 + $0xeb8] sm:$0xf] %v5792_v18  ;;  %v5793_v19 = vld [vmem:[%s9710_s0 + $0x758] sm:$0xf] }
 0x132   :  { %v5794_v21 = vld [vmem:[%s9710_s0 + $0x754] sm:$0xf]  ;;  %v5795_v22 = vld [vmem:[%s9710_s0 + $0x750] sm:$0xf]  ;;  %213 = vst [vmem:[#allocation0 + $0xeb0] sm:$0xf] %v5793_v19 }
 0x133   :  { %v3619_v24 = vld [vmem:[#allocation0 + $0xc83] ss:$8 sm:$0xf0]   ;;  %218 = vst [vmem:[#allocation0 + $0xea8] sm:$0xf] %v5794_v21 }
 0x134   :  { %223 = vst [vmem:[#allocation0 + $0xea0] sm:$0xf] %v5795_v22  ;;  %v5796_v25 = vld [vmem:[%s9710_s0 + $0x74c] sm:$0xf]  ;;  %v5797_v26 = vld [vmem:[%s9710_s0 + $0x748] sm:$0xf] }
 0x135   :  { %228 = vst [vmem:[#allocation0 + $0xe98] sm:$0xf] %v5796_v25  ;;  %v5798_v27 = vld [vmem:[%s9710_s0 + $0x744] sm:$0xf]  ;;  %v5799_v28 = vld [vmem:[%s9710_s0 + $0x740] sm:$0xf] }
 0x136   :  { %v3617_v31 = vld [vmem:[#allocation0 + $0xc83] ss:$8 sm:$0xf]   ;;  %233 = vst [vmem:[#allocation0 + $0xe90] sm:$0xf] %v5797_v26 }
 0x137   :  { %238 = vst [vmem:[#allocation0 + $0xe88] sm:$0xf] %v5798_v27  ;;  %243 = vst [vmem:[#allocation0 + $0xe80] sm:$0xf] %v5799_v28  ;;  %v5760_v33 = vld [vmem:[%s9710_s0 + $0x7dc] sm:$0xf]  ;;  %v3621_v34 = vsel %vm2562_vm0, %v3619_v24, %v3617_v31  ;;  %v7889_v28 = vpop.permute.xlu1 %3347  }
 0x138   :  { %48 = vst [vmem:[#allocation0 + $0xfb8] sm:$0xf] %v5760_v33  ;;  %v5761_v35 = vld [vmem:[%s9710_s0 + $0x7d8] sm:$0xf]  ;;  %v5762_v37 = vld [vmem:[%s9710_s0 + $0x7d4] sm:$0xf]  ;;  %3622 = vrot.lane.b32.xlu0 %v3621_v34, %s6518_s10 }
 0x139   :  { %v5763_v38 = vld [vmem:[%s9710_s0 + $0x7d0] sm:$0xf]  ;;  %53 = vst [vmem:[#allocation0 + $0xfb0] sm:$0xf] %v5761_v35  ;;  %58 = vst [vmem:[#allocation0 + $0xfa8] sm:$0xf] %v5762_v37 }
 0x13a   :  { %v3630_v40 = vld [vmem:[#allocation0 + $0xd83] ss:$8 sm:$0xf0]   ;;  %63 = vst [vmem:[#allocation0 + $0xfa0] sm:$0xf] %v5763_v38 }
 0x13b   :  { %v5764_v41 = vld [vmem:[%s9710_s0 + $0x7cc] sm:$0xf]  ;;  %v5765_v42 = vld [vmem:[%s9710_s0 + $0x7c8] sm:$0xf]  ;;  %v5766_v43 = vld [vmem:[%s9710_s0 + $0x7c4] sm:$0xf] }
 0x13c   :  { %68 = vst [vmem:[#allocation0 + $0xf98] sm:$0xf] %v5764_v41  ;;  %v5767_v44 = vld [vmem:[%s9710_s0 + $0x7c0] sm:$0xf]  ;;  %73 = vst [vmem:[#allocation0 + $0xf90] sm:$0xf] %v5765_v42 }
 0x13d   :  { %v3628_v45 = vld [vmem:[#allocation0 + $0xd83] ss:$8 sm:$0xf]   ;;  %78 = vst [vmem:[#allocation0 + $0xf88] sm:$0xf] %v5766_v43 }
 0x13e   :  { %83 = vst [vmem:[#allocation0 + $0xf80] sm:$0xf] %v5767_v44  ;;  %v6232_v48 = vld [vmem:[%s9710_s0 + $0x7c] sm:$0xf]  ;;  %v3632_v50 = vsel %vm2562_vm0, %v3630_v40, %v3628_v45  ;;  %v6233_v52 = vld [vmem:[%s9710_s0 + $0x78] sm:$0xf] }
 0x13f   :  { %v3641_v51 = vld [vmem:[#allocation0 + $0xe83] ss:$8 sm:$0xf0]   ;;  %2408 = vst [vmem:[#allocation0 + $0xf8] sm:$0xf] %v6232_v48  ;;  %3633 = vrot.lane.b32.xlu1 %v3632_v50, %s6518_s10  ;;  %v7920_v50 = vpop.permute.xlu0 %3358  }
 0x140   :  { %2413 = vst [vmem:[#allocation0 + $0xf0] sm:$0xf] %v6233_v52  ;;  %v6234_v54 = vld [vmem:[%s9710_s0 + $0x74] sm:$0xf]  ;;  %v6235_v55 = vld [vmem:[%s9710_s0 + $0x70] sm:$0xf] }
 0x141   :  { %v6236_v56 = vld [vmem:[%s9710_s0 + $0x6c] sm:$0xf]  ;;  %v3639_v57 = vld [vmem:[#allocation0 + $0xe83] ss:$8 sm:$0xf]  }
 0x142   :  { %2418 = vst [vmem:[#allocation0 + $0xe8] sm:$0xf] %v6234_v54  ;;  %2423 = vst [vmem:[#allocation0 + $0xe0] sm:$0xf] %v6235_v55  ;;  %v6237_v58 = vld [vmem:[%s9710_s0 + $0x68] sm:$0xf]  ;;  %v3643_v59 = vsel %vm2562_vm0, %v3641_v51, %v3639_v57 }
 0x143   :  { %2428 = vst [vmem:[#allocation0 + $0xd8] sm:$0xf] %v6236_v56  ;;  %2433 = vst [vmem:[#allocation0 + $0xd0] sm:$0xf] %v6237_v58  ;;  %v6238_v61 = vld [vmem:[%s9710_s0 + $0x64] sm:$0xf]  ;;  %3644 = vrot.lane.b32.xlu0 %v3643_v59, %s6518_s10 }
 0x144   :  { %v6239_v63 = vld [vmem:[%s9710_s0 + $0x60] sm:$0xf]  ;;  %v6200_v0 = vld [vmem:[%s9710_s0 + $0xfc] sm:$0xf]  ;;  %2438 = vst [vmem:[#allocation0 + $0xc8] sm:$0xf] %v6238_v61 }
 0x145   :  { %v3652_v2 = vld [vmem:[#allocation0 + $0xf83] ss:$8 sm:$0xf0]   ;;  %2443 = vst [vmem:[#allocation0 + $0xc0] sm:$0xf] %v6239_v63 }
 0x146   :  { %2248 = vst [vmem:[#allocation0 + $0x1f8] sm:$0xf] %v6200_v0  ;;  %v6201_v3 = vld [vmem:[%s9710_s0 + $0xf8] sm:$0xf]  ;;  %v6202_v5 = vld [vmem:[%s9710_s0 + $0xf4] sm:$0xf] }
 0x147   :  { %2253 = vst [vmem:[#allocation0 + $0x1f0] sm:$0xf] %v6201_v3  ;;  %v6203_v6 = vld [vmem:[%s9710_s0 + $0xf0] sm:$0xf]  ;;  %v6204_v7 = vld [vmem:[%s9710_s0 + $0xec] sm:$0xf]  ;;  %v7949_v3 = vpop.permute.xlu1 %3369  }
 0x148   :  { %v3650_v8 = vld [vmem:[#allocation0 + $0xf83] ss:$8 sm:$0xf]   ;;  %2258 = vst [vmem:[#allocation0 + $0x1e8] sm:$0xf] %v6202_v5 }
 0x149   :  { %2263 = vst [vmem:[#allocation0 + $0x1e0] sm:$0xf] %v6203_v6  ;;  %2268 = vst [vmem:[#allocation0 + $0x1d8] sm:$0xf] %v6204_v7  ;;  %v6205_v9 = vld [vmem:[%s9710_s0 + $0xe8] sm:$0xf]  ;;  %v3654_v13 = vsel %vm2562_vm0, %v3652_v2, %v3650_v8 }
 0x14a   :  { %2273 = vst [vmem:[#allocation0 + $0x1d0] sm:$0xf] %v6205_v9  ;;  %v6206_v15 = vld [vmem:[%s9710_s0 + $0xe4] sm:$0xf]  ;;  %v6207_v16 = vld [vmem:[%s9710_s0 + $0xe0] sm:$0xf]  ;;  %3655 = vrot.lane.b32.xlu1 %v3654_v13, %s6518_s10 }
 0x14b   :  { %v6168_v17 = vld [vmem:[%s9710_s0 + $0x17c] sm:$0xf]  ;;  %2278 = vst [vmem:[#allocation0 + $0x1c8] sm:$0xf] %v6206_v15  ;;  %2283 = vst [vmem:[#allocation0 + $0x1c0] sm:$0xf] %v6207_v16  ;;  %v7967_v16 = vpop.permute.xlu0 %3380  }
 0x14c   :  { %2088 = vst [vmem:[#allocation0 + $0x2f8] sm:$0xf] %v6168_v17  ;;  %v6169_v18 = vld [vmem:[%s9710_s0 + $0x178] sm:$0xf]  ;;  %v6170_v19 = vld [vmem:[%s9710_s0 + $0x174] sm:$0xf] }
 0x14d   :  { %v6171_v21 = vld [vmem:[%s9710_s0 + $0x170] sm:$0xf]  ;;  %2093 = vst [vmem:[#allocation0 + $0x2f0] sm:$0xf] %v6169_v18  ;;  %2098 = vst [vmem:[#allocation0 + $0x2e8] sm:$0xf] %v6170_v19 }
 0x14e   :  { %v3663_v22 = vld [vmem:[#allocation0 + $0xc3] ss:$8 sm:$0xf0]   ;;  %2103 = vst [vmem:[#allocation0 + $0x2e0] sm:$0xf] %v6171_v21 }
 0x14f   :  { %v6172_v24 = vld [vmem:[%s9710_s0 + $0x16c] sm:$0xf]  ;;  %v6173_v25 = vld [vmem:[%s9710_s0 + $0x168] sm:$0xf]  ;;  %v6174_v26 = vld [vmem:[%s9710_s0 + $0x164] sm:$0xf] }
 0x150   :  { %2108 = vst [vmem:[#allocation0 + $0x2d8] sm:$0xf] %v6172_v24  ;;  %v6175_v27 = vld [vmem:[%s9710_s0 + $0x160] sm:$0xf]  ;;  %2113 = vst [vmem:[#allocation0 + $0x2d0] sm:$0xf] %v6173_v25 }
 0x151   :  { %v3661_v31 = vld [vmem:[#allocation0 + $0xc3] ss:$8 sm:$0xf]   ;;  %2118 = vst [vmem:[#allocation0 + $0x2c8] sm:$0xf] %v6174_v26 }
 0x152   :  { %2123 = vst [vmem:[#allocation0 + $0x2c0] sm:$0xf] %v6175_v27  ;;  %v6136_v33 = vld [vmem:[%s9710_s0 + $0x1fc] sm:$0xf]  ;;  %v3665_v34 = vsel %vm2562_vm0, %v3663_v22, %v3661_v31  ;;  %v6137_v35 = vld [vmem:[%s9710_s0 + $0x1f8] sm:$0xf] }
 0x153   :  { %1928 = vst [vmem:[#allocation0 + $0x3f8] sm:$0xf] %v6136_v33  ;;  %v6138_v37 = vld [vmem:[%s9710_s0 + $0x1f4] sm:$0xf]  ;;  %v6139_v38 = vld [vmem:[%s9710_s0 + $0x1f0] sm:$0xf]  ;;  %3666 = vrot.lane.b32.xlu0 %v3665_v34, %s6518_s10 }
 0x154   :  { %v3674_v40 = vld [vmem:[#allocation0 + $0x1c3] ss:$8 sm:$0xf0]   ;;  %1933 = vst [vmem:[#allocation0 + $0x3f0] sm:$0xf] %v6137_v35  ;;  %v8001_v35 = vpop.permute.xlu1 %3391  }
 0x155   :  { %1938 = vst [vmem:[#allocation0 + $0x3e8] sm:$0xf] %v6138_v37  ;;  %1943 = vst [vmem:[#allocation0 + $0x3e0] sm:$0xf] %v6139_v38  ;;  %v6140_v41 = vld [vmem:[%s9710_s0 + $0x1ec] sm:$0xf] }
 0x156   :  { %1948 = vst [vmem:[#allocation0 + $0x3d8] sm:$0xf] %v6140_v41  ;;  %v6141_v42 = vld [vmem:[%s9710_s0 + $0x1e8] sm:$0xf]  ;;  %v6142_v43 = vld [vmem:[%s9710_s0 + $0x1e4] sm:$0xf] }
 0x157   :  { %v6143_v44 = vld [vmem:[%s9710_s0 + $0x1e0] sm:$0xf]  ;;  %1953 = vst [vmem:[#allocation0 + $0x3d0] sm:$0xf] %v6141_v42  ;;  %1958 = vst [vmem:[#allocation0 + $0x3c8] sm:$0xf] %v6142_v43 }
 0x158   :  { %v3672_v45 = vld [vmem:[#allocation0 + $0x1c3] ss:$8 sm:$0xf]   ;;  %1963 = vst [vmem:[#allocation0 + $0x3c0] sm:$0xf] %v6143_v44 }
 0x159   :  { %v6104_v48 = vld [vmem:[%s9710_s0 + $0x27c] sm:$0xf]  ;;  %v3676_v51 = vsel %vm2562_vm0, %v3674_v40, %v3672_v45  ;;  %v3685_v52 = vld [vmem:[#allocation0 + $0x2c3] ss:$8 sm:$0xf0]  }
 0x15a   :  { %1768 = vst [vmem:[#allocation0 + $0x4f8] sm:$0xf] %v6104_v48  ;;  %v6105_v54 = vld [vmem:[%s9710_s0 + $0x278] sm:$0xf]  ;;  %3677 = vrot.lane.b32.xlu1 %v3676_v51, %s6518_s10  ;;  %v6106_v55 = vld [vmem:[%s9710_s0 + $0x274] sm:$0xf] }
 0x15b   :  { %1773 = vst [vmem:[#allocation0 + $0x4f0] sm:$0xf] %v6105_v54  ;;  %v6107_v56 = vld [vmem:[%s9710_s0 + $0x270] sm:$0xf]  ;;  %v6108_v57 = vld [vmem:[%s9710_s0 + $0x26c] sm:$0xf] }
 0x15c   :  { %v3683_v58 = vld [vmem:[#allocation0 + $0x2c3] ss:$8 sm:$0xf]   ;;  %1778 = vst [vmem:[#allocation0 + $0x4e8] sm:$0xf] %v6106_v55 }
 0x15d   :  { %1783 = vst [vmem:[#allocation0 + $0x4e0] sm:$0xf] %v6107_v56  ;;  %1788 = vst [vmem:[#allocation0 + $0x4d8] sm:$0xf] %v6108_v57  ;;  %v6109_v59 = vld [vmem:[%s9710_s0 + $0x268] sm:$0xf]  ;;  %v3687_v61 = vsel %vm2562_vm0, %v3685_v52, %v3683_v58  ;;  %v8032_v56 = vpop.permute.xlu0 %3402  }
 0x15e   :  { %1793 = vst [vmem:[#allocation0 + $0x4d0] sm:$0xf] %v6109_v59  ;;  %v6110_v63 = vld [vmem:[%s9710_s0 + $0x264] sm:$0xf]  ;;  %v6111_v0 = vld [vmem:[%s9710_s0 + $0x260] sm:$0xf]  ;;  %3688 = vrot.lane.b32.xlu0 %v3687_v61, %s6518_s10 }
 0x15f   :  { %v6072_v2 = vld [vmem:[%s9710_s0 + $0x2fc] sm:$0xf]  ;;  %v3696_v5 = vld [vmem:[#allocation0 + $0x3c3] ss:$8 sm:$0xf0]  }
 0x160   :  { %1798 = vst [vmem:[#allocation0 + $0x4c8] sm:$0xf] %v6110_v63  ;;  %1803 = vst [vmem:[#allocation0 + $0x4c0] sm:$0xf] %v6111_v0  ;;  %v6073_v6 = vld [vmem:[%s9710_s0 + $0x2f8] sm:$0xf] }
 0x161   :  { %1608 = vst [vmem:[#allocation0 + $0x5f8] sm:$0xf] %v6072_v2  ;;  %1613 = vst [vmem:[#allocation0 + $0x5f0] sm:$0xf] %v6073_v6  ;;  %v6074_v7 = vld [vmem:[%s9710_s0 + $0x2f4] sm:$0xf] }
 0x162   :  { %v6075_v8 = vld [vmem:[%s9710_s0 + $0x2f0] sm:$0xf]  ;;  %v6076_v9 = vld [vmem:[%s9710_s0 + $0x2ec] sm:$0xf]  ;;  %1618 = vst [vmem:[#allocation0 + $0x5e8] sm:$0xf] %v6074_v7 }
 0x163   :  { %v3694_v13 = vld [vmem:[#allocation0 + $0x3c3] ss:$8 sm:$0xf]   ;;  %1623 = vst [vmem:[#allocation0 + $0x5e0] sm:$0xf] %v6075_v8 }
 0x164   :  { %1628 = vst [vmem:[#allocation0 + $0x5d8] sm:$0xf] %v6076_v9  ;;  %v6077_v15 = vld [vmem:[%s9710_s0 + $0x2e8] sm:$0xf]  ;;  %v3698_v17 = vsel %vm2562_vm0, %v3696_v5, %v3694_v13  ;;  %v6078_v18 = vld [vmem:[%s9710_s0 + $0x2e4] sm:$0xf]  ;;  %v8061_v13 = vpop.permute.xlu1 %3413  }
 0x165   :  { %1633 = vst [vmem:[#allocation0 + $0x5d0] sm:$0xf] %v6077_v15  ;;  %v6079_v19 = vld [vmem:[%s9710_s0 + $0x2e0] sm:$0xf]  ;;  %v6040_v21 = vld [vmem:[%s9710_s0 + $0x37c] sm:$0xf]  ;;  %3699 = vrot.lane.b32.xlu1 %v3698_v17, %s6518_s10 }
 0x166   :  { %1638 = vst [vmem:[#allocation0 + $0x5c8] sm:$0xf] %v6078_v18  ;;  %1643 = vst [vmem:[#allocation0 + $0x5c0] sm:$0xf] %v6079_v19  ;;  %v6041_v22 = vld [vmem:[%s9710_s0 + $0x378] sm:$0xf] }
 0x167   :  { %1448 = vst [vmem:[#allocation0 + $0x6f8] sm:$0xf] %v6040_v21  ;;  %v6042_v24 = vld [vmem:[%s9710_s0 + $0x374] sm:$0xf]  ;;  %v6043_v25 = vld [vmem:[%s9710_s0 + $0x370] sm:$0xf] }
 0x168   :  { %v3707_v26 = vld [vmem:[#allocation0 + $0x4c3] ss:$8 sm:$0xf0]   ;;  %1453 = vst [vmem:[#allocation0 + $0x6f0] sm:$0xf] %v6041_v22 }
 0x169   :  { %1458 = vst [vmem:[#allocation0 + $0x6e8] sm:$0xf] %v6042_v24  ;;  %1463 = vst [vmem:[#allocation0 + $0x6e0] sm:$0xf] %v6043_v25  ;;  %v6044_v27 = vld [vmem:[%s9710_s0 + $0x36c] sm:$0xf]  ;;  %v8079_v25 = vpop.permute.xlu0 %3424  }
 0x16a   :  { %1468 = vst [vmem:[#allocation0 + $0x6d8] sm:$0xf] %v6044_v27  ;;  %v6045_v31 = vld [vmem:[%s9710_s0 + $0x368] sm:$0xf]  ;;  %v6046_v33 = vld [vmem:[%s9710_s0 + $0x364] sm:$0xf] }
 0x16b   :  { %v6047_v34 = vld [vmem:[%s9710_s0 + $0x360] sm:$0xf]  ;;  %1473 = vst [vmem:[#allocation0 + $0x6d0] sm:$0xf] %v6045_v31  ;;  %1478 = vst [vmem:[#allocation0 + $0x6c8] sm:$0xf] %v6046_v33 }
 0x16c   :  { %v3705_v37 = vld [vmem:[#allocation0 + $0x4c3] ss:$8 sm:$0xf]   ;;  %1483 = vst [vmem:[#allocation0 + $0x6c0] sm:$0xf] %v6047_v34 }
 0x16d   :  { %v6008_v38 = vld [vmem:[%s9710_s0 + $0x3fc] sm:$0xf]  ;;  %v3709_v40 = vsel %vm2562_vm0, %v3707_v26, %v3705_v37  ;;  %v6009_v41 = vld [vmem:[%s9710_s0 + $0x3f8] sm:$0xf]  ;;  %v6010_v42 = vld [vmem:[%s9710_s0 + $0x3f4] sm:$0xf] }
 0x16e   :  { %1288 = vst [vmem:[#allocation0 + $0x7f8] sm:$0xf] %v6008_v38  ;;  %v6011_v43 = vld [vmem:[%s9710_s0 + $0x3f0] sm:$0xf]  ;;  %3710 = vrot.lane.b32.xlu0 %v3709_v40, %s6518_s10  ;;  %1293 = vst [vmem:[#allocation0 + $0x7f0] sm:$0xf] %v6009_v41 }
 0x16f   :  { %v3718_v44 = vld [vmem:[#allocation0 + $0x5c3] ss:$8 sm:$0xf0]   ;;  %1298 = vst [vmem:[#allocation0 + $0x7e8] sm:$0xf] %v6010_v42 }
 0x170   :  { %1303 = vst [vmem:[#allocation0 + $0x7e0] sm:$0xf] %v6011_v43  ;;  %v6012_v45 = vld [vmem:[%s9710_s0 + $0x3ec] sm:$0xf]  ;;  %v6013_v48 = vld [vmem:[%s9710_s0 + $0x3e8] sm:$0xf] }
 0x171   :  { %1308 = vst [vmem:[#allocation0 + $0x7d8] sm:$0xf] %v6012_v45  ;;  %v6014_v51 = vld [vmem:[%s9710_s0 + $0x3e4] sm:$0xf]  ;;  %v6015_v52 = vld [vmem:[%s9710_s0 + $0x3e0] sm:$0xf] }
 0x172   :  { %v3716_v54 = vld [vmem:[#allocation0 + $0x5c3] ss:$8 sm:$0xf]   ;;  %1313 = vst [vmem:[#allocation0 + $0x7d0] sm:$0xf] %v6013_v48 }
 0x173   :  { %1318 = vst [vmem:[#allocation0 + $0x7c8] sm:$0xf] %v6014_v51  ;;  %1323 = vst [vmem:[#allocation0 + $0x7c0] sm:$0xf] %v6015_v52  ;;  %v5976_v55 = vld [vmem:[%s9710_s0 + $0x47c] sm:$0xf]  ;;  %v3720_v57 = vsel %vm2562_vm0, %v3718_v44, %v3716_v54  ;;  %v8100_v44 = vpop.permute.xlu1 %3435  }
 0x174   :  { %v3729_v58 = vld [vmem:[#allocation0 + $0x6c3] ss:$8 sm:$0xf0]   ;;  %1128 = vst [vmem:[#allocation0 + $0x8f8] sm:$0xf] %v5976_v55  ;;  %3721 = vrot.lane.b32.xlu1 %v3720_v57, %s6518_s10 }
 0x175   :  { %v5977_v59 = vld [vmem:[%s9710_s0 + $0x478] sm:$0xf]  ;;  %v5978_v61 = vld [vmem:[%s9710_s0 + $0x474] sm:$0xf]  ;;  %v5979_v63 = vld [vmem:[%s9710_s0 + $0x470] sm:$0xf] }
 0x176   :  { %1133 = vst [vmem:[#allocation0 + $0x8f0] sm:$0xf] %v5977_v59  ;;  %v5980_v0 = vld [vmem:[%s9710_s0 + $0x46c] sm:$0xf]  ;;  %1138 = vst [vmem:[#allocation0 + $0x8e8] sm:$0xf] %v5978_v61 }
 0x177   :  { %v3727_v2 = vld [vmem:[#allocation0 + $0x6c3] ss:$8 sm:$0xf]   ;;  %1143 = vst [vmem:[#allocation0 + $0x8e0] sm:$0xf] %v5979_v63 }
 0x178   :  { %1148 = vst [vmem:[#allocation0 + $0x8d8] sm:$0xf] %v5980_v0  ;;  %v5981_v5 = vld [vmem:[%s9710_s0 + $0x468] sm:$0xf]  ;;  %v3731_v6 = vsel %vm2562_vm0, %v3729_v58, %v3727_v2  ;;  %v5982_v7 = vld [vmem:[%s9710_s0 + $0x464] sm:$0xf]  ;;  %v8146_v2 = vpop.permute.xlu0 %3446  }
 0x179   :  { %1153 = vst [vmem:[#allocation0 + $0x8d0] sm:$0xf] %v5981_v5  ;;  %v5983_v8 = vld [vmem:[%s9710_s0 + $0x460] sm:$0xf]  ;;  %v5944_v9 = vld [vmem:[%s9710_s0 + $0x4fc] sm:$0xf]  ;;  %3732 = vrot.lane.b32.xlu0 %v3731_v6, %s6518_s10 }
 0x17a   :  { %v3740_v15 = vld [vmem:[#allocation0 + $0x7c3] ss:$8 sm:$0xf0]   ;;  %1158 = vst [vmem:[#allocation0 + $0x8c8] sm:$0xf] %v5982_v7 }
 0x17b   :  { %1163 = vst [vmem:[#allocation0 + $0x8c0] sm:$0xf] %v5983_v8  ;;  %968 = vst [vmem:[#allocation0 + $0x9f8] sm:$0xf] %v5944_v9  ;;  %v5945_v17 = vld [vmem:[%s9710_s0 + $0x4f8] sm:$0xf] }
 0x17c   :  { %973 = vst [vmem:[#allocation0 + $0x9f0] sm:$0xf] %v5945_v17  ;;  %v5946_v18 = vld [vmem:[%s9710_s0 + $0x4f4] sm:$0xf]  ;;  %v5947_v19 = vld [vmem:[%s9710_s0 + $0x4f0] sm:$0xf] }
 0x17d   :  { %v5948_v21 = vld [vmem:[%s9710_s0 + $0x4ec] sm:$0xf]  ;;  %v3738_v22 = vld [vmem:[#allocation0 + $0x7c3] ss:$8 sm:$0xf]  }
 0x17e   :  { %978 = vst [vmem:[#allocation0 + $0x9e8] sm:$0xf] %v5946_v18  ;;  %983 = vst [vmem:[#allocation0 + $0x9e0] sm:$0xf] %v5947_v19  ;;  %v5949_v24 = vld [vmem:[%s9710_s0 + $0x4e8] sm:$0xf]  ;;  %v3742_v26 = vsel %vm2562_vm0, %v3740_v15, %v3738_v22 }
 0x17f   :  { %988 = vst [vmem:[#allocation0 + $0x9d8] sm:$0xf] %v5948_v21  ;;  %993 = vst [vmem:[#allocation0 + $0x9d0] sm:$0xf] %v5949_v24  ;;  %v5950_v27 = vld [vmem:[%s9710_s0 + $0x4e4] sm:$0xf]  ;;  %3743 = vrot.lane.b32.xlu1 %v3742_v26, %s6518_s10  ;;  %v8169_v26 = vpop.permute.xlu1 %3457  }
 0x180   :  { %v5951_v31 = vld [vmem:[%s9710_s0 + $0x4e0] sm:$0xf]  ;;  %v5912_v33 = vld [vmem:[%s9710_s0 + $0x57c] sm:$0xf]  ;;  %998 = vst [vmem:[#allocation0 + $0x9c8] sm:$0xf] %v5950_v27 }
 0x181   :  { %1003 = vst [vmem:[#allocation0 + $0x9c0] sm:$0xf] %v5951_v31  ;;  %v2560_v34 = vld [vmem:[#allocation0] ss:$8 sm:$0xf]  }
 0x182   :  { %v2561_v37 = vld [vmem:[#allocation0] ss:$8 sm:$0xf0]   ;;  %808 = vst [vmem:[#allocation0 + $0xaf8] sm:$0xf] %v5912_v33 }
 0x183   :  { %v3751_v38 = vld [vmem:[#allocation0 + $0x8c3] ss:$8 sm:$0xf0]   ;;  %v2563_v40 = vsel %vm2562_vm0, %v2561_v37, %v2560_v34  ;;  %v2630_v41 = vld [vmem:[#allocation0 + $0x200] ss:$8 sm:$0xf]  }
 0x184   :  { %2565 = vst.msk [vmem:[%s9711_s1] sm:$0xff] %vm2564_vm1, %v2563_v40   ;;  %v2632_v42 = vld [vmem:[#allocation0 + $0x200] ss:$8 sm:$0xf0]   ;;  %v5914_v48 = vld [vmem:[%s9710_s0 + $0x574] sm:$0xf]  ;;  %v8205_v40 = vpop.permute.xlu0 %3468  }
 0x185   :  { %v5913_v43 = vld [vmem:[%s9710_s0 + $0x578] sm:$0xf]  ;;  %3142 = vst.msk [vmem:[%s9711_s1] sm:$0xff] %vm3141_vm2, %v7364_v29   ;;  %v2634_v29 = vsel %vm2562_vm0, %v2632_v42, %v2630_v41  ;;  %818 = vst [vmem:[#allocation0 + $0xae8] sm:$0xf] %v5914_v48 }
 0x186   :  { %v3749_v45 = vld [vmem:[#allocation0 + $0x8c3] ss:$8 sm:$0xf]   ;;  %813 = vst [vmem:[#allocation0 + $0xaf0] sm:$0xf] %v5913_v43  ;;  %6270 = vst.msk [vmem:[%s9711_s1 + $0x40] sm:$0xff] %vm2564_vm1, %v2634_v29  }
 0x187   :  { %v3753_v51 = vsel %vm2562_vm0, %v3751_v38, %v3749_v45  ;;  %v5915_v52 = vld [vmem:[%s9710_s0 + $0x570] sm:$0xf]  ;;  %v5916_v54 = vld [vmem:[%s9710_s0 + $0x56c] sm:$0xf]  ;;  %v5917_v55 = vld [vmem:[%s9710_s0 + $0x568] sm:$0xf] }
 0x188   :  { %3754 = vrot.lane.b32.xlu0 %v3753_v51, %s6518_s10  ;;  %v3762_v57 = vld [vmem:[#allocation0 + $0x9c3] ss:$8 sm:$0xf0]   ;;  %6327 = vst.msk [vmem:[%s9711_s1 + $0x40] sm:$0xff] %vm3141_vm2, %v7389_v39   ;;  %823 = vst [vmem:[#allocation0 + $0xae0] sm:$0xf] %v5915_v52 }
 0x189   :  { %828 = vst [vmem:[#allocation0 + $0xad8] sm:$0xf] %v5916_v54  ;;  %833 = vst [vmem:[#allocation0 + $0xad0] sm:$0xf] %v5917_v55  ;;  %v5918_v39 = vld [vmem:[%s9710_s0 + $0x564] sm:$0xf] }
 0x18a   :  { %838 = vst [vmem:[#allocation0 + $0xac8] sm:$0xf] %v5918_v39  ;;  %v5919_v58 = vld [vmem:[%s9710_s0 + $0x560] sm:$0xf]  ;;  %v5880_v59 = vld [vmem:[%s9710_s0 + $0x5fc] sm:$0xf] }
 0x18b   :  { %v5881_v61 = vld [vmem:[%s9710_s0 + $0x5f8] sm:$0xf]  ;;  %843 = vst [vmem:[#allocation0 + $0xac0] sm:$0xf] %v5919_v58  ;;  %648 = vst [vmem:[#allocation0 + $0xbf8] sm:$0xf] %v5880_v59  ;;  %v8234_v58 = vpop.permute.xlu1 %3479  }
 0x18c   :  { %v3760_v63 = vld [vmem:[#allocation0 + $0x9c3] ss:$8 sm:$0xf]   ;;  %653 = vst [vmem:[#allocation0 + $0xbf0] sm:$0xf] %v5881_v61 }
 0x18d   :  { %v5882_v0 = vld [vmem:[%s9710_s0 + $0x5f4] sm:$0xf]  ;;  %v3764_v5 = vsel %vm2562_vm0, %v3762_v57, %v3760_v63  ;;  %v5883_v6 = vld [vmem:[%s9710_s0 + $0x5f0] sm:$0xf]  ;;  %v5884_v7 = vld [vmem:[%s9710_s0 + $0x5ec] sm:$0xf] }
 0x18e   :  { %658 = vst [vmem:[#allocation0 + $0xbe8] sm:$0xf] %v5882_v0  ;;  %v5885_v8 = vld [vmem:[%s9710_s0 + $0x5e8] sm:$0xf]  ;;  %3765 = vrot.lane.b32.xlu1 %v3764_v5, %s6518_s10  ;;  %663 = vst [vmem:[#allocation0 + $0xbe0] sm:$0xf] %v5883_v6 }
 0x18f   :  { %668 = vst [vmem:[#allocation0 + $0xbd8] sm:$0xf] %v5884_v7  ;;  %673 = vst [vmem:[#allocation0 + $0xbd0] sm:$0xf] %v5885_v8  ;;  %v5886_v9 = vld [vmem:[%s9710_s0 + $0x5e4] sm:$0xf] }
 0x190   :  { %v5887_v15 = vld [vmem:[%s9710_s0 + $0x5e0] sm:$0xf]  ;;  %v5848_v17 = vld [vmem:[%s9710_s0 + $0x67c] sm:$0xf]  ;;  %678 = vst [vmem:[#allocation0 + $0xbc8] sm:$0xf] %v5886_v9 }
 0x191   :  { %683 = vst [vmem:[#allocation0 + $0xbc0] sm:$0xf] %v5887_v15  ;;  %v2594_v18 = vld [vmem:[#allocation0 + $0x100] ss:$8 sm:$0xf]  }
 0x192   :  { %v2596_v19 = vld [vmem:[#allocation0 + $0x100] ss:$8 sm:$0xf0]   ;;  %488 = vst [vmem:[#allocation0 + $0xcf8] sm:$0xf] %v5848_v17 }
 0x193   :  { %v2598_v21 = vsel %vm2562_vm0, %v2596_v19, %v2594_v18  ;;  %v2666_v22 = vld [vmem:[#allocation0 + $0x300] ss:$8 sm:$0xf]   ;;  %v3773_v27 = vld [vmem:[#allocation0 + $0xac3] ss:$8 sm:$0xf0]   ;;  %v8263_v19 = vpop.permute.xlu0 %3490  }
 0x194   :  { %v2668_v24 = vld [vmem:[#allocation0 + $0x300] ss:$8 sm:$0xf0]   ;;  %6266 = vst.msk [vmem:[%s9711_s1 + $0x20] sm:$0xff] %vm2564_vm1, %v2598_v21   ;;  %v5852_v37 = vld [vmem:[%s9710_s0 + $0x66c] sm:$0xf] }
 0x195   :  { %v2670_v31 = vsel %vm2562_vm0, %v2668_v24, %v2666_v22  ;;  %v5849_v33 = vld [vmem:[%s9710_s0 + $0x678] sm:$0xf]  ;;  %6326 = vst.msk [vmem:[%s9711_s1 + $0x20] sm:$0xff] %vm3141_vm2, %v7407_v47   ;;  %v5850_v47 = vld [vmem:[%s9710_s0 + $0x674] sm:$0xf] }
 0x196   :  { %6274 = vst.msk [vmem:[%s9711_s1 + $0x60] sm:$0xff] %vm2564_vm1, %v2670_v31   ;;  %493 = vst [vmem:[#allocation0 + $0xcf0] sm:$0xf] %v5849_v33  ;;  %v5851_v34 = vld [vmem:[%s9710_s0 + $0x670] sm:$0xf] }
 0x197   :  { %v3771_v38 = vld [vmem:[#allocation0 + $0xac3] ss:$8 sm:$0xf]   ;;  %6328 = vst.msk [vmem:[%s9711_s1 + $0x60] sm:$0xff] %vm3141_vm2, %v7441_v60   ;;  %498 = vst [vmem:[#allocation0 + $0xce8] sm:$0xf] %v5850_v47 }
 0x198   :  { %503 = vst [vmem:[#allocation0 + $0xce0] sm:$0xf] %v5851_v34  ;;  %508 = vst [vmem:[#allocation0 + $0xcd8] sm:$0xf] %v5852_v37  ;;  %v5853_v60 = vld [vmem:[%s9710_s0 + $0x668] sm:$0xf]  ;;  %v3775_v41 = vsel %vm2562_vm0, %v3773_v27, %v3771_v38 }
 0x199   :  { %513 = vst [vmem:[#allocation0 + $0xcd0] sm:$0xf] %v5853_v60  ;;  %v5854_v42 = vld [vmem:[%s9710_s0 + $0x664] sm:$0xf]  ;;  %v5855_v43 = vld [vmem:[%s9710_s0 + $0x660] sm:$0xf]  ;;  %3776 = vrot.lane.b32.xlu0 %v3775_v41, %s6518_s10  ;;  %v8300_v60 = vpop.permute.xlu1 %3501  }
 0x19a   :  { %v5816_v45 = vld [vmem:[%s9710_s0 + $0x6fc] sm:$0xf]  ;;  %v3784_v29 = vld [vmem:[#allocation0 + $0xbc3] ss:$8 sm:$0xf0]  }
 0x19b   :  { %518 = vst [vmem:[#allocation0 + $0xcc8] sm:$0xf] %v5854_v42  ;;  %523 = vst [vmem:[#allocation0 + $0xcc0] sm:$0xf] %v5855_v43  ;;  %v5817_v48 = vld [vmem:[%s9710_s0 + $0x6f8] sm:$0xf] }
 0x19c   :  { %328 = vst [vmem:[#allocation0 + $0xdf8] sm:$0xf] %v5816_v45  ;;  %v3782_v51 = vld [vmem:[#allocation0 + $0xbc3] ss:$8 sm:$0xf]  }
 0x19d   :  { %333 = vst [vmem:[#allocation0 + $0xdf0] sm:$0xf] %v5817_v48  ;;  %v5818_v52 = vld [vmem:[%s9710_s0 + $0x6f4] sm:$0xf]  ;;  %v3786_v54 = vsel %vm2562_vm0, %v3784_v29, %v3782_v51  ;;  %v5819_v55 = vld [vmem:[%s9710_s0 + $0x6f0] sm:$0xf] }
 0x19e   :  { %338 = vst [vmem:[#allocation0 + $0xde8] sm:$0xf] %v5818_v52  ;;  %v5820_v57 = vld [vmem:[%s9710_s0 + $0x6ec] sm:$0xf]  ;;  %v5821_v39 = vld [vmem:[%s9710_s0 + $0x6e8] sm:$0xf]  ;;  %3787 = vrot.lane.b32.xlu1 %v3786_v54, %s6518_s10  ;;  %v8319_v54 = vpop.permute.xlu0 %3512  }
 0x19f   :  { %343 = vst [vmem:[#allocation0 + $0xde0] sm:$0xf] %v5819_v55  ;;  %348 = vst [vmem:[#allocation0 + $0xdd8] sm:$0xf] %v5820_v57  ;;  %v5822_v59 = vld [vmem:[%s9710_s0 + $0x6e4] sm:$0xf] }
 0x1a0   :  { %353 = vst [vmem:[#allocation0 + $0xdd0] sm:$0xf] %v5821_v39  ;;  %v5823_v61 = vld [vmem:[%s9710_s0 + $0x6e0] sm:$0xf]  ;;  %v5784_v63 = vld [vmem:[%s9710_s0 + $0x77c] sm:$0xf] }
 0x1a1   :  { %358 = vst [vmem:[#allocation0 + $0xdc8] sm:$0xf] %v5822_v59  ;;  %363 = vst [vmem:[#allocation0 + $0xdc0] sm:$0xf] %v5823_v61  ;;  %v5785_v15 = vld [vmem:[%s9710_s0 + $0x778] sm:$0xf] }
 0x1a2   :  { %v2702_v0 = vld [vmem:[#allocation0 + $0x400] ss:$8 sm:$0xf]   ;;  %168 = vst [vmem:[#allocation0 + $0xef8] sm:$0xf] %v5784_v63 }
 0x1a3   :  { %v2704_v5 = vld [vmem:[#allocation0 + $0x400] ss:$8 sm:$0xf0]   ;;  %v3795_v6 = vld [vmem:[#allocation0 + $0xcc3] ss:$8 sm:$0xf0]  }
 0x1a4   :  { %v2706_v7 = vsel %vm2562_vm0, %v2704_v5, %v2702_v0  ;;  %v2738_v8 = vld [vmem:[#allocation0 + $0x500] ss:$8 sm:$0xf]   ;;  %v3793_v17 = vld [vmem:[#allocation0 + $0xcc3] ss:$8 sm:$0xf]  }
 0x1a5   :  { %6278 = vst.msk [vmem:[%s9711_s1 + $0x80] sm:$0xff] %vm2564_vm1, %v2706_v7   ;;  %v2740_v9 = vld [vmem:[#allocation0 + $0x500] ss:$8 sm:$0xf0]   ;;  %173 = vst [vmem:[#allocation0 + $0xef0] sm:$0xf] %v5785_v15  ;;  %v3797_v21 = vsel %vm2562_vm0, %v3795_v6, %v3793_v17 }
 0x1a6   :  { %6329 = vst.msk [vmem:[%s9711_s1 + $0x80] sm:$0xff] %vm3141_vm2, %v7472_v10   ;;  %v2742_v10 = vsel %vm2562_vm0, %v2740_v9, %v2738_v8  ;;  %v5786_v18 = vld [vmem:[%s9710_s0 + $0x774] sm:$0xf]  ;;  %v5787_v22 = vld [vmem:[%s9710_s0 + $0x770] sm:$0xf]  ;;  %3798 = vrot.lane.b32.xlu0 %v3797_v21, %s6518_s10 }
 0x1a7   :  { %6282 = vst.msk [vmem:[%s9711_s1 + $0xa0] sm:$0xff] %vm2564_vm1, %v2742_v10   ;;  %178 = vst [vmem:[#allocation0 + $0xee8] sm:$0xf] %v5786_v18  ;;  %v5788_v24 = vld [vmem:[%s9710_s0 + $0x76c] sm:$0xf] }
 0x1a8   :  { %v5789_v27 = vld [vmem:[%s9710_s0 + $0x768] sm:$0xf]  ;;  %6330 = vst.msk [vmem:[%s9711_s1 + $0xa0] sm:$0xff] %vm3141_vm2, %v7501_v23   ;;  %183 = vst [vmem:[#allocation0 + $0xee0] sm:$0xf] %v5787_v22 }
 0x1a9   :  { %188 = vst [vmem:[#allocation0 + $0xed8] sm:$0xf] %v5788_v24  ;;  %193 = vst [vmem:[#allocation0 + $0xed0] sm:$0xf] %v5789_v27  ;;  %v5790_v23 = vld [vmem:[%s9710_s0 + $0x764] sm:$0xf] }
 0x1aa   :  { %v5791_v31 = vld [vmem:[%s9710_s0 + $0x760] sm:$0xf]  ;;  %v5752_v33 = vld [vmem:[%s9710_s0 + $0x7fc] sm:$0xf]  ;;  %198 = vst [vmem:[#allocation0 + $0xec8] sm:$0xf] %v5790_v23 }
 0x1ab   :  { %v3806_v47 = vld [vmem:[#allocation0 + $0xdc3] ss:$8 sm:$0xf0]   ;;  %203 = vst [vmem:[#allocation0 + $0xec0] sm:$0xf] %v5791_v31 }
 0x1ac   :  { %8 = vst [vmem:[#allocation0 + $0xff8] sm:$0xf] %v5752_v33  ;;  %v5753_v34 = vld [vmem:[%s9710_s0 + $0x7f8] sm:$0xf]  ;;  %v5754_v38 = vld [vmem:[%s9710_s0 + $0x7f4] sm:$0xf] }
 0x1ad   :  { %v3804_v37 = vld [vmem:[#allocation0 + $0xdc3] ss:$8 sm:$0xf]   ;;  %13 = vst [vmem:[#allocation0 + $0xff0] sm:$0xf] %v5753_v34 }
 0x1ae   :  { %v3808_v41 = vsel %vm2562_vm0, %v3806_v47, %v3804_v37  ;;  %18 = vst [vmem:[#allocation0 + $0xfe8] sm:$0xf] %v5754_v38  ;;  %v5755_v42 = vld [vmem:[%s9710_s0 + $0x7f0] sm:$0xf]  ;;  %v5756_v43 = vld [vmem:[%s9710_s0 + $0x7ec] sm:$0xf]  ;;  %v8364_v47 = vpop.permute.xlu0 %3534  }
 0x1af   :  { %v5757_v45 = vld [vmem:[%s9710_s0 + $0x7e8] sm:$0xf]  ;;  %3809 = vrot.lane.b32.xlu1 %v3808_v41, %s6518_s10  ;;  %23 = vst [vmem:[#allocation0 + $0xfe0] sm:$0xf] %v5755_v42  ;;  %28 = vst [vmem:[#allocation0 + $0xfd8] sm:$0xf] %v5756_v43 }
 0x1b0   :  { %33 = vst [vmem:[#allocation0 + $0xfd0] sm:$0xf] %v5757_v45  ;;  %v5758_v29 = vld [vmem:[%s9710_s0 + $0x7e4] sm:$0xf]  ;;  %v5759_v48 = vld [vmem:[%s9710_s0 + $0x7e0] sm:$0xf] }
 0x1b1   :  { %38 = vst [vmem:[#allocation0 + $0xfc8] sm:$0xf] %v5758_v29  ;;  %43 = vst [vmem:[#allocation0 + $0xfc0] sm:$0xf] %v5759_v48 }
 0x1b2   :  { %v2774_v51 = vld [vmem:[#allocation0 + $0x600] ss:$8 sm:$0xf]   ;;  %v3817_v59 = vld [vmem:[#allocation0 + $0xec3] ss:$8 sm:$0xf0]  }
 0x1b3   :  { %v2776_v52 = vld [vmem:[#allocation0 + $0x600] ss:$8 sm:$0xf0]   ;;  %v3837_v63 = vld [vmem:[#allocation0 + $0x2] ss:$8 sm:$0xf]  }
 0x1b4   :  { %v2778_v55 = vsel %vm2562_vm0, %v2776_v52, %v2774_v51  ;;  %v2810_v57 = vld [vmem:[#allocation0 + $0x700] ss:$8 sm:$0xf]   ;;  %v3815_v0 = vld [vmem:[#allocation0 + $0xec3] ss:$8 sm:$0xf]  }
 0x1b5   :  { %v2812_v39 = vld [vmem:[#allocation0 + $0x700] ss:$8 sm:$0xf0]   ;;  %6286 = vst.msk [vmem:[%s9711_s1 + $0xc0] sm:$0xff] %vm2564_vm1, %v2778_v55   ;;  %v3819_v5 = vsel %vm2562_vm0, %v3817_v59, %v3815_v0 }
 0x1b6   :  { %v2814_v61 = vsel %vm2562_vm0, %v2812_v39, %v2810_v57  ;;  %6331 = vst.msk [vmem:[%s9711_s1 + $0xc0] sm:$0xff] %vm3141_vm2, %v7519_v32   ;;  %v3839_v32 = vld [vmem:[#allocation0 + $0x2] ss:$8 sm:$0xf0]   ;;  %3820 = vrot.lane.b32.xlu0 %v3819_v5, %s6518_s10 }
 0x1b7   :  { %6290 = vst.msk [vmem:[%s9711_s1 + $0xe0] sm:$0xff] %vm2564_vm1, %v2814_v61   ;;  %v3847_v6 = vld [vmem:[#allocation0 + $0x102] ss:$8 sm:$0xf]   ;;  %v3841_v17 = vsel %vm2562_vm0, %v3839_v32, %v3837_v63 }
 0x1b8   :  { %6332 = vst.msk [vmem:[%s9711_s1 + $0xe0] sm:$0xff] %vm3141_vm2, %v7553_v46   ;;  %v8342_v46 = vpop.permute.xlu1 %3523   ;;  %v3849_v7 = vld [vmem:[#allocation0 + $0x102] ss:$8 sm:$0xf0]  }
 0x1b9   :  { %v2846_v8 = vld [vmem:[#allocation0 + $0x800] ss:$8 sm:$0xf]   ;;  %v3828_v15 = vld [vmem:[#allocation0 + $0xfc3] ss:$8 sm:$0xf0]   ;;  %v3851_v34 = vsel %vm2562_vm0, %v3849_v7, %v3847_v6  ;;  %v8405_v6 = vpop.permute.xlu0 %3556  }
 0x1ba   :  { %v2848_v9 = vld [vmem:[#allocation0 + $0x800] ss:$8 sm:$0xf0]   ;;  %v3826_v21 = vld [vmem:[#allocation0 + $0xfc3] ss:$8 sm:$0xf]  }
 0x1bb   :  { %v2850_v10 = vsel %vm2562_vm0, %v2848_v9, %v2846_v8  ;;  %v2882_v18 = vld [vmem:[#allocation0 + $0x900] ss:$8 sm:$0xf]   ;;  %v3830_v24 = vsel %vm2562_vm0, %v3828_v15, %v3826_v21  ;;  %v3858_v27 = vld [vmem:[#allocation0 + $0x202] ss:$8 sm:$0xf]  }
 0x1bc   :  { %6294 = vst.msk [vmem:[%s9711_s1 + $0x100] sm:$0xff] %vm2564_vm1, %v2850_v10   ;;  %v2884_v22 = vld [vmem:[#allocation0 + $0x900] ss:$8 sm:$0xf0]   ;;  %3831 = vrot.lane.b32.xlu1 %v3830_v24, %s6518_s10  ;;  %s6519_s10 = smov 64   ;;  %v8390_v52 = vpop.permute.xlu1 %3545  }
 0x1bd   :  { %6333 = vst.msk [vmem:[%s9711_s1 + $0x100] sm:$0xff] %vm3141_vm2, %v7584_v62   ;;  %v2886_v62 = vsel %vm2562_vm0, %v2884_v22, %v2882_v18  ;;  %v3860_v23 = vld [vmem:[#allocation0 + $0x202] ss:$8 sm:$0xf0]   ;;  %3842 = vrot.lane.b32.xlu0 %v3841_v17, %s6519_s10 }
 0x1be   :  { %6298 = vst.msk [vmem:[%s9711_s1 + $0x120] sm:$0xff] %vm2564_vm1, %v2886_v62   ;;  %v3869_v31 = vld [vmem:[#allocation0 + $0x302] ss:$8 sm:$0xf]  }
 0x1bf   :  { %v3871_v33 = vld [vmem:[#allocation0 + $0x302] ss:$8 sm:$0xf0]   ;;  %6334 = vst.msk [vmem:[%s9711_s1 + $0x120] sm:$0xff] %vm3141_vm2, %v7613_v12   ;;  %v3862_v12 = vsel %vm2562_vm0, %v3860_v23, %v3858_v27 }
 0x1c0   :  { %v2918_v37 = vld [vmem:[#allocation0 + $0xa00] ss:$8 sm:$0xf]   ;;  %v3880_v29 = vld [vmem:[#allocation0 + $0x402] ss:$8 sm:$0xf]   ;;  %3852 = vrot.lane.b32.xlu1 %v3851_v34, %s6519_s10  ;;  %v3873_v55 = vsel %vm2562_vm0, %v3871_v33, %v3869_v31  ;;  %v8431_v62 = vpop.permute.xlu1 %3567  }
 0x1c1   :  { %v2920_v38 = vld [vmem:[#allocation0 + $0xa00] ss:$8 sm:$0xf0]   ;;  %v3882_v48 = vld [vmem:[#allocation0 + $0x402] ss:$8 sm:$0xf0]   ;;  %3863 = vrot.lane.b32.xlu0 %v3862_v12, %s6519_s10 }
 0x1c2   :  { %v2922_v41 = vsel %vm2562_vm0, %v2920_v38, %v2918_v37  ;;  %v2954_v42 = vld [vmem:[#allocation0 + $0xb00] ss:$8 sm:$0xf]   ;;  %v3893_v51 = vld [vmem:[#allocation0 + $0x502] ss:$8 sm:$0xf0]  }
 0x1c3   :  { %v2956_v43 = vld [vmem:[#allocation0 + $0xb00] ss:$8 sm:$0xf0]   ;;  %6302 = vst.msk [vmem:[%s9711_s1 + $0x140] sm:$0xff] %vm2564_vm1, %v2922_v41  }
 0x1c4   :  { %v2958_v45 = vsel %vm2562_vm0, %v2956_v43, %v2954_v42  ;;  %6335 = vst.msk [vmem:[%s9711_s1 + $0x140] sm:$0xff] %vm3141_vm2, %v7631_v20   ;;  %v3891_v20 = vld [vmem:[#allocation0 + $0x502] ss:$8 sm:$0xf]   ;;  %3874 = vrot.lane.b32.xlu1 %v3873_v55, %s6519_s10 }
 0x1c5   :  { %6306 = vst.msk [vmem:[%s9711_s1 + $0x160] sm:$0xff] %vm2564_vm1, %v2958_v45   ;;  %v2990_v57 = vld [vmem:[#allocation0 + $0xc00] ss:$8 sm:$0xf]   ;;  %v3895_v8 = vsel %vm2562_vm0, %v3893_v51, %v3891_v20  ;;  %v8468_v45 = vpop.permute.xlu0 %3578  }
 0x1c6   :  { %6336 = vst.msk [vmem:[%s9711_s1 + $0x160] sm:$0xff] %vm3141_vm2, %v7665_v36   ;;  %v3884_v36 = vsel %vm2562_vm0, %v3882_v48, %v3880_v29  ;;  %v2992_v39 = vld [vmem:[#allocation0 + $0xc00] ss:$8 sm:$0xf0]  }
 0x1c7   :  { %v2994_v59 = vsel %vm2562_vm0, %v2992_v39, %v2990_v57  ;;  %v3026_v61 = vld [vmem:[#allocation0 + $0xd00] ss:$8 sm:$0xf]   ;;  %v3902_v32 = vld [vmem:[#allocation0 + $0x602] ss:$8 sm:$0xf]   ;;  %3885 = vrot.lane.b32.xlu0 %v3884_v36, %s6519_s10 }
 0x1c8   :  { %v3028_v63 = vld [vmem:[#allocation0 + $0xd00] ss:$8 sm:$0xf0]   ;;  %6310 = vst.msk [vmem:[%s9711_s1 + $0x180] sm:$0xff] %vm2564_vm1, %v2994_v59   ;;  %3896 = vrot.lane.b32.xlu1 %v3895_v8, %s6519_s10 }
 0x1c9   :  { %v3030_v0 = vsel %vm2562_vm0, %v3028_v63, %v3026_v61  ;;  %v3904_v5 = vld [vmem:[#allocation0 + $0x602] ss:$8 sm:$0xf0]   ;;  %6337 = vst.msk [vmem:[%s9711_s1 + $0x180] sm:$0xff] %vm3141_vm2, %v7696_v53   ;;  %v8494_v63 = vpop.permute.xlu1 %3589  }
 0x1ca   :  { %6314 = vst.msk [vmem:[%s9711_s1 + $0x1a0] sm:$0xff] %vm2564_vm1, %v3030_v0   ;;  %v3913_v53 = vld [vmem:[#allocation0 + $0x702] ss:$8 sm:$0xf]  }
 0x1cb   :  { %v3915_v7 = vld [vmem:[#allocation0 + $0x702] ss:$8 sm:$0xf0]   ;;  %6338 = vst.msk [vmem:[%s9711_s1 + $0x1a0] sm:$0xff] %vm3141_vm2, %v7725_v4   ;;  %v3906_v4 = vsel %vm2562_vm0, %v3904_v5, %v3902_v32 }
 0x1cc   :  { %v3062_v9 = vld [vmem:[#allocation0 + $0xe00] ss:$8 sm:$0xf]   ;;  %v3924_v22 = vld [vmem:[#allocation0 + $0x802] ss:$8 sm:$0xf]   ;;  %3907 = vrot.lane.b32.xlu0 %v3906_v4, %s6519_s10  ;;  %v3917_v23 = vsel %vm2562_vm0, %v3915_v7, %v3913_v53 }
 0x1cd   :  { %v3064_v15 = vld [vmem:[#allocation0 + $0xe00] ss:$8 sm:$0xf0]   ;;  %v3926_v24 = vld [vmem:[#allocation0 + $0x802] ss:$8 sm:$0xf0]   ;;  %3918 = vrot.lane.b32.xlu1 %v3917_v23, %s6519_s10 }
 0x1ce   :  { %v3066_v17 = vsel %vm2562_vm0, %v3064_v15, %v3062_v9  ;;  %v3098_v10 = vld [vmem:[#allocation0 + $0xf00] ss:$8 sm:$0xf]   ;;  %v3937_v27 = vld [vmem:[#allocation0 + $0x902] ss:$8 sm:$0xf0]  }
 0x1cf   :  { %v3100_v18 = vld [vmem:[#allocation0 + $0xf00] ss:$8 sm:$0xf0]   ;;  %6318 = vst.msk [vmem:[%s9711_s1 + $0x1c0] sm:$0xff] %vm2564_vm1, %v3066_v17   ;;  %v8509_v17 = vpop.permute.xlu0 %3600  }
 0x1d0   :  { %v3102_v21 = vsel %vm2562_vm0, %v3100_v18, %v3098_v10  ;;  %6339 = vst.msk [vmem:[%s9711_s1 + $0x1c0] sm:$0xff] %vm3141_vm2, %v7743_v14   ;;  %v3935_v14 = vld [vmem:[#allocation0 + $0x902] ss:$8 sm:$0xf]  }
 0x1d1   :  { %6322 = vst.msk [vmem:[%s9711_s1 + $0x1e0] sm:$0xff] %vm2564_vm1, %v3102_v21   ;;  %v2567_v31 = vld [vmem:[#allocation0 + $0x40] ss:$8 sm:$0xf]   ;;  %v3939_v29 = vsel %vm2562_vm0, %v3937_v27, %v3935_v14 }
 0x1d2   :  { %6340 = vst.msk [vmem:[%s9711_s1 + $0x1e0] sm:$0xff] %vm3141_vm2, %v7777_v30   ;;  %v3928_v30 = vsel %vm2562_vm0, %v3926_v24, %v3924_v22  ;;  %v2569_v33 = vld [vmem:[#allocation0 + $0x40] ss:$8 sm:$0xf0]   ;;  %3940 = vrot.lane.b32.xlu1 %v3939_v29, %s6519_s10 }
 0x1d3   :  { %v2571_v34 = vsel %vm2562_vm0, %v2569_v33, %v2567_v31  ;;  %v2603_v12 = vld [vmem:[#allocation0 + $0x140] ss:$8 sm:$0xf]   ;;  %v3946_v41 = vld [vmem:[#allocation0 + $0xa02] ss:$8 sm:$0xf]   ;;  %3929 = vrot.lane.b32.xlu0 %v3928_v30, %s6519_s10  ;;  %v8535_v33 = vpop.permute.xlu1 %3611  }
 0x1d4   :  { %v2605_v37 = vld [vmem:[#allocation0 + $0x140] ss:$8 sm:$0xf0]   ;;  %6263 = vst.msk [vmem:[%s9711_s1 + $0x8] sm:$0xff] %vm2564_vm1, %v2571_v34  }
 0x1d5   :  { %v2607_v38 = vsel %vm2562_vm0, %v2605_v37, %v2603_v12  ;;  %v3948_v42 = vld [vmem:[#allocation0 + $0xa02] ss:$8 sm:$0xf0]   ;;  %6341 = vst.msk [vmem:[%s9711_s1 + $0x8] sm:$0xff] %vm3141_vm2, %v7808_v49  }
 0x1d6   :  { %6267 = vst.msk [vmem:[%s9711_s1 + $0x28] sm:$0xff] %vm2564_vm1, %v2607_v38   ;;  %v3957_v49 = vld [vmem:[#allocation0 + $0xb02] ss:$8 sm:$0xf]  }
 0x1d7   :  { %v3959_v43 = vld [vmem:[#allocation0 + $0xb02] ss:$8 sm:$0xf0]   ;;  %6342 = vst.msk [vmem:[%s9711_s1 + $0x28] sm:$0xff] %vm3141_vm2, %v7837_v1   ;;  %v3950_v1 = vsel %vm2562_vm0, %v3948_v42, %v3946_v41 }
 0x1d8   :  { %v2639_v48 = vld [vmem:[#allocation0 + $0x240] ss:$8 sm:$0xf]   ;;  %v3968_v39 = vld [vmem:[#allocation0 + $0xc02] ss:$8 sm:$0xf]   ;;  %3951 = vrot.lane.b32.xlu0 %v3950_v1, %s6519_s10  ;;  %v3961_v0 = vsel %vm2562_vm0, %v3959_v43, %v3957_v49 }
 0x1d9   :  { %v2641_v20 = vld [vmem:[#allocation0 + $0x240] ss:$8 sm:$0xf0]   ;;  %v3970_v59 = vld [vmem:[#allocation0 + $0xc02] ss:$8 sm:$0xf0]   ;;  %3962 = vrot.lane.b32.xlu1 %v3961_v0, %s6519_s10 }
 0x1da   :  { %v2643_v51 = vsel %vm2562_vm0, %v2641_v20, %v2639_v48  ;;  %v2675_v55 = vld [vmem:[#allocation0 + $0x340] ss:$8 sm:$0xf]   ;;  %v3981_v61 = vld [vmem:[#allocation0 + $0xd02] ss:$8 sm:$0xf0]   ;;  %v8572_v20 = vpop.permute.xlu0 %3622  }
 0x1db   :  { %v2677_v36 = vld [vmem:[#allocation0 + $0x340] ss:$8 sm:$0xf0]   ;;  %6271 = vst.msk [vmem:[%s9711_s1 + $0x48] sm:$0xff] %vm2564_vm1, %v2643_v51  }
 0x1dc   :  { %v2679_v57 = vsel %vm2562_vm0, %v2677_v36, %v2675_v55  ;;  %6343 = vst.msk [vmem:[%s9711_s1 + $0x48] sm:$0xff] %vm3141_vm2, %v7855_v11   ;;  %v3979_v11 = vld [vmem:[#allocation0 + $0xd02] ss:$8 sm:$0xf]  }
 0x1dd   :  { %6275 = vst.msk [vmem:[%s9711_s1 + $0x68] sm:$0xff] %vm2564_vm1, %v2679_v57   ;;  %v2711_v32 = vld [vmem:[#allocation0 + $0x440] ss:$8 sm:$0xf]   ;;  %v3983_v18 = vsel %vm2562_vm0, %v3981_v61, %v3979_v11 }
 0x1de   :  { %6344 = vst.msk [vmem:[%s9711_s1 + $0x68] sm:$0xff] %vm3141_vm2, %v7889_v28   ;;  %v3972_v28 = vsel %vm2562_vm0, %v3970_v59, %v3968_v39  ;;  %v2713_v5 = vld [vmem:[#allocation0 + $0x440] ss:$8 sm:$0xf0]   ;;  %3984 = vrot.lane.b32.xlu1 %v3983_v18, %s6519_s10  ;;  %v8613_v18 = vpop.permute.xlu0 %3644  }
 0x1df   :  { %v2715_v53 = vsel %vm2562_vm0, %v2713_v5, %v2711_v32  ;;  %v2747_v7 = vld [vmem:[#allocation0 + $0x540] ss:$8 sm:$0xf]   ;;  %v3990_v9 = vld [vmem:[#allocation0 + $0xe02] ss:$8 sm:$0xf]   ;;  %3973 = vrot.lane.b32.xlu0 %v3972_v28, %s6519_s10  ;;  %v8598_v32 = vpop.permute.xlu1 %3633  }
 0x1e0   :  { %v2749_v8 = vld [vmem:[#allocation0 + $0x540] ss:$8 sm:$0xf0]   ;;  %6279 = vst.msk [vmem:[%s9711_s1 + $0x88] sm:$0xff] %vm2564_vm1, %v2715_v53  }
 0x1e1   :  { %v2751_v4 = vsel %vm2562_vm0, %v2749_v8, %v2747_v7  ;;  %v3992_v15 = vld [vmem:[#allocation0 + $0xe02] ss:$8 sm:$0xf0]   ;;  %6345 = vst.msk [vmem:[%s9711_s1 + $0x88] sm:$0xff] %vm3141_vm2, %v7920_v50  }
 0x1e2   :  { %6283 = vst.msk [vmem:[%s9711_s1 + $0xa8] sm:$0xff] %vm2564_vm1, %v2751_v4   ;;  %v4001_v50 = vld [vmem:[#allocation0 + $0xf02] ss:$8 sm:$0xf]  }
 0x1e3   :  { %v4003_v10 = vld [vmem:[#allocation0 + $0xf02] ss:$8 sm:$0xf0]   ;;  %6346 = vst.msk [vmem:[%s9711_s1 + $0xa8] sm:$0xff] %vm3141_vm2, %v7949_v3   ;;  %v3994_v3 = vsel %vm2562_vm0, %v3992_v15, %v3990_v9 }
 0x1e4   :  { %v2783_v21 = vld [vmem:[#allocation0 + $0x640] ss:$8 sm:$0xf]   ;;  %v4012_v30 = vld [vmem:[#allocation0 + $0x42] ss:$8 sm:$0xf]   ;;  %3995 = vrot.lane.b32.xlu0 %v3994_v3, %s6519_s10  ;;  %v4005_v12 = vsel %vm2562_vm0, %v4003_v10, %v4001_v50 }
 0x1e5   :  { %v2785_v22 = vld [vmem:[#allocation0 + $0x640] ss:$8 sm:$0xf0]   ;;  %v4014_v31 = vld [vmem:[#allocation0 + $0x42] ss:$8 sm:$0xf0]   ;;  %4006 = vrot.lane.b32.xlu1 %v4005_v12, %s6519_s10 }
 0x1e6   :  { %v2787_v24 = vsel %vm2562_vm0, %v2785_v22, %v2783_v21  ;;  %v2819_v14 = vld [vmem:[#allocation0 + $0x740] ss:$8 sm:$0xf]   ;;  %v4025_v34 = vld [vmem:[#allocation0 + $0x142] ss:$8 sm:$0xf0]  }
 0x1e7   :  { %v2821_v27 = vld [vmem:[#allocation0 + $0x740] ss:$8 sm:$0xf0]   ;;  %6287 = vst.msk [vmem:[%s9711_s1 + $0xc8] sm:$0xff] %vm2564_vm1, %v2787_v24  }
 0x1e8   :  { %v2823_v23 = vsel %vm2562_vm0, %v2821_v27, %v2819_v14  ;;  %6347 = vst.msk [vmem:[%s9711_s1 + $0xc8] sm:$0xff] %vm3141_vm2, %v7967_v16   ;;  %v4023_v16 = vld [vmem:[#allocation0 + $0x142] ss:$8 sm:$0xf]  }
 0x1e9   :  { %6291 = vst.msk [vmem:[%s9711_s1 + $0xe8] sm:$0xff] %vm2564_vm1, %v2823_v23   ;;  %v2855_v37 = vld [vmem:[#allocation0 + $0x840] ss:$8 sm:$0xf]   ;;  %v4027_v51 = vsel %vm2562_vm0, %v4025_v34, %v4023_v16  ;;  %v8639_v34 = vpop.permute.xlu1 %3655  }
 0x1ea   :  { %6348 = vst.msk [vmem:[%s9711_s1 + $0xe8] sm:$0xff] %vm3141_vm2, %v8001_v35   ;;  %v4016_v35 = vsel %vm2562_vm0, %v4014_v31, %v4012_v30  ;;  %v2857_v38 = vld [vmem:[#allocation0 + $0x840] ss:$8 sm:$0xf0]   ;;  %4028 = vrot.lane.b32.xlu1 %v4027_v51, %s6519_s10 }
 0x1eb   :  { %v2859_v41 = vsel %vm2562_vm0, %v2857_v38, %v2855_v37  ;;  %v2891_v42 = vld [vmem:[#allocation0 + $0x940] ss:$8 sm:$0xf]   ;;  %v4034_v29 = vld [vmem:[#allocation0 + $0x242] ss:$8 sm:$0xf]   ;;  %4017 = vrot.lane.b32.xlu0 %v4016_v35, %s6519_s10 }
 0x1ec   :  { %v2893_v49 = vld [vmem:[#allocation0 + $0x940] ss:$8 sm:$0xf0]   ;;  %6295 = vst.msk [vmem:[%s9711_s1 + $0x108] sm:$0xff] %vm2564_vm1, %v2859_v41  }
 0x1ed   :  { %v2895_v43 = vsel %vm2562_vm0, %v2893_v49, %v2891_v42  ;;  %v4036_v1 = vld [vmem:[#allocation0 + $0x242] ss:$8 sm:$0xf0]   ;;  %6349 = vst.msk [vmem:[%s9711_s1 + $0x108] sm:$0xff] %vm3141_vm2, %v8032_v56  }
 0x1ee   :  { %6299 = vst.msk [vmem:[%s9711_s1 + $0x128] sm:$0xff] %vm2564_vm1, %v2895_v43   ;;  %v4045_v56 = vld [vmem:[#allocation0 + $0x342] ss:$8 sm:$0xf]  }
 0x1ef   :  { %v4047_v48 = vld [vmem:[#allocation0 + $0x342] ss:$8 sm:$0xf0]   ;;  %6350 = vst.msk [vmem:[%s9711_s1 + $0x128] sm:$0xff] %vm3141_vm2, %v8061_v13   ;;  %v4038_v13 = vsel %vm2562_vm0, %v4036_v1, %v4034_v29 }
 0x1f0   :  { %v2927_v55 = vld [vmem:[#allocation0 + $0xa40] ss:$8 sm:$0xf]   ;;  %v4056_v61 = vld [vmem:[#allocation0 + $0x442] ss:$8 sm:$0xf]   ;;  %4039 = vrot.lane.b32.xlu0 %v4038_v13, %s6519_s10  ;;  %v4049_v5 = vsel %vm2562_vm0, %v4047_v48, %v4045_v56  ;;  %v8676_v48 = vpop.permute.xlu0 %3666  }
 0x1f1   :  { %v2929_v36 = vld [vmem:[#allocation0 + $0xa40] ss:$8 sm:$0xf0]   ;;  %v4058_v0 = vld [vmem:[#allocation0 + $0x442] ss:$8 sm:$0xf0]   ;;  %4050 = vrot.lane.b32.xlu1 %v4049_v5, %s6519_s10 }
 0x1f2   :  { %v2931_v57 = vsel %vm2562_vm0, %v2929_v36, %v2927_v55  ;;  %v2963_v39 = vld [vmem:[#allocation0 + $0xb40] ss:$8 sm:$0xf]   ;;  %v4069_v28 = vld [vmem:[#allocation0 + $0x542] ss:$8 sm:$0xf0]  }
 0x1f3   :  { %v2965_v59 = vld [vmem:[#allocation0 + $0xb40] ss:$8 sm:$0xf0]   ;;  %6303 = vst.msk [vmem:[%s9711_s1 + $0x148] sm:$0xff] %vm2564_vm1, %v2931_v57  }
 0x1f4   :  { %v2967_v11 = vsel %vm2562_vm0, %v2965_v59, %v2963_v39  ;;  %6351 = vst.msk [vmem:[%s9711_s1 + $0x148] sm:$0xff] %vm3141_vm2, %v8079_v25   ;;  %v4067_v25 = vld [vmem:[#allocation0 + $0x542] ss:$8 sm:$0xf]  }
 0x1f5   :  { %6307 = vst.msk [vmem:[%s9711_s1 + $0x168] sm:$0xff] %vm2564_vm1, %v2967_v11   ;;  %v2999_v53 = vld [vmem:[#allocation0 + $0xc40] ss:$8 sm:$0xf]   ;;  %v4071_v21 = vsel %vm2562_vm0, %v4069_v28, %v4067_v25  ;;  %v8702_v25 = vpop.permute.xlu1 %3677  }
 0x1f6   :  { %6352 = vst.msk [vmem:[%s9711_s1 + $0x168] sm:$0xff] %vm3141_vm2, %v8100_v44   ;;  %v4060_v44 = vsel %vm2562_vm0, %v4058_v0, %v4056_v61  ;;  %v3001_v7 = vld [vmem:[#allocation0 + $0xc40] ss:$8 sm:$0xf0]   ;;  %4072 = vrot.lane.b32.xlu1 %v4071_v21, %s6519_s10 }
 0x1f7   :  { %v3003_v8 = vsel %vm2562_vm0, %v3001_v7, %v2999_v53  ;;  %v3035_v4 = vld [vmem:[#allocation0 + $0xd40] ss:$8 sm:$0xf]   ;;  %v4078_v50 = vld [vmem:[#allocation0 + $0x642] ss:$8 sm:$0xf]   ;;  %4061 = vrot.lane.b32.xlu0 %v4060_v44, %s6519_s10 }
 0x1f8   :  { %v3037_v9 = vld [vmem:[#allocation0 + $0xd40] ss:$8 sm:$0xf0]   ;;  %6311 = vst.msk [vmem:[%s9711_s1 + $0x188] sm:$0xff] %vm2564_vm1, %v3003_v8  }
 0x1f9   :  { %v3039_v15 = vsel %vm2562_vm0, %v3037_v9, %v3035_v4  ;;  %v4080_v10 = vld [vmem:[#allocation0 + $0x642] ss:$8 sm:$0xf0]   ;;  %6353 = vst.msk [vmem:[%s9711_s1 + $0x188] sm:$0xff] %vm3141_vm2, %v8146_v2  }
 0x1fa   :  { %6315 = vst.msk [vmem:[%s9711_s1 + $0x1a8] sm:$0xff] %vm2564_vm1, %v3039_v15   ;;  %v4089_v2 = vld [vmem:[#allocation0 + $0x742] ss:$8 sm:$0xf]  }
 0x1fb   :  { %v4091_v3 = vld [vmem:[#allocation0 + $0x742] ss:$8 sm:$0xf0]   ;;  %6354 = vst.msk [vmem:[%s9711_s1 + $0x1a8] sm:$0xff] %vm3141_vm2, %v8169_v26   ;;  %v4082_v26 = vsel %vm2562_vm0, %v4080_v10, %v4078_v50  ;;  %v8717_v50 = vpop.permute.xlu0 %3688  }
 0x1fc   :  { %v3071_v22 = vld [vmem:[#allocation0 + $0xe40] ss:$8 sm:$0xf]   ;;  %v4100_v31 = vld [vmem:[#allocation0 + $0x842] ss:$8 sm:$0xf]   ;;  %4083 = vrot.lane.b32.xlu0 %v4082_v26, %s6519_s10  ;;  %v4093_v35 = vsel %vm2562_vm0, %v4091_v3, %v4089_v2 }
 0x1fd   :  { %v3073_v24 = vld [vmem:[#allocation0 + $0xe40] ss:$8 sm:$0xf0]   ;;  %v4102_v16 = vld [vmem:[#allocation0 + $0x842] ss:$8 sm:$0xf0]   ;;  %4094 = vrot.lane.b32.xlu1 %v4093_v35, %s6519_s10 }
 0x1fe   :  { %v3075_v14 = vsel %vm2562_vm0, %v3073_v24, %v3071_v22  ;;  %v3107_v27 = vld [vmem:[#allocation0 + $0xf40] ss:$8 sm:$0xf]   ;;  %v4113_v12 = vld [vmem:[#allocation0 + $0x942] ss:$8 sm:$0xf0]  }
 0x1ff   :  { %v3109_v23 = vld [vmem:[#allocation0 + $0xf40] ss:$8 sm:$0xf0]   ;;  %6319 = vst.msk [vmem:[%s9711_s1 + $0x1c8] sm:$0xff] %vm2564_vm1, %v3075_v14  }
 0x200   :  { %v3111_v30 = vsel %vm2562_vm0, %v3109_v23, %v3107_v27  ;;  %6355 = vst.msk [vmem:[%s9711_s1 + $0x1c8] sm:$0xff] %vm3141_vm2, %v8205_v40   ;;  %v4111_v40 = vld [vmem:[#allocation0 + $0x942] ss:$8 sm:$0xf]  }
 0x201   :  { %6323 = vst.msk [vmem:[%s9711_s1 + $0x1e8] sm:$0xff] %vm2564_vm1, %v3111_v30   ;;  %v2576_v37 = vld [vmem:[#allocation0 + $0x80] ss:$8 sm:$0xf]   ;;  %v4115_v51 = vsel %vm2562_vm0, %v4113_v12, %v4111_v40  ;;  %v8743_v30 = vpop.permute.xlu1 %3699  }
 0x202   :  { %6356 = vst.msk [vmem:[%s9711_s1 + $0x1e8] sm:$0xff] %vm3141_vm2, %v8234_v58   ;;  %v4104_v58 = vsel %vm2562_vm0, %v4102_v16, %v4100_v31  ;;  %v2578_v38 = vld [vmem:[#allocation0 + $0x80] ss:$8 sm:$0xf0]   ;;  %4116 = vrot.lane.b32.xlu1 %v4115_v51, %s6519_s10 }
 0x203   :  { %v2580_v41 = vsel %vm2562_vm0, %v2578_v38, %v2576_v37  ;;  %v2612_v42 = vld [vmem:[#allocation0 + $0x180] ss:$8 sm:$0xf]   ;;  %v4122_v29 = vld [vmem:[#allocation0 + $0xa42] ss:$8 sm:$0xf]   ;;  %4105 = vrot.lane.b32.xlu0 %v4104_v58, %s6519_s10 }
 0x204   :  { %v2614_v49 = vld [vmem:[#allocation0 + $0x180] ss:$8 sm:$0xf0]   ;;  %6264 = vst.msk [vmem:[%s9711_s1 + $0x10] sm:$0xff] %vm2564_vm1, %v2580_v41  }
 0x205   :  { %v2616_v43 = vsel %vm2562_vm0, %v2614_v49, %v2612_v42  ;;  %v4124_v1 = vld [vmem:[#allocation0 + $0xa42] ss:$8 sm:$0xf0]   ;;  %6357 = vst.msk [vmem:[%s9711_s1 + $0x10] sm:$0xff] %vm3141_vm2, %v8263_v19  }
 0x206   :  { %6268 = vst.msk [vmem:[%s9711_s1 + $0x30] sm:$0xff] %vm2564_vm1, %v2616_v43   ;;  %v4133_v19 = vld [vmem:[#allocation0 + $0xb42] ss:$8 sm:$0xf]   ;;  %v8780_v43 = vpop.permute.xlu0 %3710  }
 0x207   :  { %v4135_v56 = vld [vmem:[#allocation0 + $0xb42] ss:$8 sm:$0xf0]   ;;  %6358 = vst.msk [vmem:[%s9711_s1 + $0x30] sm:$0xff] %vm3141_vm2, %v8300_v60   ;;  %v4126_v60 = vsel %vm2562_vm0, %v4124_v1, %v4122_v29 }
 0x208   :  { %v2648_v13 = vld [vmem:[#allocation0 + $0x280] ss:$8 sm:$0xf]   ;;  %v4144_v11 = vld [vmem:[#allocation0 + $0xc42] ss:$8 sm:$0xf]   ;;  %4127 = vrot.lane.b32.xlu0 %v4126_v60, %s6519_s10  ;;  %v4137_v28 = vsel %vm2562_vm0, %v4135_v56, %v4133_v19 }
 0x209   :  { %v2650_v55 = vld [vmem:[#allocation0 + $0x280] ss:$8 sm:$0xf0]   ;;  %v4146_v61 = vld [vmem:[#allocation0 + $0xc42] ss:$8 sm:$0xf0]   ;;  %4138 = vrot.lane.b32.xlu1 %v4137_v28, %s6519_s10 }
 0x20a   :  { %v2652_v36 = vsel %vm2562_vm0, %v2650_v55, %v2648_v13  ;;  %v2684_v57 = vld [vmem:[#allocation0 + $0x380] ss:$8 sm:$0xf]   ;;  %v4157_v0 = vld [vmem:[#allocation0 + $0xd42] ss:$8 sm:$0xf0]  }
 0x20b   :  { %v2686_v39 = vld [vmem:[#allocation0 + $0x380] ss:$8 sm:$0xf0]   ;;  %6272 = vst.msk [vmem:[%s9711_s1 + $0x50] sm:$0xff] %vm2564_vm1, %v2652_v36  }
 0x20c   :  { %v2688_v59 = vsel %vm2562_vm0, %v2686_v39, %v2684_v57  ;;  %6359 = vst.msk [vmem:[%s9711_s1 + $0x50] sm:$0xff] %vm3141_vm2, %v8319_v54   ;;  %v4155_v54 = vld [vmem:[#allocation0 + $0xd42] ss:$8 sm:$0xf]   ;;  %v8806_v39 = vpop.permute.xlu1 %3721  }
 0x20d   :  { %6276 = vst.msk [vmem:[%s9711_s1 + $0x70] sm:$0xff] %vm2564_vm1, %v2688_v59   ;;  %v2720_v5 = vld [vmem:[#allocation0 + $0x480] ss:$8 sm:$0xf]   ;;  %v4159_v2 = vsel %vm2562_vm0, %v4157_v0, %v4155_v54 }
 0x20e   :  { %6360 = vst.msk [vmem:[%s9711_s1 + $0x70] sm:$0xff] %vm3141_vm2, %v8342_v46   ;;  %v4148_v46 = vsel %vm2562_vm0, %v4146_v61, %v4144_v11  ;;  %v2722_v44 = vld [vmem:[#allocation0 + $0x480] ss:$8 sm:$0xf0]   ;;  %4160 = vrot.lane.b32.xlu1 %v4159_v2, %s6519_s10 }
 0x20f   :  { %v2724_v53 = vsel %vm2562_vm0, %v2722_v44, %v2720_v5  ;;  %v2756_v7 = vld [vmem:[#allocation0 + $0x580] ss:$8 sm:$0xf]   ;;  %v4166_v9 = vld [vmem:[#allocation0 + $0xe42] ss:$8 sm:$0xf]   ;;  %4149 = vrot.lane.b32.xlu0 %v4148_v46, %s6519_s10 }
 0x210   :  { %v2758_v8 = vld [vmem:[#allocation0 + $0x580] ss:$8 sm:$0xf0]   ;;  %6280 = vst.msk [vmem:[%s9711_s1 + $0x90] sm:$0xff] %vm2564_vm1, %v2724_v53   ;;  %v8821_v53 = vpop.permute.xlu0 %3732  }
 0x211   :  { %v2760_v4 = vsel %vm2562_vm0, %v2758_v8, %v2756_v7  ;;  %v4168_v15 = vld [vmem:[#allocation0 + $0xe42] ss:$8 sm:$0xf0]   ;;  %6361 = vst.msk [vmem:[%s9711_s1 + $0x90] sm:$0xff] %vm3141_vm2, %v8364_v47  }
 0x212   :  { %6284 = vst.msk [vmem:[%s9711_s1 + $0xb0] sm:$0xff] %vm2564_vm1, %v2760_v4   ;;  %v4177_v47 = vld [vmem:[#allocation0 + $0xf42] ss:$8 sm:$0xf]  }
 0x213   :  { %v4179_v10 = vld [vmem:[#allocation0 + $0xf42] ss:$8 sm:$0xf0]   ;;  %6362 = vst.msk [vmem:[%s9711_s1 + $0xb0] sm:$0xff] %vm3141_vm2, %v8390_v52   ;;  %v4170_v52 = vsel %vm2562_vm0, %v4168_v15, %v4166_v9 }
 0x214   :  { %v2792_v3 = vld [vmem:[#allocation0 + $0x680] ss:$8 sm:$0xf]   ;;  %v4188_v27 = vld [vmem:[#allocation0 + $0x82] ss:$8 sm:$0xf]   ;;  %4171 = vrot.lane.b32.xlu0 %v4170_v52, %s6519_s10  ;;  %v4181_v16 = vsel %vm2562_vm0, %v4179_v10, %v4177_v47 }
 0x215   :  { %v2794_v21 = vld [vmem:[#allocation0 + $0x680] ss:$8 sm:$0xf0]   ;;  %v4190_v23 = vld [vmem:[#allocation0 + $0x82] ss:$8 sm:$0xf0]   ;;  %4182 = vrot.lane.b32.xlu1 %v4181_v16, %s6519_s10 }
 0x216   :  { %v2796_v26 = vsel %vm2562_vm0, %v2794_v21, %v2792_v3  ;;  %v2828_v22 = vld [vmem:[#allocation0 + $0x780] ss:$8 sm:$0xf]   ;;  %v4201_v31 = vld [vmem:[#allocation0 + $0x182] ss:$8 sm:$0xf0]   ;;  %v8847_v21 = vpop.permute.xlu1 %3743  }
 0x217   :  { %v2830_v24 = vld [vmem:[#allocation0 + $0x780] ss:$8 sm:$0xf0]   ;;  %6288 = vst.msk [vmem:[%s9711_s1 + $0xd0] sm:$0xff] %vm2564_vm1, %v2796_v26  }
 0x218   :  { %v2832_v14 = vsel %vm2562_vm0, %v2830_v24, %v2828_v22  ;;  %6363 = vst.msk [vmem:[%s9711_s1 + $0xd0] sm:$0xff] %vm3141_vm2, %v8405_v6   ;;  %v4199_v6 = vld [vmem:[#allocation0 + $0x182] ss:$8 sm:$0xf]  }
 0x219   :  { %6292 = vst.msk [vmem:[%s9711_s1 + $0xf0] sm:$0xff] %vm2564_vm1, %v2832_v14   ;;  %v2864_v40 = vld [vmem:[#allocation0 + $0x880] ss:$8 sm:$0xf]   ;;  %v4203_v29 = vsel %vm2562_vm0, %v4201_v31, %v4199_v6 }
 0x21a   :  { %6364 = vst.msk [vmem:[%s9711_s1 + $0xf0] sm:$0xff] %vm3141_vm2, %v8431_v62   ;;  %v4192_v62 = vsel %vm2562_vm0, %v4190_v23, %v4188_v27  ;;  %v2866_v12 = vld [vmem:[#allocation0 + $0x880] ss:$8 sm:$0xf0]   ;;  %4204 = vrot.lane.b32.xlu1 %v4203_v29, %s6519_s10 }
 0x21b   :  { %v2868_v35 = vsel %vm2562_vm0, %v2866_v12, %v2864_v40  ;;  %v2900_v58 = vld [vmem:[#allocation0 + $0x980] ss:$8 sm:$0xf]   ;;  %v4210_v41 = vld [vmem:[#allocation0 + $0x282] ss:$8 sm:$0xf]   ;;  %4193 = vrot.lane.b32.xlu0 %v4192_v62, %s6519_s10  ;;  %v8884_v12 = vpop.permute.xlu0 %3754  }
 0x21c   :  { %v2902_v37 = vld [vmem:[#allocation0 + $0x980] ss:$8 sm:$0xf0]   ;;  %6296 = vst.msk [vmem:[%s9711_s1 + $0x110] sm:$0xff] %vm2564_vm1, %v2868_v35  }
 0x21d   :  { %v2904_v38 = vsel %vm2562_vm0, %v2902_v37, %v2900_v58  ;;  %v4212_v42 = vld [vmem:[#allocation0 + $0x282] ss:$8 sm:$0xf0]   ;;  %6365 = vst.msk [vmem:[%s9711_s1 + $0x110] sm:$0xff] %vm3141_vm2, %v8468_v45  }
 0x21e   :  { %6300 = vst.msk [vmem:[%s9711_s1 + $0x130] sm:$0xff] %vm2564_vm1, %v2904_v38   ;;  %v4221_v45 = vld [vmem:[#allocation0 + $0x382] ss:$8 sm:$0xf]  }
 0x21f   :  { %v4223_v49 = vld [vmem:[#allocation0 + $0x382] ss:$8 sm:$0xf0]   ;;  %6366 = vst.msk [vmem:[%s9711_s1 + $0x130] sm:$0xff] %vm3141_vm2, %v8494_v63   ;;  %v4214_v63 = vsel %vm2562_vm0, %v4212_v42, %v4210_v41 }
 0x220   :  { %v2936_v1 = vld [vmem:[#allocation0 + $0xa80] ss:$8 sm:$0xf]   ;;  %v4232_v55 = vld [vmem:[#allocation0 + $0x482] ss:$8 sm:$0xf]   ;;  %4215 = vrot.lane.b32.xlu0 %v4214_v63, %s6519_s10  ;;  %v4225_v59 = vsel %vm2562_vm0, %v4223_v49, %v4221_v45 }
 0x221   :  { %v2938_v19 = vld [vmem:[#allocation0 + $0xa80] ss:$8 sm:$0xf0]   ;;  %v4234_v36 = vld [vmem:[#allocation0 + $0x482] ss:$8 sm:$0xf0]   ;;  %4226 = vrot.lane.b32.xlu1 %v4225_v59, %s6519_s10 }
 0x222   :  { %v2940_v56 = vsel %vm2562_vm0, %v2938_v19, %v2936_v1  ;;  %v2972_v51 = vld [vmem:[#allocation0 + $0xb80] ss:$8 sm:$0xf]   ;;  %v4245_v57 = vld [vmem:[#allocation0 + $0x582] ss:$8 sm:$0xf0]   ;;  %v3766_v1 = vpop.permute.xlu1 %3765  }
 0x223   :  { %v2974_v60 = vld [vmem:[#allocation0 + $0xb80] ss:$8 sm:$0xf0]   ;;  %6304 = vst.msk [vmem:[%s9711_s1 + $0x150] sm:$0xff] %vm2564_vm1, %v2940_v56  }
 0x224   :  { %v2976_v13 = vsel %vm2562_vm0, %v2974_v60, %v2972_v51  ;;  %6367 = vst.msk [vmem:[%s9711_s1 + $0x150] sm:$0xff] %vm3141_vm2, %v8509_v17   ;;  %v4243_v17 = vld [vmem:[#allocation0 + $0x582] ss:$8 sm:$0xf]  }
 0x225   :  { %6308 = vst.msk [vmem:[%s9711_s1 + $0x170] sm:$0xff] %vm2564_vm1, %v2976_v13   ;;  %v3008_v11 = vld [vmem:[#allocation0 + $0xc80] ss:$8 sm:$0xf]   ;;  %v4247_v8 = vsel %vm2562_vm0, %v4245_v57, %v4243_v17 }
 0x226   :  { %6368 = vst.msk [vmem:[%s9711_s1 + $0x170] sm:$0xff] %vm3141_vm2, %v8535_v33   ;;  %v4236_v33 = vsel %vm2562_vm0, %v4234_v36, %v4232_v55  ;;  %v3010_v61 = vld [vmem:[#allocation0 + $0xc80] ss:$8 sm:$0xf0]   ;;  %4248 = vrot.lane.b32.xlu1 %v4247_v8, %s6519_s10 }
 0x227   :  { %v3012_v54 = vsel %vm2562_vm0, %v3010_v61, %v3008_v11  ;;  %v3044_v0 = vld [vmem:[#allocation0 + $0xd80] ss:$8 sm:$0xf]   ;;  %v4254_v5 = vld [vmem:[#allocation0 + $0x682] ss:$8 sm:$0xf]   ;;  %4237 = vrot.lane.b32.xlu0 %v4236_v33, %s6519_s10 }
 0x228   :  { %v3046_v28 = vld [vmem:[#allocation0 + $0xd80] ss:$8 sm:$0xf0]   ;;  %6312 = vst.msk [vmem:[%s9711_s1 + $0x190] sm:$0xff] %vm2564_vm1, %v3012_v54  }
 0x229   :  { %v3048_v46 = vsel %vm2562_vm0, %v3046_v28, %v3044_v0  ;;  %v4256_v44 = vld [vmem:[#allocation0 + $0x682] ss:$8 sm:$0xf0]   ;;  %6369 = vst.msk [vmem:[%s9711_s1 + $0x190] sm:$0xff] %vm3141_vm2, %v8572_v20  }
 0x22a   :  { %6316 = vst.msk [vmem:[%s9711_s1 + $0x1b0] sm:$0xff] %vm2564_vm1, %v3048_v46   ;;  %v4265_v20 = vld [vmem:[#allocation0 + $0x782] ss:$8 sm:$0xf]  }
 0x22b   :  { %v4267_v7 = vld [vmem:[#allocation0 + $0x782] ss:$8 sm:$0xf0]   ;;  %6370 = vst.msk [vmem:[%s9711_s1 + $0x1b0] sm:$0xff] %vm3141_vm2, %v8598_v32   ;;  %v4258_v32 = vsel %vm2562_vm0, %v4256_v44, %v4254_v5 }
 0x22c   :  { %v3080_v4 = vld [vmem:[#allocation0 + $0xe80] ss:$8 sm:$0xf]   ;;  %v4276_v52 = vld [vmem:[#allocation0 + $0x882] ss:$8 sm:$0xf]   ;;  %4259 = vrot.lane.b32.xlu0 %v4258_v32, %s6519_s10  ;;  %v4269_v22 = vsel %vm2562_vm0, %v4267_v7, %v4265_v20  ;;  %v3777_v20 = vpop.permute.xlu0 %3776  }
 0x22d   :  { %v3082_v9 = vld [vmem:[#allocation0 + $0xe80] ss:$8 sm:$0xf0]   ;;  %v4278_v3 = vld [vmem:[#allocation0 + $0x882] ss:$8 sm:$0xf0]   ;;  %4270 = vrot.lane.b32.xlu1 %v4269_v22, %s6519_s10 }
 0x22e   :  { %v3084_v15 = vsel %vm2562_vm0, %v3082_v9, %v3080_v4  ;;  %v3116_v47 = vld [vmem:[#allocation0 + $0xf80] ss:$8 sm:$0xf]   ;;  %v4289_v26 = vld [vmem:[#allocation0 + $0x982] ss:$8 sm:$0xf0]  }
 0x22f   :  { %v3118_v10 = vld [vmem:[#allocation0 + $0xf80] ss:$8 sm:$0xf0]   ;;  %6320 = vst.msk [vmem:[%s9711_s1 + $0x1d0] sm:$0xff] %vm2564_vm1, %v3084_v15  }
 0x230   :  { %v3120_v2 = vsel %vm2562_vm0, %v3118_v10, %v3116_v47  ;;  %6371 = vst.msk [vmem:[%s9711_s1 + $0x1d0] sm:$0xff] %vm3141_vm2, %v8613_v18   ;;  %v4287_v18 = vld [vmem:[#allocation0 + $0x982] ss:$8 sm:$0xf]  }
 0x231   :  { %6324 = vst.msk [vmem:[%s9711_s1 + $0x1f0] sm:$0xff] %vm2564_vm1, %v3120_v2   ;;  %v2585_v24 = vld [vmem:[#allocation0 + $0xc0] ss:$8 sm:$0xf]   ;;  %v4291_v35 = vsel %vm2562_vm0, %v4289_v26, %v4287_v18  ;;  %v3788_v2 = vpop.permute.xlu1 %3787  }
 0x232   :  { %6372 = vst.msk [vmem:[%s9711_s1 + $0x1f0] sm:$0xff] %vm3141_vm2, %v8639_v34   ;;  %v4280_v34 = vsel %vm2562_vm0, %v4278_v3, %v4276_v52  ;;  %v2587_v14 = vld [vmem:[#allocation0 + $0xc0] ss:$8 sm:$0xf0]   ;;  %4292 = vrot.lane.b32.xlu1 %v4291_v35, %s6519_s10 }
 0x233   :  { %v2589_v27 = vsel %vm2562_vm0, %v2587_v14, %v2585_v24  ;;  %v2621_v23 = vld [vmem:[#allocation0 + $0x1c0] ss:$8 sm:$0xf]   ;;  %v4298_v16 = vld [vmem:[#allocation0 + $0xa82] ss:$8 sm:$0xf]   ;;  %4281 = vrot.lane.b32.xlu0 %v4280_v34, %s6519_s10 }
 0x234   :  { %v2623_v6 = vld [vmem:[#allocation0 + $0x1c0] ss:$8 sm:$0xf0]   ;;  %6265 = vst.msk [vmem:[%s9711_s1 + $0x18] sm:$0xff] %vm2564_vm1, %v2589_v27  }
 0x235   :  { %v2625_v31 = vsel %vm2562_vm0, %v2623_v6, %v2621_v23  ;;  %v4300_v62 = vld [vmem:[#allocation0 + $0xa82] ss:$8 sm:$0xf0]   ;;  %6373 = vst.msk [vmem:[%s9711_s1 + $0x18] sm:$0xff] %vm3141_vm2, %v8676_v48  }
 0x236   :  { %6269 = vst.msk [vmem:[%s9711_s1 + $0x38] sm:$0xff] %vm2564_vm1, %v2625_v31   ;;  %v4309_v48 = vld [vmem:[#allocation0 + $0xb82] ss:$8 sm:$0xf]  }
 0x237   :  { %v4311_v40 = vld [vmem:[#allocation0 + $0xb82] ss:$8 sm:$0xf0]   ;;  %6374 = vst.msk [vmem:[%s9711_s1 + $0x38] sm:$0xff] %vm3141_vm2, %v8702_v25   ;;  %v4302_v25 = vsel %vm2562_vm0, %v4300_v62, %v4298_v16 }
 0x238   :  { %v2657_v58 = vld [vmem:[#allocation0 + $0x2c0] ss:$8 sm:$0xf]   ;;  %v4320_v49 = vld [vmem:[#allocation0 + $0xc82] ss:$8 sm:$0xf]   ;;  %4303 = vrot.lane.b32.xlu0 %v4302_v25, %s6519_s10  ;;  %v4313_v19 = vsel %vm2562_vm0, %v4311_v40, %v4309_v48 }
 0x239   :  { %v2659_v37 = vld [vmem:[#allocation0 + $0x2c0] ss:$8 sm:$0xf0]   ;;  %v4322_v29 = vld [vmem:[#allocation0 + $0xc82] ss:$8 sm:$0xf0]   ;;  %4314 = vrot.lane.b32.xlu1 %v4313_v19, %s6519_s10 }
 0x23a   :  { %v2661_v38 = vsel %vm2562_vm0, %v2659_v37, %v2657_v58  ;;  %v2693_v41 = vld [vmem:[#allocation0 + $0x3c0] ss:$8 sm:$0xf]   ;;  %v4333_v63 = vld [vmem:[#allocation0 + $0xd82] ss:$8 sm:$0xf0]  }
 0x23b   :  { %v2695_v42 = vld [vmem:[#allocation0 + $0x3c0] ss:$8 sm:$0xf0]   ;;  %6273 = vst.msk [vmem:[%s9711_s1 + $0x58] sm:$0xff] %vm2564_vm1, %v2661_v38  }
 0x23c   :  { %v2697_v45 = vsel %vm2562_vm0, %v2695_v42, %v2693_v41  ;;  %6375 = vst.msk [vmem:[%s9711_s1 + $0x58] sm:$0xff] %vm3141_vm2, %v8717_v50   ;;  %v4331_v50 = vld [vmem:[#allocation0 + $0xd82] ss:$8 sm:$0xf]  }
 0x23d   :  { %6277 = vst.msk [vmem:[%s9711_s1 + $0x78] sm:$0xff] %vm2564_vm1, %v2697_v45   ;;  %v2729_v56 = vld [vmem:[#allocation0 + $0x4c0] ss:$8 sm:$0xf]   ;;  %v4335_v33 = vsel %vm2562_vm0, %v4333_v63, %v4331_v50  ;;  %v3810_v50 = vpop.permute.xlu1 %3809  }
 0x23e   :  { %6376 = vst.msk [vmem:[%s9711_s1 + $0x78] sm:$0xff] %vm3141_vm2, %v8743_v30   ;;  %v4324_v30 = vsel %vm2562_vm0, %v4322_v29, %v4320_v49  ;;  %v2731_v51 = vld [vmem:[#allocation0 + $0x4c0] ss:$8 sm:$0xf0]   ;;  %4336 = vrot.lane.b32.xlu1 %v4335_v33, %s6519_s10 }
 0x23f   :  { %v2733_v60 = vsel %vm2562_vm0, %v2731_v51, %v2729_v56  ;;  %v2765_v13 = vld [vmem:[#allocation0 + $0x5c0] ss:$8 sm:$0xf]   ;;  %v4342_v17 = vld [vmem:[#allocation0 + $0xe82] ss:$8 sm:$0xf]   ;;  %4325 = vrot.lane.b32.xlu0 %v4324_v30, %s6519_s10 }
 0x240   :  { %v2767_v55 = vld [vmem:[#allocation0 + $0x5c0] ss:$8 sm:$0xf0]   ;;  %6281 = vst.msk [vmem:[%s9711_s1 + $0x98] sm:$0xff] %vm2564_vm1, %v2733_v60  }
 0x241   :  { %v2769_v36 = vsel %vm2562_vm0, %v2767_v55, %v2765_v13  ;;  %v4344_v57 = vld [vmem:[#allocation0 + $0xe82] ss:$8 sm:$0xf0]   ;;  %6377 = vst.msk [vmem:[%s9711_s1 + $0x98] sm:$0xff] %vm3141_vm2, %v8780_v43  }
 0x242   :  { %6285 = vst.msk [vmem:[%s9711_s1 + $0xb8] sm:$0xff] %vm2564_vm1, %v2769_v36   ;;  %v4353_v43 = vld [vmem:[#allocation0 + $0xf82] ss:$8 sm:$0xf]  }
 0x243   :  { %v4355_v59 = vld [vmem:[#allocation0 + $0xf82] ss:$8 sm:$0xf0]   ;;  %6378 = vst.msk [vmem:[%s9711_s1 + $0xb8] sm:$0xff] %vm3141_vm2, %v8806_v39   ;;  %v4346_v39 = vsel %vm2562_vm0, %v4344_v57, %v4342_v17 }
 0x244   :  { %v2801_v11 = vld [vmem:[#allocation0 + $0x6c0] ss:$8 sm:$0xf]   ;;  %v4364_v5 = vld [vmem:[#allocation0 + $0xc2] ss:$8 sm:$0xf]   ;;  %4347 = vrot.lane.b32.xlu0 %v4346_v39, %s6519_s10  ;;  %v4357_v8 = vsel %vm2562_vm0, %v4355_v59, %v4353_v43 }
 0x245   :  { %v2803_v61 = vld [vmem:[#allocation0 + $0x6c0] ss:$8 sm:$0xf0]   ;;  %v4366_v44 = vld [vmem:[#allocation0 + $0xc2] ss:$8 sm:$0xf0]   ;;  %4358 = vrot.lane.b32.xlu1 %v4357_v8, %s6519_s10 }
 0x246   :  { %v2805_v54 = vsel %vm2562_vm0, %v2803_v61, %v2801_v11  ;;  %v2837_v0 = vld [vmem:[#allocation0 + $0x7c0] ss:$8 sm:$0xf]   ;;  %v4377_v7 = vld [vmem:[#allocation0 + $0x1c2] ss:$8 sm:$0xf0]   ;;  %v4368_v32 = vsel %vm2562_vm0, %v4366_v44, %v4364_v5  ;;  %v3832_v44 = vpop.permute.xlu1 %3831  }
 0x247   :  { %v2839_v28 = vld [vmem:[#allocation0 + $0x7c0] ss:$8 sm:$0xf0]   ;;  %6289 = vst.msk [vmem:[%s9711_s1 + $0xd8] sm:$0xff] %vm2564_vm1, %v2805_v54  }
 0x248   :  { %v2841_v46 = vsel %vm2562_vm0, %v2839_v28, %v2837_v0  ;;  %6379 = vst.msk [vmem:[%s9711_s1 + $0xd8] sm:$0xff] %vm3141_vm2, %v8821_v53   ;;  %v4375_v53 = vld [vmem:[#allocation0 + $0x1c2] ss:$8 sm:$0xf]   ;;  %4369 = vrot.lane.b32.xlu0 %v4368_v32, %s6519_s10 }
 0x249   :  { %6293 = vst.msk [vmem:[%s9711_s1 + $0xf8] sm:$0xff] %vm2564_vm1, %v2841_v46   ;;  %v2873_v4 = vld [vmem:[#allocation0 + $0x8c0] ss:$8 sm:$0xf]   ;;  %v4379_v22 = vsel %vm2562_vm0, %v4377_v7, %v4375_v53 }
 0x24a   :  { %6380 = vst.msk [vmem:[%s9711_s1 + $0xf8] sm:$0xff] %vm3141_vm2, %v8847_v21   ;;  %v2875_v9 = vld [vmem:[#allocation0 + $0x8c0] ss:$8 sm:$0xf0]   ;;  %4380 = vrot.lane.b32.xlu1 %v4379_v22, %s6519_s10 }
 0x24b   :  { %v2877_v15 = vsel %vm2562_vm0, %v2875_v9, %v2873_v4  ;;  %v2909_v47 = vld [vmem:[#allocation0 + $0x9c0] ss:$8 sm:$0xf]   ;;  %v4386_v3 = vld [vmem:[#allocation0 + $0x2c2] ss:$8 sm:$0xf]  }
 0x24c   :  { %v2911_v10 = vld [vmem:[#allocation0 + $0x9c0] ss:$8 sm:$0xf0]   ;;  %6297 = vst.msk [vmem:[%s9711_s1 + $0x118] sm:$0xff] %vm2564_vm1, %v2877_v15   ;;  %v3853_v15 = vpop.permute.xlu1 %3852  }
 0x24d   :  { %v2913_v52 = vsel %vm2562_vm0, %v2911_v10, %v2909_v47  ;;  %v4388_v21 = vld [vmem:[#allocation0 + $0x2c2] ss:$8 sm:$0xf0]   ;;  %6381 = vst.msk [vmem:[%s9711_s1 + $0x118] sm:$0xff] %vm3141_vm2, %v8884_v12   ;;  %v3799_v12 = vpop.permute.xlu0 %3798  }
 0x24e   :  { %6301 = vst.msk [vmem:[%s9711_s1 + $0x138] sm:$0xff] %vm2564_vm1, %v2913_v52   ;;  %v4397_v18 = vld [vmem:[#allocation0 + $0x3c2] ss:$8 sm:$0xf]   ;;  %v4390_v34 = vsel %vm2562_vm0, %v4388_v21, %v4386_v3 }
 0x24f   :  { %v4399_v26 = vld [vmem:[#allocation0 + $0x3c2] ss:$8 sm:$0xf0]   ;;  %6382 = vst.msk [vmem:[%s9711_s1 + $0x138] sm:$0xff] %vm3141_vm2, %v3766_v1   ;;  %4391 = vrot.lane.b32.xlu0 %v4390_v34, %s6519_s10 }
 0x250   :  { %v2945_v24 = vld [vmem:[#allocation0 + $0xac0] ss:$8 sm:$0xf]   ;;  %v4408_v16 = vld [vmem:[#allocation0 + $0x4c2] ss:$8 sm:$0xf]   ;;  %v4401_v35 = vsel %vm2562_vm0, %v4399_v26, %v4397_v18  ;;  %v3875_v26 = vpop.permute.xlu1 %3874  }
 0x251   :  { %v2947_v14 = vld [vmem:[#allocation0 + $0xac0] ss:$8 sm:$0xf0]   ;;  %v4410_v62 = vld [vmem:[#allocation0 + $0x4c2] ss:$8 sm:$0xf0]   ;;  %4402 = vrot.lane.b32.xlu1 %v4401_v35, %s6519_s10  ;;  %v3821_v11 = vpop.permute.xlu0 %3820  }
 0x252   :  { %v2949_v27 = vsel %vm2562_vm0, %v2947_v14, %v2945_v24  ;;  %v2981_v23 = vld [vmem:[#allocation0 + $0xbc0] ss:$8 sm:$0xf]   ;;  %v4419_v48 = vld [vmem:[#allocation0 + $0x5c2] ss:$8 sm:$0xf]   ;;  %v4412_v25 = vsel %vm2562_vm0, %v4410_v62, %v4408_v16 }
 0x253   :  { %v2983_v6 = vld [vmem:[#allocation0 + $0xbc0] ss:$8 sm:$0xf0]   ;;  %6305 = vst.msk [vmem:[%s9711_s1 + $0x158] sm:$0xff] %vm2564_vm1, %v2949_v27   ;;  %4413 = vrot.lane.b32.xlu0 %v4412_v25, %s6519_s10 }
 0x254   :  { %v2985_v31 = vsel %vm2562_vm0, %v2983_v6, %v2981_v23  ;;  %6383 = vst.msk [vmem:[%s9711_s1 + $0x158] sm:$0xff] %vm3141_vm2, %v3777_v20   ;;  %v4421_v40 = vld [vmem:[#allocation0 + $0x5c2] ss:$8 sm:$0xf0]  }
 0x255   :  { %6309 = vst.msk [vmem:[%s9711_s1 + $0x178] sm:$0xff] %vm2564_vm1, %v2985_v31   ;;  %v3017_v58 = vld [vmem:[#allocation0 + $0xcc0] ss:$8 sm:$0xf]   ;;  %v4423_v19 = vsel %vm2562_vm0, %v4421_v40, %v4419_v48  ;;  %v3843_v20 = vpop.permute.xlu0 %3842   ;;  %v3897_v31 = vpop.permute.xlu1 %3896  }
 0x256   :  { %6384 = vst.msk [vmem:[%s9711_s1 + $0x178] sm:$0xff] %vm3141_vm2, %v3788_v2   ;;  %v3019_v37 = vld [vmem:[#allocation0 + $0xcc0] ss:$8 sm:$0xf0]   ;;  %4424 = vrot.lane.b32.xlu1 %v4423_v19, %s6519_s10 }
 0x257   :  { %v3021_v38 = vsel %vm2562_vm0, %v3019_v37, %v3017_v58  ;;  %v3053_v41 = vld [vmem:[#allocation0 + $0xdc0] ss:$8 sm:$0xf]   ;;  %v4430_v49 = vld [vmem:[#allocation0 + $0x6c2] ss:$8 sm:$0xf]  }
 0x258   :  { %v3055_v42 = vld [vmem:[#allocation0 + $0xdc0] ss:$8 sm:$0xf0]   ;;  %6313 = vst.msk [vmem:[%s9711_s1 + $0x198] sm:$0xff] %vm2564_vm1, %v3021_v38  }
 0x259   :  { %v3057_v45 = vsel %vm2562_vm0, %v3055_v42, %v3053_v41  ;;  %v4432_v29 = vld [vmem:[#allocation0 + $0x6c2] ss:$8 sm:$0xf0]   ;;  %6385 = vst.msk [vmem:[%s9711_s1 + $0x198] sm:$0xff] %vm3141_vm2, %v3799_v12   ;;  %v3864_v47 = vpop.permute.xlu0 %3863   ;;  %v3919_v58 = vpop.permute.xlu1 %3918  }
 0x25a   :  { %6317 = vst.msk [vmem:[%s9711_s1 + $0x1b8] sm:$0xff] %vm2564_vm1, %v3057_v45   ;;  %v4441_v63 = vld [vmem:[#allocation0 + $0x7c2] ss:$8 sm:$0xf]   ;;  %v4434_v30 = vsel %vm2562_vm0, %v4432_v29, %v4430_v49 }
 0x25b   :  { %v4443_v1 = vld [vmem:[#allocation0 + $0x7c2] ss:$8 sm:$0xf0]   ;;  %6386 = vst.msk [vmem:[%s9711_s1 + $0x1b8] sm:$0xff] %vm3141_vm2, %v3810_v50   ;;  %4435 = vrot.lane.b32.xlu0 %v4434_v30, %s6519_s10 }
 0x25c   :  { %v3089_v56 = vld [vmem:[#allocation0 + $0xec0] ss:$8 sm:$0xf]   ;;  %v4452_v17 = vld [vmem:[#allocation0 + $0x8c2] ss:$8 sm:$0xf]   ;;  %v4445_v43 = vsel %vm2562_vm0, %v4443_v1, %v4441_v63 }
 0x25d   :  { %v3091_v51 = vld [vmem:[#allocation0 + $0xec0] ss:$8 sm:$0xf0]   ;;  %v4454_v57 = vld [vmem:[#allocation0 + $0x8c2] ss:$8 sm:$0xf0]   ;;  %4446 = vrot.lane.b32.xlu1 %v4445_v43, %s6519_s10  ;;  %v3886_v22 = vpop.permute.xlu0 %3885   ;;  %v3941_v50 = vpop.permute.xlu1 %3940  }
 0x25e   :  { %v3093_v60 = vsel %vm2562_vm0, %v3091_v51, %v3089_v56  ;;  %v3125_v13 = vld [vmem:[#allocation0 + $0xfc0] ss:$8 sm:$0xf]   ;;  %v4456_v59 = vsel %vm2562_vm0, %v4454_v57, %v4452_v17  ;;  %v4463_v33 = vld [vmem:[#allocation0 + $0x9c2] ss:$8 sm:$0xf]  }
 0x25f   :  { %v3127_v55 = vld [vmem:[#allocation0 + $0xfc0] ss:$8 sm:$0xf0]   ;;  %6321 = vst.msk [vmem:[%s9711_s1 + $0x1d8] sm:$0xff] %vm2564_vm1, %v3093_v60   ;;  %4457 = vrot.lane.b32.xlu0 %v4456_v59, %s6519_s10 }
 0x260   :  { %v3129_v36 = vsel %vm2562_vm0, %v3127_v55, %v3125_v13  ;;  %v4465_v39 = vld [vmem:[#allocation0 + $0x9c2] ss:$8 sm:$0xf0]   ;;  %6387 = vst.msk [vmem:[%s9711_s1 + $0x1d8] sm:$0xff] %vm3141_vm2, %v3821_v11  }
 0x261   :  { %6325 = vst.msk [vmem:[%s9711_s1 + $0x1f8] sm:$0xff] %vm2564_vm1, %v3129_v36   ;;  %v4474_v61 = vld [vmem:[#allocation0 + $0xac2] ss:$8 sm:$0xf]   ;;  %v4467_v0 = vsel %vm2562_vm0, %v4465_v39, %v4463_v33  ;;  %v3908_v16 = vpop.permute.xlu0 %3907   ;;  %v3963_v13 = vpop.permute.xlu1 %3962  }
 0x262   :  { %v4476_v54 = vld [vmem:[#allocation0 + $0xac2] ss:$8 sm:$0xf0]   ;;  %6388 = vst.msk [vmem:[%s9711_s1 + $0x1f8] sm:$0xff] %vm3141_vm2, %v3832_v44   ;;  %4468 = vrot.lane.b32.xlu1 %v4467_v0, %s6519_s10 }
 0x263   :  { %v4478_v28 = vsel %vm2562_vm0, %v4476_v54, %v4474_v61  ;;  %v4485_v46 = vld [vmem:[#allocation0 + $0xbc2] ss:$8 sm:$0xf]   ;;  %3845 = vst.msk [vmem:[%s9711_s1] sm:$0xff] %vm3844_vm3, %v3843_v20   ;;  %6389 = vst.msk [vmem:[%s9711_s1 + $0x20] sm:$0xff] %vm3844_vm3, %v3853_v15  }
 0x264   :  { %v4487_v5 = vld [vmem:[#allocation0 + $0xbc2] ss:$8 sm:$0xf0]   ;;  %4479 = vrot.lane.b32.xlu0 %v4478_v28, %s6519_s10  ;;  %6390 = vst.msk [vmem:[%s9711_s1 + $0x40] sm:$0xff] %vm3844_vm3, %v3864_v47   ;;  %6391 = vst.msk [vmem:[%s9711_s1 + $0x60] sm:$0xff] %vm3844_vm3, %v3875_v26  }
 0x265   :  { %v4496_v53 = vld [vmem:[#allocation0 + $0xcc2] ss:$8 sm:$0xf]   ;;  %v4489_v8 = vsel %vm2562_vm0, %v4487_v5, %v4485_v46  ;;  %v4540_v34 = vld [vmem:[#allocation0 + $0x1] ss:$8 sm:$0xf]   ;;  %v3930_v37 = vpop.permute.xlu0 %3929   ;;  %v3985_v39 = vpop.permute.xlu1 %3984  }
 0x266   :  { %v4498_v7 = vld [vmem:[#allocation0 + $0xcc2] ss:$8 sm:$0xf0]   ;;  %4490 = vrot.lane.b32.xlu1 %v4489_v8, %s6519_s10  ;;  %v4542_v24 = vld [vmem:[#allocation0 + $0x1] ss:$8 sm:$0xf0]  }
 0x267   :  { %v4500_v32 = vsel %vm2562_vm0, %v4498_v7, %v4496_v53  ;;  %v4507_v4 = vld [vmem:[#allocation0 + $0xdc2] ss:$8 sm:$0xf]   ;;  %6392 = vst.msk [vmem:[%s9711_s1 + $0x80] sm:$0xff] %vm3844_vm3, %v3886_v22   ;;  %v4544_v27 = vsel %vm2562_vm0, %v4542_v24, %v4540_v34  ;;  %6393 = vst.msk [vmem:[%s9711_s1 + $0xa0] sm:$0xff] %vm3844_vm3, %v3897_v31  }
 0x268   :  { %v4509_v9 = vld [vmem:[#allocation0 + $0xdc2] ss:$8 sm:$0xf0]   ;;  %4501 = vrot.lane.b32.xlu0 %v4500_v32, %s6519_s10  ;;  %v4550_v23 = vld [vmem:[#allocation0 + $0x101] ss:$8 sm:$0xf]  }
 0x269   :  { %v4518_v10 = vld [vmem:[#allocation0 + $0xec2] ss:$8 sm:$0xf]   ;;  %v4511_v52 = vsel %vm2562_vm0, %v4509_v9, %v4507_v4  ;;  %v4552_v6 = vld [vmem:[#allocation0 + $0x101] ss:$8 sm:$0xf0]   ;;  %v3952_v63 = vpop.permute.xlu0 %3951   ;;  %v4007_v44 = vpop.permute.xlu1 %4006  }
 0x26a   :  { %v4520_v2 = vld [vmem:[#allocation0 + $0xec2] ss:$8 sm:$0xf0]   ;;  %4512 = vrot.lane.b32.xlu1 %v4511_v52, %s6519_s10  ;;  %v4561_v62 = vld [vmem:[#allocation0 + $0x201] ss:$8 sm:$0xf]   ;;  %v4554_v40 = vsel %vm2562_vm0, %v4552_v6, %v4550_v23 }
 0x26b   :  { %v4522_v3 = vsel %vm2562_vm0, %v4520_v2, %v4518_v10  ;;  %v4529_v21 = vld [vmem:[#allocation0 + $0xfc2] ss:$8 sm:$0xf]   ;;  %v4563_v48 = vld [vmem:[#allocation0 + $0x201] ss:$8 sm:$0xf0]  }
 0x26c   :  { %v4531_v18 = vld [vmem:[#allocation0 + $0xfc2] ss:$8 sm:$0xf0]   ;;  %4523 = vrot.lane.b32.xlu0 %v4522_v3, %s6519_s10  ;;  %6394 = vst.msk [vmem:[%s9711_s1 + $0xc0] sm:$0xff] %vm3844_vm3, %v3908_v16   ;;  %v4565_v12 = vsel %vm2562_vm0, %v4563_v48, %v4561_v62  ;;  %6395 = vst.msk [vmem:[%s9711_s1 + $0xe0] sm:$0xff] %vm3844_vm3, %v3919_v58  }
 0x26d   :  { %v4533_v14 = vsel %vm2562_vm0, %v4531_v18, %v4529_v21  ;;  %v4572_v35 = vld [vmem:[#allocation0 + $0x301] ss:$8 sm:$0xf]   ;;  %6396 = vst.msk [vmem:[%s9711_s1 + $0x100] sm:$0xff] %vm3844_vm3, %v3930_v37   ;;  %6397 = vst.msk [vmem:[%s9711_s1 + $0x120] sm:$0xff] %vm3844_vm3, %v3941_v50   ;;  %v3974_v55 = vpop.permute.xlu0 %3973   ;;  %v4029_v15 = vpop.permute.xlu1 %4028  }
 0x26e   :  { %4534 = vrot.lane.b32.xlu1 %v4533_v14, %s6519_s10  ;;  %s6520_s10 = smov 32   ;;  %v4574_v25 = vld [vmem:[#allocation0 + $0x301] ss:$8 sm:$0xf0]   ;;  %6398 = vst.msk [vmem:[%s9711_s1 + $0x140] sm:$0xff] %vm3844_vm3, %v3952_v63   ;;  %6399 = vst.msk [vmem:[%s9711_s1 + $0x160] sm:$0xff] %vm3844_vm3, %v3963_v13  }
 0x26f   :  { %v4583_v38 = vld [vmem:[#allocation0 + $0x401] ss:$8 sm:$0xf]   ;;  %v4576_v42 = vsel %vm2562_vm0, %v4574_v25, %v4572_v35  ;;  %6400 = vst.msk [vmem:[%s9711_s1 + $0x180] sm:$0xff] %vm3844_vm3, %v3974_v55   ;;  %6401 = vst.msk [vmem:[%s9711_s1 + $0x1a0] sm:$0xff] %vm3844_vm3, %v3985_v39  }
 0x270   :  { %4545 = vrot.lane.b32.xlu0 %v4544_v27, %s6520_s10  ;;  %v4585_v41 = vld [vmem:[#allocation0 + $0x401] ss:$8 sm:$0xf0]   ;;  %6403 = vst.msk [vmem:[%s9711_s1 + $0x1e0] sm:$0xff] %vm3844_vm3, %v4007_v44   ;;  %6405 = vst.msk [vmem:[%s9711_s1 + $0x28] sm:$0xff] %vm3844_vm3, %v4029_v15  }
 0x271   :  { %v4587_v45 = vsel %vm2562_vm0, %v4585_v41, %v4583_v38  ;;  %v4594_v49 = vld [vmem:[#allocation0 + $0x501] ss:$8 sm:$0xf]   ;;  %v3996_v11 = vpop.permute.xlu0 %3995   ;;  %v4051_v26 = vpop.permute.xlu1 %4050  }
 0x272   :  { %4555 = vrot.lane.b32.xlu1 %v4554_v40, %s6520_s10  ;;  %v4596_v29 = vld [vmem:[#allocation0 + $0x501] ss:$8 sm:$0xf0]   ;;  %6402 = vst.msk [vmem:[%s9711_s1 + $0x1c0] sm:$0xff] %vm3844_vm3, %v3996_v11   ;;  %6407 = vst.msk [vmem:[%s9711_s1 + $0x68] sm:$0xff] %vm3844_vm3, %v4051_v26  }
 0x273   :  { %v4605_v1 = vld [vmem:[#allocation0 + $0x601] ss:$8 sm:$0xf]   ;;  %v4598_v30 = vsel %vm2562_vm0, %v4596_v29, %v4594_v49 }
 0x274   :  { %4566 = vrot.lane.b32.xlu0 %v4565_v12, %s6520_s10  ;;  %v4607_v19 = vld [vmem:[#allocation0 + $0x601] ss:$8 sm:$0xf0]  }
 0x275   :  { %v4609_v56 = vsel %vm2562_vm0, %v4607_v19, %v4605_v1  ;;  %v4616_v51 = vld [vmem:[#allocation0 + $0x701] ss:$8 sm:$0xf]   ;;  %v4018_v20 = vpop.permute.xlu0 %4017   ;;  %v4073_v31 = vpop.permute.xlu1 %4072  }
 0x276   :  { %4577 = vrot.lane.b32.xlu1 %v4576_v42, %s6520_s10  ;;  %v4618_v60 = vld [vmem:[#allocation0 + $0x701] ss:$8 sm:$0xf0]   ;;  %6404 = vst.msk [vmem:[%s9711_s1 + $0x8] sm:$0xff] %vm3844_vm3, %v4018_v20   ;;  %6409 = vst.msk [vmem:[%s9711_s1 + $0xa8] sm:$0xff] %vm3844_vm3, %v4073_v31  }
 0x277   :  { %v4627_v36 = vld [vmem:[#allocation0 + $0x801] ss:$8 sm:$0xf]   ;;  %v4620_v57 = vsel %vm2562_vm0, %v4618_v60, %v4616_v51 }
 0x278   :  { %4588 = vrot.lane.b32.xlu0 %v4587_v45, %s6520_s10  ;;  %v4629_v17 = vld [vmem:[#allocation0 + $0x801] ss:$8 sm:$0xf0]  }
 0x279   :  { %v4631_v43 = vsel %vm2562_vm0, %v4629_v17, %v4627_v36  ;;  %v4638_v59 = vld [vmem:[#allocation0 + $0x901] ss:$8 sm:$0xf]   ;;  %v4040_v47 = vpop.permute.xlu0 %4039   ;;  %v4095_v58 = vpop.permute.xlu1 %4094  }
 0x27a   :  { %4599 = vrot.lane.b32.xlu1 %v4598_v30, %s6520_s10  ;;  %v4640_v33 = vld [vmem:[#allocation0 + $0x901] ss:$8 sm:$0xf0]   ;;  %6406 = vst.msk [vmem:[%s9711_s1 + $0x48] sm:$0xff] %vm3844_vm3, %v4040_v47   ;;  %6411 = vst.msk [vmem:[%s9711_s1 + $0xe8] sm:$0xff] %vm3844_vm3, %v4095_v58  }
 0x27b   :  { %v4649_v61 = vld [vmem:[#allocation0 + $0xa01] ss:$8 sm:$0xf]   ;;  %v4642_v0 = vsel %vm2562_vm0, %v4640_v33, %v4638_v59 }
 0x27c   :  { %4610 = vrot.lane.b32.xlu0 %v4609_v56, %s6520_s10  ;;  %v4651_v54 = vld [vmem:[#allocation0 + $0xa01] ss:$8 sm:$0xf0]  }
 0x27d   :  { %v4653_v28 = vsel %vm2562_vm0, %v4651_v54, %v4649_v61  ;;  %v4660_v46 = vld [vmem:[#allocation0 + $0xb01] ss:$8 sm:$0xf]   ;;  %v4062_v22 = vpop.permute.xlu0 %4061   ;;  %v4117_v50 = vpop.permute.xlu1 %4116  }
 0x27e   :  { %4621 = vrot.lane.b32.xlu1 %v4620_v57, %s6520_s10  ;;  %v4662_v5 = vld [vmem:[#allocation0 + $0xb01] ss:$8 sm:$0xf0]   ;;  %6408 = vst.msk [vmem:[%s9711_s1 + $0x88] sm:$0xff] %vm3844_vm3, %v4062_v22   ;;  %6413 = vst.msk [vmem:[%s9711_s1 + $0x128] sm:$0xff] %vm3844_vm3, %v4117_v50  }
 0x27f   :  { %v4671_v53 = vld [vmem:[#allocation0 + $0xc01] ss:$8 sm:$0xf]   ;;  %v4664_v8 = vsel %vm2562_vm0, %v4662_v5, %v4660_v46 }
 0x280   :  { %4632 = vrot.lane.b32.xlu0 %v4631_v43, %s6520_s10  ;;  %v4673_v7 = vld [vmem:[#allocation0 + $0xc01] ss:$8 sm:$0xf0]  }
 0x281   :  { %v4675_v32 = vsel %vm2562_vm0, %v4673_v7, %v4671_v53  ;;  %v4682_v4 = vld [vmem:[#allocation0 + $0xd01] ss:$8 sm:$0xf]   ;;  %v4084_v16 = vpop.permute.xlu0 %4083   ;;  %v4139_v13 = vpop.permute.xlu1 %4138  }
 0x282   :  { %4643 = vrot.lane.b32.xlu1 %v4642_v0, %s6520_s10  ;;  %v4684_v9 = vld [vmem:[#allocation0 + $0xd01] ss:$8 sm:$0xf0]   ;;  %6410 = vst.msk [vmem:[%s9711_s1 + $0xc8] sm:$0xff] %vm3844_vm3, %v4084_v16   ;;  %6415 = vst.msk [vmem:[%s9711_s1 + $0x168] sm:$0xff] %vm3844_vm3, %v4139_v13  }
 0x283   :  { %v4693_v10 = vld [vmem:[#allocation0 + $0xe01] ss:$8 sm:$0xf]   ;;  %v4686_v52 = vsel %vm2562_vm0, %v4684_v9, %v4682_v4 }
 0x284   :  { %4654 = vrot.lane.b32.xlu0 %v4653_v28, %s6520_s10  ;;  %v4695_v2 = vld [vmem:[#allocation0 + $0xe01] ss:$8 sm:$0xf0]  }
 0x285   :  { %v4697_v3 = vsel %vm2562_vm0, %v4695_v2, %v4693_v10  ;;  %v4704_v21 = vld [vmem:[#allocation0 + $0xf01] ss:$8 sm:$0xf]   ;;  %v4106_v37 = vpop.permute.xlu0 %4105   ;;  %v4161_v39 = vpop.permute.xlu1 %4160  }
 0x286   :  { %4665 = vrot.lane.b32.xlu1 %v4664_v8, %s6520_s10  ;;  %v4706_v18 = vld [vmem:[#allocation0 + $0xf01] ss:$8 sm:$0xf0]   ;;  %6412 = vst.msk [vmem:[%s9711_s1 + $0x108] sm:$0xff] %vm3844_vm3, %v4106_v37   ;;  %6417 = vst.msk [vmem:[%s9711_s1 + $0x1a8] sm:$0xff] %vm3844_vm3, %v4161_v39  }
 0x287   :  { %v4715_v34 = vld [vmem:[#allocation0 + $0x41] ss:$8 sm:$0xf]   ;;  %v4708_v14 = vsel %vm2562_vm0, %v4706_v18, %v4704_v21 }
 0x288   :  { %4676 = vrot.lane.b32.xlu0 %v4675_v32, %s6520_s10  ;;  %v4717_v24 = vld [vmem:[#allocation0 + $0x41] ss:$8 sm:$0xf0]  }
 0x289   :  { %v4719_v27 = vsel %vm2562_vm0, %v4717_v24, %v4715_v34  ;;  %v4726_v23 = vld [vmem:[#allocation0 + $0x141] ss:$8 sm:$0xf]   ;;  %v4128_v63 = vpop.permute.xlu0 %4127   ;;  %v4183_v44 = vpop.permute.xlu1 %4182  }
 0x28a   :  { %4687 = vrot.lane.b32.xlu1 %v4686_v52, %s6520_s10  ;;  %v4728_v6 = vld [vmem:[#allocation0 + $0x141] ss:$8 sm:$0xf0]   ;;  %6414 = vst.msk [vmem:[%s9711_s1 + $0x148] sm:$0xff] %vm3844_vm3, %v4128_v63   ;;  %6419 = vst.msk [vmem:[%s9711_s1 + $0x1e8] sm:$0xff] %vm3844_vm3, %v4183_v44  }
 0x28b   :  { %v4737_v62 = vld [vmem:[#allocation0 + $0x241] ss:$8 sm:$0xf]   ;;  %v4730_v40 = vsel %vm2562_vm0, %v4728_v6, %v4726_v23 }
 0x28c   :  { %4698 = vrot.lane.b32.xlu0 %v4697_v3, %s6520_s10  ;;  %v4739_v48 = vld [vmem:[#allocation0 + $0x241] ss:$8 sm:$0xf0]  }
 0x28d   :  { %v4741_v12 = vsel %vm2562_vm0, %v4739_v48, %v4737_v62  ;;  %v4748_v35 = vld [vmem:[#allocation0 + $0x341] ss:$8 sm:$0xf]   ;;  %v4150_v55 = vpop.permute.xlu0 %4149   ;;  %v4205_v15 = vpop.permute.xlu1 %4204  }
 0x28e   :  { %4709 = vrot.lane.b32.xlu1 %v4708_v14, %s6520_s10  ;;  %v4750_v25 = vld [vmem:[#allocation0 + $0x341] ss:$8 sm:$0xf0]   ;;  %6416 = vst.msk [vmem:[%s9711_s1 + $0x188] sm:$0xff] %vm3844_vm3, %v4150_v55   ;;  %6421 = vst.msk [vmem:[%s9711_s1 + $0x30] sm:$0xff] %vm3844_vm3, %v4205_v15  }
 0x28f   :  { %v4759_v38 = vld [vmem:[#allocation0 + $0x441] ss:$8 sm:$0xf]   ;;  %v4752_v42 = vsel %vm2562_vm0, %v4750_v25, %v4748_v35 }
 0x290   :  { %4720 = vrot.lane.b32.xlu0 %v4719_v27, %s6520_s10  ;;  %v4761_v41 = vld [vmem:[#allocation0 + $0x441] ss:$8 sm:$0xf0]  }
 0x291   :  { %v4763_v45 = vsel %vm2562_vm0, %v4761_v41, %v4759_v38  ;;  %v4770_v49 = vld [vmem:[#allocation0 + $0x541] ss:$8 sm:$0xf]   ;;  %v4172_v11 = vpop.permute.xlu0 %4171  }
 0x292   :  { %4731 = vrot.lane.b32.xlu1 %v4730_v40, %s6520_s10  ;;  %v4772_v29 = vld [vmem:[#allocation0 + $0x541] ss:$8 sm:$0xf0]   ;;  %6418 = vst.msk [vmem:[%s9711_s1 + $0x1c8] sm:$0xff] %vm3844_vm3, %v4172_v11  }
 0x293   :  { %v4781_v1 = vld [vmem:[#allocation0 + $0x641] ss:$8 sm:$0xf]   ;;  %v4774_v30 = vsel %vm2562_vm0, %v4772_v29, %v4770_v49  ;;  %v4227_v26 = vpop.permute.xlu1 %4226  }
 0x294   :  { %4742 = vrot.lane.b32.xlu0 %v4741_v12, %s6520_s10  ;;  %v4783_v19 = vld [vmem:[#allocation0 + $0x641] ss:$8 sm:$0xf0]   ;;  %6423 = vst.msk [vmem:[%s9711_s1 + $0x70] sm:$0xff] %vm3844_vm3, %v4227_v26  }
 0x295   :  { %v4785_v56 = vsel %vm2562_vm0, %v4783_v19, %v4781_v1  ;;  %v4792_v51 = vld [vmem:[#allocation0 + $0x741] ss:$8 sm:$0xf]   ;;  %v4194_v20 = vpop.permute.xlu0 %4193  }
 0x296   :  { %4753 = vrot.lane.b32.xlu1 %v4752_v42, %s6520_s10  ;;  %v4794_v60 = vld [vmem:[#allocation0 + $0x741] ss:$8 sm:$0xf0]   ;;  %6420 = vst.msk [vmem:[%s9711_s1 + $0x10] sm:$0xff] %vm3844_vm3, %v4194_v20  }
 0x297   :  { %v4803_v36 = vld [vmem:[#allocation0 + $0x841] ss:$8 sm:$0xf]   ;;  %v4796_v57 = vsel %vm2562_vm0, %v4794_v60, %v4792_v51 }
 0x298   :  { %4764 = vrot.lane.b32.xlu0 %v4763_v45, %s6520_s10  ;;  %v4805_v17 = vld [vmem:[#allocation0 + $0x841] ss:$8 sm:$0xf0]   ;;  %v4249_v31 = vpop.permute.xlu1 %4248  }
 0x299   :  { %v4807_v43 = vsel %vm2562_vm0, %v4805_v17, %v4803_v36  ;;  %v4814_v59 = vld [vmem:[#allocation0 + $0x941] ss:$8 sm:$0xf]   ;;  %v4216_v47 = vpop.permute.xlu0 %4215   ;;  %6425 = vst.msk [vmem:[%s9711_s1 + $0xb0] sm:$0xff] %vm3844_vm3, %v4249_v31  }
 0x29a   :  { %4775 = vrot.lane.b32.xlu1 %v4774_v30, %s6520_s10  ;;  %v4816_v33 = vld [vmem:[#allocation0 + $0x941] ss:$8 sm:$0xf0]   ;;  %6422 = vst.msk [vmem:[%s9711_s1 + $0x50] sm:$0xff] %vm3844_vm3, %v4216_v47  }
 0x29b   :  { %v4825_v61 = vld [vmem:[#allocation0 + $0xa41] ss:$8 sm:$0xf]   ;;  %v4818_v0 = vsel %vm2562_vm0, %v4816_v33, %v4814_v59 }
 0x29c   :  { %4786 = vrot.lane.b32.xlu0 %v4785_v56, %s6520_s10  ;;  %v4827_v54 = vld [vmem:[#allocation0 + $0xa41] ss:$8 sm:$0xf0]  }
 0x29d   :  { %v4829_v28 = vsel %vm2562_vm0, %v4827_v54, %v4825_v61  ;;  %v4836_v46 = vld [vmem:[#allocation0 + $0xb41] ss:$8 sm:$0xf]   ;;  %v4238_v22 = vpop.permute.xlu0 %4237  }
 0x29e   :  { %4797 = vrot.lane.b32.xlu1 %v4796_v57, %s6520_s10  ;;  %v4838_v5 = vld [vmem:[#allocation0 + $0xb41] ss:$8 sm:$0xf0]   ;;  %6424 = vst.msk [vmem:[%s9711_s1 + $0x90] sm:$0xff] %vm3844_vm3, %v4238_v22  }
 0x29f   :  { %v4847_v53 = vld [vmem:[#allocation0 + $0xc41] ss:$8 sm:$0xf]   ;;  %v4840_v8 = vsel %vm2562_vm0, %v4838_v5, %v4836_v46  ;;  %v4271_v58 = vpop.permute.xlu1 %4270  }
 0x2a0   :  { %4808 = vrot.lane.b32.xlu0 %v4807_v43, %s6520_s10  ;;  %v4849_v7 = vld [vmem:[#allocation0 + $0xc41] ss:$8 sm:$0xf0]   ;;  %6427 = vst.msk [vmem:[%s9711_s1 + $0xf0] sm:$0xff] %vm3844_vm3, %v4271_v58  }
 0x2a1   :  { %v4851_v32 = vsel %vm2562_vm0, %v4849_v7, %v4847_v53  ;;  %v4858_v4 = vld [vmem:[#allocation0 + $0xd41] ss:$8 sm:$0xf]   ;;  %v4260_v16 = vpop.permute.xlu0 %4259  }
 0x2a2   :  { %4819 = vrot.lane.b32.xlu1 %v4818_v0, %s6520_s10  ;;  %v4860_v9 = vld [vmem:[#allocation0 + $0xd41] ss:$8 sm:$0xf0]   ;;  %6426 = vst.msk [vmem:[%s9711_s1 + $0xd0] sm:$0xff] %vm3844_vm3, %v4260_v16  }
 0x2a3   :  { %v4869_v10 = vld [vmem:[#allocation0 + $0xe41] ss:$8 sm:$0xf]   ;;  %v4862_v52 = vsel %vm2562_vm0, %v4860_v9, %v4858_v4 }
 0x2a4   :  { %4830 = vrot.lane.b32.xlu0 %v4829_v28, %s6520_s10  ;;  %v4871_v2 = vld [vmem:[#allocation0 + $0xe41] ss:$8 sm:$0xf0]   ;;  %v4293_v50 = vpop.permute.xlu1 %4292  }
 0x2a5   :  { %v4873_v3 = vsel %vm2562_vm0, %v4871_v2, %v4869_v10  ;;  %v4880_v21 = vld [vmem:[#allocation0 + $0xf41] ss:$8 sm:$0xf]   ;;  %v4282_v37 = vpop.permute.xlu0 %4281   ;;  %6429 = vst.msk [vmem:[%s9711_s1 + $0x130] sm:$0xff] %vm3844_vm3, %v4293_v50  }
 0x2a6   :  { %4841 = vrot.lane.b32.xlu1 %v4840_v8, %s6520_s10  ;;  %v4882_v18 = vld [vmem:[#allocation0 + $0xf41] ss:$8 sm:$0xf0]   ;;  %6428 = vst.msk [vmem:[%s9711_s1 + $0x110] sm:$0xff] %vm3844_vm3, %v4282_v37  }
 0x2a7   :  { %v4891_v34 = vld [vmem:[#allocation0 + $0x81] ss:$8 sm:$0xf]   ;;  %v4884_v14 = vsel %vm2562_vm0, %v4882_v18, %v4880_v21 }
 0x2a8   :  { %4852 = vrot.lane.b32.xlu0 %v4851_v32, %s6520_s10  ;;  %v4893_v24 = vld [vmem:[#allocation0 + $0x81] ss:$8 sm:$0xf0]  }
 0x2a9   :  { %v4895_v27 = vsel %vm2562_vm0, %v4893_v24, %v4891_v34  ;;  %v4902_v23 = vld [vmem:[#allocation0 + $0x181] ss:$8 sm:$0xf]  }
 0x2aa   :  { %4863 = vrot.lane.b32.xlu1 %v4862_v52, %s6520_s10  ;;  %v4904_v6 = vld [vmem:[#allocation0 + $0x181] ss:$8 sm:$0xf0]   ;;  %v4304_v63 = vpop.permute.xlu0 %4303  }
 0x2ab   :  { %v4913_v62 = vld [vmem:[#allocation0 + $0x281] ss:$8 sm:$0xf]   ;;  %v4906_v40 = vsel %vm2562_vm0, %v4904_v6, %v4902_v23  ;;  %6430 = vst.msk [vmem:[%s9711_s1 + $0x150] sm:$0xff] %vm3844_vm3, %v4304_v63   ;;  %v4315_v13 = vpop.permute.xlu1 %4314  }
 0x2ac   :  { %4874 = vrot.lane.b32.xlu0 %v4873_v3, %s6520_s10  ;;  %v4915_v48 = vld [vmem:[#allocation0 + $0x281] ss:$8 sm:$0xf0]   ;;  %6431 = vst.msk [vmem:[%s9711_s1 + $0x170] sm:$0xff] %vm3844_vm3, %v4315_v13  }
 0x2ad   :  { %v4917_v12 = vsel %vm2562_vm0, %v4915_v48, %v4913_v62  ;;  %v4924_v35 = vld [vmem:[#allocation0 + $0x381] ss:$8 sm:$0xf]  }
 0x2ae   :  { %4885 = vrot.lane.b32.xlu1 %v4884_v14, %s6520_s10  ;;  %v4926_v25 = vld [vmem:[#allocation0 + $0x381] ss:$8 sm:$0xf0]  }
 0x2af   :  { %v4935_v38 = vld [vmem:[#allocation0 + $0x481] ss:$8 sm:$0xf]   ;;  %v4928_v42 = vsel %vm2562_vm0, %v4926_v25, %v4924_v35 }
 0x2b0   :  { %4896 = vrot.lane.b32.xlu0 %v4895_v27, %s6520_s10  ;;  %v4937_v41 = vld [vmem:[#allocation0 + $0x481] ss:$8 sm:$0xf0]   ;;  %v4337_v39 = vpop.permute.xlu1 %4336  }
 0x2b1   :  { %v4939_v45 = vsel %vm2562_vm0, %v4937_v41, %v4935_v38  ;;  %v4946_v49 = vld [vmem:[#allocation0 + $0x581] ss:$8 sm:$0xf]   ;;  %v4326_v55 = vpop.permute.xlu0 %4325   ;;  %6433 = vst.msk [vmem:[%s9711_s1 + $0x1b0] sm:$0xff] %vm3844_vm3, %v4337_v39  }
 0x2b2   :  { %4907 = vrot.lane.b32.xlu1 %v4906_v40, %s6520_s10  ;;  %v4948_v29 = vld [vmem:[#allocation0 + $0x581] ss:$8 sm:$0xf0]   ;;  %6432 = vst.msk [vmem:[%s9711_s1 + $0x190] sm:$0xff] %vm3844_vm3, %v4326_v55  }
 0x2b3   :  { %v4957_v1 = vld [vmem:[#allocation0 + $0x681] ss:$8 sm:$0xf]   ;;  %v4950_v30 = vsel %vm2562_vm0, %v4948_v29, %v4946_v49 }
 0x2b4   :  { %4918 = vrot.lane.b32.xlu0 %v4917_v12, %s6520_s10  ;;  %v4959_v19 = vld [vmem:[#allocation0 + $0x681] ss:$8 sm:$0xf0]  }
 0x2b5   :  { %v4961_v56 = vsel %vm2562_vm0, %v4959_v19, %v4957_v1  ;;  %v4968_v51 = vld [vmem:[#allocation0 + $0x781] ss:$8 sm:$0xf]  }
 0x2b6   :  { %4929 = vrot.lane.b32.xlu1 %v4928_v42, %s6520_s10  ;;  %v4970_v60 = vld [vmem:[#allocation0 + $0x781] ss:$8 sm:$0xf0]   ;;  %v4348_v11 = vpop.permute.xlu0 %4347  }
 0x2b7   :  { %v4979_v36 = vld [vmem:[#allocation0 + $0x881] ss:$8 sm:$0xf]   ;;  %v4972_v57 = vsel %vm2562_vm0, %v4970_v60, %v4968_v51  ;;  %6434 = vst.msk [vmem:[%s9711_s1 + $0x1d0] sm:$0xff] %vm3844_vm3, %v4348_v11   ;;  %v4359_v44 = vpop.permute.xlu1 %4358  }
 0x2b8   :  { %4940 = vrot.lane.b32.xlu0 %v4939_v45, %s6520_s10  ;;  %v4981_v17 = vld [vmem:[#allocation0 + $0x881] ss:$8 sm:$0xf0]   ;;  %6435 = vst.msk [vmem:[%s9711_s1 + $0x1f0] sm:$0xff] %vm3844_vm3, %v4359_v44  }
 0x2b9   :  { %v4983_v43 = vsel %vm2562_vm0, %v4981_v17, %v4979_v36  ;;  %v4990_v59 = vld [vmem:[#allocation0 + $0x981] ss:$8 sm:$0xf]  }
 0x2ba   :  { %4951 = vrot.lane.b32.xlu1 %v4950_v30, %s6520_s10  ;;  %v4992_v33 = vld [vmem:[#allocation0 + $0x981] ss:$8 sm:$0xf0]   ;;  %v4370_v20 = vpop.permute.xlu0 %4369  }
 0x2bb   :  { %v5001_v61 = vld [vmem:[#allocation0 + $0xa81] ss:$8 sm:$0xf]   ;;  %v4994_v0 = vsel %vm2562_vm0, %v4992_v33, %v4990_v59  ;;  %6436 = vst.msk [vmem:[%s9711_s1 + $0x18] sm:$0xff] %vm3844_vm3, %v4370_v20  }
 0x2bc   :  { %4962 = vrot.lane.b32.xlu0 %v4961_v56, %s6520_s10  ;;  %v5003_v54 = vld [vmem:[#allocation0 + $0xa81] ss:$8 sm:$0xf0]   ;;  %v4381_v15 = vpop.permute.xlu1 %4380  }
 0x2bd   :  { %v5005_v28 = vsel %vm2562_vm0, %v5003_v54, %v5001_v61  ;;  %v5012_v46 = vld [vmem:[#allocation0 + $0xb81] ss:$8 sm:$0xf]   ;;  %6437 = vst.msk [vmem:[%s9711_s1 + $0x38] sm:$0xff] %vm3844_vm3, %v4381_v15  }
 0x2be   :  { %4973 = vrot.lane.b32.xlu1 %v4972_v57, %s6520_s10  ;;  %v5014_v5 = vld [vmem:[#allocation0 + $0xb81] ss:$8 sm:$0xf0]  }
 0x2bf   :  { %v5023_v53 = vld [vmem:[#allocation0 + $0xc81] ss:$8 sm:$0xf]   ;;  %v5016_v8 = vsel %vm2562_vm0, %v5014_v5, %v5012_v46 }
 0x2c0   :  { %4984 = vrot.lane.b32.xlu0 %v4983_v43, %s6520_s10  ;;  %v5025_v7 = vld [vmem:[#allocation0 + $0xc81] ss:$8 sm:$0xf0]  }
 0x2c1   :  { %v5027_v32 = vsel %vm2562_vm0, %v5025_v7, %v5023_v53  ;;  %v5034_v4 = vld [vmem:[#allocation0 + $0xd81] ss:$8 sm:$0xf]   ;;  %v4392_v47 = vpop.permute.xlu0 %4391  }
 0x2c2   :  { %4995 = vrot.lane.b32.xlu1 %v4994_v0, %s6520_s10  ;;  %v5036_v9 = vld [vmem:[#allocation0 + $0xd81] ss:$8 sm:$0xf0]   ;;  %6438 = vst.msk [vmem:[%s9711_s1 + $0x58] sm:$0xff] %vm3844_vm3, %v4392_v47  }
 0x2c3   :  { %v5045_v10 = vld [vmem:[#allocation0 + $0xe81] ss:$8 sm:$0xf]   ;;  %v5038_v52 = vsel %vm2562_vm0, %v5036_v9, %v5034_v4  ;;  %v4403_v26 = vpop.permute.xlu1 %4402  }
 0x2c4   :  { %5006 = vrot.lane.b32.xlu0 %v5005_v28, %s6520_s10  ;;  %v5047_v2 = vld [vmem:[#allocation0 + $0xe81] ss:$8 sm:$0xf0]   ;;  %6439 = vst.msk [vmem:[%s9711_s1 + $0x78] sm:$0xff] %vm3844_vm3, %v4403_v26  }
 0x2c5   :  { %v5049_v3 = vsel %vm2562_vm0, %v5047_v2, %v5045_v10  ;;  %v5056_v21 = vld [vmem:[#allocation0 + $0xf81] ss:$8 sm:$0xf]   ;;  %v4414_v22 = vpop.permute.xlu0 %4413  }
 0x2c6   :  { %5017 = vrot.lane.b32.xlu1 %v5016_v8, %s6520_s10  ;;  %v5058_v18 = vld [vmem:[#allocation0 + $0xf81] ss:$8 sm:$0xf0]   ;;  %6440 = vst.msk [vmem:[%s9711_s1 + $0x98] sm:$0xff] %vm3844_vm3, %v4414_v22  }
 0x2c7   :  { %v5067_v34 = vld [vmem:[#allocation0 + $0xc1] ss:$8 sm:$0xf]   ;;  %v5060_v14 = vsel %vm2562_vm0, %v5058_v18, %v5056_v21 }
 0x2c8   :  { %5028 = vrot.lane.b32.xlu0 %v5027_v32, %s6520_s10  ;;  %v5069_v24 = vld [vmem:[#allocation0 + $0xc1] ss:$8 sm:$0xf0]   ;;  %v4425_v31 = vpop.permute.xlu1 %4424  }
 0x2c9   :  { %v5071_v27 = vsel %vm2562_vm0, %v5069_v24, %v5067_v34  ;;  %v5078_v23 = vld [vmem:[#allocation0 + $0x1c1] ss:$8 sm:$0xf]   ;;  %6441 = vst.msk [vmem:[%s9711_s1 + $0xb8] sm:$0xff] %vm3844_vm3, %v4425_v31  }
 0x2ca   :  { %5039 = vrot.lane.b32.xlu1 %v5038_v52, %s6520_s10  ;;  %v5080_v6 = vld [vmem:[#allocation0 + $0x1c1] ss:$8 sm:$0xf0]  }
 0x2cb   :  { %v5089_v62 = vld [vmem:[#allocation0 + $0x2c1] ss:$8 sm:$0xf]   ;;  %v5082_v40 = vsel %vm2562_vm0, %v5080_v6, %v5078_v23 }
 0x2cc   :  { %5050 = vrot.lane.b32.xlu0 %v5049_v3, %s6520_s10  ;;  %v5091_v48 = vld [vmem:[#allocation0 + $0x2c1] ss:$8 sm:$0xf0]  }
 0x2cd   :  { %v4436_v16 = vpop.permute.xlu0 %4435   ;;  %v5093_v12 = vsel %vm2562_vm0, %v5091_v48, %v5089_v62  ;;  %v5100_v35 = vld [vmem:[#allocation0 + $0x3c1] ss:$8 sm:$0xf]  }
 0x2ce   :  { %6442 = vst.msk [vmem:[%s9711_s1 + $0xd8] sm:$0xff] %vm3844_vm3, %v4436_v16   ;;  %5061 = vrot.lane.b32.xlu1 %v5060_v14, %s6520_s10  ;;  %v5102_v25 = vld [vmem:[#allocation0 + $0x3c1] ss:$8 sm:$0xf0]  }
 0x2cf   :  { %v4447_v58 = vpop.permute.xlu1 %4446   ;;  %v5111_v38 = vld [vmem:[#allocation0 + $0x4c1] ss:$8 sm:$0xf]   ;;  %v5104_v42 = vsel %vm2562_vm0, %v5102_v25, %v5100_v35 }
 0x2d0   :  { %5072 = vrot.lane.b32.xlu0 %v5071_v27, %s6520_s10  ;;  %v5113_v41 = vld [vmem:[#allocation0 + $0x4c1] ss:$8 sm:$0xf0]   ;;  %6443 = vst.msk [vmem:[%s9711_s1 + $0xf8] sm:$0xff] %vm3844_vm3, %v4447_v58  }
 0x2d1   :  { %v4458_v37 = vpop.permute.xlu0 %4457   ;;  %v5115_v45 = vsel %vm2562_vm0, %v5113_v41, %v5111_v38  ;;  %v5122_v49 = vld [vmem:[#allocation0 + $0x5c1] ss:$8 sm:$0xf]  }
 0x2d2   :  { %6444 = vst.msk [vmem:[%s9711_s1 + $0x118] sm:$0xff] %vm3844_vm3, %v4458_v37   ;;  %5083 = vrot.lane.b32.xlu1 %v5082_v40, %s6520_s10  ;;  %v5124_v29 = vld [vmem:[#allocation0 + $0x5c1] ss:$8 sm:$0xf0]  }
 0x2d3   :  { %v5133_v1 = vld [vmem:[#allocation0 + $0x6c1] ss:$8 sm:$0xf]   ;;  %v5126_v30 = vsel %vm2562_vm0, %v5124_v29, %v5122_v49 }
 0x2d4   :  { %5094 = vrot.lane.b32.xlu0 %v5093_v12, %s6520_s10  ;;  %v4469_v50 = vpop.permute.xlu1 %4468   ;;  %v5135_v19 = vld [vmem:[#allocation0 + $0x6c1] ss:$8 sm:$0xf0]  }
 0x2d5   :  { %6445 = vst.msk [vmem:[%s9711_s1 + $0x138] sm:$0xff] %vm3844_vm3, %v4469_v50   ;;  %v5137_v56 = vsel %vm2562_vm0, %v5135_v19, %v5133_v1  ;;  %v5144_v51 = vld [vmem:[#allocation0 + $0x7c1] ss:$8 sm:$0xf]  }
 0x2d6   :  { %v4480_v63 = vpop.permute.xlu0 %4479   ;;  %5105 = vrot.lane.b32.xlu1 %v5104_v42, %s6520_s10  ;;  %v5146_v60 = vld [vmem:[#allocation0 + $0x7c1] ss:$8 sm:$0xf0]  }
 0x2d7   :  { %6446 = vst.msk [vmem:[%s9711_s1 + $0x158] sm:$0xff] %vm3844_vm3, %v4480_v63   ;;  %v5155_v36 = vld [vmem:[#allocation0 + $0x8c1] ss:$8 sm:$0xf]   ;;  %v5148_v57 = vsel %vm2562_vm0, %v5146_v60, %v5144_v51 }
 0x2d8   :  { %5116 = vrot.lane.b32.xlu0 %v5115_v45, %s6520_s10  ;;  %v4491_v13 = vpop.permute.xlu1 %4490   ;;  %v5157_v17 = vld [vmem:[#allocation0 + $0x8c1] ss:$8 sm:$0xf0]  }
 0x2d9   :  { %6447 = vst.msk [vmem:[%s9711_s1 + $0x178] sm:$0xff] %vm3844_vm3, %v4491_v13   ;;  %v5159_v43 = vsel %vm2562_vm0, %v5157_v17, %v5155_v36  ;;  %v5166_v59 = vld [vmem:[#allocation0 + $0x9c1] ss:$8 sm:$0xf]  }
 0x2da   :  { %v4502_v55 = vpop.permute.xlu0 %4501   ;;  %5127 = vrot.lane.b32.xlu1 %v5126_v30, %s6520_s10  ;;  %v5168_v33 = vld [vmem:[#allocation0 + $0x9c1] ss:$8 sm:$0xf0]  }
 0x2db   :  { %6448 = vst.msk [vmem:[%s9711_s1 + $0x198] sm:$0xff] %vm3844_vm3, %v4502_v55   ;;  %v5177_v61 = vld [vmem:[#allocation0 + $0xac1] ss:$8 sm:$0xf]   ;;  %v5170_v0 = vsel %vm2562_vm0, %v5168_v33, %v5166_v59 }
 0x2dc   :  { %5138 = vrot.lane.b32.xlu0 %v5137_v56, %s6520_s10  ;;  %v4513_v39 = vpop.permute.xlu1 %4512   ;;  %v5179_v54 = vld [vmem:[#allocation0 + $0xac1] ss:$8 sm:$0xf0]  }
 0x2dd   :  { %6449 = vst.msk [vmem:[%s9711_s1 + $0x1b8] sm:$0xff] %vm3844_vm3, %v4513_v39   ;;  %v5181_v28 = vsel %vm2562_vm0, %v5179_v54, %v5177_v61  ;;  %v5188_v46 = vld [vmem:[#allocation0 + $0xbc1] ss:$8 sm:$0xf]  }
 0x2de   :  { %v4524_v11 = vpop.permute.xlu0 %4523   ;;  %5149 = vrot.lane.b32.xlu1 %v5148_v57, %s6520_s10  ;;  %v5190_v5 = vld [vmem:[#allocation0 + $0xbc1] ss:$8 sm:$0xf0]  }
 0x2df   :  { %6450 = vst.msk [vmem:[%s9711_s1 + $0x1d8] sm:$0xff] %vm3844_vm3, %v4524_v11   ;;  %v5199_v53 = vld [vmem:[#allocation0 + $0xcc1] ss:$8 sm:$0xf]   ;;  %v5192_v8 = vsel %vm2562_vm0, %v5190_v5, %v5188_v46 }
 0x2e0   :  { %5160 = vrot.lane.b32.xlu0 %v5159_v43, %s6520_s10  ;;  %v4535_v44 = vpop.permute.xlu1 %4534   ;;  %v5201_v7 = vld [vmem:[#allocation0 + $0xcc1] ss:$8 sm:$0xf0]  }
 0x2e1   :  { %6451 = vst.msk [vmem:[%s9711_s1 + $0x1f8] sm:$0xff] %vm3844_vm3, %v4535_v44   ;;  %v5203_v32 = vsel %vm2562_vm0, %v5201_v7, %v5199_v53  ;;  %v5210_v4 = vld [vmem:[#allocation0 + $0xdc1] ss:$8 sm:$0xf]  }
 0x2e2   :  { %v4546_v20 = vpop.permute.xlu0 %4545   ;;  %5171 = vrot.lane.b32.xlu1 %v5170_v0, %s6520_s10  ;;  %v5212_v9 = vld [vmem:[#allocation0 + $0xdc1] ss:$8 sm:$0xf0]  }
 0x2e3   :  { %4548 = vst.msk [vmem:[%s9711_s1] sm:$0xff] %vm4547_vm4, %v4546_v20   ;;  %v5221_v10 = vld [vmem:[#allocation0 + $0xec1] ss:$8 sm:$0xf]   ;;  %v5214_v52 = vsel %vm2562_vm0, %v5212_v9, %v5210_v4 }
 0x2e4   :  { %5182 = vrot.lane.b32.xlu0 %v5181_v28, %s6520_s10  ;;  %v4556_v15 = vpop.permute.xlu1 %4555   ;;  %v5223_v2 = vld [vmem:[#allocation0 + $0xec1] ss:$8 sm:$0xf0]  }
 0x2e5   :  { %6452 = vst.msk [vmem:[%s9711_s1 + $0x20] sm:$0xff] %vm4547_vm4, %v4556_v15   ;;  %v5225_v3 = vsel %vm2562_vm0, %v5223_v2, %v5221_v10  ;;  %v5232_v26 = vld [vmem:[#allocation0 + $0xfc1] ss:$8 sm:$0xf]  }
 0x2e6   :  { %v4567_v47 = vpop.permute.xlu0 %4566   ;;  %5193 = vrot.lane.b32.xlu1 %v5192_v8, %s6520_s10  ;;  %v5234_v22 = vld [vmem:[#allocation0 + $0xfc1] ss:$8 sm:$0xf0]  }
 0x2e7   :  { %6453 = vst.msk [vmem:[%s9711_s1 + $0x40] sm:$0xff] %vm4547_vm4, %v4567_v47   ;;  %v5236_v34 = vsel %vm2562_vm0, %v5234_v22, %v5232_v26 }
 0x2e8   :  { %5204 = vrot.lane.b32.xlu0 %v5203_v32, %s6520_s10  ;;  %v4578_v21 = vpop.permute.xlu1 %4577  }
 0x2e9   :  { %6454 = vst.msk [vmem:[%s9711_s1 + $0x60] sm:$0xff] %vm4547_vm4, %v4578_v21  }
 0x2ea   :  { %v4589_v18 = vpop.permute.xlu0 %4588   ;;  %5215 = vrot.lane.b32.xlu1 %v5214_v52, %s6520_s10 }
 0x2eb   :  { %6455 = vst.msk [vmem:[%s9711_s1 + $0x80] sm:$0xff] %vm4547_vm4, %v4589_v18  }
 0x2ec   :  { %5226 = vrot.lane.b32.xlu0 %v5225_v3, %s6520_s10  ;;  %v4600_v24 = vpop.permute.xlu1 %4599  }
 0x2ed   :  { %6456 = vst.msk [vmem:[%s9711_s1 + $0xa0] sm:$0xff] %vm4547_vm4, %v4600_v24  }
 0x2ee   :  { %v4611_v14 = vpop.permute.xlu0 %4610   ;;  %5237 = vrot.lane.b32.xlu1 %v5236_v34, %s6520_s10 }
 0x2ef   :  { %6457 = vst.msk [vmem:[%s9711_s1 + $0xc0] sm:$0xff] %vm4547_vm4, %v4611_v14  }
 0x2f0   :  { %v4622_v27 = vpop.permute.xlu1 %4621  }
 0x2f1   :  { %6458 = vst.msk [vmem:[%s9711_s1 + $0xe0] sm:$0xff] %vm4547_vm4, %v4622_v27  }
 0x2f2   :  { %v4633_v23 = vpop.permute.xlu0 %4632  }
 0x2f3   :  { %6459 = vst.msk [vmem:[%s9711_s1 + $0x100] sm:$0xff] %vm4547_vm4, %v4633_v23  }
 0x2f4   :  { %v4644_v6 = vpop.permute.xlu1 %4643  }
 0x2f5   :  { %6460 = vst.msk [vmem:[%s9711_s1 + $0x120] sm:$0xff] %vm4547_vm4, %v4644_v6  }
 0x2f6   :  { %v4655_v31 = vpop.permute.xlu0 %4654  }
 0x2f7   :  { %6461 = vst.msk [vmem:[%s9711_s1 + $0x140] sm:$0xff] %vm4547_vm4, %v4655_v31  }
 0x2f8   :  { %v4666_v16 = vpop.permute.xlu1 %4665  }
 0x2f9   :  { %6462 = vst.msk [vmem:[%s9711_s1 + $0x160] sm:$0xff] %vm4547_vm4, %v4666_v16  }
 0x2fa   :  { %v4677_v62 = vpop.permute.xlu0 %4676  }
 0x2fb   :  { %6463 = vst.msk [vmem:[%s9711_s1 + $0x180] sm:$0xff] %vm4547_vm4, %v4677_v62  }
 0x2fc   :  { %v4688_v48 = vpop.permute.xlu1 %4687  }
 0x2fd   :  { %6464 = vst.msk [vmem:[%s9711_s1 + $0x1a0] sm:$0xff] %vm4547_vm4, %v4688_v48  }
 0x2fe   :  { %v4699_v40 = vpop.permute.xlu0 %4698  }
 0x2ff   :  { %6465 = vst.msk [vmem:[%s9711_s1 + $0x1c0] sm:$0xff] %vm4547_vm4, %v4699_v40  }
 0x300   :  { %v4710_v12 = vpop.permute.xlu1 %4709  }
 0x301   :  { %6466 = vst.msk [vmem:[%s9711_s1 + $0x1e0] sm:$0xff] %vm4547_vm4, %v4710_v12  }
 0x302   :  { %v4721_v35 = vpop.permute.xlu0 %4720  }
 0x303   :  { %6467 = vst.msk [vmem:[%s9711_s1 + $0x8] sm:$0xff] %vm4547_vm4, %v4721_v35  }
 0x304   :  { %v4732_v25 = vpop.permute.xlu1 %4731  }
 0x305   :  { %6468 = vst.msk [vmem:[%s9711_s1 + $0x28] sm:$0xff] %vm4547_vm4, %v4732_v25  }
 0x306   :  { %v4743_v58 = vpop.permute.xlu0 %4742  }
 0x307   :  { %6469 = vst.msk [vmem:[%s9711_s1 + $0x48] sm:$0xff] %vm4547_vm4, %v4743_v58  }
 0x308   :  { %v4754_v37 = vpop.permute.xlu1 %4753  }
 0x309   :  { %6470 = vst.msk [vmem:[%s9711_s1 + $0x68] sm:$0xff] %vm4547_vm4, %v4754_v37  }
 0x30a   :  { %v4765_v38 = vpop.permute.xlu0 %4764  }
 0x30b   :  { %6471 = vst.msk [vmem:[%s9711_s1 + $0x88] sm:$0xff] %vm4547_vm4, %v4765_v38  }
 0x30c   :  { %v4776_v41 = vpop.permute.xlu1 %4775  }
 0x30d   :  { %6472 = vst.msk [vmem:[%s9711_s1 + $0xa8] sm:$0xff] %vm4547_vm4, %v4776_v41  }
 0x30e   :  { %v4787_v42 = vpop.permute.xlu0 %4786  }
 0x30f   :  { %6473 = vst.msk [vmem:[%s9711_s1 + $0xc8] sm:$0xff] %vm4547_vm4, %v4787_v42  }
 0x310   :  { %v4798_v45 = vpop.permute.xlu1 %4797  }
 0x311   :  { %6474 = vst.msk [vmem:[%s9711_s1 + $0xe8] sm:$0xff] %vm4547_vm4, %v4798_v45  }
 0x312   :  { %v4809_v49 = vpop.permute.xlu0 %4808  }
 0x313   :  { %6475 = vst.msk [vmem:[%s9711_s1 + $0x108] sm:$0xff] %vm4547_vm4, %v4809_v49  }
 0x314   :  { %v4820_v29 = vpop.permute.xlu1 %4819  }
 0x315   :  { %6476 = vst.msk [vmem:[%s9711_s1 + $0x128] sm:$0xff] %vm4547_vm4, %v4820_v29  }
 0x316   :  { %v4831_v50 = vpop.permute.xlu0 %4830  }
 0x317   :  { %6477 = vst.msk [vmem:[%s9711_s1 + $0x148] sm:$0xff] %vm4547_vm4, %v4831_v50  }
 0x318   :  { %v4842_v63 = vpop.permute.xlu1 %4841  }
 0x319   :  { %6478 = vst.msk [vmem:[%s9711_s1 + $0x168] sm:$0xff] %vm4547_vm4, %v4842_v63  }
 0x31a   :  { %v4853_v1 = vpop.permute.xlu0 %4852  }
 0x31b   :  { %6479 = vst.msk [vmem:[%s9711_s1 + $0x188] sm:$0xff] %vm4547_vm4, %v4853_v1  }
 0x31c   :  { %v4864_v19 = vpop.permute.xlu1 %4863  }
 0x31d   :  { %6480 = vst.msk [vmem:[%s9711_s1 + $0x1a8] sm:$0xff] %vm4547_vm4, %v4864_v19  }
 0x31e   :  { %v4875_v30 = vpop.permute.xlu0 %4874  }
 0x31f   :  { %6481 = vst.msk [vmem:[%s9711_s1 + $0x1c8] sm:$0xff] %vm4547_vm4, %v4875_v30  }
 0x320   :  { %v4886_v56 = vpop.permute.xlu1 %4885  }
 0x321   :  { %6482 = vst.msk [vmem:[%s9711_s1 + $0x1e8] sm:$0xff] %vm4547_vm4, %v4886_v56  }
 0x322   :  { %v4897_v51 = vpop.permute.xlu0 %4896  }
 0x323   :  { %6483 = vst.msk [vmem:[%s9711_s1 + $0x10] sm:$0xff] %vm4547_vm4, %v4897_v51  }
 0x324   :  { %v4908_v60 = vpop.permute.xlu1 %4907  }
 0x325   :  { %6484 = vst.msk [vmem:[%s9711_s1 + $0x30] sm:$0xff] %vm4547_vm4, %v4908_v60  }
 0x326   :  { %v4919_v13 = vpop.permute.xlu0 %4918  }
 0x327   :  { %6485 = vst.msk [vmem:[%s9711_s1 + $0x50] sm:$0xff] %vm4547_vm4, %v4919_v13  }
 0x328   :  { %v4930_v55 = vpop.permute.xlu1 %4929  }
 0x329   :  { %6486 = vst.msk [vmem:[%s9711_s1 + $0x70] sm:$0xff] %vm4547_vm4, %v4930_v55  }
 0x32a   :  { %v4941_v36 = vpop.permute.xlu0 %4940  }
 0x32b   :  { %6487 = vst.msk [vmem:[%s9711_s1 + $0x90] sm:$0xff] %vm4547_vm4, %v4941_v36  }
 0x32c   :  { %v4952_v17 = vpop.permute.xlu1 %4951  }
 0x32d   :  { %6488 = vst.msk [vmem:[%s9711_s1 + $0xb0] sm:$0xff] %vm4547_vm4, %v4952_v17  }
 0x32e   :  { %v4963_v57 = vpop.permute.xlu0 %4962  }
 0x32f   :  { %6489 = vst.msk [vmem:[%s9711_s1 + $0xd0] sm:$0xff] %vm4547_vm4, %v4963_v57  }
 0x330   :  { %v4974_v43 = vpop.permute.xlu1 %4973  }
 0x331   :  { %6490 = vst.msk [vmem:[%s9711_s1 + $0xf0] sm:$0xff] %vm4547_vm4, %v4974_v43  }
 0x332   :  { %v4985_v59 = vpop.permute.xlu0 %4984  }
 0x333   :  { %6491 = vst.msk [vmem:[%s9711_s1 + $0x110] sm:$0xff] %vm4547_vm4, %v4985_v59  }
 0x334   :  { %v4996_v33 = vpop.permute.xlu1 %4995  }
 0x335   :  { %6492 = vst.msk [vmem:[%s9711_s1 + $0x130] sm:$0xff] %vm4547_vm4, %v4996_v33  }
 0x336   :  { %v5007_v39 = vpop.permute.xlu0 %5006  }
 0x337   :  { %6493 = vst.msk [vmem:[%s9711_s1 + $0x150] sm:$0xff] %vm4547_vm4, %v5007_v39  }
 0x338   :  { %v5018_v11 = vpop.permute.xlu1 %5017  }
 0x339   :  { %6494 = vst.msk [vmem:[%s9711_s1 + $0x170] sm:$0xff] %vm4547_vm4, %v5018_v11  }
 0x33a   :  { %v5029_v61 = vpop.permute.xlu0 %5028  }
 0x33b   :  { %6495 = vst.msk [vmem:[%s9711_s1 + $0x190] sm:$0xff] %vm4547_vm4, %v5029_v61  }
 0x33c   :  { %v5040_v54 = vpop.permute.xlu1 %5039  }
 0x33d   :  { %6496 = vst.msk [vmem:[%s9711_s1 + $0x1b0] sm:$0xff] %vm4547_vm4, %v5040_v54  }
 0x33e   :  { %v5051_v0 = vpop.permute.xlu0 %5050  }
 0x33f   :  { %6497 = vst.msk [vmem:[%s9711_s1 + $0x1d0] sm:$0xff] %vm4547_vm4, %v5051_v0  }
 0x340   :  { %v5062_v28 = vpop.permute.xlu1 %5061  }
 0x341   :  { %6498 = vst.msk [vmem:[%s9711_s1 + $0x1f0] sm:$0xff] %vm4547_vm4, %v5062_v28  }
 0x342   :  { %v5073_v46 = vpop.permute.xlu0 %5072  }
 0x343   :  { %6499 = vst.msk [vmem:[%s9711_s1 + $0x18] sm:$0xff] %vm4547_vm4, %v5073_v46  }
 0x344   :  { %v5084_v5 = vpop.permute.xlu1 %5083  }
 0x345   :  { %6500 = vst.msk [vmem:[%s9711_s1 + $0x38] sm:$0xff] %vm4547_vm4, %v5084_v5  }
 0x346   :  { %v5095_v44 = vpop.permute.xlu0 %5094  }
 0x347   :  { %6501 = vst.msk [vmem:[%s9711_s1 + $0x58] sm:$0xff] %vm4547_vm4, %v5095_v44  }
 0x348   :  { %v5106_v20 = vpop.permute.xlu1 %5105  }
 0x349   :  { %6502 = vst.msk [vmem:[%s9711_s1 + $0x78] sm:$0xff] %vm4547_vm4, %v5106_v20  }
 0x34a   :  { %v5117_v53 = vpop.permute.xlu0 %5116  }
 0x34b   :  { %6503 = vst.msk [vmem:[%s9711_s1 + $0x98] sm:$0xff] %vm4547_vm4, %v5117_v53  }
 0x34c   :  { %v5128_v7 = vpop.permute.xlu1 %5127  }
 0x34d   :  { %6504 = vst.msk [vmem:[%s9711_s1 + $0xb8] sm:$0xff] %vm4547_vm4, %v5128_v7  }
 0x34e   :  { %v5139_v8 = vpop.permute.xlu0 %5138  }
 0x34f   :  { %6505 = vst.msk [vmem:[%s9711_s1 + $0xd8] sm:$0xff] %vm4547_vm4, %v5139_v8  }
 0x350   :  { %v5150_v32 = vpop.permute.xlu1 %5149  }
 0x351   :  { %6506 = vst.msk [vmem:[%s9711_s1 + $0xf8] sm:$0xff] %vm4547_vm4, %v5150_v32  }
 0x352   :  { %v5161_v4 = vpop.permute.xlu0 %5160  }
 0x353   :  { %6507 = vst.msk [vmem:[%s9711_s1 + $0x118] sm:$0xff] %vm4547_vm4, %v5161_v4  }
 0x354   :  { %v5172_v9 = vpop.permute.xlu1 %5171  }
 0x355   :  { %6508 = vst.msk [vmem:[%s9711_s1 + $0x138] sm:$0xff] %vm4547_vm4, %v5172_v9  }
 0x356   :  { %v5183_v15 = vpop.permute.xlu0 %5182  }
 0x357   :  { %6509 = vst.msk [vmem:[%s9711_s1 + $0x158] sm:$0xff] %vm4547_vm4, %v5183_v15  }
 0x358   :  { %v5194_v47 = vpop.permute.xlu1 %5193  }
 0x359   :  { %6510 = vst.msk [vmem:[%s9711_s1 + $0x178] sm:$0xff] %vm4547_vm4, %v5194_v47  }
 0x35a   :  { %v5205_v10 = vpop.permute.xlu0 %5204  }
 0x35b   :  { %6511 = vst.msk [vmem:[%s9711_s1 + $0x198] sm:$0xff] %vm4547_vm4, %v5205_v10  }
 0x35c   :  { %v5216_v2 = vpop.permute.xlu1 %5215  }
 0x35d   :  { %6512 = vst.msk [vmem:[%s9711_s1 + $0x1b8] sm:$0xff] %vm4547_vm4, %v5216_v2  }
 0x35e   :  { %v5227_v52 = vpop.permute.xlu0 %5226  }
 0x35f   :  { %6513 = vst.msk [vmem:[%s9711_s1 + $0x1d8] sm:$0xff] %vm4547_vm4, %v5227_v52  }
 0x360   :  { %v5238_v3 = vpop.permute.xlu1 %5237  }
 0x361   :  { %6514 = vst.msk [vmem:[%s9711_s1 + $0x1f8] sm:$0xff] %vm4547_vm4, %v5238_v3  }

// kernel: backbone_forward.1
= control target key start
LH: loop header
LB: loop body
LE: loop exit
PB: predicated region body
PF: predicated region fallthrough
CT: control target
= control target key end

     0   :  { %s3175_s26 = smov 0   ;;  %s4032_s0 = inlined_call_operand.vmem [shape: f32[2,16,4], index: 0, kind: input, shape index: {}]   ;;  %s4033_s1 = inlined_call_operand.vmem [shape: f32[2,2,128], index: 1, kind: input, shape index: {}]   ;;  %s4034_s2 = inlined_call_operand.vmem [shape: f32[4,128], index: 2, kind: input, shape index: {}]   ;;  %s4035_s3 = inlined_call_operand.vmem [shape: f32[1,128], index: 3, kind: input, shape index: {}]   ;;  %s4036_s4 = inlined_call_operand.vmem [shape: f32[128,128], index: 4, kind: input, shape index: {}]   ;;  %s4037_s5 = inlined_call_operand.vmem [shape: f32[2,128], index: 5, kind: input, shape index: {}]   ;;  %s4038_s6 = inlined_call_operand.vmem [shape: f32[2,128], index: 6, kind: input, shape index: {}]   ;;  %s4039_s7 = inlined_call_operand.vmem [shape: f32[2,16,16,128], index: 7, kind: input, shape index: {}]   ;;  %s4040_s8 = inlined_call_operand.vmem [shape: f32[2,128], index: 8, kind: input, shape index: {}]   ;;  %s4041_s9 = inlined_call_operand.vmem [shape: bf16[2,128,128], index: 9, kind: input, shape index: {}]   ;;  %s4042_s10 = inlined_call_operand.vmem [shape: f32[2,128], index: 10, kind: input, shape index: {}]   ;;  %s4043_s11 = inlined_call_operand.vmem [shape: bf16[2,128,256], index: 11, kind: input, shape index: {}]   ;;  %s4044_s12 = inlined_call_operand.vmem [shape: f32[2,256], index: 12, kind: input, shape index: {}]   ;;  %s4045_s13 = inlined_call_operand.vmem [shape: bf16[128,128], index: 13, kind: input, shape index: {}]   ;;  %s4046_s14 = inlined_call_operand.vmem [shape: f32[1,128], index: 14, kind: input, shape index: {}]   ;;  %s4047_s15 = inlined_call_operand.vmem [shape: f32[128,4], index: 15, kind: input, shape index: {}]   ;;  %s4048_s16 = inlined_call_operand.<no memory space> [shape: f32[1], index: 16, kind: input, shape index: {}]   ;;  %s4049_s17 = inlined_call_operand.vmem [shape: f32[2,16,4], index: 17, kind: output, shape index: {}]  }
   0x1   :  { %4050 = sst [smem:[#allocation3_spill]] %s4032_s0 }
   0x2   :  { %4051 = sst [smem:[#allocation4_spill]] %s4033_s1 }
   0x3   :  { %22 = sst [smem:[#allocation2]] %s4048_s16 }
   0x4 LB: > { %s2244_s27 = sadd.s32 4294967295, %s3077_s26   ;;  %p2248_p0 = scmp.ge.s32.totalorder %s3077_s26, 1  ;;  %s3077_s26 = sphi %s3175_s26, %s28_s26  }
   0x5   : > { %p497_p1 = scmp.lt.s32.totalorder %s3077_s26, 3 }
   0x7   : > { %p498_p2 = pnand %p2248_p0, %p497_p1 }
   0x8   : > { %v571_v0 = vld [vmem:[%s4034_s2] sm:$0xf] (!%p498_p2)  ;;  %vm586_vm0 = vcmask (!%p498_p2), 1043456   ;;  %p553_p3 = scmp.lt.s32.totalorder (!%p498_p2), %s2244_s27, 1  ;;  %v668_v2 = vld [vmem:[%s4036_s4 + $0x8] sm:$0xff] (!%p498_p2)  ;;  %v669_v3 = vld [vmem:[%s4036_s4 + $0x10] sm:$0xff] (!%p498_p2)  ;;  %v683_v27 = vlaneseq (!%p498_p2) }
   0x9   : > { %501 = sbr.rel (%p498_p2) target bundleno = 2202 (0x89a), region = 88  ;;  %v667_v1 = vld [vmem:[%s4036_s4] sm:$0xff] (!%p498_p2)  ;;  %2546 = vmatprep.subr.msk.mxu0 (!%p498_p2), %vm586_vm0, %v571_v0  ;;  %v670_v4 = vld [vmem:[%s4036_s4 + $0x18] sm:$0xff] (!%p498_p2)  ;;  %v672_v8 = vld [vmem:[%s4036_s4 + $0x28] sm:$0xff] (!%p498_p2)  ;;  %vm579_vm1 = vcmask (!%p498_p2), 31744   ;;  %s4052_s0 = sld [smem:[#allocation3_spill]] (!%p498_p2) }
   0xa   : > { %2547 = vmatpush3.msk.msra.mxu0 (!%p498_p2), %vm586_vm0, %v571_v0  ;;  %v3200_v5 = vpack.c.bf16 (!%p498_p2), %v668_v2, %v667_v1  ;;  %v3202_v6 = vpack.c.bf16 (!%p498_p2), %v670_v4, %v669_v3  ;;  %v671_v7 = vld [vmem:[%s4036_s4 + $0x20] sm:$0xff] (!%p498_p2)  ;;  %v673_v9 = vld [vmem:[%s4036_s4 + $0x30] sm:$0xff] (!%p498_p2)  ;;  %v674_v13 = vld [vmem:[%s4036_s4 + $0x38] sm:$0xff] (!%p498_p2)  ;;  %v3297_v28 = vshrl.u32 (!%p498_p2), %v683_v27, 7  ;;  %v3079_v44 = vmov (!%p498_p2), 0.0   ;;  %s2096_s29 = sld [smem:[#allocation2]] (!%p498_p2) }
   0xb   : > { %v3227_v12 = vpack.c.bf16 (!%p498_p2), %v672_v8, %v671_v7  ;;  %v675_v14 = vld [vmem:[%s4036_s4 + $0x40] sm:$0xff] (!%p498_p2)  ;;  %v676_v15 = vld [vmem:[%s4036_s4 + $0x48] sm:$0xff] (!%p498_p2)  ;;  %v3244_v16 = vpack.c.bf16 (!%p498_p2), %v674_v13, %v673_v9  ;;  %v677_v17 = vld [vmem:[%s4036_s4 + $0x50] sm:$0xff] (!%p498_p2)  ;;  %vm3080_vm2 = vmmov (!%p498_p2), 0  }
   0xc   : > { %2787 = vmatprep.subr.bf16.mxu1 (!%p498_p2), %v3200_v5  ;;  %2819 = vmatprep.subr.bf16.mxu0 (!%p498_p2), %v3200_v5  ;;  %v678_v18 = vld [vmem:[%s4036_s4 + $0x58] sm:$0xff] (!%p498_p2)  ;;  %v3256_v19 = vpack.c.bf16 (!%p498_p2), %v676_v15, %v675_v14  ;;  %v679_v21 = vld [vmem:[%s4036_s4 + $0x60] sm:$0xff] (!%p498_p2)  ;;  %v680_v22 = vld [vmem:[%s4036_s4 + $0x68] sm:$0xff] (!%p498_p2)  ;;  %v685_v29 = vsub.s32 (!%p498_p2), 0, %v3297_v28  ;;  %vm878_vm3 = vcmp.lt.s32.totalorder (!%p498_p2), %v3297_v28, 1  ;;  %vm890_vm4 = vcmp.lt.s32.totalorder (!%p498_p2), %v3297_v28, 2 }
   0xd   : > { %2789 = vmatpush3.bf16.msra.mxu1 (!%p498_p2), %v3200_v5  ;;  %v3262_v20 = vpack.c.bf16 (!%p498_p2), %v678_v18, %v677_v17  ;;  %v3278_v23 = vpack.c.bf16 (!%p498_p2), %v680_v22, %v679_v21  ;;  %v681_v24 = vld [vmem:[%s4036_s4 + $0x70] sm:$0xff] (!%p498_p2)  ;;  %v682_v25 = vld [vmem:[%s4036_s4 + $0x78] sm:$0xff] (!%p498_p2)  ;;  %v2254_v31 = vld [vmem:[%s4035_s3] ss:$0 sm:$0xff] (!%p498_p2)  ;;  %vm902_vm5 = vcmp.lt.s32.totalorder (!%p498_p2), %v3297_v28, 3  ;;  %vm914_vm6 = vcmp.lt.s32.totalorder (!%p498_p2), %v3297_v28, 4 }
   0xe   : > { %2791 = vmatprep.subr.bf16.mxu1 (!%p498_p2), %v3202_v6  ;;  %v3290_v26 = vpack.c.bf16 (!%p498_p2), %v682_v25, %v681_v24  ;;  %v2957_v43 = vld [vmem:[%s4041_s9] sm:$0xff] (!%p498_p2)   ;;  %v2958_v45 = vld [vmem:[%s4041_s9 + $0x8] sm:$0xff] (!%p498_p2)   ;;  %v2959_v46 = vld [vmem:[%s4041_s9 + $0x10] sm:$0xff] (!%p498_p2)   ;;  %vm926_vm7 = vcmp.lt.s32.totalorder (!%p498_p2), %v3297_v28, 5  ;;  %vm938_vm8 = vcmp.lt.s32.totalorder (!%p498_p2), %v3297_v28, 6  ;;  %vm950_vm9 = vcmp.lt.s32.totalorder (!%p498_p2), %v3297_v28, 7 }
   0xf   : > { %v2960_v47 = vld [vmem:[%s4041_s9 + $0x18] sm:$0xff] (!%p498_p2)   ;;  %v2961_v48 = vld [vmem:[%s4041_s9 + $0x20] sm:$0xff] (!%p498_p2)   ;;  %v2962_v49 = vld [vmem:[%s4041_s9 + $0x28] sm:$0xff] (!%p498_p2)  }
  0x10   : > { %s4055_s27 = smov (!%p553_p3, %s2244_s27), 1  ;;  %v2963_v50 = vld [vmem:[%s4041_s9 + $0x30] sm:$0xff]   ;;  %v2964_v51 = vld [vmem:[%s4041_s9 + $0x38] sm:$0xff]   ;;  %v2258_v1 = vld [vmem:[%s4037_s5] ss:$0 sm:$0xff] }
  0x11   : > { %s2424_s28 = sshll.u32 %s4055_s27, 4  ;;  %2793 = vmatpush3.bf16.msra.mxu1 %v3202_v6  ;;  %s2251_s25 = sshll.u32 %s4055_s27, 1  ;;  %v2259_v4 = vld [vmem:[%s4038_s6] ss:$0 sm:$0xff]  ;;  %v2260_v17 = vld [vmem:[%s4039_s7 + $0x10] sm:$0xff]  ;;  %v2261_v25 = vld [vmem:[%s4039_s7 + $0x18] sm:$0xff] }
  0x12   : > { %s3218_s30 = scalar_lea.vmem %s4052_s0, %s2424_s28  ;;  %2795 = vmatprep.subr.bf16.mxu1 %v3227_v12  ;;  %s4053_s0 = sld [smem:[#allocation4_spill]]  ;;  %v867_v13 = vld [vmem:[%s4039_s7] sm:$0xff] }
  0x13   : > { %v568_v10 = vld [vmem:[%s3218_s30] sm:$0xff]  ;;  %v569_v11 = vld [vmem:[%s3218_s30 + $0x8] sm:$0xff] }
  0x14   : > { %2548 = vmatprep.mubr.msk.f32.mxu0 %vm579_vm1, %v568_v10  ;;  %v868_v10 = vld [vmem:[%s4039_s7 + $0x8] sm:$0xff] }
  0x15   : > { %2549 = vmatmul.mubr.msk.f32.vlgmr.msra.gmra.mrb[0].mxu0 %vm579_vm1, %v569_v11  ;;  %2797 = vmatpush3.bf16.msra.mxu1 %v3227_v12 }
  0x16   : > { %2821 = vmatpush3.bf16.msra.mxu0 %v3200_v5  ;;  %2799 = vmatprep.subr.bf16.mxu1 %v3244_v16 }
  0x17   : > { %2823 = vmatprep.subr.bf16.mxu0 %v3202_v6 }
  0x18   : > { %s561_s18 = scalar_lea.vmem %s4053_s0, %s2251_s25 }
  0x19   : > { %2801 = vmatpush3.bf16.msra.mxu1 %v3244_v16  ;;  %v3303_v30 = vld [vmem:[%s561_s18] sm:$0x3]  ;;  %s566_s18 = scalar_lea.vmem %s4049_s17, %s2424_s28 }
  0x1a   : > { %2825 = vmatpush3.bf16.msra.mxu0 %v3202_v6  ;;  %2803 = vmatprep.subr.bf16.mxu1 %v3256_v19  ;;  %v686_v34 = vrot.slane %v3303_v30, %v685_v29 }
  0x1b   : > { %2827 = vmatprep.subr.bf16.mxu0 %v3227_v12 }
  0x1d   : > { %2805 = vmatpush3.bf16.msra.mxu1 %v3256_v19 }
  0x1e   : > { %2829 = vmatpush3.bf16.msra.mxu0 %v3227_v12  ;;  %2807 = vmatprep.subr.bf16.mxu1 %v3262_v20 }
  0x1f   : > { %2831 = vmatprep.subr.bf16.mxu0 %v3244_v16 }
  0x21   : > { %2809 = vmatpush3.bf16.msra.mxu1 %v3262_v20 }
  0x22   : > { %2833 = vmatpush3.bf16.msra.mxu0 %v3244_v16  ;;  %2811 = vmatprep.subr.bf16.mxu1 %v3278_v23 }
  0x23   : > { %2835 = vmatprep.subr.bf16.mxu0 %v3256_v19 }
  0x25   : > { %2813 = vmatpush3.bf16.msra.mxu1 %v3278_v23 }
  0x26   : > { %2837 = vmatpush3.bf16.msra.mxu0 %v3256_v19  ;;  %2815 = vmatprep.subr.bf16.mxu1 %v3290_v26 }
  0x27   : > { %2839 = vmatprep.subr.bf16.mxu0 %v3262_v20 }
  0x29   : > { %2817 = vmatpush3.bf16.msra.mxu1 %v3290_v26 }
  0x2a   : > { %2841 = vmatpush3.bf16.msra.mxu0 %v3262_v20  ;;  %2621 = vmatprep.subr.bf16.mxu1 %v3079_v44 }
  0x2b   : > { %2843 = vmatprep.subr.bf16.mxu0 %v3278_v23 }
  0x2e   : > { %2845 = vmatpush3.bf16.msra.mxu0 %v3278_v23 }
  0x2f   : > { %2847 = vmatprep.subr.bf16.mxu0 %v3290_v26 }
  0x32   : > { %2849 = vmatpush3.bf16.msra.mxu0 %v3290_v26 }
  0xe8   : > { %v2550_v32 = vpop.f32.mrb[0].mxu0 }
  0xe9   : > { %v3308_v33 = vadd.f32 %v2550_v32, %v2254_v31  ;;  %v656_v35 = vpop.f32.mrb[1].mxu0  ;;  %v2263_v32 = vld [vmem:[%s4039_s7 + $0x28] sm:$0xff] }
  0xea   : > { %v3313_v36 = vadd.f32 %v2254_v31, %v656_v35  ;;  %v2262_v31 = vld [vmem:[%s4039_s7 + $0x20] sm:$0xff] }
  0xeb   : > { %v666_v37 = vmax.f32 %v3308_v33, 0.0  ;;  %v2989_v33 = vld [vmem:[%s4041_s9 + $0x40] sm:$0xff]  }
  0xec   : > { %v665_v38 = vmax.f32 %v3313_v36, 0.0 }
  0xed   : > { %v3319_v39 = vadd.f32 %v686_v34, %v666_v37 }
  0xee   : > { %v3323_v40 = vadd.f32 %v686_v34, %v665_v38 }
  0xef   : > { %v765_v42 = vmul.f32 %v3319_v39, %v3319_v39 }
  0xf0   : > { %2583 = vmatprep.mubr.f32.mxu1 %v3323_v40  ;;  %v764_v41 = vmul.f32 %v3323_v40, %v3323_v40 }
  0xf1   : > { %2584 = vmatmul.mubr.f32.vlgmr.msra.gmra.mrb[0].mxu1 %v3319_v39 }
  0xf2   : > { %2618 = vmatprep.mubr.f32.mxu0 %v764_v41  ;;  %2637 = vmatprep.mubr.msk.bf16.mxu1 %vm3080_vm2, %v3079_v44  ;;  %v2264_v41 = vld [vmem:[%s4039_s7 + $0x30] sm:$0xff] }
  0xf3   : > { %2619 = vmatmul.mubr.f32.vlgmr.msra.gmra.mrb[2].mxu0 %v765_v42  ;;  %2622 = vmatpush3.bf16.msra.mxu1 %v2957_v43 }
  0xf4   : > { %2623 = vmatprep.subr.bf16.mxu1 %v3079_v44 }
  0xf7   : > { %2624 = vmatpush3.bf16.msra.mxu1 %v2958_v45 }
  0xf8   : > { %2625 = vmatprep.subr.bf16.mxu1 %v3079_v44 }
  0xfb   : > { %2626 = vmatpush3.bf16.msra.mxu1 %v2959_v46 }
  0xfc   : > { %2627 = vmatprep.subr.bf16.mxu1 %v3079_v44 }
  0xff   : > { %2628 = vmatpush3.bf16.msra.mxu1 %v2960_v47 }
 0x100   : > { %2629 = vmatprep.subr.bf16.mxu1 %v3079_v44 }
 0x103   : > { %2630 = vmatpush3.bf16.msra.mxu1 %v2961_v48 }
 0x104   : > { %2631 = vmatprep.subr.bf16.mxu1 %v3079_v44 }
 0x107   : > { %2632 = vmatpush3.bf16.msra.mxu1 %v2962_v49 }
 0x108   : > { %2633 = vmatprep.subr.bf16.mxu1 %v3079_v44 }
 0x10b   : > { %2634 = vmatpush3.bf16.msra.mxu1 %v2963_v50 }
 0x10c   : > { %2635 = vmatprep.subr.bf16.mxu1 %v3079_v44 }
 0x10f   : > { %2636 = vmatpush3.bf16.msra.mxu1 %v2964_v51  ;;  %v2265_v51 = vld [vmem:[%s4039_s7 + $0x38] sm:$0xff] }
 0x110   : > { %2851 = vmatprep.subr.bf16.mxu1 %v3200_v5 }
 0x1c4   : > { %v2585_v52 = vpop.f32.mrb[0].mxu1 }
 0x1c5   : > { %v842_v53 = vmul.f32 %v2585_v52, %v2585_v52  ;;  %v755_v54 = vpop.f32.mrb[1].mxu1  ;;  %v846_v62 = vsub.f32 %v3319_v39, %v2585_v52  ;;  %v2266_v52 = vld [vmem:[%s4039_s7 + $0x40] sm:$0xff] }
 0x1c6   : > { %v841_v55 = vmul.f32 %v755_v54, %v755_v54  ;;  %v2620_v56 = vpop.f32.mrb[2].mxu0  ;;  %v845_v0 = vsub.f32 %v3323_v40, %v755_v54 }
 0x1c7   : > { %v844_v57 = vsub.f32 %v2620_v56, %v842_v53  ;;  %v832_v58 = vpop.f32.mrb[3].mxu0  ;;  %v2267_v53 = vld [vmem:[%s4039_s7 + $0x48] sm:$0xff] }
 0x1c8   : > { %v843_v59 = vsub.f32 %v832_v58, %v841_v55 }
 0x1c9   : > { %v848_v60 = vadd.f32 1e-05, %v844_v57 }
 0x1ca   : > { %v847_v61 = vadd.f32 1e-05, %v843_v59 }
 0x1cb   : > { %3029 = vrsqrt.f32 %v848_v60 }
 0x1cc   : > { %3031 = vrsqrt.f32 %v847_v61 }
 0x1d5   : > { %v3030_v63 = vpop.eup %3029 }
 0x1d6   : > { %v3032_v2 = vpop.eup %3031  ;;  %v852_v3 = vmul.f32 %v3030_v63, %v846_v62  ;;  %v2268_v62 = vld [vmem:[%s4039_s7 + $0x50] sm:$0xff]  ;;  %v2269_v63 = vld [vmem:[%s4039_s7 + $0x58] sm:$0xff] }
 0x1d7   : > { %v851_v7 = vmul.f32 %v3032_v2, %v845_v0 }
 0x1d8   : > { %v859_v8 = vmul.f32 %v2258_v1, %v852_v3 }
 0x1d9   : > { %v858_v9 = vmul.f32 %v2258_v1, %v851_v7 }
 0x1da   : > { %v3377_v11 = vadd.f32 %v2259_v4, %v859_v8  ;;  %v2270_v8 = vld [vmem:[%s4039_s7 + $0x60] sm:$0xff] }
 0x1db   : > { %v3385_v14 = vadd.f32 %v2259_v4, %v858_v9  ;;  %v2271_v9 = vld [vmem:[%s4039_s7 + $0x68] sm:$0xff] }
 0x1dc   : > { %v870_v15 = vmul.f32 %v868_v10, %v3377_v11  ;;  %v875_v18 = vrot.slane %v3377_v11, 7  ;;  %v889_v21 = vrot.slane %v3377_v11, 6  ;;  %v901_v22 = vrot.slane %v3377_v11, 5 }
 0x1dd   : > { %v869_v24 = vmul.f32 %v867_v13, %v3385_v14  ;;  %v874_v27 = vrot.slane %v3385_v14, 7  ;;  %v888_v34 = vrot.slane %v3385_v14, 6  ;;  %v900_v35 = vrot.slane %v3385_v14, 5 }
 0x1de   : > { %v912_v42 = vrot.slane %v3385_v14, 4  ;;  %v913_v43 = vrot.slane %v3377_v11, 4  ;;  %v924_v45 = vrot.slane %v3385_v14, 3  ;;  %v925_v46 = vrot.slane %v3377_v11, 3 }
 0x1df   : > { %v879_v47 = vsel %vm878_vm3, %v874_v27, %v875_v18  ;;  %v880_v48 = vsel %vm878_vm3, %v875_v18, %v874_v27  ;;  %v3424_v49 = vsel %vm890_vm4, %v888_v34, %v889_v21  ;;  %v3428_v50 = vsel %vm890_vm4, %v889_v21, %v888_v34  ;;  %v2275_v27 = vld [vmem:[%s4039_s7 + $0x88] sm:$0xff] }
 0x1e0   : > { %v881_v54 = vmul.f32 %v2260_v17, %v880_v48  ;;  %v882_v55 = vmul.f32 %v2261_v25, %v879_v47  ;;  %v893_v56 = vmul.f32 %v2262_v31, %v3428_v50  ;;  %v894_v57 = vmul.f32 %v2263_v32, %v3424_v49  ;;  %v2274_v25 = vld [vmem:[%s4039_s7 + $0x80] sm:$0xff] }
 0x1e1   : > { %v903_v58 = vsel %vm902_vm5, %v900_v35, %v901_v22  ;;  %v904_v59 = vsel %vm902_vm5, %v901_v22, %v900_v35  ;;  %v3447_v60 = vsel %vm914_vm6, %v912_v42, %v913_v43  ;;  %v3451_v61 = vsel %vm914_vm6, %v913_v43, %v912_v42 }
 0x1e2   : > { %v905_v0 = vmul.f32 %v2264_v41, %v904_v59  ;;  %v906_v1 = vmul.f32 %v2265_v51, %v903_v58  ;;  %v917_v2 = vmul.f32 %v2266_v52, %v3451_v61  ;;  %v918_v3 = vmul.f32 %v2267_v53, %v3447_v60  ;;  %v2277_v51 = vld [vmem:[%s4039_s7 + $0x98] sm:$0xff] }
 0x1e3   : > { %v927_v4 = vsel %vm926_vm7, %v924_v45, %v925_v46  ;;  %v928_v7 = vsel %vm926_vm7, %v925_v46, %v924_v45  ;;  %v936_v10 = vrot.slane %v3385_v14, 2  ;;  %v937_v13 = vrot.slane %v3377_v11, 2  ;;  %v2276_v46 = vld [vmem:[%s4039_s7 + $0x90] sm:$0xff] }
 0x1e4   : > { %v919_v17 = vadd.f32 %v917_v2, %v869_v24  ;;  %v920_v18 = vadd.f32 %v918_v3, %v870_v15  ;;  %v929_v21 = vmul.f32 %v2268_v62, %v928_v7  ;;  %v930_v22 = vmul.f32 %v2269_v63, %v927_v4  ;;  %v2272_v15 = vld [vmem:[%s4039_s7 + $0x70] sm:$0xff]  ;;  %v2273_v24 = vld [vmem:[%s4039_s7 + $0x78] sm:$0xff]  ;;  %v2279_v63 = vld [vmem:[%s4039_s7 + $0xa8] sm:$0xff] }
 0x1e5   : > { %v939_v31 = vsel %vm938_vm8, %v936_v10, %v937_v13  ;;  %v940_v32 = vsel %vm938_vm8, %v937_v13, %v936_v10  ;;  %v948_v34 = vrot.slane %v3385_v14, 1  ;;  %v949_v35 = vrot.slane %v3377_v11, 1  ;;  %v2280_v10 = vld [vmem:[%s4039_s7 + $0xb0] sm:$0xff]  ;;  %v2281_v13 = vld [vmem:[%s4039_s7 + $0xb8] sm:$0xff] }
 0x1e6   : > { %v931_v41 = vadd.f32 %v929_v21, %v881_v54  ;;  %v932_v42 = vadd.f32 %v930_v22, %v882_v55  ;;  %v941_v43 = vmul.f32 %v2270_v8, %v940_v32  ;;  %v942_v45 = vmul.f32 %v2271_v9, %v939_v31  ;;  %v2278_v55 = vld [vmem:[%s4039_s7 + $0xa0] sm:$0xff] }
 0x1e7   : > { %v951_v52 = vsel %vm950_vm9, %v948_v34, %v949_v35  ;;  %v952_v53 = vsel %vm950_vm9, %v949_v35, %v948_v34  ;;  %v960_v62 = vmul.f32 %v2274_v25, %v3377_v11  ;;  %v961_v54 = vmul.f32 %v2275_v27, %v3385_v14  ;;  %v2282_v34 = vld [vmem:[%s4039_s7 + $0xc0] sm:$0xff] }
 0x1e8   : > { %v943_v2 = vadd.f32 %v941_v43, %v893_v56  ;;  %v944_v3 = vadd.f32 %v942_v45, %v894_v57  ;;  %v953_v8 = vmul.f32 %v2272_v15, %v952_v53  ;;  %v954_v9 = vmul.f32 %v2273_v24, %v951_v52  ;;  %v2283_v56 = vld [vmem:[%s4039_s7 + $0xc8] sm:$0xff] }
 0x1e9   : > { %v962_v21 = vadd.f32 %v960_v62, %v919_v17  ;;  %v963_v22 = vadd.f32 %v961_v54, %v920_v18  ;;  %v967_v25 = vmul.f32 %v2276_v46, %v879_v47  ;;  %v968_v27 = vmul.f32 %v2277_v51, %v880_v48  ;;  %v2284_v17 = vld [vmem:[%s4039_s7 + $0xd0] sm:$0xff]  ;;  %v2285_v47 = vld [vmem:[%s4039_s7 + $0xd8] sm:$0xff] }
 0x1ea   : > { %v955_v57 = vadd.f32 %v953_v8, %v905_v0  ;;  %v956_v15 = vadd.f32 %v954_v9, %v906_v1  ;;  %v974_v24 = vmul.f32 %v2278_v55, %v3424_v49  ;;  %v975_v35 = vmul.f32 %v2279_v63, %v3428_v50  ;;  %v2286_v0 = vld [vmem:[%s4039_s7 + $0xe0] sm:$0xff]  ;;  %v2287_v49 = vld [vmem:[%s4039_s7 + $0xe8] sm:$0xff] }
 0x1eb   : > { %v969_v48 = vadd.f32 %v967_v25, %v931_v41  ;;  %v970_v18 = vadd.f32 %v968_v27, %v932_v42  ;;  %v981_v43 = vmul.f32 %v2280_v10, %v903_v58  ;;  %v982_v45 = vmul.f32 %v2281_v13, %v904_v59  ;;  %v2288_v41 = vld [vmem:[%s4039_s7 + $0xf0] sm:$0xff]  ;;  %v2289_v58 = vld [vmem:[%s4039_s7 + $0xf8] sm:$0xff] }
 0x1ec   : > { %v976_v50 = vadd.f32 %v974_v24, %v943_v2  ;;  %v977_v1 = vadd.f32 %v975_v35, %v944_v3  ;;  %v988_v46 = vmul.f32 %v2282_v34, %v3447_v60  ;;  %v989_v51 = vmul.f32 %v2283_v56, %v3451_v61 }
 0x1ed   : > { %v983_v59 = vadd.f32 %v981_v43, %v955_v57  ;;  %v984_v42 = vadd.f32 %v982_v45, %v956_v15  ;;  %v995_v62 = vmul.f32 %v2284_v17, %v927_v4  ;;  %v996_v54 = vmul.f32 %v2285_v47, %v928_v7  ;;  %v2290_v57 = vld [vmem:[%s4040_s8] ss:$0 sm:$0xff] }
 0x1ee   : > { %v990_v55 = vadd.f32 %v988_v46, %v962_v21  ;;  %v991_v63 = vadd.f32 %v989_v51, %v963_v22  ;;  %v1002_v2 = vmul.f32 %v2286_v0, %v939_v31  ;;  %v1003_v3 = vmul.f32 %v2287_v49, %v940_v32 }
 0x1ef   : > { %v997_v8 = vadd.f32 %v995_v62, %v969_v48  ;;  %v998_v60 = vadd.f32 %v996_v54, %v970_v18  ;;  %v1009_v9 = vmul.f32 %v2288_v41, %v951_v52  ;;  %v1010_v61 = vmul.f32 %v2289_v58, %v952_v53  ;;  %v2970_v62 = vld [vmem:[%s4043_s11 + $0x14] ss:$8 sps:$4 sm:$0xff]   ;;  %v2968_v54 = vld [vmem:[%s4043_s11 + $0x10] ss:$8 sps:$4 sm:$0xff]  }
 0x1f0   : > { %v1004_v10 = vadd.f32 %v1002_v2, %v976_v50  ;;  %v1005_v13 = vadd.f32 %v1003_v3, %v977_v1  ;;  %v1024_v31 = vmul.f32 %v2290_v57, %v3385_v14  ;;  %v1025_v32 = vmul.f32 %v2290_v57, %v3377_v11  ;;  %v2974_v2 = vld [vmem:[%s4043_s11 + $0x30] ss:$8 sps:$4 sm:$0xff]   ;;  %v2976_v3 = vld [vmem:[%s4043_s11 + $0x34] ss:$8 sps:$4 sm:$0xff]  }
 0x1f1   : > { %v1011_v25 = vadd.f32 %v1009_v9, %v983_v59  ;;  %v1012_v27 = vadd.f32 %v1010_v61, %v984_v42  ;;  %v1013_v34 = vadd.f32 %v997_v8, %v990_v55  ;;  %v1014_v56 = vadd.f32 %v998_v60, %v991_v63  ;;  %v2967_v59 = vld [vmem:[%s4043_s11 + $0x4] ss:$8 sps:$4 sm:$0xff]   ;;  %v2965_v42 = vld [vmem:[%s4043_s11] ss:$8 sps:$4 sm:$0xff]   ;;  %v2982_v61 = vld [vmem:[%s4043_s11 + $0x54] ss:$8 sps:$4 sm:$0xff]  }
 0x1f2   : > { %1284 = vmatprep.subr.bf16.mxu0 %v2967_v59  ;;  %v2973_v55 = vld [vmem:[%s4043_s11 + $0x24] ss:$8 sps:$4 sm:$0xff]   ;;  %v2971_v63 = vld [vmem:[%s4043_s11 + $0x20] ss:$8 sps:$4 sm:$0xff]   ;;  %v3081_v9 = vmov 0   ;;  %v2996_v59 = vld [vmem:[%s4041_s9 + $0x78] sm:$0xff]  }
 0x1f3   : > { %v1015_v4 = vadd.f32 %v1011_v25, %v1004_v10  ;;  %v1016_v7 = vadd.f32 %v1012_v27, %v1005_v13  ;;  %1285 = vmatpush1.bf16.msra.mxu0 %v2965_v42  ;;  %v2979_v8 = vld [vmem:[%s4043_s11 + $0x44] ss:$8 sps:$4 sm:$0xff]   ;;  %v2977_v60 = vld [vmem:[%s4043_s11 + $0x40] ss:$8 sps:$4 sm:$0xff]   ;;  %1316 = vmatprep.mubr.bf16.mxu0 %v3081_v9  ;;  %v2980_v10 = vld [vmem:[%s4043_s11 + $0x50] ss:$8 sps:$4 sm:$0xff]  }
 0x1f4   : > { %1286 = vmatprep.subr.bf16.mxu0 %v2970_v62  ;;  %v2985_v13 = vld [vmem:[%s4043_s11 + $0x64] ss:$8 sps:$4 sm:$0xff]   ;;  %v2983_v25 = vld [vmem:[%s4043_s11 + $0x60] ss:$8 sps:$4 sm:$0xff]   ;;  %v2988_v27 = vld [vmem:[%s4043_s11 + $0x74] ss:$8 sps:$4 sm:$0xff]  }
 0x1f5   : > { %v1017_v21 = vadd.f32 %v1015_v4, %v1013_v34  ;;  %v1018_v22 = vadd.f32 %v1016_v7, %v1014_v56  ;;  %v2986_v34 = vld [vmem:[%s4043_s11 + $0x70] ss:$8 sps:$4 sm:$0xff]   ;;  %v2291_v56 = vld [vmem:[%s4042_s10] ss:$0 sm:$0xff] }
 0x1f7   : > { %v1026_v52 = vadd.f32 %v1024_v31, %v1017_v21  ;;  %v1027_v53 = vadd.f32 %v1025_v32, %v1018_v22  ;;  %1287 = vmatpush1.bf16.msra.mxu0 %v2968_v54 }
 0x1f8   : > { %1288 = vmatprep.subr.bf16.mxu0 %v2973_v55 }
 0x1f9   : > { %v1028_v15 = vmul.f32 %v1026_v52, %v1026_v52  ;;  %v1029_v24 = vmul.f32 %v1027_v53, %v1027_v53 }
 0x1fb   : > { %v1030_v35 = vmul.f32 %v1028_v15, %v1026_v52  ;;  %v1031_v17 = vmul.f32 %v1029_v24, %v1027_v53  ;;  %1289 = vmatpush1.bf16.msra.mxu0 %v2971_v63 }
 0x1fc   : > { %1290 = vmatprep.subr.bf16.mxu0 %v2976_v3 }
 0x1fd   : > { %v1032_v47 = vmul.f32 0.044715, %v1030_v35  ;;  %v1033_v48 = vmul.f32 0.044715, %v1031_v17 }
 0x1ff   : > { %v1034_v18 = vadd.f32 %v1032_v47, %v1026_v52  ;;  %v1035_v43 = vadd.f32 %v1033_v48, %v1027_v53  ;;  %1291 = vmatpush1.bf16.msra.mxu0 %v2974_v2 }
 0x200   : > { %1292 = vmatprep.subr.bf16.mxu0 %v2979_v8 }
 0x201   : > { %v1036_v45 = vmul.f32 0.7978846, %v1034_v18  ;;  %v1037_v0 = vmul.f32 0.7978846, %v1035_v43 }
 0x203   : > { %3033 = vtanh.f32 %v1036_v45  ;;  %1293 = vmatpush1.bf16.msra.mxu0 %v2977_v60 }
 0x204   : > { %3035 = vtanh.f32 %v1037_v0  ;;  %1294 = vmatprep.subr.bf16.mxu0 %v2982_v61 }
 0x207   : > { %1295 = vmatpush1.bf16.msra.mxu0 %v2980_v10 }
 0x208   : > { %1296 = vmatprep.subr.bf16.mxu0 %v2985_v13 }
 0x20b   : > { %1297 = vmatpush1.bf16.msra.mxu0 %v2983_v25  ;;  %v2318_v25 = vld [vmem:[%s4037_s5 + $0x1] ss:$0 sm:$0xff] }
 0x20c   : > { %1298 = vmatprep.subr.bf16.mxu0 %v2988_v27 }
 0x20d   : > { %v3034_v49 = vpop.eup %3033 }
 0x20e   : > { %v3036_v50 = vpop.eup %3035  ;;  %v1040_v1 = vadd.f32 1.0, %v3034_v49 }
 0x20f   : > { %v1041_v14 = vadd.f32 1.0, %v3036_v50  ;;  %1299 = vmatpush1.bf16.msra.mxu0 %v2986_v34 }
 0x210   : > { %v1042_v46 = vmul.f32 0.5, %v1040_v1  ;;  %2883 = vmatprep.subr.bf16.mxu0 %v3200_v5 }
 0x211   : > { %v1043_v11 = vmul.f32 0.5, %v1041_v14 }
 0x212   : > { %v1044_v51 = vmul.f32 %v1042_v46, %v1026_v52 }
 0x213   : > { %v1045_v41 = vmul.f32 %v1043_v11, %v1027_v53  ;;  %v2992_v11 = vld [vmem:[%s4041_s9 + $0x58] sm:$0xff]  }
 0x215   : > { %v1046_v58 = vpack.c.bf16 %v1045_v41, %v1044_v51  ;;  %v2993_v51 = vld [vmem:[%s4041_s9 + $0x60] sm:$0xff]   ;;  %v2994_v41 = vld [vmem:[%s4041_s9 + $0x68] sm:$0xff]  }
 0x217   : > { %2638 = vmatmul.mubr.bf16.vlgmr.msra.gmra.mrb[4].mxu1 %v1046_v58  ;;  %v2995_v58 = vld [vmem:[%s4041_s9 + $0x70] sm:$0xff]  }
 0x218   : > { %2853 = vmatpush3.bf16.msra.mxu1 %v3200_v5 }
 0x219   : > { %2855 = vmatprep.subr.bf16.mxu1 %v3202_v6 }
 0x21c   : > { %2857 = vmatpush3.bf16.msra.mxu1 %v3202_v6 }
 0x21d   : > { %2859 = vmatprep.subr.bf16.mxu1 %v3227_v12 }
 0x220   : > { %2861 = vmatpush3.bf16.msra.mxu1 %v3227_v12 }
 0x221   : > { %2863 = vmatprep.subr.bf16.mxu1 %v3244_v16 }
 0x224   : > { %2865 = vmatpush3.bf16.msra.mxu1 %v3244_v16 }
 0x225   : > { %2867 = vmatprep.subr.bf16.mxu1 %v3256_v19 }
 0x228   : > { %2869 = vmatpush3.bf16.msra.mxu1 %v3256_v19 }
 0x229   : > { %2871 = vmatprep.subr.bf16.mxu1 %v3262_v20 }
 0x22c   : > { %2873 = vmatpush3.bf16.msra.mxu1 %v3262_v20 }
 0x22d   : > { %2875 = vmatprep.subr.bf16.mxu1 %v3278_v23 }
 0x230   : > { %2877 = vmatpush3.bf16.msra.mxu1 %v3278_v23 }
 0x231   : > { %2879 = vmatprep.subr.bf16.mxu1 %v3290_v26 }
 0x234   : > { %2881 = vmatpush3.bf16.msra.mxu1 %v3290_v26 }
 0x235   : > { %2711 = vmatprep.subr.bf16.mxu1 %v3079_v44 }
 0x2ea   : > { %v1150_v57 = vpop.f32.mrb[4].mxu1 }
 0x2eb   : > { %v1151_v4 = vadd.f32 %v2291_v56, %v1150_v57  ;;  %v2639_v7 = vpop.f32.mrb[5].mxu1 }
 0x2ec   : > { %v1153_v21 = vpop.f32.mrb[6].mxu1 }
 0x2ed   : > { %v1157_v22 = vadd.f32 %v1151_v4, %v3323_v40  ;;  %v1154_v31 = vadd.f32 %v2291_v56, %v1153_v21  ;;  %v2640_v32 = vpop.f32.mrb[7].mxu1  ;;  %v2319_v56 = vld [vmem:[%s4038_s6 + $0x1] ss:$0 sm:$0xff]  ;;  %v2321_v21 = vld [vmem:[%s4039_s7 + $0x108] sm:$0xff] }
 0x2ef   : > { %v2300_v52 = vmul.f32 -1.442695, %v1157_v22  ;;  %v1158_v53 = vadd.f32 %v1154_v31, %v3319_v39  ;;  %v2320_v31 = vld [vmem:[%s4039_s7 + $0x100] sm:$0xff] }
 0x2f1   : > { %3037 = vpow2.f32 %v2300_v52  ;;  %v2301_v15 = vmul.f32 -1.442695, %v1158_v53 }
 0x2f3   : > { %3039 = vpow2.f32 %v2301_v15 }
 0x2f4   : > { %3041 = vtanh.f32 %v1157_v22 }
 0x2fb   : > { %v3038_v24 = vpop.eup %3037 }
 0x2fc   : > { %v1167_v35 = vadd.f32 1.0, %v3038_v24 }
 0x2fd   : > { %v3040_v17 = vpop.eup %3039 }
 0x2fe   : > { %3043 = vrcp.f32 %v1167_v35  ;;  %v1168_v47 = vadd.f32 1.0, %v3040_v17  ;;  %v3042_v48 = vpop.eup %3041 }
 0x2ff   : > { %3045 = vtanh.f32 %v1158_v53  ;;  %v2322_v53 = vld [vmem:[%s4039_s7 + $0x110] sm:$0xff] }
 0x300   : > { %3047 = vrcp.f32 %v1168_v47  ;;  %v2323_v47 = vld [vmem:[%s4039_s7 + $0x118] sm:$0xff] }
 0x308   : > { %v3044_v18 = vpop.eup %3043 }
 0x309   : > { %v3046_v43 = vpop.eup %3045  ;;  %v1173_v45 = vmul.f32 %v3044_v18, %v3042_v48  ;;  %v2324_v18 = vld [vmem:[%s4039_s7 + $0x120] sm:$0xff] }
 0x30a   : > { %v3048_v40 = vpop.eup %3047 }
 0x30b   : > { %v1174_v0 = vmul.f32 %v3048_v40, %v3046_v43  ;;  %v2325_v43 = vld [vmem:[%s4039_s7 + $0x128] sm:$0xff] }
 0x30d   : > { %v1175_v49 = vpack.c.bf16 %v1174_v0, %v1173_v45  ;;  %v2326_v0 = vld [vmem:[%s4039_s7 + $0x130] sm:$0xff] }
 0x30f   : > { %1317 = vmatmul.mubr.bf16.vlgmr.msra.gmra.mrb[4].mxu0 %v1175_v49 }
 0x310   : > { %2885 = vmatpush3.bf16.msra.mxu0 %v3200_v5  ;;  %v3637_v5 = vld [vmem:[%s4044_s12] ss:$2 sm:$0x3] }
 0x311   : > { %2887 = vmatprep.subr.bf16.mxu0 %v3202_v6 }
 0x314   : > { %2889 = vmatpush3.bf16.msra.mxu0 %v3202_v6  ;;  %v1197_v6 = vrot.slane %v3637_v5, %v685_v29 }
 0x315   : > { %2891 = vmatprep.subr.bf16.mxu0 %v3227_v12 }
 0x318   : > { %2893 = vmatpush3.bf16.msra.mxu0 %v3227_v12  ;;  %v3643_v12 = vsub.s32 1, %v3297_v28  ;;  %v2342_v28 = vld [vmem:[%s4039_s7 + $0x1b0] sm:$0xff] }
 0x319   : > { %2895 = vmatprep.subr.bf16.mxu0 %v3244_v16 }
 0x31c   : > { %2897 = vmatpush3.bf16.msra.mxu0 %v3244_v16 }
 0x31d   : > { %2899 = vmatprep.subr.bf16.mxu0 %v3256_v19 }
 0x320   : > { %2901 = vmatpush3.bf16.msra.mxu0 %v3256_v19 }
 0x321   : > { %2903 = vmatprep.subr.bf16.mxu0 %v3262_v20 }
 0x324   : > { %2905 = vmatpush3.bf16.msra.mxu0 %v3262_v20  ;;  %v1334_v20 = vrot.slane %v3303_v30, %v3643_v12 }
 0x325   : > { %2907 = vmatprep.subr.bf16.mxu0 %v3278_v23 }
 0x328   : > { %2909 = vmatpush3.bf16.msra.mxu0 %v3278_v23 }
 0x329   : > { %2911 = vmatprep.subr.bf16.mxu0 %v3290_v26 }
 0x32c   : > { %2913 = vmatpush3.bf16.msra.mxu0 %v3290_v26 }
 0x3e2   : > { %v1318_v16 = vpop.f32.mrb[4].mxu0 }
 0x3e3   : > { %v1319_v19 = vadd.f32 %v1318_v16, %v1197_v6  ;;  %v3647_v23 = vpop.f32.mrb[5].mxu0 }
 0x3e4   : > { %v1322_v26 = vpop.f32.mrb[6].mxu0 }
 0x3e5   : > { %v1327_v39 = vadd.f32 %v1319_v19, %v665_v38  ;;  %v1323_v50 = vadd.f32 %v1322_v26, %v1197_v6  ;;  %v3651_v1 = vpop.f32.mrb[7].mxu0  ;;  %v2991_v38 = vld [vmem:[%s4041_s9 + $0x50] sm:$0xff]  }
 0x3e7   : > { %v3653_v14 = vadd.f32 %v1334_v20, %v1327_v39  ;;  %v1328_v29 = vadd.f32 %v1323_v50, %v666_v37  ;;  %v2990_v37 = vld [vmem:[%s4041_s9 + $0x48] sm:$0xff]  }
 0x3e9   : > { %v3657_v46 = vadd.f32 %v1334_v20, %v1328_v29  ;;  %2673 = vmatprep.mubr.f32.mxu1 %v3653_v14  ;;  %v1412_v30 = vmul.f32 %v3653_v14, %v3653_v14  ;;  %v2327_v29 = vld [vmem:[%s4039_s7 + $0x138] sm:$0xff] }
 0x3eb   : > { %2674 = vmatmul.mubr.f32.vlgmr.msra.gmra.mrb[2].mxu1 %v3657_v46  ;;  %2708 = vmatprep.mubr.f32.mxu0 %v1412_v30  ;;  %v1413_v36 = vmul.f32 %v3657_v46, %v3657_v46  ;;  %v2328_v30 = vld [vmem:[%s4039_s7 + $0x140] sm:$0xff] }
 0x3ec   : > { %2727 = vmatprep.mubr.msk.bf16.mxu1 %vm3080_vm2, %v3079_v44  ;;  %2712 = vmatpush3.bf16.msra.mxu1 %v2989_v33 }
 0x3ed   : > { %2709 = vmatmul.mubr.f32.vlgmr.msra.gmra.mrb[8].mxu0 %v1413_v36  ;;  %2713 = vmatprep.subr.bf16.mxu1 %v3079_v44  ;;  %v2329_v36 = vld [vmem:[%s4039_s7 + $0x148] sm:$0xff] }
 0x3ee   : > { %1954 = vmatprep.mubr.bf16.mxu0 %v3081_v9 }
 0x3f0   : > { %2714 = vmatpush3.bf16.msra.mxu1 %v2990_v37 }
 0x3f1   : > { %2715 = vmatprep.subr.bf16.mxu1 %v3079_v44 }
 0x3f4   : > { %2716 = vmatpush3.bf16.msra.mxu1 %v2991_v38 }
 0x3f5   : > { %2717 = vmatprep.subr.bf16.mxu1 %v3079_v44 }
 0x3f8   : > { %2718 = vmatpush3.bf16.msra.mxu1 %v2992_v11 }
 0x3f9   : > { %2719 = vmatprep.subr.bf16.mxu1 %v3079_v44 }
 0x3fc   : > { %2720 = vmatpush3.bf16.msra.mxu1 %v2993_v51 }
 0x3fd   : > { %2721 = vmatprep.subr.bf16.mxu1 %v3079_v44 }
 0x400   : > { %2722 = vmatpush3.bf16.msra.mxu1 %v2994_v41 }
 0x401   : > { %2723 = vmatprep.subr.bf16.mxu1 %v3079_v44 }
 0x404   : > { %2724 = vmatpush3.bf16.msra.mxu1 %v2995_v58 }
 0x405   : > { %2725 = vmatprep.subr.bf16.mxu1 %v3079_v44 }
 0x408   : > { %2726 = vmatpush3.bf16.msra.mxu1 %v2996_v59 }
 0x409   : > { %2731 = vmatprep.subr.bf16.mxu1 %v3079_v44 }
 0x4be   : > { %v2675_v42 = vpop.f32.mrb[2].mxu1 }
 0x4bf   : > { %v1490_v62 = vmul.f32 %v2675_v42, %v2675_v42  ;;  %v1403_v54 = vpop.f32.mrb[3].mxu1  ;;  %v1494_v61 = vsub.f32 %v3657_v46, %v2675_v42  ;;  %v2330_v42 = vld [vmem:[%s4039_s7 + $0x150] sm:$0xff] }
 0x4c0   : > { %v1489_v55 = vmul.f32 %v1403_v54, %v1403_v54  ;;  %v2710_v63 = vpop.f32.mrb[8].mxu0  ;;  %v1493_v13 = vsub.f32 %v3653_v14, %v1403_v54 }
 0x4c1   : > { %v1492_v2 = vsub.f32 %v2710_v63, %v1490_v62  ;;  %v1480_v3 = vpop.f32.mrb[9].mxu0  ;;  %v2331_v62 = vld [vmem:[%s4039_s7 + $0x158] sm:$0xff] }
 0x4c2   : > { %v1491_v8 = vsub.f32 %v1480_v3, %v1489_v55 }
 0x4c3   : > { %v1496_v60 = vadd.f32 1e-05, %v1492_v2 }
 0x4c4   : > { %v1495_v9 = vadd.f32 1e-05, %v1491_v8 }
 0x4c5   : > { %3049 = vrsqrt.f32 %v1496_v60  ;;  %v2332_v60 = vld [vmem:[%s4039_s7 + $0x160] sm:$0xff] }
 0x4c6   : > { %3051 = vrsqrt.f32 %v1495_v9  ;;  %v2333_v9 = vld [vmem:[%s4039_s7 + $0x168] sm:$0xff] }
 0x4cf   : > { %v3050_v10 = vpop.eup %3049 }
 0x4d0   : > { %v3052_v27 = vpop.eup %3051  ;;  %v1500_v34 = vmul.f32 %v3050_v10, %v1494_v61 }
 0x4d1   : > { %v1499_v57 = vmul.f32 %v3052_v27, %v1493_v13 }
 0x4d2   : > { %v1507_v4 = vmul.f32 %v2318_v25, %v1500_v34 }
 0x4d3   : > { %v1506_v7 = vmul.f32 %v2318_v25, %v1499_v57  ;;  %v2337_v57 = vld [vmem:[%s4039_s7 + $0x188] sm:$0xff] }
 0x4d4   : > { %v3711_v22 = vadd.f32 %v2319_v56, %v1507_v4 }
 0x4d5   : > { %v3716_v32 = vadd.f32 %v2319_v56, %v1506_v7  ;;  %v2336_v56 = vld [vmem:[%s4039_s7 + $0x180] sm:$0xff] }
 0x4d6   : > { %v1519_v52 = vmul.f32 %v2321_v21, %v3711_v22  ;;  %v1524_v15 = vrot.slane %v3711_v22, 7  ;;  %v1535_v24 = vrot.slane %v3711_v22, 6  ;;  %v1546_v35 = vrot.slane %v3711_v22, 5  ;;  %v2334_v21 = vld [vmem:[%s4039_s7 + $0x170] sm:$0xff] }
 0x4d7   : > { %v1518_v17 = vmul.f32 %v2320_v31, %v3716_v32  ;;  %v1523_v48 = vrot.slane %v3716_v32, 7  ;;  %v1534_v40 = vrot.slane %v3716_v32, 6  ;;  %v1545_v45 = vrot.slane %v3716_v32, 5  ;;  %v2335_v31 = vld [vmem:[%s4039_s7 + $0x178] sm:$0xff] }
 0x4d8   : > { %v1556_v49 = vrot.slane %v3716_v32, 4  ;;  %v1557_v6 = vrot.slane %v3711_v22, 4  ;;  %v1567_v16 = vrot.slane %v3716_v32, 3  ;;  %v1568_v19 = vrot.slane %v3711_v22, 3 }
 0x4d9   : > { %v1525_v20 = vsel %vm878_vm3, %v1523_v48, %v1524_v15  ;;  %v1526_v26 = vsel %vm878_vm3, %v1524_v15, %v1523_v48  ;;  %v3751_v39 = vsel %vm890_vm4, %v1534_v40, %v1535_v24  ;;  %v3755_v50 = vsel %vm890_vm4, %v1535_v24, %v1534_v40  ;;  %v2339_v48 = vld [vmem:[%s4039_s7 + $0x198] sm:$0xff] }
 0x4da   : > { %v1527_v33 = vmul.f32 %v2322_v53, %v1526_v26  ;;  %v1528_v37 = vmul.f32 %v2323_v47, %v1525_v20  ;;  %v1538_v38 = vmul.f32 %v2324_v18, %v3755_v50  ;;  %v1539_v11 = vmul.f32 %v2325_v43, %v3751_v39  ;;  %v2338_v47 = vld [vmem:[%s4039_s7 + $0x190] sm:$0xff] }
 0x4db   : > { %v1547_v51 = vsel %vm902_vm5, %v1545_v45, %v1546_v35  ;;  %v1548_v41 = vsel %vm902_vm5, %v1546_v35, %v1545_v45  ;;  %v3774_v58 = vsel %vm914_vm6, %v1556_v49, %v1557_v6  ;;  %v3778_v59 = vsel %vm914_vm6, %v1557_v6, %v1556_v49  ;;  %v2341_v49 = vld [vmem:[%s4039_s7 + $0x1a8] sm:$0xff] }
 0x4dc   : > { %v1549_v54 = vmul.f32 %v2326_v0, %v1548_v41  ;;  %v1550_v55 = vmul.f32 %v2327_v29, %v1547_v51  ;;  %v1560_v63 = vmul.f32 %v2328_v30, %v3778_v59  ;;  %v1561_v2 = vmul.f32 %v2329_v36, %v3774_v58  ;;  %v2340_v0 = vld [vmem:[%s4039_s7 + $0x1a0] sm:$0xff]  ;;  %v2343_v30 = vld [vmem:[%s4039_s7 + $0x1b8] sm:$0xff] }
 0x4dd   : > { %v1569_v3 = vsel %vm926_vm7, %v1567_v16, %v1568_v19  ;;  %v1570_v8 = vsel %vm926_vm7, %v1568_v19, %v1567_v16  ;;  %v1578_v61 = vrot.slane %v3716_v32, 2  ;;  %v1579_v10 = vrot.slane %v3711_v22, 2 }
 0x4de   : > { %v1562_v13 = vadd.f32 %v1560_v63, %v1518_v17  ;;  %v1563_v25 = vadd.f32 %v1561_v2, %v1519_v52  ;;  %v1571_v27 = vmul.f32 %v2330_v42, %v1570_v8  ;;  %v1572_v34 = vmul.f32 %v2331_v62, %v1569_v3  ;;  %v2344_v62 = vld [vmem:[%s4039_s7 + $0x1c0] sm:$0xff] }
 0x4df   : > { %v1580_v4 = vsel %vm938_vm8, %v1578_v61, %v1579_v10  ;;  %v1581_v7 = vsel %vm938_vm8, %v1579_v10, %v1578_v61  ;;  %v1589_v52 = vrot.slane %v3716_v32, 1  ;;  %v1590_v53 = vrot.slane %v3711_v22, 1 }
 0x4e0   : > { %v1573_v15 = vadd.f32 %v1571_v27, %v1527_v33  ;;  %v1574_v24 = vadd.f32 %v1572_v34, %v1528_v37  ;;  %v1582_v35 = vmul.f32 %v2332_v60, %v1581_v7  ;;  %v1583_v17 = vmul.f32 %v2333_v9, %v1580_v4  ;;  %v2346_v9 = vld [vmem:[%s4039_s7 + $0x1d0] sm:$0xff] }
 0x4e1   : > { %v1591_v18 = vsel %vm950_vm9, %v1589_v52, %v1590_v53  ;;  %v1592_v43 = vsel %vm950_vm9, %v1590_v53, %v1589_v52  ;;  %v1600_v40 = vmul.f32 %v2336_v56, %v3711_v22  ;;  %v1601_v45 = vmul.f32 %v2337_v57, %v3716_v32  ;;  %v2350_v34 = vld [vmem:[%s4039_s7 + $0x1f0] sm:$0xff] }
 0x4e2   : > { %v1584_v6 = vadd.f32 %v1582_v35, %v1538_v38  ;;  %v1585_v16 = vadd.f32 %v1583_v17, %v1539_v11  ;;  %v1593_v19 = vmul.f32 %v2334_v21, %v1592_v43  ;;  %v1594_v29 = vmul.f32 %v2335_v31, %v1591_v18  ;;  %v2345_v38 = vld [vmem:[%s4039_s7 + $0x1c8] sm:$0xff] }
 0x4e3   : > { %v1602_v36 = vadd.f32 %v1600_v40, %v1562_v13  ;;  %v1603_v33 = vadd.f32 %v1601_v45, %v1563_v25  ;;  %v1607_v37 = vmul.f32 %v2338_v47, %v1525_v20  ;;  %v1608_v42 = vmul.f32 %v2339_v48, %v1526_v26  ;;  %v2347_v20 = vld [vmem:[%s4039_s7 + $0x1d8] sm:$0xff] }
 0x4e4   : > { %v1595_v11 = vadd.f32 %v1593_v19, %v1549_v54  ;;  %v1596_v63 = vadd.f32 %v1594_v29, %v1550_v55  ;;  %v1614_v2 = vmul.f32 %v2340_v0, %v3751_v39  ;;  %v1615_v60 = vmul.f32 %v2341_v49, %v3755_v50  ;;  %v2348_v54 = vld [vmem:[%s4039_s7 + $0x1e0] sm:$0xff]  ;;  %v2349_v39 = vld [vmem:[%s4039_s7 + $0x1e8] sm:$0xff] }
 0x4e5   : > { %v1609_v26 = vadd.f32 %v1607_v37, %v1573_v15  ;;  %v1610_v61 = vadd.f32 %v1608_v42, %v1574_v24  ;;  %v1621_v10 = vmul.f32 %v2342_v28, %v1547_v51  ;;  %v1622_v13 = vmul.f32 %v2343_v30, %v1548_v41  ;;  %v2351_v51 = vld [vmem:[%s4039_s7 + $0x1f8] sm:$0xff]  ;;  %v2352_v49 = vld [vmem:[%s4040_s8 + $0x1] ss:$0 sm:$0xff] }
 0x4e6   : > { %v1616_v50 = vadd.f32 %v1614_v2, %v1584_v6  ;;  %v1617_v55 = vadd.f32 %v1615_v60, %v1585_v16  ;;  %v1628_v25 = vmul.f32 %v2344_v62, %v3774_v58  ;;  %v1629_v27 = vmul.f32 %v2345_v38, %v3778_v59 }
 0x4e7   : > { %v1623_v41 = vadd.f32 %v1621_v10, %v1595_v11  ;;  %v1624_v56 = vadd.f32 %v1622_v13, %v1596_v63  ;;  %v1635_v57 = vmul.f32 %v2346_v9, %v1569_v3  ;;  %v1636_v21 = vmul.f32 %v2347_v20, %v1570_v8  ;;  %v2997_v10 = vld [vmem:[%s4043_s11 + $0x80] ss:$8 sps:$4 sm:$0xff]   ;;  %v3002_v13 = vld [vmem:[%s4043_s11 + $0x94] ss:$8 sps:$4 sm:$0xff]  }
 0x4e8   : > { %v1630_v31 = vadd.f32 %v1628_v25, %v1602_v36  ;;  %v1631_v52 = vadd.f32 %v1629_v27, %v1603_v33  ;;  %v1642_v53 = vmul.f32 %v2348_v54, %v1580_v4  ;;  %v1643_v15 = vmul.f32 %v2349_v39, %v1581_v7  ;;  %v3000_v54 = vld [vmem:[%s4043_s11 + $0x90] ss:$8 sps:$4 sm:$0xff]   ;;  %v3005_v39 = vld [vmem:[%s4043_s11 + $0xa4] ss:$8 sps:$4 sm:$0xff]   ;;  %v3008_v25 = vld [vmem:[%s4043_s11 + $0xb4] ss:$8 sps:$4 sm:$0xff]  }
 0x4e9   : > { %v1637_v24 = vadd.f32 %v1635_v57, %v1609_v26  ;;  %v1638_v58 = vadd.f32 %v1636_v21, %v1610_v61  ;;  %v1649_v35 = vmul.f32 %v2350_v34, %v1591_v18  ;;  %v1650_v59 = vmul.f32 %v2351_v51, %v1592_v43  ;;  %v2999_v61 = vld [vmem:[%s4043_s11 + $0x84] ss:$8 sps:$4 sm:$0xff]   ;;  %v3009_v34 = vld [vmem:[%s4043_s11 + $0xc0] ss:$8 sps:$4 sm:$0xff]   ;;  %v3014_v51 = vld [vmem:[%s4043_s11 + $0xd4] ss:$8 sps:$4 sm:$0xff]  }
 0x4ea   : > { %v1644_v17 = vadd.f32 %v1642_v53, %v1616_v50  ;;  %v1645_v47 = vadd.f32 %v1643_v15, %v1617_v55  ;;  %v1664_v4 = vmul.f32 %v2352_v49, %v3716_v32  ;;  %v1665_v7 = vmul.f32 %v2352_v49, %v3711_v22  ;;  %1922 = vmatprep.subr.bf16.mxu0 %v2999_v61  ;;  %v3003_v50 = vld [vmem:[%s4043_s11 + $0xa0] ss:$8 sps:$4 sm:$0xff]   ;;  %v3006_v55 = vld [vmem:[%s4043_s11 + $0xb0] ss:$8 sps:$4 sm:$0xff]   ;;  %v3011_v27 = vld [vmem:[%s4043_s11 + $0xc4] ss:$8 sps:$4 sm:$0xff]  }
 0x4eb   : > { %v1651_v48 = vadd.f32 %v1649_v35, %v1623_v41  ;;  %v1652_v40 = vadd.f32 %v1650_v59, %v1624_v56  ;;  %v1653_v45 = vadd.f32 %v1637_v24, %v1630_v31  ;;  %v1654_v0 = vadd.f32 %v1638_v58, %v1631_v52  ;;  %1923 = vmatpush1.bf16.msra.mxu0 %v2997_v10  ;;  %v3012_v41 = vld [vmem:[%s4043_s11 + $0xd0] ss:$8 sps:$4 sm:$0xff]   ;;  %v3017_v56 = vld [vmem:[%s4043_s11 + $0xe4] ss:$8 sps:$4 sm:$0xff]   ;;  %v3015_v57 = vld [vmem:[%s4043_s11 + $0xe0] ss:$8 sps:$4 sm:$0xff]  }
 0x4ec   : > { %1924 = vmatprep.subr.bf16.mxu0 %v3002_v13  ;;  %v3020_v21 = vld [vmem:[%s4043_s11 + $0xf4] ss:$8 sps:$4 sm:$0xff]   ;;  %v3021_v31 = vld [vmem:[%s4045_s13] sm:$0xff]   ;;  %v3018_v52 = vld [vmem:[%s4043_s11 + $0xf0] ss:$8 sps:$4 sm:$0xff]  }
 0x4ed   : > { %v1655_v3 = vadd.f32 %v1651_v48, %v1644_v17  ;;  %v1656_v8 = vadd.f32 %v1652_v40, %v1645_v47  ;;  %v3022_v53 = vld [vmem:[%s4045_s13 + $0x8] sm:$0xff]   ;;  %v3023_v15 = vld [vmem:[%s4045_s13 + $0x10] sm:$0xff]   ;;  %v3024_v24 = vld [vmem:[%s4045_s13 + $0x18] sm:$0xff]  }
 0x4ee   : > { %v3025_v58 = vld [vmem:[%s4045_s13 + $0x20] sm:$0xff]   ;;  %v3026_v35 = vld [vmem:[%s4045_s13 + $0x28] sm:$0xff]   ;;  %v2090_v10 = vld [vmem:[%s4047_s15 + $0x50] sm:$0xff] }
 0x4ef   : > { %v1657_v6 = vadd.f32 %v1655_v3, %v1653_v45  ;;  %v1658_v16 = vadd.f32 %v1656_v8, %v1654_v0  ;;  %1925 = vmatpush1.bf16.msra.mxu0 %v3000_v54  ;;  %v2369_v59 = vld [vmem:[%s4042_s10 + $0x1] ss:$0 sm:$0xff]  ;;  %v2091_v13 = vld [vmem:[%s4047_s15 + $0x58] sm:$0xff] }
 0x4f0   : > { %1926 = vmatprep.subr.bf16.mxu0 %v3005_v39  ;;  %v2934_v54 = vpack.c.bf16 %v2091_v13, %v2090_v10  ;;  %v2092_v39 = vld [vmem:[%s4047_s15 + $0x60] sm:$0xff] }
 0x4f1   : > { %v1666_v18 = vadd.f32 %v1664_v4, %v1657_v6  ;;  %v1667_v43 = vadd.f32 %v1665_v7, %v1658_v16 }
 0x4f3   : > { %v1668_v19 = vmul.f32 %v1666_v18, %v1666_v18  ;;  %v1669_v29 = vmul.f32 %v1667_v43, %v1667_v43  ;;  %1927 = vmatpush1.bf16.msra.mxu0 %v3003_v50  ;;  %v2093_v50 = vld [vmem:[%s4047_s15 + $0x68] sm:$0xff] }
 0x4f4   : > { %1928 = vmatprep.subr.bf16.mxu0 %v3008_v25  ;;  %v2396_v25 = vld [vmem:[%s4044_s12 + $0x1] ss:$2 sm:$0x3] }
 0x4f5   : > { %v1670_v28 = vmul.f32 %v1668_v19, %v1666_v18  ;;  %v1671_v30 = vmul.f32 %v1669_v29, %v1667_v43 }
 0x4f7   : > { %v1672_v36 = vmul.f32 0.044715, %v1670_v28  ;;  %v1673_v33 = vmul.f32 0.044715, %v1671_v30  ;;  %1929 = vmatpush1.bf16.msra.mxu0 %v3006_v55  ;;  %v2938_v55 = vpack.c.bf16 %v2093_v50, %v2092_v39 }
 0x4f8   : > { %1930 = vmatprep.subr.bf16.mxu0 %v3011_v27  ;;  %v1201_v27 = vrot.slane %v3637_v5, %v3643_v12  ;;  %v2094_v5 = vld [vmem:[%s4047_s15 + $0x70] sm:$0xff] }
 0x4f9   : > { %v1674_v37 = vadd.f32 %v1672_v36, %v1666_v18  ;;  %v1675_v42 = vadd.f32 %v1673_v33, %v1667_v43  ;;  %v3028_v33 = vld [vmem:[%s4045_s13 + $0x38] sm:$0xff]  }
 0x4fb   : > { %v1676_v62 = vmul.f32 0.7978846, %v1674_v37  ;;  %v1677_v38 = vmul.f32 0.7978846, %v1675_v42  ;;  %1931 = vmatpush1.bf16.msra.mxu0 %v3009_v34  ;;  %v2080_v37 = vld [vmem:[%s4047_s15] sm:$0xff]  ;;  %v2081_v42 = vld [vmem:[%s4047_s15 + $0x8] sm:$0xff]  ;;  %v1840_v34 = vrot.slane %v2396_v25, %v3643_v12 }
 0x4fc   : > { %1932 = vmatprep.subr.bf16.mxu0 %v3014_v51  ;;  %v2095_v12 = vld [vmem:[%s4047_s15 + $0x78] sm:$0xff] }
 0x4fd   : > { %3053 = vtanh.f32 %v1676_v62  ;;  %v2082_v62 = vld [vmem:[%s4047_s15 + $0x10] sm:$0xff] }
 0x4fe   : > { %3055 = vtanh.f32 %v1677_v38  ;;  %v2914_v38 = vpack.c.bf16 %v2081_v42, %v2080_v37 }
 0x4ff   : > { %1933 = vmatpush1.bf16.msra.mxu0 %v3012_v41 }
 0x500   : > { %1934 = vmatprep.subr.bf16.mxu0 %v3017_v56  ;;  %v1321_v56 = vadd.f32 %v3647_v23, %v1201_v27  ;;  %v2413_v23 = vld [vmem:[%s4046_s14] ss:$0 sm:$0xff] }
 0x503   : > { %1935 = vmatpush1.bf16.msra.mxu0 %v3015_v57 }
 0x504   : > { %1936 = vmatprep.subr.bf16.mxu0 %v3020_v21 }
 0x507   : > { %v3054_v11 = vpop.eup %3053  ;;  %1937 = vmatpush1.bf16.msra.mxu0 %v3018_v52  ;;  %v1325_v52 = vadd.f32 %v3651_v1, %v1201_v27 }
 0x508   : > { %v3056_v63 = vpop.eup %3055  ;;  %v1680_v2 = vadd.f32 1.0, %v3054_v11  ;;  %v2083_v11 = vld [vmem:[%s4047_s15 + $0x18] sm:$0xff]  ;;  %2915 = vmatprep.subr.bf16.mxu0 %v2914_v38 }
 0x509   : > { %v1681_v32 = vadd.f32 1.0, %v3056_v63  ;;  %v2918_v63 = vpack.c.bf16 %v2083_v11, %v2082_v62 }
 0x50a   : > { %v1682_v60 = vmul.f32 0.5, %v1680_v2  ;;  %v2084_v2 = vld [vmem:[%s4047_s15 + $0x20] sm:$0xff] }
 0x50b   : > { %v1683_v22 = vmul.f32 0.5, %v1681_v32  ;;  %v2085_v32 = vld [vmem:[%s4047_s15 + $0x28] sm:$0xff] }
 0x50c   : > { %v1684_v9 = vmul.f32 %v1682_v60, %v1666_v18  ;;  %v2922_v60 = vpack.c.bf16 %v2085_v32, %v2084_v2 }
 0x50d   : > { %v1685_v20 = vmul.f32 %v1683_v22, %v1667_v43  ;;  %v2087_v22 = vld [vmem:[%s4047_s15 + $0x38] sm:$0xff] }
 0x50f   : > { %v1686_v26 = vpack.c.bf16 %v1685_v20, %v1684_v9  ;;  %v2088_v20 = vld [vmem:[%s4047_s15 + $0x40] sm:$0xff] }
 0x511   : > { %2728 = vmatmul.mubr.bf16.vlgmr.msra.gmra.mrb[8].mxu1 %v1686_v26  ;;  %v2089_v26 = vld [vmem:[%s4047_s15 + $0x48] sm:$0xff] }
 0x512   : > { %2747 = vmatprep.mubr.msk.bf16.mxu1 %vm3080_vm2, %v3079_v44  ;;  %2732 = vmatpush3.bf16.msra.mxu1 %v3021_v31  ;;  %v2930_v61 = vpack.c.bf16 %v2089_v26, %v2088_v20 }
 0x513   : > { %2733 = vmatprep.subr.bf16.mxu1 %v3079_v44 }
 0x516   : > { %2734 = vmatpush3.bf16.msra.mxu1 %v3022_v53 }
 0x517   : > { %2735 = vmatprep.subr.bf16.mxu1 %v3079_v44 }
 0x51a   : > { %2736 = vmatpush3.bf16.msra.mxu1 %v3023_v15 }
 0x51b   : > { %2737 = vmatprep.subr.bf16.mxu1 %v3079_v44 }
 0x51e   : > { %2738 = vmatpush3.bf16.msra.mxu1 %v3024_v24 }
 0x51f   : > { %2739 = vmatprep.subr.bf16.mxu1 %v3079_v44 }
 0x522   : > { %2740 = vmatpush3.bf16.msra.mxu1 %v3025_v58 }
 0x523   : > { %2741 = vmatprep.subr.bf16.mxu1 %v3079_v44 }
 0x526   : > { %2742 = vmatpush3.bf16.msra.mxu1 %v3026_v35  ;;  %v2942_v35 = vpack.c.bf16 %v2095_v12, %v2094_v5 }
 0x527   : > { %2743 = vmatprep.subr.bf16.mxu1 %v3079_v44 }
 0x5e4   : > { %v1791_v17 = vpop.f32.mrb[8].mxu1 }
 0x5e5   : > { %v1792_v47 = vadd.f32 %v2369_v59, %v1791_v17  ;;  %v2729_v48 = vpop.f32.mrb[9].mxu1 }
 0x5e6   : > { %v1794_v40 = vpop.f32.mrb[10].mxu1 }
 0x5e7   : > { %v1798_v45 = vadd.f32 %v1792_v47, %v3653_v14  ;;  %v1795_v0 = vadd.f32 %v2369_v59, %v1794_v40  ;;  %v2730_v49 = vpop.f32.mrb[11].mxu1 }
 0x5e8   : > { %v2097_v49 = vstv %s2096_s29 }
 0x5e9   : > { %v2378_v3 = vmul.f32 -1.442695, %v1798_v45  ;;  %v1799_v8 = vadd.f32 %v1795_v0, %v3657_v46  ;;  %v3027_v46 = vld [vmem:[%s4045_s13 + $0x30] sm:$0xff]  }
 0x5ea   : > { %2744 = vmatpush3.bf16.msra.mxu1 %v3027_v46 }
 0x5eb   : > { %3057 = vpow2.f32 %v2378_v3  ;;  %v2379_v6 = vmul.f32 -1.442695, %v1799_v8  ;;  %2745 = vmatprep.subr.bf16.mxu1 %v3079_v44  ;;  %v2086_v44 = vld [vmem:[%s4047_s15 + $0x30] sm:$0xff] }
 0x5ec   : > { %v2926_v9 = vpack.c.bf16 %v2087_v22, %v2086_v44 }
 0x5ed   : > { %3059 = vpow2.f32 %v2379_v6 }
 0x5ee   : > { %3061 = vtanh.f32 %v1798_v45  ;;  %2746 = vmatpush3.bf16.msra.mxu1 %v3028_v33 }
 0x5f5   : > { %v3058_v16 = vpop.eup %3057 }
 0x5f6   : > { %v1808_v4 = vadd.f32 1.0, %v3058_v16 }
 0x5f7   : > { %v3060_v7 = vpop.eup %3059 }
 0x5f8   : > { %3063 = vrcp.f32 %v1808_v4  ;;  %v1809_v18 = vadd.f32 1.0, %v3060_v7  ;;  %v3062_v43 = vpop.eup %3061  ;;  %v3069_v4 = vld [vmem:[%s3218_s30 + $0x8] sm:$0xff] }
 0x5f9   : > { %3065 = vtanh.f32 %v1799_v8 }
 0x5fa   : > { %3067 = vrcp.f32 %v1809_v18  ;;  %v3070_v18 = vld [vmem:[%s3218_s30] sm:$0xff] }
 0x602   : > { %v3064_v19 = vpop.eup %3063 }
 0x603   : > { %v3066_v29 = vpop.eup %3065  ;;  %v1814_v28 = vmul.f32 %v3064_v19, %v3062_v43 }
 0x604   : > { %v3068_v14 = vpop.eup %3067 }
 0x605   : > { %v1815_v30 = vmul.f32 %v3068_v14, %v3066_v29 }
 0x607   : > { %v1816_v36 = vpack.c.bf16 %v1815_v30, %v1814_v28 }
 0x609   : > { %1955 = vmatmul.mubr.bf16.vlgmr.msra.gmra.mrb[12].mxu0 %v1816_v36 }
 0x60a   : > { %2917 = vmatpush3.bf16.msra.mxu0 %v2914_v38 }
 0x60b   : > { %2919 = vmatprep.subr.bf16.mxu0 %v2918_v63 }
 0x60e   : > { %2921 = vmatpush3.bf16.msra.mxu0 %v2918_v63 }
 0x60f   : > { %2923 = vmatprep.subr.bf16.mxu0 %v2922_v60 }
 0x612   : > { %2925 = vmatpush3.bf16.msra.mxu0 %v2922_v60 }
 0x613   : > { %2927 = vmatprep.subr.bf16.mxu0 %v2926_v9 }
 0x616   : > { %2929 = vmatpush3.bf16.msra.mxu0 %v2926_v9 }
 0x617   : > { %2931 = vmatprep.subr.bf16.mxu0 %v2930_v61 }
 0x61a   : > { %2933 = vmatpush3.bf16.msra.mxu0 %v2930_v61 }
 0x61b   : > { %2935 = vmatprep.subr.bf16.mxu0 %v2934_v54 }
 0x61e   : > { %2937 = vmatpush3.bf16.msra.mxu0 %v2934_v54 }
 0x61f   : > { %2939 = vmatprep.subr.bf16.mxu0 %v2938_v55 }
 0x622   : > { %2941 = vmatpush3.bf16.msra.mxu0 %v2938_v55 }
 0x623   : > { %2943 = vmatprep.subr.bf16.mxu0 %v2942_v35 }
 0x626   : > { %2945 = vmatpush3.bf16.msra.mxu0 %v2942_v35 }
 0x6dc   : > { %v1956_v51 = vpop.f32.mrb[12].mxu0 }
 0x6dd   : > { %v1957_v41 = vpop.f32.mrb[13].mxu0 }
 0x6de   : > { %v1958_v57 = vadd.f32 %v1957_v41, %v1840_v34  ;;  %v1959_v21 = vpop.f32.mrb[14].mxu0 }
 0x6df   : > { %v1960_v31 = vpop.f32.mrb[15].mxu0 }
 0x6e0   : > { %v1963_v53 = vadd.f32 %v1958_v57, %v1321_v56  ;;  %v1961_v15 = vadd.f32 %v1960_v31, %v1840_v34 }
 0x6e2   : > { %v1964_v24 = vadd.f32 %v1961_v15, %v1325_v52 }
 0x6e4   : > { %v1965_v58 = vpack.c.bf16 %v1964_v24, %v1963_v53 }
 0x6e6   : > { %2748 = vmatmul.mubr.bf16.vlgmr.msra.gmra.mrb[12].mxu1 %v1965_v58 }
 0x7b9   : > { %v2071_v1 = vpop.f32.mrb[12].mxu1 }
 0x7ba   : > { %v2072_v59 = vadd.f32 %v2413_v23, %v2071_v1  ;;  %v2749_v17 = vpop.f32.mrb[13].mxu1 }
 0x7bb   : > { %v2074_v47 = vpop.f32.mrb[14].mxu1 }
 0x7bc   : > { %v2078_v48 = vmax.f32 %v2072_v59, 0.0  ;;  %v2075_v40 = vadd.f32 %v2413_v23, %v2074_v47  ;;  %v2750_v45 = vpop.f32.mrb[15].mxu1 }
 0x7be   : > { %v2079_v0 = vmax.f32 %v2075_v40, 0.0  ;;  %2783 = vmatprep.mubr.f32.mxu0 %v2078_v48 }
 0x7c0   : > { %2784 = vmatmul.mubr.f32.vlgmr.msra.gmra.mrb[10].mxu0 %v2079_v0 }
 0x893   : > { %v2785_v3 = vpop.f32.mrb[10].mxu0 }
 0x894   : > { %v2170_v8 = vadd.f32 %v2785_v3, %v2097_v49  ;;  %v2164_v6 = vpop.f32.mrb[11].mxu0 }
 0x895   : > { %v2165_v16 = vadd.f32 %v2164_v6, %v2097_v49 }
 0x896   : > { %v2174_v7 = vsub.f32 %v2170_v8, %v3069_v4 }
 0x897   : > { %v2173_v43 = vsub.f32 %v2165_v16, %v3070_v18 }
 0x898   : > { %2176 = vst.msk [vmem:[%s566_s18 + $0x8] sm:$0xff] %vm579_vm1, %v2174_v7 }
 0x899   : > { %2175 = vst.msk [vmem:[%s566_s18] sm:$0xff] %vm579_vm1, %v2173_v43 }
 0x89a PF: > { %s28_s26 = sadd.s32 1, %s3077_s26  }
 0x89b   : > { %p25_p4 = scmp.ge.s32.totalorder %s28_s26, 4  }
 0x89d   :  { %27 = sbr.rel (!%p25_p4) target bundleno = 4 (0x4), region = 155 }

</bundles_post_ra>
